<compile_context>
chip_gen: v5e
topology: v5e:2x2
jax: 0.10.0
libtpu: 0.0.40
codegen_flags: <defaults>
</compile_context>

<pallas_src>
import functools

import jax
import jax.numpy as jnp
from jax.experimental import pallas as pl
from jax.experimental.pallas import tpu as pltpu


# ---------------------------------------------------------------------------
# Fused kernel: conv1 + bn1 + relu + conv2 + bn2 + (shortcut/identity residual) + relu
# ---------------------------------------------------------------------------
def _basic_block_kernel(*refs, tap_offs, q_rows, center_off, wp, valid_w,
                        has_shortcut):
    f32 = jnp.float32
    bf16 = jnp.bfloat16
    if has_shortcut:
        (x_ref, w1_ref, w2_ref, ws_ref, s1_ref, b1_ref, s2_ref, b2_ref,
         o_ref, o1p_ref) = refs
    else:
        (x_ref, w1_ref, w2_ref, s1_ref, b1_ref, s2_ref, b2_ref,
         o_ref, o1p_ref) = refs
        ws_ref = None
    rin, coutp = o1p_ref.shape

    # ---- conv1: 9 shifted-row GEMM taps; x is already bf16, accumulate in f32 ----
    acc = None
    for t, off in enumerate(tap_offs):
        p = jnp.dot(x_ref[0, off:off + q_rows, :], w1_ref[t],
                    preferred_element_type=f32)
        acc = p if acc is None else acc + p

    # ---- bn1 (folded) + relu; zero the flat-layout wrap-around columns (in-kernel iota,
    #      no mask input / no lane-padded (Q,1) VMEM block) ----
    row = jax.lax.broadcasted_iota(jnp.int32, (q_rows, 1), 0)
    valid = (row % wp) < valid_w
    o1 = jnp.where(valid, jnp.maximum(acc * s1_ref[...] + b1_ref[...], 0.0), 0.0)

    # ---- stage o1 in bf16 VMEM (intermediate never touches HBM).
    #      Zero ONLY the halo rows: the center q_rows are fully overwritten every grid
    #      step, so zero-filling them would be pure vst-slot waste; the halo rows supply
    #      conv2's vertical zero padding. ----
    o1p_ref[0:center_off, :] = jnp.zeros((center_off, coutp), bf16)
    o1p_ref[center_off + q_rows:rin, :] = jnp.zeros(
        (rin - center_off - q_rows, coutp), bf16)
    o1p_ref[center_off:center_off + q_rows, :] = o1.astype(bf16)

    # ---- residual: fused 1x1 shortcut GEMM, or direct lane-padded identity add
    #      (skips the previous Q x Coutp x Cin identity GEMM) ----
    xc = x_ref[0, center_off:center_off + q_rows, :]
    if has_shortcut:
        res = jnp.dot(xc, ws_ref[...], preferred_element_type=f32)
    else:
        res = xc.astype(f32)
        if res.shape[1] < coutp:
            res = jnp.concatenate(
                [res, jnp.zeros((q_rows, coutp - res.shape[1]), f32)], axis=-1)

    # ---- conv2: 9 shifted-row GEMM taps over the bf16-staged o1 ----
    acc2 = None
    for t, off in enumerate(tap_offs):
        p = jnp.dot(o1p_ref[off:off + q_rows, :], w2_ref[t],
                    preferred_element_type=f32)
        acc2 = p if acc2 is None else acc2 + p

    # ---- bn2 + residual add + relu; lane-dense bf16 output store ----
    y = jnp.maximum(acc2 * s2_ref[...] + b2_ref[...] + res, 0.0)
    o_ref[0] = y.astype(o_ref.dtype)


# ---------------------------------------------------------------------------
# Wrappers
# ---------------------------------------------------------------------------
def _round_up(x, m):
    return (x + m - 1) // m * m


def _bn_fold(gamma, beta, mean, var, eps):
    s = gamma / jnp.sqrt(var + eps)
    return s, beta - mean * s


def _vmem_limit_bytes():
    """Generation-aware scoped-VMEM limit (~75% of physical: ~96 MiB v5e/v6e, ~48 MiB v7x)."""
    cap = 64 * 1024 * 1024
    try:
        info = pltpu.get_tpu_info()
        cap = int(getattr(info, "vmem_capacity_bytes", cap))
    except Exception:
        pass
    return min((cap * 3) // 4, 100 * 1024 * 1024)


def basic_block_forward_nhwc(x_nhwc, params, stride=1, dilation=1, eps=1e-5):
    """BasicBlock forward on an NHWC activation. Returns NHWC (bf16)."""
    if stride != 1:
        raise NotImplementedError("BasicBlock Pallas kernel supports stride == 1 only")

    d = int(dilation)
    B, H, W, Cin = x_nhwc.shape
    w1 = params["conv1_w"]                       # [Cout, Cin, 3, 3]
    w2 = params["conv2_w"]                       # [Cout, Cout, 3, 3]
    Cout = w1.shape[0]
    Coutp = _round_up(Cout, 128)                 # lane-dense output channels

    Wp = W + 2 * d                               # padded width
    Hp = H + 2 * d + 1                           # padded height (+1 row keeps shifted reads in-bounds)
    Rin = Hp * Wp                                # flattened padded rows per image
    Q = H * Wp                                   # flattened output rows per image (cols >= W are garbage)
    tap_offs = tuple(ky * d * Wp + kx * d for ky in range(3) for kx in range(3))
    center_off = d * Wp + d
    has_shortcut = "shortcut_w" in params
    if not has_shortcut and Cin != Cout:
        raise ValueError("identity residual requires Cin == Cout")

    # Activations: pad + flatten once, bf16 in HBM (half the input DMA, no in-kernel casts).
    xp = jnp.pad(x_nhwc.astype(jnp.bfloat16), ((0, 0), (d, d + 1), (d, d), (0, 0)))
    x_flat = xp.reshape(B, Rin, Cin)

    # Weights: one (Cin, Coutp) slice per tap, bf16, zero-padded to lane-dense Coutp.
    w1_t = jnp.transpose(w1, (2, 3, 1, 0)).reshape(9, Cin, Cout).astype(jnp.float32)
    w1_t = jnp.pad(w1_t, ((0, 0), (0, 0), (0, Coutp - Cout))).astype(jnp.bfloat16)
    w2_t = jnp.transpose(w2, (2, 3, 1, 0)).reshape(9, Cout, Cout).astype(jnp.float32)
    w2_t = jnp.pad(w2_t, ((0, 0), (0, Coutp - Cout), (0, Coutp - Cout))).astype(jnp.bfloat16)

    inputs = [x_flat, w1_t, w2_t]
    in_specs = [
        pl.BlockSpec((1, Rin, Cin), lambda b: (b, 0, 0)),      # padded/flattened bf16 activations
        pl.BlockSpec((9, Cin, Coutp), lambda b: (0, 0, 0)),    # conv1 taps (resident, bf16)
        pl.BlockSpec((9, Coutp, Coutp), lambda b: (0, 0, 0)),  # conv2 taps (resident, bf16)
    ]
    if has_shortcut:
        ws = params["shortcut_w"].reshape(Cout, Cin).T.astype(jnp.float32)   # [Cin, Cout]
        ws = jnp.pad(ws, ((0, 0), (0, Coutp - Cout))).astype(jnp.bfloat16)
        inputs.append(ws)
        in_specs.append(pl.BlockSpec((Cin, Coutp), lambda b: (0, 0)))        # shortcut weight

    # Folded inference-mode BatchNorm scale/shift, zero-padded channels.
    s1, b1 = _bn_fold(params["bn1_gamma"], params["bn1_beta"],
                      params["bn1_mean"], params["bn1_var"], eps)
    s2, b2 = _bn_fold(params["bn2_gamma"], params["bn2_beta"],
                      params["bn2_mean"], params["bn2_var"], eps)
    pad_c = lambda v: jnp.pad(v.astype(jnp.float32), (0, Coutp - Cout)).reshape(1, Coutp)
    inputs += [pad_c(s1), pad_c(b1), pad_c(s2), pad_c(b2)]
    in_specs += [pl.BlockSpec((1, Coutp), lambda b: (0, 0)) for _ in range(4)]

    kernel = functools.partial(_basic_block_kernel, tap_offs=tap_offs, q_rows=Q,
                               center_off=center_off, wp=Wp, valid_w=W,
                               has_shortcut=has_shortcut)

    out_flat = pl.pallas_call(
        kernel,
        out_shape=jax.ShapeDtypeStruct((B, Q, Coutp), jnp.bfloat16),
        grid=(B,),
        in_specs=in_specs,
        out_specs=pl.BlockSpec((1, Q, Coutp), lambda b: (b, 0, 0)),
        scratch_shapes=[pltpu.VMEM((Rin, Coutp), jnp.bfloat16)],   # bf16 o1 staging
        compiler_params=pltpu.CompilerParams(
            dimension_semantics=("parallel",),     # v7x megacore: images shard across TCs
            vmem_limit_bytes=_vmem_limit_bytes()),
    )(*inputs)

    # External interface: slice the padded flat layout back to NHWC.  In a full network,
    # chain on the flat (B, Q, Coutp) bf16 layout instead to avoid this HBM round-trip.
    out = out_flat.reshape(B, H, Wp, Coutp)[:, :, :W, :Cout]
    return out


def basic_block_forward(x_nchw, params, stride=1, dilation=1, eps=1e-5):
    """Public NCHW interface (matches nn.Conv2d). Returns NCHW bf16."""
    x = jnp.transpose(x_nchw, (0, 2, 3, 1))
    out = basic_block_forward_nhwc(x, params, stride=stride, dilation=dilation, eps=eps)
    return jnp.transpose(out, (0, 3, 1, 2))


# ---------------------------------------------------------------------------
# Pure-JAX reference (lax.conv) mirroring the kernel's bf16 operand rounding
# ---------------------------------------------------------------------------
def reference_forward(x, params, dilation=1, eps=1e-5):
    bf = lambda a: a.astype(jnp.bfloat16).astype(jnp.float32)

    def conv(x, w, d, pad):
        return jax.lax.conv_general_dilated(
            x, w, window_strides=(1, 1), padding=((pad, pad), (pad, pad)),
            rhs_dilation=(d, d), dimension_numbers=("NCHW", "OIHW", "NCHW"))

    def bn(x, g, b, m, v):
        rs = lambda a: a.reshape(1, -1, 1, 1)
        return (x - rs(m)) / jnp.sqrt(rs(v) + eps) * rs(g) + rs(b)

    xb = bf(x)
    if "shortcut_w" in params:
        residual = conv(xb, bf(params["shortcut_w"]), 1, 0)
    else:
        residual = xb
    out = conv(xb, bf(params["conv1_w"]), dilation, dilation)
    out = jnp.maximum(bn(out, params["bn1_gamma"], params["bn1_beta"],
                         params["bn1_mean"], params["bn1_var"]), 0.0)
    out = bf(out)                                 # kernel stages conv2's input in bf16
    out = bn(conv(out, bf(params["conv2_w"]), dilation, dilation),
             params["bn2_gamma"], params["bn2_beta"],
             params["bn2_mean"], params["bn2_var"])
    return jnp.maximum(out + residual, 0.0)


# ---------------------------------------------------------------------------
def make_params(key, inplanes, planes, with_shortcut):
    k1, k2, k3 = jax.random.split(key, 3)
    p = {
        "conv1_w": 0.1 * jax.random.normal(k1, (planes, inplanes, 3, 3), jnp.float32),
        "conv2_w": 0.1 * jax.random.normal(k2, (planes, planes, 3, 3), jnp.float32),
        "bn1_gamma": 1.0 + 0.10 * jnp.arange(planes, dtype=jnp.float32),
        "bn1_beta": 0.05 * jnp.arange(planes, dtype=jnp.float32),
        "bn1_mean": 0.02 * jnp.arange(planes, dtype=jnp.float32),
        "bn1_var": 1.0 + 0.10 * jnp.arange(planes, dtype=jnp.float32),
        "bn2_gamma": 1.0 - 0.03 * jnp.arange(planes, dtype=jnp.float32),
        "bn2_beta": -0.04 * jnp.arange(planes, dtype=jnp.float32),
        "bn2_mean": 0.01 * jnp.arange(planes, dtype=jnp.float32),
        "bn2_var": 1.0 + 0.05 * jnp.arange(planes, dtype=jnp.float32),
    }
    if with_shortcut:
        p["shortcut_w"] = 0.1 * jax.random.normal(k3, (planes, inplanes, 1, 1), jnp.float32)
    return p


if __name__ == "__main__":
    key = jax.random.PRNGKey(0)
    kx1, kp1, kx2, kp2 = jax.random.split(key, 4)

    def err_metric(out, ref):
        return float(jnp.max(jnp.abs(out - ref) / (1.0 + jnp.abs(ref))))

    # Case 1: inplanes != planes -> fused 1x1 shortcut, dilation 1.
    inplanes, planes, B, H, W = 4, 8, 2, 16, 16
    params1 = make_params(kp1, inplanes, planes, with_shortcut=True)
    x1 = jax.random.normal(kx1, (B, inplanes, H, W), jnp.float32)
    fwd1 = jax.jit(lambda x, p: basic_block_forward(x, p, stride=1, dilation=1))
    out1 = jax.block_until_ready(fwd1(x1, params1)).astype(jnp.float32)
    ref1 = reference_forward(x1, params1, dilation=1)
    assert out1.shape == (B, planes, H, W), out1.shape
    err1 = err_metric(out1, ref1)
    assert err1 < 1e-2, err1

    # Case 2: inplanes == planes -> identity residual (no GEMM), dilation 2.
    planes2 = 8
    params2 = make_params(kp2, planes2, planes2, with_shortcut=False)
    x2 = jax.random.normal(kx2, (B, planes2, H, W), jnp.float32)
    fwd2 = jax.jit(lambda x, p: basic_block_forward(x, p, stride=1, dilation=2))
    out2 = jax.block_until_ready(fwd2(x2, params2)).astype(jnp.float32)
    ref2 = reference_forward(x2, params2, dilation=2)
    assert out2.shape == (B, planes2, H, W), out2.shape
    err2 = err_metric(out2, ref2)
    assert err2 < 1e-2, err2

    print("KERNEL_OK")
</pallas_src>

<mosaic_0001>
module attributes {stable_mosaic.version = 11 : i64} {
  func.func @_basic_block_kernel(%arg0: i32, %arg1: memref<1x342x4xbf16, #tpu.memory_space<vmem>>, %arg2: memref<9x4x128xbf16, #tpu.memory_space<vmem>>, %arg3: memref<9x128x128xbf16, #tpu.memory_space<vmem>>, %arg4: memref<4x128xbf16, #tpu.memory_space<vmem>>, %arg5: memref<1x128xf32, #tpu.memory_space<vmem>>, %arg6: memref<1x128xf32, #tpu.memory_space<vmem>>, %arg7: memref<1x128xf32, #tpu.memory_space<vmem>>, %arg8: memref<1x128xf32, #tpu.memory_space<vmem>>, %arg9: memref<1x288x128xbf16, #tpu.memory_space<vmem>>, %arg10: memref<342x128xbf16, #tpu.memory_space<vmem>>) attributes {dimension_semantics = [#tpu.dimension_semantics<parallel>], iteration_bounds = array<i64: 2>, scalar_prefetch = 0 : i64, scratch_operands = 1 : i64, tpu.core_type = #tpu.core_type<tc>, window_params = [{transform_indices = @transform_0, window_bounds = array<i64: 1, 342, 4>}, {pipeline_mode = #tpu.pipeline_mode<synchronous>, transform_indices = @transform_1, window_bounds = array<i64: 9, 4, 128>}, {pipeline_mode = #tpu.pipeline_mode<synchronous>, transform_indices = @transform_2, window_bounds = array<i64: 9, 128, 128>}, {pipeline_mode = #tpu.pipeline_mode<synchronous>, transform_indices = @transform_3, window_bounds = array<i64: 4, 128>}, {pipeline_mode = #tpu.pipeline_mode<synchronous>, transform_indices = @transform_4, window_bounds = array<i64: 1, 128>}, {pipeline_mode = #tpu.pipeline_mode<synchronous>, transform_indices = @transform_5, window_bounds = array<i64: 1, 128>}, {pipeline_mode = #tpu.pipeline_mode<synchronous>, transform_indices = @transform_6, window_bounds = array<i64: 1, 128>}, {pipeline_mode = #tpu.pipeline_mode<synchronous>, transform_indices = @transform_7, window_bounds = array<i64: 1, 128>}, {transform_indices = @transform_8, window_bounds = array<i64: 1, 288, 128>}]} {
    %c0 = arith.constant 0 : index
    %c0_0 = arith.constant 0 : index
    %c0_1 = arith.constant 0 : index
    %0 = vector.load %arg1[%c0, %c0_0, %c0_1] : memref<1x342x4xbf16, #tpu.memory_space<vmem>>, vector<1x288x4xbf16>
    %1 = vector.shape_cast %0 : vector<1x288x4xbf16> to vector<288x4xbf16>
    %c0_2 = arith.constant 0 : index
    %c0_3 = arith.constant 0 : index
    %c0_4 = arith.constant 0 : index
    %2 = vector.load %arg2[%c0_2, %c0_3, %c0_4] : memref<9x4x128xbf16, #tpu.memory_space<vmem>>, vector<1x4x128xbf16>
    %3 = vector.shape_cast %2 : vector<1x4x128xbf16> to vector<4x128xbf16>
    %cst = arith.constant dense<0.000000e+00> : vector<288x128xf32>
    %4 = tpu.matmul %1, %3, %cst {dimension_numbers = #tpu.dot_dimension_numbers<[1], [0], [0], [1], [0, 0, 1, 1], [], []>} : vector<288x4xbf16>, vector<4x128xbf16>, vector<288x128xf32> -> vector<288x128xf32>
    %c0_5 = arith.constant 0 : index
    %c1 = arith.constant 1 : index
    %c0_6 = arith.constant 0 : index
    %5 = vector.load %arg1[%c0_5, %c1, %c0_6] : memref<1x342x4xbf16, #tpu.memory_space<vmem>>, vector<1x288x4xbf16>
    %6 = vector.shape_cast %5 : vector<1x288x4xbf16> to vector<288x4xbf16>
    %c1_7 = arith.constant 1 : index
    %c0_8 = arith.constant 0 : index
    %c0_9 = arith.constant 0 : index
    %7 = vector.load %arg2[%c1_7, %c0_8, %c0_9] : memref<9x4x128xbf16, #tpu.memory_space<vmem>>, vector<1x4x128xbf16>
    %8 = vector.shape_cast %7 : vector<1x4x128xbf16> to vector<4x128xbf16>
    %cst_10 = arith.constant dense<0.000000e+00> : vector<288x128xf32>
    %9 = tpu.matmul %6, %8, %cst_10 {dimension_numbers = #tpu.dot_dimension_numbers<[1], [0], [0], [1], [0, 0, 1, 1], [], []>} : vector<288x4xbf16>, vector<4x128xbf16>, vector<288x128xf32> -> vector<288x128xf32>
    %10 = arith.addf %4, %9 : vector<288x128xf32>
    %c0_11 = arith.constant 0 : index
    %c2 = arith.constant 2 : index
    %c0_12 = arith.constant 0 : index
    %11 = vector.load %arg1[%c0_11, %c2, %c0_12] : memref<1x342x4xbf16, #tpu.memory_space<vmem>>, vector<1x288x4xbf16>
    %12 = vector.shape_cast %11 : vector<1x288x4xbf16> to vector<288x4xbf16>
    %c2_13 = arith.constant 2 : index
    %c0_14 = arith.constant 0 : index
    %c0_15 = arith.constant 0 : index
    %13 = vector.load %arg2[%c2_13, %c0_14, %c0_15] : memref<9x4x128xbf16, #tpu.memory_space<vmem>>, vector<1x4x128xbf16>
    %14 = vector.shape_cast %13 : vector<1x4x128xbf16> to vector<4x128xbf16>
    %cst_16 = arith.constant dense<0.000000e+00> : vector<288x128xf32>
    %15 = tpu.matmul %12, %14, %cst_16 {dimension_numbers = #tpu.dot_dimension_numbers<[1], [0], [0], [1], [0, 0, 1, 1], [], []>} : vector<288x4xbf16>, vector<4x128xbf16>, vector<288x128xf32> -> vector<288x128xf32>
    %16 = arith.addf %10, %15 : vector<288x128xf32>
    %c0_17 = arith.constant 0 : index
    %c18 = arith.constant 18 : index
    %c0_18 = arith.constant 0 : index
    %17 = vector.load %arg1[%c0_17, %c18, %c0_18] : memref<1x342x4xbf16, #tpu.memory_space<vmem>>, vector<1x288x4xbf16>
    %18 = vector.shape_cast %17 : vector<1x288x4xbf16> to vector<288x4xbf16>
    %c3 = arith.constant 3 : index
    %c0_19 = arith.constant 0 : index
    %c0_20 = arith.constant 0 : index
    %19 = vector.load %arg2[%c3, %c0_19, %c0_20] : memref<9x4x128xbf16, #tpu.memory_space<vmem>>, vector<1x4x128xbf16>
    %20 = vector.shape_cast %19 : vector<1x4x128xbf16> to vector<4x128xbf16>
    %cst_21 = arith.constant dense<0.000000e+00> : vector<288x128xf32>
    %21 = tpu.matmul %18, %20, %cst_21 {dimension_numbers = #tpu.dot_dimension_numbers<[1], [0], [0], [1], [0, 0, 1, 1], [], []>} : vector<288x4xbf16>, vector<4x128xbf16>, vector<288x128xf32> -> vector<288x128xf32>
    %22 = arith.addf %16, %21 : vector<288x128xf32>
    %c0_22 = arith.constant 0 : index
    %c19 = arith.constant 19 : index
    %c0_23 = arith.constant 0 : index
    %23 = vector.load %arg1[%c0_22, %c19, %c0_23] : memref<1x342x4xbf16, #tpu.memory_space<vmem>>, vector<1x288x4xbf16>
    %24 = vector.shape_cast %23 : vector<1x288x4xbf16> to vector<288x4xbf16>
    %c4 = arith.constant 4 : index
    %c0_24 = arith.constant 0 : index
    %c0_25 = arith.constant 0 : index
    %25 = vector.load %arg2[%c4, %c0_24, %c0_25] : memref<9x4x128xbf16, #tpu.memory_space<vmem>>, vector<1x4x128xbf16>
    %26 = vector.shape_cast %25 : vector<1x4x128xbf16> to vector<4x128xbf16>
    %cst_26 = arith.constant dense<0.000000e+00> : vector<288x128xf32>
    %27 = tpu.matmul %24, %26, %cst_26 {dimension_numbers = #tpu.dot_dimension_numbers<[1], [0], [0], [1], [0, 0, 1, 1], [], []>} : vector<288x4xbf16>, vector<4x128xbf16>, vector<288x128xf32> -> vector<288x128xf32>
    %28 = arith.addf %22, %27 : vector<288x128xf32>
    %c0_27 = arith.constant 0 : index
    %c20 = arith.constant 20 : index
    %c0_28 = arith.constant 0 : index
    %29 = vector.load %arg1[%c0_27, %c20, %c0_28] : memref<1x342x4xbf16, #tpu.memory_space<vmem>>, vector<1x288x4xbf16>
    %30 = vector.shape_cast %29 : vector<1x288x4xbf16> to vector<288x4xbf16>
    %c5 = arith.constant 5 : index
    %c0_29 = arith.constant 0 : index
    %c0_30 = arith.constant 0 : index
    %31 = vector.load %arg2[%c5, %c0_29, %c0_30] : memref<9x4x128xbf16, #tpu.memory_space<vmem>>, vector<1x4x128xbf16>
    %32 = vector.shape_cast %31 : vector<1x4x128xbf16> to vector<4x128xbf16>
    %cst_31 = arith.constant dense<0.000000e+00> : vector<288x128xf32>
    %33 = tpu.matmul %30, %32, %cst_31 {dimension_numbers = #tpu.dot_dimension_numbers<[1], [0], [0], [1], [0, 0, 1, 1], [], []>} : vector<288x4xbf16>, vector<4x128xbf16>, vector<288x128xf32> -> vector<288x128xf32>
    %34 = arith.addf %28, %33 : vector<288x128xf32>
    %c0_32 = arith.constant 0 : index
    %c36 = arith.constant 36 : index
    %c0_33 = arith.constant 0 : index
    %35 = vector.load %arg1[%c0_32, %c36, %c0_33] : memref<1x342x4xbf16, #tpu.memory_space<vmem>>, vector<1x288x4xbf16>
    %36 = vector.shape_cast %35 : vector<1x288x4xbf16> to vector<288x4xbf16>
    %c6 = arith.constant 6 : index
    %c0_34 = arith.constant 0 : index
    %c0_35 = arith.constant 0 : index
    %37 = vector.load %arg2[%c6, %c0_34, %c0_35] : memref<9x4x128xbf16, #tpu.memory_space<vmem>>, vector<1x4x128xbf16>
    %38 = vector.shape_cast %37 : vector<1x4x128xbf16> to vector<4x128xbf16>
    %cst_36 = arith.constant dense<0.000000e+00> : vector<288x128xf32>
    %39 = tpu.matmul %36, %38, %cst_36 {dimension_numbers = #tpu.dot_dimension_numbers<[1], [0], [0], [1], [0, 0, 1, 1], [], []>} : vector<288x4xbf16>, vector<4x128xbf16>, vector<288x128xf32> -> vector<288x128xf32>
    %40 = arith.addf %34, %39 : vector<288x128xf32>
    %c0_37 = arith.constant 0 : index
    %c37 = arith.constant 37 : index
    %c0_38 = arith.constant 0 : index
    %41 = vector.load %arg1[%c0_37, %c37, %c0_38] : memref<1x342x4xbf16, #tpu.memory_space<vmem>>, vector<1x288x4xbf16>
    %42 = vector.shape_cast %41 : vector<1x288x4xbf16> to vector<288x4xbf16>
    %c7 = arith.constant 7 : index
    %c0_39 = arith.constant 0 : index
    %c0_40 = arith.constant 0 : index
    %43 = vector.load %arg2[%c7, %c0_39, %c0_40] : memref<9x4x128xbf16, #tpu.memory_space<vmem>>, vector<1x4x128xbf16>
    %44 = vector.shape_cast %43 : vector<1x4x128xbf16> to vector<4x128xbf16>
    %cst_41 = arith.constant dense<0.000000e+00> : vector<288x128xf32>
    %45 = tpu.matmul %42, %44, %cst_41 {dimension_numbers = #tpu.dot_dimension_numbers<[1], [0], [0], [1], [0, 0, 1, 1], [], []>} : vector<288x4xbf16>, vector<4x128xbf16>, vector<288x128xf32> -> vector<288x128xf32>
    %46 = arith.addf %40, %45 : vector<288x128xf32>
    %c0_42 = arith.constant 0 : index
    %c38 = arith.constant 38 : index
    %c0_43 = arith.constant 0 : index
    %47 = vector.load %arg1[%c0_42, %c38, %c0_43] : memref<1x342x4xbf16, #tpu.memory_space<vmem>>, vector<1x288x4xbf16>
    %48 = vector.shape_cast %47 : vector<1x288x4xbf16> to vector<288x4xbf16>
    %c8 = arith.constant 8 : index
    %c0_44 = arith.constant 0 : index
    %c0_45 = arith.constant 0 : index
    %49 = vector.load %arg2[%c8, %c0_44, %c0_45] : memref<9x4x128xbf16, #tpu.memory_space<vmem>>, vector<1x4x128xbf16>
    %50 = vector.shape_cast %49 : vector<1x4x128xbf16> to vector<4x128xbf16>
    %cst_46 = arith.constant dense<0.000000e+00> : vector<288x128xf32>
    %51 = tpu.matmul %48, %50, %cst_46 {dimension_numbers = #tpu.dot_dimension_numbers<[1], [0], [0], [1], [0, 0, 1, 1], [], []>} : vector<288x4xbf16>, vector<4x128xbf16>, vector<288x128xf32> -> vector<288x128xf32>
    %52 = arith.addf %46, %51 : vector<288x128xf32>
    %53 = tpu.iota {dimensions = array<i32: 0>} : vector<288x1xi32>
    %c18_i32 = arith.constant 18 : i32
    %c0_i32 = arith.constant 0 : i32
    %54 = arith.cmpi eq, %c18_i32, %c0_i32 : i32
    %c1_i32 = arith.constant 1 : i32
    %55 = arith.select %54, %c1_i32, %c18_i32 : i32
    %56 = vector.broadcast %55 : i32 to vector<288x1xi32>
    %57 = arith.remsi %53, %56 : vector<288x1xi32>
    %c0_i32_47 = arith.constant 0 : i32
    %58 = vector.broadcast %c0_i32_47 : i32 to vector<288x1xi32>
    %59 = arith.cmpi ne, %57, %58 : vector<288x1xi32>
    %c0_i32_48 = arith.constant 0 : i32
    %60 = vector.broadcast %c0_i32_48 : i32 to vector<288x1xi32>
    %61 = arith.cmpi slt, %57, %60 : vector<288x1xi32>
    %c0_i32_49 = arith.constant 0 : i32
    %62 = arith.cmpi slt, %55, %c0_i32_49 : i32
    %63 = vector.broadcast %62 : i1 to vector<288x1xi1>
    %64 = vector.broadcast %63 : vector<288x1xi1> to vector<288x1xi1>
    %65 = arith.xori %61, %64 : vector<288x1xi1>
    %66 = arith.andi %65, %59 : vector<288x1xi1>
    %67 = vector.broadcast %55 : i32 to vector<288x1xi32>
    %68 = arith.addi %57, %67 : vector<288x1xi32>
    %69 = arith.select %66, %68, %57 : vector<288x1xi1>, vector<288x1xi32>
    %c16_i32 = arith.constant 16 : i32
    %70 = vector.broadcast %c16_i32 : i32 to vector<288x1xi32>
    %71 = arith.cmpi slt, %69, %70 : vector<288x1xi32>
    %c0_50 = arith.constant 0 : index
    %c0_51 = arith.constant 0 : index
    %72 = vector.load %arg5[%c0_50, %c0_51] : memref<1x128xf32, #tpu.memory_space<vmem>>, vector<1x128xf32>
    %73 = vector.broadcast %72 : vector<1x128xf32> to vector<288x128xf32>
    %74 = arith.mulf %52, %73 : vector<288x128xf32>
    %c0_52 = arith.constant 0 : index
    %c0_53 = arith.constant 0 : index
    %75 = vector.load %arg6[%c0_52, %c0_53] : memref<1x128xf32, #tpu.memory_space<vmem>>, vector<1x128xf32>
    %76 = vector.broadcast %75 : vector<1x128xf32> to vector<288x128xf32>
    %77 = arith.addf %74, %76 : vector<288x128xf32>
    %cst_54 = arith.constant 0.000000e+00 : f32
    %78 = vector.broadcast %cst_54 : f32 to vector<288x128xf32>
    %79 = arith.maximumf %77, %78 : vector<288x128xf32>
    %cst_55 = arith.constant 0.000000e+00 : f32
    %80 = vector.shape_cast %71 : vector<288x1xi1> to vector<288x1xi1>
    %81 = vector.broadcast %80 : vector<288x1xi1> to vector<288x128xi1>
    %82 = vector.broadcast %cst_55 : f32 to vector<288x128xf32>
    %83 = arith.select %81, %79, %82 : vector<288x128xi1>, vector<288x128xf32>
    %cst_56 = arith.constant 0.000000e+00 : bf16
    %84 = vector.broadcast %cst_56 : bf16 to vector<19x128xbf16>
    %c0_57 = arith.constant 0 : index
    %c0_58 = arith.constant 0 : index
    %85 = vector.load %arg10[%c0_57, %c0_58] : memref<342x128xbf16, #tpu.memory_space<vmem>>, vector<19x128xbf16>
    tpu.vector_store %arg10[%c0_57, %c0_58], %84 {strides = array<i32>} : memref<342x128xbf16, #tpu.memory_space<vmem>>, vector<19x128xbf16>,
    %cst_59 = arith.constant 0.000000e+00 : bf16
    %86 = vector.broadcast %cst_59 : bf16 to vector<35x128xbf16>
    %c307 = arith.constant 307 : index
    %c0_60 = arith.constant 0 : index
    %87 = vector.load %arg10[%c307, %c0_60] : memref<342x128xbf16, #tpu.memory_space<vmem>>, vector<35x128xbf16>
    tpu.vector_store %arg10[%c307, %c0_60], %86 {strides = array<i32>} : memref<342x128xbf16, #tpu.memory_space<vmem>>, vector<35x128xbf16>,
    %88 = arith.truncf %83 : vector<288x128xf32> to vector<288x128xbf16>
    %c19_61 = arith.constant 19 : index
    %c0_62 = arith.constant 0 : index
    %89 = vector.load %arg10[%c19_61, %c0_62] : memref<342x128xbf16, #tpu.memory_space<vmem>>, vector<288x128xbf16>
    tpu.vector_store %arg10[%c19_61, %c0_62], %88 {strides = array<i32>} : memref<342x128xbf16, #tpu.memory_space<vmem>>, vector<288x128xbf16>,
    %c0_63 = arith.constant 0 : index
    %c19_64 = arith.constant 19 : index
    %c0_65 = arith.constant 0 : index
    %90 = vector.load %arg1[%c0_63, %c19_64, %c0_65] : memref<1x342x4xbf16, #tpu.memory_space<vmem>>, vector<1x288x4xbf16>
    %91 = vector.shape_cast %90 : vector<1x288x4xbf16> to vector<288x4xbf16>
    %c0_66 = arith.constant 0 : index
    %c0_67 = arith.constant 0 : index
    %92 = vector.load %arg4[%c0_66, %c0_67] : memref<4x128xbf16, #tpu.memory_space<vmem>>, vector<4x128xbf16>
    %cst_68 = arith.constant dense<0.000000e+00> : vector<288x128xf32>
    %93 = tpu.matmul %91, %92, %cst_68 {dimension_numbers = #tpu.dot_dimension_numbers<[1], [0], [0], [1], [0, 0, 1, 1], [], []>} : vector<288x4xbf16>, vector<4x128xbf16>, vector<288x128xf32> -> vector<288x128xf32>
    %c0_69 = arith.constant 0 : index
    %c0_70 = arith.constant 0 : index
    %94 = vector.load %arg10[%c0_69, %c0_70] : memref<342x128xbf16, #tpu.memory_space<vmem>>, vector<288x128xbf16>
    %c0_71 = arith.constant 0 : index
    %c0_72 = arith.constant 0 : index
    %c0_73 = arith.constant 0 : index
    %95 = vector.load %arg3[%c0_71, %c0_72, %c0_73] : memref<9x128x128xbf16, #tpu.memory_space<vmem>>, vector<1x128x128xbf16>
    %96 = vector.shape_cast %95 : vector<1x128x128xbf16> to vector<128x128xbf16>
    %cst_74 = arith.constant dense<0.000000e+00> : vector<288x128xf32>
    %97 = tpu.matmul %94, %96, %cst_74 {dimension_numbers = #tpu.dot_dimension_numbers<[1], [0], [0], [1], [0, 0, 1, 1], [], []>} : vector<288x128xbf16>, vector<128x128xbf16>, vector<288x128xf32> -> vector<288x128xf32>
    %c1_75 = arith.constant 1 : index
    %c0_76 = arith.constant 0 : index
    %98 = vector.load %arg10[%c1_75, %c0_76] : memref<342x128xbf16, #tpu.memory_space<vmem>>, vector<288x128xbf16>
    %c1_77 = arith.constant 1 : index
    %c0_78 = arith.constant 0 : index
    %c0_79 = arith.constant 0 : index
    %99 = vector.load %arg3[%c1_77, %c0_78, %c0_79] : memref<9x128x128xbf16, #tpu.memory_space<vmem>>, vector<1x128x128xbf16>
    %100 = vector.shape_cast %99 : vector<1x128x128xbf16> to vector<128x128xbf16>
    %cst_80 = arith.constant dense<0.000000e+00> : vector<288x128xf32>
    %101 = tpu.matmul %98, %100, %cst_80 {dimension_numbers = #tpu.dot_dimension_numbers<[1], [0], [0], [1], [0, 0, 1, 1], [], []>} : vector<288x128xbf16>, vector<128x128xbf16>, vector<288x128xf32> -> vector<288x128xf32>
    %102 = arith.addf %97, %101 : vector<288x128xf32>
    %c2_81 = arith.constant 2 : index
    %c0_82 = arith.constant 0 : index
    %103 = vector.load %arg10[%c2_81, %c0_82] : memref<342x128xbf16, #tpu.memory_space<vmem>>, vector<288x128xbf16>
    %c2_83 = arith.constant 2 : index
    %c0_84 = arith.constant 0 : index
    %c0_85 = arith.constant 0 : index
    %104 = vector.load %arg3[%c2_83, %c0_84, %c0_85] : memref<9x128x128xbf16, #tpu.memory_space<vmem>>, vector<1x128x128xbf16>
    %105 = vector.shape_cast %104 : vector<1x128x128xbf16> to vector<128x128xbf16>
    %cst_86 = arith.constant dense<0.000000e+00> : vector<288x128xf32>
    %106 = tpu.matmul %103, %105, %cst_86 {dimension_numbers = #tpu.dot_dimension_numbers<[1], [0], [0], [1], [0, 0, 1, 1], [], []>} : vector<288x128xbf16>, vector<128x128xbf16>, vector<288x128xf32> -> vector<288x128xf32>
    %107 = arith.addf %102, %106 : vector<288x128xf32>
    %c18_87 = arith.constant 18 : index
    %c0_88 = arith.constant 0 : index
    %108 = vector.load %arg10[%c18_87, %c0_88] : memref<342x128xbf16, #tpu.memory_space<vmem>>, vector<288x128xbf16>
    %c3_89 = arith.constant 3 : index
    %c0_90 = arith.constant 0 : index
    %c0_91 = arith.constant 0 : index
    %109 = vector.load %arg3[%c3_89, %c0_90, %c0_91] : memref<9x128x128xbf16, #tpu.memory_space<vmem>>, vector<1x128x128xbf16>
    %110 = vector.shape_cast %109 : vector<1x128x128xbf16> to vector<128x128xbf16>
    %cst_92 = arith.constant dense<0.000000e+00> : vector<288x128xf32>
    %111 = tpu.matmul %108, %110, %cst_92 {dimension_numbers = #tpu.dot_dimension_numbers<[1], [0], [0], [1], [0, 0, 1, 1], [], []>} : vector<288x128xbf16>, vector<128x128xbf16>, vector<288x128xf32> -> vector<288x128xf32>
    %112 = arith.addf %107, %111 : vector<288x128xf32>
    %c19_93 = arith.constant 19 : index
    %c0_94 = arith.constant 0 : index
    %113 = vector.load %arg10[%c19_93, %c0_94] : memref<342x128xbf16, #tpu.memory_space<vmem>>, vector<288x128xbf16>
    %c4_95 = arith.constant 4 : index
    %c0_96 = arith.constant 0 : index
    %c0_97 = arith.constant 0 : index
    %114 = vector.load %arg3[%c4_95, %c0_96, %c0_97] : memref<9x128x128xbf16, #tpu.memory_space<vmem>>, vector<1x128x128xbf16>
    %115 = vector.shape_cast %114 : vector<1x128x128xbf16> to vector<128x128xbf16>
    %cst_98 = arith.constant dense<0.000000e+00> : vector<288x128xf32>
    %116 = tpu.matmul %113, %115, %cst_98 {dimension_numbers = #tpu.dot_dimension_numbers<[1], [0], [0], [1], [0, 0, 1, 1], [], []>} : vector<288x128xbf16>, vector<128x128xbf16>, vector<288x128xf32> -> vector<288x128xf32>
    %117 = arith.addf %112, %116 : vector<288x128xf32>
    %c20_99 = arith.constant 20 : index
    %c0_100 = arith.constant 0 : index
    %118 = vector.load %arg10[%c20_99, %c0_100] : memref<342x128xbf16, #tpu.memory_space<vmem>>, vector<288x128xbf16>
    %c5_101 = arith.constant 5 : index
    %c0_102 = arith.constant 0 : index
    %c0_103 = arith.constant 0 : index
    %119 = vector.load %arg3[%c5_101, %c0_102, %c0_103] : memref<9x128x128xbf16, #tpu.memory_space<vmem>>, vector<1x128x128xbf16>
    %120 = vector.shape_cast %119 : vector<1x128x128xbf16> to vector<128x128xbf16>
    %cst_104 = arith.constant dense<0.000000e+00> : vector<288x128xf32>
    %121 = tpu.matmul %118, %120, %cst_104 {dimension_numbers = #tpu.dot_dimension_numbers<[1], [0], [0], [1], [0, 0, 1, 1], [], []>} : vector<288x128xbf16>, vector<128x128xbf16>, vector<288x128xf32> -> vector<288x128xf32>
    %122 = arith.addf %117, %121 : vector<288x128xf32>
    %c36_105 = arith.constant 36 : index
    %c0_106 = arith.constant 0 : index
    %123 = vector.load %arg10[%c36_105, %c0_106] : memref<342x128xbf16, #tpu.memory_space<vmem>>, vector<288x128xbf16>
    %c6_107 = arith.constant 6 : index
    %c0_108 = arith.constant 0 : index
    %c0_109 = arith.constant 0 : index
    %124 = vector.load %arg3[%c6_107, %c0_108, %c0_109] : memref<9x128x128xbf16, #tpu.memory_space<vmem>>, vector<1x128x128xbf16>
    %125 = vector.shape_cast %124 : vector<1x128x128xbf16> to vector<128x128xbf16>
    %cst_110 = arith.constant dense<0.000000e+00> : vector<288x128xf32>
    %126 = tpu.matmul %123, %125, %cst_110 {dimension_numbers = #tpu.dot_dimension_numbers<[1], [0], [0], [1], [0, 0, 1, 1], [], []>} : vector<288x128xbf16>, vector<128x128xbf16>, vector<288x128xf32> -> vector<288x128xf32>
    %127 = arith.addf %122, %126 : vector<288x128xf32>
    %c37_111 = arith.constant 37 : index
    %c0_112 = arith.constant 0 : index
    %128 = vector.load %arg10[%c37_111, %c0_112] : memref<342x128xbf16, #tpu.memory_space<vmem>>, vector<288x128xbf16>
    %c7_113 = arith.constant 7 : index
    %c0_114 = arith.constant 0 : index
    %c0_115 = arith.constant 0 : index
    %129 = vector.load %arg3[%c7_113, %c0_114, %c0_115] : memref<9x128x128xbf16, #tpu.memory_space<vmem>>, vector<1x128x128xbf16>
    %130 = vector.shape_cast %129 : vector<1x128x128xbf16> to vector<128x128xbf16>
    %cst_116 = arith.constant dense<0.000000e+00> : vector<288x128xf32>
    %131 = tpu.matmul %128, %130, %cst_116 {dimension_numbers = #tpu.dot_dimension_numbers<[1], [0], [0], [1], [0, 0, 1, 1], [], []>} : vector<288x128xbf16>, vector<128x128xbf16>, vector<288x128xf32> -> vector<288x128xf32>
    %132 = arith.addf %127, %131 : vector<288x128xf32>
    %c38_117 = arith.constant 38 : index
    %c0_118 = arith.constant 0 : index
    %133 = vector.load %arg10[%c38_117, %c0_118] : memref<342x128xbf16, #tpu.memory_space<vmem>>, vector<288x128xbf16>
    %c8_119 = arith.constant 8 : index
    %c0_120 = arith.constant 0 : index
    %c0_121 = arith.constant 0 : index
    %134 = vector.load %arg3[%c8_119, %c0_120, %c0_121] : memref<9x128x128xbf16, #tpu.memory_space<vmem>>, vector<1x128x128xbf16>
    %135 = vector.shape_cast %134 : vector<1x128x128xbf16> to vector<128x128xbf16>
    %cst_122 = arith.constant dense<0.000000e+00> : vector<288x128xf32>
    %136 = tpu.matmul %133, %135, %cst_122 {dimension_numbers = #tpu.dot_dimension_numbers<[1], [0], [0], [1], [0, 0, 1, 1], [], []>} : vector<288x128xbf16>, vector<128x128xbf16>, vector<288x128xf32> -> vector<288x128xf32>
    %137 = arith.addf %132, %136 : vector<288x128xf32>
    %c0_123 = arith.constant 0 : index
    %c0_124 = arith.constant 0 : index
    %138 = vector.load %arg7[%c0_123, %c0_124] : memref<1x128xf32, #tpu.memory_space<vmem>>, vector<1x128xf32>
    %139 = vector.broadcast %138 : vector<1x128xf32> to vector<288x128xf32>
    %140 = arith.mulf %137, %139 : vector<288x128xf32>
    %c0_125 = arith.constant 0 : index
    %c0_126 = arith.constant 0 : index
    %141 = vector.load %arg8[%c0_125, %c0_126] : memref<1x128xf32, #tpu.memory_space<vmem>>, vector<1x128xf32>
    %142 = vector.broadcast %141 : vector<1x128xf32> to vector<288x128xf32>
    %143 = arith.addf %140, %142 : vector<288x128xf32>
    %144 = arith.addf %143, %93 : vector<288x128xf32>
    %cst_127 = arith.constant 0.000000e+00 : f32
    %145 = vector.broadcast %cst_127 : f32 to vector<288x128xf32>
    %146 = arith.maximumf %144, %145 : vector<288x128xf32>
    %147 = arith.truncf %146 : vector<288x128xf32> to vector<288x128xbf16>
    %c0_128 = arith.constant 0 : index
    %c0_129 = arith.constant 0 : index
    %c0_130 = arith.constant 0 : index
    %148 = vector.load %arg9[%c0_128, %c0_129, %c0_130] : memref<1x288x128xbf16, #tpu.memory_space<vmem>>, vector<1x288x128xbf16>
    %149 = vector.shape_cast %148 : vector<1x288x128xbf16> to vector<288x128xbf16>
    %150 = vector.shape_cast %147 : vector<288x128xbf16> to vector<1x288x128xbf16>
    tpu.vector_store %arg9[%c0_128, %c0_129, %c0_130], %150 {strides = array<i32>} : memref<1x288x128xbf16, #tpu.memory_space<vmem>>, vector<1x288x128xbf16>,
    return
  }
  func.func @transform_0(%arg0: i32) -> (i32, i32, i32) {
    %c0_i32 = arith.constant 0 : i32
    %c0_i32_0 = arith.constant 0 : i32
    %c0_i32_1 = arith.constant 0 : i32
    return %arg0, %c0_i32, %c0_i32_0 : i32, i32, i32
  }
  func.func @transform_1(%arg0: i32) -> (i32, i32, i32) {
    %c0_i32 = arith.constant 0 : i32
    %c0_i32_0 = arith.constant 0 : i32
    %c0_i32_1 = arith.constant 0 : i32
    %c0_i32_2 = arith.constant 0 : i32
    return %c0_i32, %c0_i32_0, %c0_i32_1 : i32, i32, i32
  }
  func.func @transform_2(%arg0: i32) -> (i32, i32, i32) {
    %c0_i32 = arith.constant 0 : i32
    %c0_i32_0 = arith.constant 0 : i32
    %c0_i32_1 = arith.constant 0 : i32
    %c0_i32_2 = arith.constant 0 : i32
    return %c0_i32, %c0_i32_0, %c0_i32_1 : i32, i32, i32
  }
  func.func @transform_3(%arg0: i32) -> (i32, i32) {
    %c0_i32 = arith.constant 0 : i32
    %c0_i32_0 = arith.constant 0 : i32
    %c0_i32_1 = arith.constant 0 : i32
    return %c0_i32, %c0_i32_0 : i32, i32
  }
  func.func @transform_4(%arg0: i32) -> (i32, i32) {
    %c0_i32 = arith.constant 0 : i32
    %c0_i32_0 = arith.constant 0 : i32
    %c0_i32_1 = arith.constant 0 : i32
    return %c0_i32, %c0_i32_0 : i32, i32
  }
  func.func @transform_5(%arg0: i32) -> (i32, i32) {
    %c0_i32 = arith.constant 0 : i32
    %c0_i32_0 = arith.constant 0 : i32
    %c0_i32_1 = arith.constant 0 : i32
    return %c0_i32, %c0_i32_0 : i32, i32
  }
  func.func @transform_6(%arg0: i32) -> (i32, i32) {
    %c0_i32 = arith.constant 0 : i32
    %c0_i32_0 = arith.constant 0 : i32
    %c0_i32_1 = arith.constant 0 : i32
    return %c0_i32, %c0_i32_0 : i32, i32
  }
  func.func @transform_7(%arg0: i32) -> (i32, i32) {
    %c0_i32 = arith.constant 0 : i32
    %c0_i32_0 = arith.constant 0 : i32
    %c0_i32_1 = arith.constant 0 : i32
    return %c0_i32, %c0_i32_0 : i32, i32
  }
  func.func @transform_8(%arg0: i32) -> (i32, i32, i32) {
    %c0_i32 = arith.constant 0 : i32
    %c0_i32_0 = arith.constant 0 : i32
    %c0_i32_1 = arith.constant 0 : i32
    return %arg0, %c0_i32, %c0_i32_0 : i32, i32, i32
  }
}

</mosaic_0001>

<bundles_post_ra>
// kernel: _lambda_.1
= control target key start
LH: loop header
LB: loop body
LE: loop exit
PB: predicated region body
PF: predicated region fallthrough
CT: control target
= control target key end

     0   :  { %s10307_s27 = smov 0   ;;  %s14320_s0 = inlined_call_operand.vmem [shape: bf16[2,342,4], index: 0, kind: input, shape index: {}]   ;;  %s14321_s1 = inlined_call_operand.vmem [shape: bf16[9,4,128], index: 1, kind: input, shape index: {}]   ;;  %s14322_s2 = inlined_call_operand.vmem [shape: bf16[9,128,128], index: 2, kind: input, shape index: {}]   ;;  %s14323_s3 = inlined_call_operand.vmem [shape: bf16[4,128], index: 3, kind: input, shape index: {}]   ;;  %s14324_s4 = inlined_call_operand.vmem [shape: f32[1,128], index: 4, kind: input, shape index: {}]   ;;  %s14325_s5 = inlined_call_operand.vmem [shape: f32[1,128], index: 5, kind: input, shape index: {}]   ;;  %s14326_s6 = inlined_call_operand.vmem [shape: f32[1,128], index: 6, kind: input, shape index: {}]   ;;  %s14327_s7 = inlined_call_operand.vmem [shape: f32[1,128], index: 7, kind: input, shape index: {}]   ;;  %s14328_s8 = inlined_call_operand.vmem [shape: bf16[2,288,128], index: 8, kind: output, shape index: {}]  }
   0x1 LB: > { %s8775_s28 = sadd.s32 4294967295, %s10259_s27   ;;  %p8779_p0 = scmp.ge.s32.totalorder %s10259_s27, 1  ;;  %s10259_s27 = sphi %s10307_s27, %s18_s27  }
   0x2   : > { %p262_p1 = scmp.lt.s32.totalorder %s10259_s27, 3 }
   0x4   : > { %p263_p2 = pnand %p8779_p0, %p262_p1 }
   0x6   : > { %266 = sbr.rel (%p263_p2) target bundleno = 1832 (0x728), region = 52 }
   0xb   : > { %v343_v0 = vld [vmem:[%s14321_s1] sm:$0x3]  ;;  %vm644_vm0 = vcmask 1041408   ;;  %p296_p3 = scmp.lt.s32.totalorder %s8775_s28, 1  ;;  %v8887_v2 = vld [vmem:[%s14321_s1 + $0x4] sm:$0x3] }
   0xc   : > { %v784_v1 = vsel %vm644_vm0, %v343_v0, 0  ;;  %v8782_v3 = vld [vmem:[%s14321_s1 + $0x2] sm:$0x3]  ;;  %v984_v4 = vsel %vm644_vm0, %v8887_v2, 0  ;;  %v8993_v6 = vld [vmem:[%s14321_s1 + $0x8] sm:$0x3] }
   0xd   : > { %793 = vmatpush.bf16.msra.mxu1 %v784_v1  ;;  %s14736_s28 = smov (!%p296_p3, %s8775_s28), 1  ;;  %v646_v5 = vsel %vm644_vm0, %v8782_v3, 0  ;;  %993 = vmatpush.bf16.msra.mxu2 %v984_v4  ;;  %v1714_v7 = vsel %vm644_vm0, %v8993_v6, 0  ;;  %vm589_vm1 = vcmask 31744   ;;  %vm891_vm2 = vcmask 1046528  }
   0xe   : > { %655 = vmatpush.bf16.msra.mxu0 %v646_v5  ;;  %s10184_s15 = smul.u32 172, %s14736_s28  ;;  %10181 = vmatpush.bf16.msra.mxu3 %v646_v5  ;;  %vm440_vm3 = vsmask.f32 7424  ;;  %vm14336_vm4 = vcmask 1045504   ;;  %vm1488_vm5 = vsmask.f32 6400 }
   0xf   : > { %vm2454_vm6 = vsmask.f32 5376  ;;  %vm2823_vm7 = vcmask 1044480   ;;  %vm4577_vm12 = vsmask.f32 1280  ;;  %vm4582_vm14 = vcmask 1043457  }
  0x10   : > { %s10337_s18 = scalar_lea.vmem %s14320_s0, %s10184_s15  ;;  %vm11338_vm13 = vmand %vm644_vm0, %vm4577_vm12  ;;  %s10185_s19 = smul.u32 144, %s14736_s28 }
  0x11   : > { %v10061_v8 = vld [vmem:[%s10337_s18] sm:$0xff]   ;;  %v9868_v10 = vld [vmem:[%s10337_s18 + $0x8] sm:$0xff]  ;;  %v10345_v14 = vld [vmem:[%s10337_s18 + $0x70] sm:$0xff] }
  0x12   : > { %1723 = vmatpush.bf16.msrb.mxu0 %v1714_v7  ;;  %10182 = vmatpush.bf16.msrb.mxu3 %v784_v1  ;;  %v10158_v9 = vld [vmem:[%s10337_s18] sm:$0xf0]  ;;  %v442_v11 = vshrl.u32 %v10061_v8, 16  ;;  %v444_v12 = vshll.u32 %v10061_v8, 16  ;;  %v10159_v13 = vld [vmem:[%s10337_s18] sm:$0xe]  ;;  %s14097_s22 = scalar_lea.vmem %s14328_s8, %s10185_s19 }
  0x13   : > { %8869 = vmatmul.msk.bf16.vlgmr.msra.gmra.mxu1 %vm589_vm1, %v10061_v8  ;;  %v10348_v15 = vld [vmem:[%s10337_s18 + $0x78] sm:$0xff]  ;;  %v10160_v16 = vor.u32 %v10159_v13, %v10158_v9  ;;  %v893_v17 = vrot.slane %v9868_v10, 1  ;;  %v449_v18 = vshll.u32 %v9868_v10, 16  ;;  %v553_v20 = vshll.u32 %v10345_v14, 16  ;;  %v9869_v32 = vld [vmem:[%s10337_s18 + $0x10] sm:$0xff]  ;;  %v10364_v33 = vld [vmem:[%s10337_s18 + $0x80] sm:$0xff] }
  0x14   : > { %v446_v19 = vrot.slane %v444_v12, 1  ;;  %v557_v21 = vshrl.u32 %v10345_v14, 16  ;;  %v561_v22 = vshll.u32 %v10348_v15, 16  ;;  %v453_v34 = vshrl.u32 %v9868_v10, 16  ;;  %v9870_v46 = vld [vmem:[%s10337_s18 + $0x18] sm:$0xff]  ;;  %v10377_v47 = vld [vmem:[%s10337_s18 + $0x88] sm:$0xff] }
  0x15   : > { %v892_v23 = vrot.slane %v10160_v16, 1  ;;  %v451_v24 = vrot.slane %v449_v18, 1  ;;  %v10353_v26 = vrot.slane %v553_v20, 1  ;;  %v457_v35 = vshll.u32 %v9869_v32, 16  ;;  %v344_v58 = vld [vmem:[%s10337_s18 + $0x90] sm:$0x1] }
  0x16   : > { %v447_v25 = vor.u32 %v446_v19, %v442_v11  ;;  %v563_v27 = vrot.slane %v561_v22, 1  ;;  %v565_v36 = vshrl.u32 %v10348_v15, 16  ;;  %v569_v37 = vshll.u32 %v10364_v33, 16  ;;  %v9871_v62 = vld [vmem:[%s10337_s18 + $0x20] sm:$0xff]  ;;  %v9872_v12 = vld [vmem:[%s10337_s18 + $0x28] sm:$0xff]  ;;  %v9873_v22 = vld [vmem:[%s10337_s18 + $0x30] sm:$0xff] }
  0x17   : > { %v894_v28 = vsel %vm891_vm2, %v892_v23, %v893_v17  ;;  %v559_v30 = vor.u32 %v557_v21, %v10353_v26  ;;  %v895_v38 = vrot.slane %v9869_v32, 1  ;;  %v455_v39 = vor.u32 %v453_v34, %v451_v24 }
  0x18   : > { %8888 = vmatmul.msk.bf16.vlgmr.msra.gmra.mxu2 %vm589_vm1, %v894_v28  ;;  %v452_v29 = vsel %vm440_vm3, %v447_v25, %v451_v24  ;;  %v459_v40 = vrot.slane %v457_v35, 1  ;;  %v567_v41 = vor.u32 %v565_v36, %v563_v27  ;;  %v571_v42 = vrot.slane %v569_v37, 1 }
  0x19   : > { %8851 = vmatmul.msk.bf16.vlgmr.msra.gmra.mxu0 %vm589_vm1, %v452_v29  ;;  %v564_v31 = vsel %vm440_vm3, %v559_v30, %v563_v27  ;;  %v896_v43 = vsel %vm891_vm2, %v893_v17, %v895_v38  ;;  %v461_v48 = vshrl.u32 %v9869_v32, 16  ;;  %v465_v49 = vshll.u32 %v9870_v46, 16 }
  0x1a   : > { %8865 = vmatmul.msk.bf16.vlgmr.msra.gmra.mxu3 %vm589_vm1, %v564_v31  ;;  %v460_v44 = vsel %vm440_vm3, %v455_v39, %v459_v40  ;;  %v572_v45 = vsel %vm440_vm3, %v567_v41, %v571_v42  ;;  %v573_v50 = vshrl.u32 %v10364_v33, 16  ;;  %v577_v51 = vshll.u32 %v10377_v47, 16  ;;  %v9874_v31 = vld [vmem:[%s10337_s18 + $0x38] sm:$0xff] }
  0x1b   : > { %10183 = vmatpush.bf16.msra.mxu3 %v984_v4  ;;  %v897_v52 = vrot.slane %v9870_v46, 1  ;;  %v463_v53 = vor.u32 %v461_v48, %v459_v40  ;;  %v467_v54 = vrot.slane %v465_v49, 1  ;;  %v420_v61 = vunpack.c.l.b16 %v344_v58  ;;  %v9875_v40 = vld [vmem:[%s10337_s18 + $0x40] sm:$0xff]  ;;  %v9876_v49 = vld [vmem:[%s10337_s18 + $0x48] sm:$0xff] }
  0x1c   : > { %v575_v55 = vor.u32 %v573_v50, %v571_v42  ;;  %v579_v56 = vrot.slane %v577_v51, 1  ;;  %v469_v0 = vshrl.u32 %v9870_v46, 16  ;;  %v473_v1 = vshll.u32 %v9871_v62, 16 }
  0x1d   : > { %v898_v57 = vsel %vm891_vm2, %v895_v38, %v897_v52  ;;  %v468_v59 = vsel %vm440_vm3, %v463_v53, %v467_v54  ;;  %v10390_v63 = vpack.c.b16 %v420_v61, %v420_v61  ;;  %v581_v2 = vshrl.u32 %v10377_v47, 16  ;;  %v8906_v53 = vld [vmem:[%s14321_s1 + $0x6] sm:$0x3] }
  0x1e   : > { %v580_v60 = vsel %vm440_vm3, %v575_v55, %v579_v56  ;;  %v899_v4 = vrot.slane %v9871_v62, 1  ;;  %v471_v5 = vor.u32 %v469_v0, %v467_v54  ;;  %v475_v6 = vrot.slane %v473_v1, 1 }
  0x1f   : > { %v585_v3 = vshll.u32 %v10390_v63, 16  ;;  %v583_v7 = vor.u32 %v581_v2, %v579_v56  ;;  %v477_v13 = vshrl.u32 %v9871_v62, 16  ;;  %v481_v16 = vshll.u32 %v9872_v12, 16 }
  0x20   : > { %v900_v9 = vsel %vm891_vm2, %v897_v52, %v899_v4  ;;  %v901_v17 = vrot.slane %v9872_v12, 1  ;;  %v485_v23 = vshrl.u32 %v9872_v12, 16  ;;  %v489_v24 = vshll.u32 %v9873_v22, 16 }
  0x21   : > { %v587_v8 = vrot.slane %v585_v3, 1  ;;  %v479_v18 = vor.u32 %v477_v13, %v475_v6  ;;  %v483_v19 = vrot.slane %v481_v16, 1  ;;  %v903_v25 = vrot.slane %v9873_v22, 1  ;;  %v9877_v3 = vld [vmem:[%s10337_s18 + $0x50] sm:$0xff] }
  0x22   : > { %v902_v20 = vsel %vm891_vm2, %v899_v4, %v901_v17  ;;  %v491_v28 = vrot.slane %v489_v24, 1  ;;  %v497_v34 = vshll.u32 %v9874_v31, 16  ;;  %v905_v35 = vrot.slane %v9874_v31, 1 }
  0x23   : > { %8870 = vmatmul.msk.bf16.gmra.mxu1 %vm589_vm1, %v9868_v10  ;;  %v476_v10 = vsel %vm440_vm3, %v471_v5, %v475_v6  ;;  %v588_v11 = vsel %vm440_vm3, %v583_v7, %v587_v8  ;;  %v484_v21 = vsel %vm440_vm3, %v479_v18, %v483_v19  ;;  %v487_v27 = vor.u32 %v485_v23, %v483_v19 }
  0x24   : > { %v904_v29 = vsel %vm891_vm2, %v901_v17, %v903_v25  ;;  %v499_v37 = vrot.slane %v497_v34, 1  ;;  %v906_v38 = vsel %vm891_vm2, %v903_v25, %v905_v35  ;;  %v501_v41 = vshrl.u32 %v9874_v31, 16 }
  0x25   : > { %v492_v30 = vsel %vm440_vm3, %v487_v27, %v491_v28  ;;  %v505_v42 = vshll.u32 %v9875_v40, 16  ;;  %v509_v50 = vshrl.u32 %v9875_v40, 16  ;;  %v513_v51 = vshll.u32 %v9876_v49, 16 }
  0x26   : > { %v1345_v54 = vsel %vm644_vm0, %v8906_v53, 0  ;;  %v909_v55 = vrot.slane %v9876_v49, 1  ;;  %v919_v58 = vrot.slane %v10345_v14, 1  ;;  %v517_v7 = vshrl.u32 %v9876_v49, 16 }
  0x27   : > { %v521_v8 = vshll.u32 %v9877_v3, 16  ;;  %v911_v13 = vrot.slane %v9877_v3, 1 }
  0x28   : > { %8889 = vmatmul.msk.bf16.gmra.mxu2 %vm589_vm1, %v896_v43  ;;  %v907_v43 = vrot.slane %v9875_v40, 1 }
  0x29   : > { %8852 = vmatmul.msk.bf16.gmra.mxu0 %vm589_vm1, %v460_v44  ;;  %v503_v44 = vor.u32 %v501_v41, %v499_v37  ;;  %v523_v17 = vrot.slane %v521_v8, 1 }
  0x2a   : > { %8866 = vmatmul.msk.bf16.gmra.mxu3 %vm589_vm1, %v572_v45  ;;  %v507_v45 = vrot.slane %v505_v42, 1 }
  0x2c   : > { %v508_v48 = vsel %vm440_vm3, %v503_v44, %v507_v45  ;;  %v511_v56 = vor.u32 %v509_v50, %v507_v45  ;;  %v925_v45 = vrot.slane %v10377_v47, 1 }
  0x33   : > { %8871 = vmatmul.msk.bf16.gmra.mxu1 %vm589_vm1, %v9869_v32  ;;  %v493_v32 = vshrl.u32 %v9873_v22, 16 }
  0x35   : > { %v495_v36 = vor.u32 %v493_v32, %v491_v28 }
  0x37   : > { %v500_v39 = vsel %vm440_vm3, %v495_v36, %v499_v37  ;;  %v525_v36 = vshrl.u32 %v9877_v3, 16 }
  0x38   : > { %8890 = vmatmul.msk.bf16.gmra.mxu2 %vm589_vm1, %v898_v57  ;;  %v515_v57 = vrot.slane %v513_v51, 1 }
  0x39   : > { %8853 = vmatmul.msk.bf16.gmra.mxu0 %vm589_vm1, %v468_v59  ;;  %v921_v59 = vrot.slane %v10348_v15, 1  ;;  %v527_v41 = vor.u32 %v525_v36, %v523_v17 }
  0x3a   : > { %8867 = vmatmul.msk.bf16.gmra.mxu3 %vm589_vm1, %v580_v60  ;;  %v910_v60 = vsel %vm891_vm2, %v907_v43, %v909_v55  ;;  %v519_v16 = vor.u32 %v517_v7, %v515_v57 }
  0x3b   : > { %v922_v2 = vsel %vm891_vm2, %v919_v58, %v921_v59 }
  0x3c   : > { %v524_v27 = vsel %vm440_vm3, %v519_v16, %v523_v17  ;;  %v1121_v16 = vld [vmem:[%s10337_s18 + $0x8] sm:$0xe]  ;;  %v10509_v17 = vld [vmem:[%s10337_s18 + $0xc] sm:$0xf] }
  0x43   : > { %8872 = vmatmul.msk.bf16.gmra.mxu1 %vm589_vm1, %v9870_v46  ;;  %v908_v46 = vsel %vm891_vm2, %v905_v35, %v907_v43 }
  0x48   : > { %8891 = vmatmul.msk.bf16.gmra.mxu2 %vm589_vm1, %v900_v9 }
  0x49   : > { %8854 = vmatmul.msk.bf16.gmra.mxu0 %vm589_vm1, %v476_v10 }
  0x4a   : > { %8868 = vmatmul.msk.bf16.gmra.mxu3 %vm589_vm1, %v588_v11  ;;  %v9031_v11 = vld [vmem:[%s14321_s1 + $0xc] sm:$0x3] }
  0x53   : > { %8873 = vmatmul.msk.bf16.gmra.mxu1 %vm589_vm1, %v9871_v62  ;;  %v516_v62 = vsel %vm440_vm3, %v511_v56, %v515_v57 }
  0x58   : > { %8892 = vmatmul.msk.bf16.gmra.mxu2 %vm589_vm1, %v902_v20  ;;  %v923_v20 = vrot.slane %v10364_v33, 1 }
  0x59   : > { %8855 = vmatmul.msk.bf16.gmra.mxu0 %vm589_vm1, %v484_v21  ;;  %v9012_v21 = vld [vmem:[%s14321_s1 + $0xa] sm:$0x3] }
  0x5a   : > { %8883 = vmatmul.msk.bf16.vlgmr.msrb.gmra.mxu3 %vm589_vm1, %v10345_v14  ;;  %v1950_v23 = vsel %vm644_vm0, %v9012_v21, 0  ;;  %v926_v53 = vsel %vm891_vm2, %v923_v20, %v925_v45  ;;  %v1197_v21 = vunpack.c.l.b16 %v1121_v16 }
  0x5b   : > { %1354 = vmatpush.bf16.msrb.mxu3 %v1345_v54  ;;  %1959 = vmatpush.bf16.msrb.mxu1 %v1950_v23  ;;  %v9879_v54 = vld [vmem:[%s10337_s18 + $0x60] sm:$0xff] }
  0x63   : > { %8874 = vmatmul.msk.bf16.gmra.mxu1 %vm589_vm1, %v9872_v12  ;;  %v2311_v12 = vsel %vm644_vm0, %v9031_v11, 0 }
  0x64   : > { %2320 = vmatpush.bf16.msrb.mxu2 %v2311_v12 }
  0x68   : > { %8893 = vmatmul.msk.bf16.gmra.mxu2 %vm589_vm1, %v904_v29 }
  0x69   : > { %8856 = vmatmul.msk.bf16.gmra.mxu0 %vm589_vm1, %v492_v30  ;;  %v9878_v30 = vld [vmem:[%s10337_s18 + $0x58] sm:$0xff] }
  0x6a   : > { %8884 = vmatmul.msk.bf16.gmra.mxu3 %vm589_vm1, %v10348_v15  ;;  %v529_v37 = vshll.u32 %v9878_v30, 16 }
  0x6c   : > { %v531_v42 = vrot.slane %v529_v37, 1 }
  0x6e   : > { %v532_v50 = vsel %vm440_vm3, %v527_v41, %v531_v42 }
  0x73   : > { %8875 = vmatmul.msk.bf16.gmra.mxu1 %vm589_vm1, %v9873_v22  ;;  %v912_v22 = vsel %vm891_vm2, %v909_v55, %v911_v13 }
  0x78   : > { %8894 = vmatmul.msk.bf16.gmra.mxu2 %vm589_vm1, %v906_v38 }
  0x79   : > { %8857 = vmatmul.msk.bf16.gmra.mxu0 %vm589_vm1, %v500_v39 }
  0x7a   : > { %8885 = vmatmul.msk.bf16.gmra.mxu3 %vm589_vm1, %v10364_v33  ;;  %v924_v33 = vsel %vm891_vm2, %v921_v59, %v923_v20  ;;  %v533_v59 = vshrl.u32 %v9878_v30, 16 }
  0x83   : > { %8876 = vmatmul.msk.bf16.gmra.mxu1 %vm589_vm1, %v9874_v31 }
  0x88   : > { %8895 = vmatmul.msk.bf16.gmra.mxu2 %vm589_vm1, %v908_v46 }
  0x89   : > { %8858 = vmatmul.msk.bf16.gmra.mxu0 %vm589_vm1, %v508_v48 }
  0x8a   : > { %8886 = vmatmul.msk.bf16.gmra.mxu3 %vm589_vm1, %v10377_v47 }
  0x90   : > { %v795_v52 = vpop.f32.mrf.mxu1 }
  0x93   : > { %8877 = vmatmul.msk.bf16.gmra.mxu1 %vm589_vm1, %v9875_v40  ;;  %v913_v40 = vrot.slane %v9878_v30, 1 }
  0x95   : > { %v914_v46 = vsel %vm891_vm2, %v911_v13, %v913_v40 }
  0x96   : > { %v657_v61 = vpop.f32.mrf.mxu0 }
  0x97   : > { %v796_v0 = vadd.f32 %v795_v52, %v657_v61 }
  0x98   : > { %v797_v1 = vpop.f32.mrf.mxu1  ;;  %8896 = vmatmul.msk.bf16.gmra.mxu2 %vm589_vm1, %v910_v60  ;;  %v537_v60 = vshll.u32 %v9879_v54, 16 }
  0x99   : > { %8859 = vmatmul.msk.bf16.gmra.mxu0 %vm589_vm1, %v516_v62 }
  0x9a   : > { %8902 = vmatmul.msk.bf16.vlgmr.msra.gmra.mxu3 %vm589_vm1, %v922_v2  ;;  %v539_v2 = vrot.slane %v537_v60, 1 }
  0x9b   : > { %v995_v4 = vpop.f32.mrf.mxu2 }
  0x9c   : > { %v10450_v15 = vadd.f32 %v995_v4, %v796_v0  ;;  %v915_v0 = vrot.slane %v9879_v54, 1 }
  0x9d   : > { %v10452_v6 = vpop.f32.mrf.mxu3 }
  0x9e   : > { %v659_v5 = vpop.f32.mrf.mxu0  ;;  %v916_v7 = vsel %vm891_vm2, %v913_v40, %v915_v0 }
  0x9f   : > { %v798_v9 = vadd.f32 %v797_v1, %v659_v5  ;;  %v535_v1 = vor.u32 %v533_v59, %v531_v42  ;;  %v927_v5 = vrot.slane %v10390_v63, 1  ;;  %v9880_v63 = vld [vmem:[%s10337_s18 + $0x68] sm:$0xff] }
  0xa0   : > { %v800_v10 = vpop.f32.mrf.mxu1  ;;  %v917_v37 = vrot.slane %v9880_v63, 1 }
  0xa1   : > { %v928_v13 = vsel %vm891_vm2, %v925_v45, %v927_v5  ;;  %v1851_v5 = vld [vmem:[%s10337_s18 + $0x8] sm:$0xc] }
  0xa2   : > { %v918_v45 = vsel %vm891_vm2, %v915_v0, %v917_v37 }
  0xa3   : > { %8878 = vmatmul.msk.bf16.gmra.mxu1 %vm589_vm1, %v9876_v49  ;;  %v997_v18 = vpop.f32.mrf.mxu2 }
  0xa4   : > { %v10459_v19 = vadd.f32 %v997_v18, %v798_v9 }
  0xa5   : > { %v10467_v25 = vpop.f32.mrf.mxu3 }
  0xa6   : > { %v662_v24 = vpop.f32.mrf.mxu0 }
  0xa7   : > { %v801_v28 = vadd.f32 %v800_v10, %v662_v24  ;;  %v540_v10 = vsel %vm440_vm3, %v535_v1, %v539_v2 }
  0xa8   : > { %v802_v29 = vpop.f32.mrf.mxu1  ;;  %8897 = vmatmul.msk.bf16.gmra.mxu2 %vm589_vm1, %v912_v22  ;;  %v1198_v22 = vunpack.c.l.b16 %v10509_v17 }
  0xa9   : > { %8860 = vmatmul.msk.bf16.gmra.mxu0 %vm589_vm1, %v524_v27  ;;  %v541_v27 = vshrl.u32 %v9879_v54, 16 }
  0xaa   : > { %8903 = vmatmul.msk.bf16.gmra.mxu3 %vm589_vm1, %v924_v33 }
  0xab   : > { %v1000_v31 = vpop.f32.mrf.mxu2 }
  0xac   : > { %v10475_v32 = vadd.f32 %v1000_v31, %v801_v28  ;;  %v545_v28 = vshll.u32 %v9880_v63, 16  ;;  %v10522_v31 = vld [vmem:[%s10337_s18 + $0x10] sm:$0xff] }
  0xad   : > { %v10477_v35 = vpop.f32.mrf.mxu3 }
  0xae   : > { %v664_v34 = vpop.f32.mrf.mxu0 }
  0xaf   : > { %v803_v38 = vadd.f32 %v802_v29, %v664_v34  ;;  %v10524_v34 = vpack.c.b16 %v1198_v22, %v1197_v21  ;;  %v10564_v21 = vld [vmem:[%s10337_s18 + $0x14] sm:$0xf] }
  0xb0   : > { %v805_v39 = vpop.f32.mrf.mxu1 }
  0xb1   : > { %v1253_v42 = vrot.slane %v10524_v34, 1 }
  0xb3   : > { %8879 = vmatmul.msk.bf16.gmra.mxu1 %vm589_vm1, %v9877_v3  ;;  %v1002_v43 = vpop.f32.mrf.mxu2 }
  0xb4   : > { %v10480_v44 = vadd.f32 %v1002_v43, %v803_v38  ;;  %v543_v38 = vor.u32 %v541_v27, %v539_v2  ;;  %v1254_v43 = vrot.slane %v10522_v31, 1 }
  0xb5   : > { %v10484_v49 = vpop.f32.mrf.mxu3 }
  0xb6   : > { %v667_v48 = vpop.f32.mrf.mxu0 }
  0xb7   : > { %v806_v51 = vadd.f32 %v805_v39, %v667_v48  ;;  %v547_v39 = vrot.slane %v545_v28, 1 }
  0xb8   : > { %v807_v52 = vpop.f32.mrf.mxu1  ;;  %8898 = vmatmul.msk.bf16.gmra.mxu2 %vm589_vm1, %v914_v46 }
  0xb9   : > { %8861 = vmatmul.msk.bf16.gmra.mxu0 %vm589_vm1, %v532_v50  ;;  %v548_v50 = vsel %vm440_vm3, %v543_v38, %v547_v39 }
  0xba   : > { %8904 = vmatmul.msk.bf16.gmra.mxu3 %vm589_vm1, %v926_v53  ;;  %v1255_v53 = vsel %vm891_vm2, %v1253_v42, %v1254_v43 }
  0xbb   : > { %v1005_v55 = vpop.f32.mrf.mxu2 }
  0xbc   : > { %v10492_v47 = vadd.f32 %v1005_v55, %v806_v51 }
  0xbd   : > { %v10494_v57 = vpop.f32.mrf.mxu3 }
  0xbe   : > { %v669_v56 = vpop.f32.mrf.mxu0 }
  0xbf   : > { %v808_v61 = vadd.f32 %v807_v52, %v669_v56 }
  0xc0   : > { %v810_v62 = vpop.f32.mrf.mxu1 }
  0xc3   : > { %8880 = vmatmul.msk.bf16.gmra.mxu1 %vm589_vm1, %v9878_v30  ;;  %v1007_v3 = vpop.f32.mrf.mxu2  ;;  %v9118_v30 = vld [vmem:[%s14321_s1 + $0xe] sm:$0x3] }
  0xc4   : > { %v10497_v4 = vadd.f32 %v1007_v3, %v808_v61  ;;  %v2680_v36 = vsel %vm644_vm0, %v9118_v30, 0  ;;  %v10550_v3 = vld [vmem:[%s10337_s18 + $0x18] sm:$0xff]  ;;  %v1498_v30 = vshrl.u32 %v10522_v31, 16 }
  0xc5   : > { %v10501_v9 = vpop.f32.mrf.mxu3  ;;  %2689 = vmatpush.bf16.msra.mxu3 %v2680_v36 }
  0xc6   : > { %v672_v8 = vpop.f32.mrf.mxu0 }
  0xc7   : > { %v811_v11 = vadd.f32 %v810_v62, %v672_v8  ;;  %v549_v62 = vshrl.u32 %v9880_v63, 16 }
  0xc8   : > { %v812_v12 = vpop.f32.mrf.mxu1  ;;  %8899 = vmatmul.msk.bf16.gmra.mxu2 %vm589_vm1, %v916_v7 }
  0xc9   : > { %8862 = vmatmul.msk.bf16.gmra.mxu0 %vm589_vm1, %v540_v10  ;;  %v551_v7 = vor.u32 %v549_v62, %v547_v39  ;;  %v1855_v10 = vunpack.c.l.b16 %v1851_v5  ;;  %v9902_v39 = vld [vmem:[%s10337_s18 + $0x18] sm:$0xff] }
  0xca   : > { %8905 = vmatmul.msk.bf16.gmra.mxu3 %vm589_vm1, %v928_v13  ;;  %v920_v13 = vsel %vm891_vm2, %v917_v37, %v919_v58  ;;  %v1859_v37 = vrot.slane %v10522_v31, 2 }
  0xcb   : > { %v1010_v18 = vpop.f32.mrf.mxu2  ;;  %v556_v17 = vsel %vm440_vm3, %v551_v7, %v10353_v26  ;;  %v1856_v28 = vpack.c.b16 %v1198_v22, %v1855_v10  ;;  %v1490_v26 = vshrl.u32 %v10524_v34, 16 }
  0xcc   : > { %v10513_v20 = vadd.f32 %v1010_v18, %v811_v11  ;;  %v2087_v18 = vld [vmem:[%s10337_s18 + $0x10] sm:$0xc] }
  0xcd   : > { %v10516_v24 = vpop.f32.mrf.mxu3  ;;  %v2163_v58 = vunpack.c.l.b16 %v2087_v18  ;;  %v1858_v22 = vrot.slane %v1856_v28, 2  ;;  %v1510_v18 = vshll.u32 %v10550_v3, 16 }
  0xce   : > { %v674_v23 = vpop.f32.mrf.mxu0 }
  0xcf   : > { %v813_v29 = vadd.f32 %v812_v12, %v674_v23  ;;  %v1256_v12 = vrot.slane %v10550_v3, 1 }
  0xd0   : > { %v815_v33 = vpop.f32.mrf.mxu1 }
  0xd1   : > { %v1257_v14 = vsel %vm891_vm2, %v1254_v43, %v1256_v12  ;;  %v1492_v43 = vrot.slane %v1490_v26, 1 }
  0xd3   : > { %8881 = vmatmul.msk.bf16.gmra.mxu1 %vm589_vm1, %v9879_v54  ;;  %v1012_v40 = vpop.f32.mrf.mxu2  ;;  %v9137_v54 = vld [vmem:[%s14321_s1 + $0x10] sm:$0x3] }
  0xd4   : > { %v10528_v41 = vadd.f32 %v1012_v40, %v813_v29  ;;  %v2916_v55 = vsel %vm644_vm0, %v9137_v54, 0  ;;  %v14329_v29 = vunpack.c.l.b16 %v10564_v21  ;;  %v10591_v54 = vld [vmem:[%s10337_s18 + $0x20] sm:$0xff] }
  0xd5   : > { %v10533_v48 = vpop.f32.mrf.mxu3  ;;  %2925 = vmatpush.bf16.msra.mxu0 %v2916_v55 }
  0xd6   : > { %v677_v46 = vpop.f32.mrf.mxu0  ;;  %v10584_v40 = vpack.c.b16 %v14329_v29, %v2163_v58 }
  0xd7   : > { %v816_v51 = vadd.f32 %v815_v33, %v677_v46  ;;  %v1493_v33 = vshll.u32 %v10524_v34, 16  ;;  %v1500_v46 = vrot.slane %v1498_v30, 1 }
  0xd8   : > { %v817_v52 = vpop.f32.mrf.mxu1  ;;  %8900 = vmatmul.msk.bf16.gmra.mxu2 %vm589_vm1, %v918_v45  ;;  %v2219_v55 = vrot.slane %v10584_v40, 2 }
  0xd9   : > { %8863 = vmatmul.msk.bf16.gmra.mxu0 %vm589_vm1, %v548_v50  ;;  %v1495_v45 = vrot.slane %v1493_v33, 2  ;;  %v1512_v33 = vrot.slane %v1510_v18, 2 }
  0xda   : > { %8975 = vmatmul.msk.bf16.vlgmr.msrb.gmra.mxu3 %vm589_vm1, %v1255_v53 }
  0xdb   : > { %v1015_v56 = vpop.f32.mrf.mxu2 }
  0xdc   : > { %v10544_v59 = vadd.f32 %v1015_v56, %v816_v51  ;;  %v2220_v56 = vrot.slane %v9902_v39, 2 }
  0xdd   : > { %v865_v61 = vpop.f32.mrf.mxu3 }
  0xde   : > { %v679_v60 = vpop.f32.mrf.mxu0  ;;  %v10547_v1 = vadd.f32 %v865_v61, %v10452_v6 }
  0xdf   : > { %v818_v0 = vadd.f32 %v817_v52, %v679_v60  ;;  %v1496_v60 = vor.u32 %v1495_v45, %v1492_v43 }
  0xe0   : > { %v820_v2 = vpop.f32.mrf.mxu1 }
  0xe3   : > { %8882 = vmatmul.msk.bf16.gmra.mxu1 %vm589_vm1, %v9880_v63  ;;  %v1017_v8 = vpop.f32.mrf.mxu2 }
  0xe4   : > { %v10554_v11 = vadd.f32 %v1017_v8, %v818_v0 }
  0xe5   : > { %v867_v6 = vpop.f32.mrf.mxu3 }
  0xe6   : > { %v682_v16 = vpop.f32.mrf.mxu0  ;;  %v10567_v23 = vadd.f32 %v867_v6, %v10467_v25  ;;  %v1501_v25 = vshll.u32 %v10522_v31, 16  ;;  %v1860_v31 = vsel %vm14336_vm4, %v1858_v22, %v1859_v37  ;;  %v10618_v22 = vld [vmem:[%s10337_s18 + $0x28] sm:$0xff] }
  0xe7   : > { %v821_v63 = vadd.f32 %v820_v2, %v682_v16  ;;  %v1258_v2 = vrot.slane %v10591_v54, 1  ;;  %v1260_v43 = vrot.slane %v10618_v22, 1 }
  0xe8   : > { %v822_v27 = vpop.f32.mrf.mxu1  ;;  %8901 = vmatmul.msk.bf16.gmra.mxu2 %vm589_vm1, %v920_v13  ;;  %v1503_v50 = vrot.slane %v1501_v25, 2 }
  0xe9   : > { %8864 = vmatmul.msk.bf16.gmra.mxu0 %vm589_vm1, %v556_v17  ;;  %v1259_v6 = vsel %vm891_vm2, %v1256_v12, %v1258_v2  ;;  %v1507_v17 = vshrl.u32 %v10550_v3, 16 }
  0xea   : > { %8976 = vmatmul.msk.bf16.gmra.mxu3 %vm589_vm1, %v1257_v14  ;;  %v1504_v61 = vor.u32 %v1503_v50, %v1500_v46 }
  0xeb   : > { %v1020_v36 = vpop.f32.mrf.mxu2  ;;  %v1509_v26 = vrot.slane %v1507_v17, 1  ;;  %v10644_v17 = vld [vmem:[%s10337_s18 + $0x30] sm:$0xff] }
  0xec   : > { %v10579_v38 = vadd.f32 %v1020_v36, %v821_v63  ;;  %v1505_v8 = vsel %vm1488_vm5, %v1496_v60, %v1504_v61 }
  0xed   : > { %v870_v42 = vpop.f32.mrf.mxu3 }
  0xee   : > { %v684_v34 = vpop.f32.mrf.mxu0  ;;  %v10587_v52 = vadd.f32 %v870_v42, %v10477_v35  ;;  %v2221_v35 = vsel %vm14336_vm4, %v2219_v55, %v2220_v56  ;;  %v1516_v55 = vshrl.u32 %v10591_v54, 16 }
  0xef   : > { %v823_v51 = vadd.f32 %v822_v27, %v684_v34  ;;  %v1861_v27 = vrot.slane %v10550_v3, 2  ;;  %v1513_v3 = vor.u32 %v1512_v33, %v1509_v26 }
  0xf0   : > { %v825_v53 = vpop.f32.mrf.mxu1 }
  0xf1   : > { %v1862_v36 = vsel %vm14336_vm4, %v1859_v37, %v1861_v27  ;;  %v1514_v50 = vsel %vm1488_vm5, %v1504_v61, %v1513_v3  ;;  %v1863_v61 = vrot.slane %v10591_v54, 2 }
  0xf3   : > { %9013 = vmatmul.msk.bf16.vlgmr.msrb.gmra.mxu1 %vm589_vm1, %v1860_v31  ;;  %v1022_v62 = vpop.f32.mrf.mxu2  ;;  %v1261_v31 = vsel %vm891_vm2, %v1258_v2, %v1260_v43 }
  0xf4   : > { %v10595_v0 = vadd.f32 %v1022_v62, %v823_v51 }
  0xf5   : > { %v872_v7 = vpop.f32.mrf.mxu3 }
  0xf6   : > { %v687_v5 = vpop.f32.mrf.mxu0  ;;  %v10601_v13 = vadd.f32 %v872_v7, %v10484_v49  ;;  %v9903_v49 = vld [vmem:[%s10337_s18 + $0x20] sm:$0xff]  ;;  %v1518_v7 = vrot.slane %v1516_v55, 1 }
  0xf7   : > { %v826_v10 = vadd.f32 %v825_v53, %v687_v5  ;;  %v2222_v39 = vrot.slane %v9903_v49, 2 }
  0xf8   : > { %v827_v16 = vpop.f32.mrf.mxu1  ;;  %9100 = vmatmul.msk.bf16.vlgmr.msrb.gmra.mxu2 %vm589_vm1, %v2221_v35 }
  0xf9   : > { %8994 = vmatmul.msk.bf16.vlgmr.msrb.gmra.mxu0 %vm589_vm1, %v1505_v8  ;;  %v2223_v45 = vsel %vm14336_vm4, %v2220_v56, %v2222_v39  ;;  %v1519_v56 = vshll.u32 %v10591_v54, 16 }
  0xfa   : > { %8977 = vmatmul.msk.bf16.gmra.mxu3 %vm589_vm1, %v1259_v6  ;;  %v1864_v6 = vsel %vm14336_vm4, %v1861_v27, %v1863_v61 }
  0xfb   : > { %v1025_v63 = vpop.f32.mrf.mxu2  ;;  %v1521_v8 = vrot.slane %v1519_v56, 2 }
  0xfc   : > { %v10610_v28 = vadd.f32 %v1025_v63, %v826_v10 }
  0xfd   : > { %v875_v58 = vpop.f32.mrf.mxu3  ;;  %v1522_v54 = vor.u32 %v1521_v8, %v1518_v7 }
  0xfe   : > { %v689_v14 = vpop.f32.mrf.mxu0  ;;  %v10614_v30 = vadd.f32 %v875_v58, %v10494_v57 }
  0xff   : > { %v828_v12 = vadd.f32 %v827_v16, %v689_v14  ;;  %v1262_v14 = vrot.slane %v10644_v17, 1  ;;  %v1523_v33 = vsel %vm1488_vm5, %v1513_v3, %v1522_v54  ;;  %v1865_v3 = vrot.slane %v10618_v22, 2 }
 0x100   : > { %v830_v25 = vpop.f32.mrf.mxu1 }
 0x101   : > { %v1866_v56 = vsel %vm14336_vm4, %v1863_v61, %v1865_v3 }
 0x103   : > { %9014 = vmatmul.msk.bf16.gmra.mxu1 %vm589_vm1, %v1862_v36  ;;  %v1027_v34 = vpop.f32.mrf.mxu2  ;;  %v1263_v36 = vsel %vm891_vm2, %v1260_v43, %v1262_v14 }
 0x104   : > { %v10621_v42 = vadd.f32 %v1027_v34, %v828_v12  ;;  %v1525_v34 = vshrl.u32 %v10618_v22, 16 }
 0x105   : > { %v877_v57 = vpop.f32.mrf.mxu3 }
 0x106   : > { %v692_v46 = vpop.f32.mrf.mxu0  ;;  %v10627_v37 = vadd.f32 %v877_v57, %v10501_v9  ;;  %v9904_v9 = vld [vmem:[%s10337_s18 + $0x28] sm:$0xff] }
 0x107   : > { %v831_v51 = vadd.f32 %v830_v25, %v692_v46  ;;  %v2224_v18 = vrot.slane %v9904_v9, 2 }
 0x108   : > { %v832_v53 = vpop.f32.mrf.mxu1  ;;  %9101 = vmatmul.msk.bf16.gmra.mxu2 %vm589_vm1, %v2223_v45 }
 0x109   : > { %8995 = vmatmul.msk.bf16.gmra.mxu0 %vm589_vm1, %v1514_v50  ;;  %v2225_v58 = vsel %vm14336_vm4, %v2222_v39, %v2224_v18  ;;  %v1528_v39 = vshll.u32 %v10618_v22, 16 }
 0x10a   : > { %8978 = vmatmul.msk.bf16.gmra.mxu3 %vm589_vm1, %v1261_v31 }
 0x10b   : > { %v1030_v60 = vpop.f32.mrf.mxu2 }
 0x10c   : > { %v10636_v62 = vadd.f32 %v1030_v60, %v831_v51  ;;  %v1527_v51 = vrot.slane %v1525_v34, 1  ;;  %v10670_v60 = vld [vmem:[%s10337_s18 + $0x38] sm:$0xff] }
 0x10d   : > { %v880_v5 = vpop.f32.mrf.mxu3  ;;  %v1264_v7 = vrot.slane %v10670_v60, 1 }
 0x10e   : > { %v694_v35 = vpop.f32.mrf.mxu0  ;;  %v10640_v10 = vadd.f32 %v880_v5, %v10516_v24 }
 0x10f   : > { %v833_v2 = vadd.f32 %v832_v53, %v694_v35  ;;  %v1530_v53 = vrot.slane %v1528_v39, 2 }
 0x110   : > { %v835_v16 = vpop.f32.mrf.mxu1 }
 0x111   : > { %v1531_v22 = vor.u32 %v1530_v53, %v1527_v51 }
 0x113   : > { %9015 = vmatmul.msk.bf16.gmra.mxu1 %vm589_vm1, %v1864_v6  ;;  %v1032_v63 = vpop.f32.mrf.mxu2 }
 0x114   : > { %v10647_v49 = vadd.f32 %v1032_v63, %v833_v2 }
 0x115   : > { %v882_v24 = vpop.f32.mrf.mxu3 }
 0x116   : > { %v697_v26 = vpop.f32.mrf.mxu0  ;;  %v10653_v27 = vadd.f32 %v882_v24, %v10533_v48  ;;  %v9905_v48 = vld [vmem:[%s10337_s18 + $0x30] sm:$0xff] }
 0x117   : > { %v836_v12 = vadd.f32 %v835_v16, %v697_v26  ;;  %v2226_v9 = vrot.slane %v9905_v48, 2  ;;  %v1532_v16 = vsel %vm1488_vm5, %v1522_v54, %v1531_v22  ;;  %v1534_v26 = vshrl.u32 %v10644_v17, 16 }
 0x118   : > { %v837_v25 = vpop.f32.mrf.mxu1  ;;  %9102 = vmatmul.msk.bf16.gmra.mxu2 %vm589_vm1, %v2225_v58  ;;  %v1265_v58 = vsel %vm891_vm2, %v1262_v14, %v1264_v7  ;;  %v1867_v54 = vrot.slane %v10644_v17, 2 }
 0x119   : > { %8996 = vmatmul.msk.bf16.gmra.mxu0 %vm589_vm1, %v1523_v33  ;;  %v2227_v8 = vsel %vm14336_vm4, %v2224_v18, %v2226_v9  ;;  %v1537_v18 = vshll.u32 %v10644_v17, 16 }
 0x11a   : > { %8979 = vmatmul.msk.bf16.gmra.mxu3 %vm589_vm1, %v1263_v36  ;;  %v1536_v36 = vrot.slane %v1534_v26, 1  ;;  %v1868_v48 = vsel %vm14336_vm4, %v1865_v3, %v1867_v54 }
 0x11b   : > { %v1035_v45 = vpop.f32.mrf.mxu2  ;;  %v1539_v34 = vrot.slane %v1537_v18, 2 }
 0x11c   : > { %v10662_v46 = vadd.f32 %v1035_v45, %v836_v12 }
 0x11d   : > { %v1065_v50 = vpop.f32.mrf.mxu3  ;;  %v1540_v17 = vor.u32 %v1539_v34, %v1536_v36  ;;  %v10722_v36 = vld [vmem:[%s10337_s18 + $0x48] sm:$0xff] }
 0x11e   : > { %v699_v57 = vpop.f32.mrf.mxu0  ;;  %v10666_v31 = vadd.f32 %v1065_v50, %v10547_v1 }
 0x11f   : > { %v838_v43 = vadd.f32 %v837_v25, %v699_v57  ;;  %v10696_v57 = vld [vmem:[%s10337_s18 + $0x40] sm:$0xff] }
 0x120   : > { %v840_v55 = vpop.f32.mrf.mxu1 }
 0x123   : > { %9016 = vmatmul.msk.bf16.gmra.mxu1 %vm589_vm1, %v1866_v56  ;;  %v1037_v35 = vpop.f32.mrf.mxu2 }
 0x124   : > { %v10673_v5 = vadd.f32 %v1037_v35, %v838_v43  ;;  %v1266_v43 = vrot.slane %v10696_v57, 1  ;;  %v1541_v35 = vsel %vm1488_vm5, %v1531_v22, %v1540_v17  ;;  %v1869_v22 = vrot.slane %v10670_v60, 2 }
 0x125   : > { %v1067_v1 = vpop.f32.mrf.mxu3 }
 0x126   : > { %v702_v2 = vpop.f32.mrf.mxu0  ;;  %v10679_v61 = vadd.f32 %v1067_v1, %v10567_v23  ;;  %v9906_v23 = vld [vmem:[%s10337_s18 + $0x38] sm:$0xff]  ;;  %v1267_v1 = vsel %vm891_vm2, %v1264_v7, %v1266_v43 }
 0x127   : > { %v841_v6 = vadd.f32 %v840_v55, %v702_v2  ;;  %v2228_v50 = vrot.slane %v9906_v23, 2 }
 0x128   : > { %v842_v63 = vpop.f32.mrf.mxu1  ;;  %9103 = vmatmul.msk.bf16.gmra.mxu2 %vm589_vm1, %v2227_v8 }
 0x129   : > { %8997 = vmatmul.msk.bf16.gmra.mxu0 %vm589_vm1, %v1532_v16  ;;  %v2229_v55 = vsel %vm14336_vm4, %v2226_v9, %v2228_v50  ;;  %v1543_v16 = vshrl.u32 %v10670_v60, 16  ;;  %v1546_v9 = vshll.u32 %v10670_v60, 16 }
 0x12a   : > { %8980 = vmatmul.msk.bf16.gmra.mxu3 %vm589_vm1, %v1265_v58 }
 0x12b   : > { %v1040_v24 = vpop.f32.mrf.mxu2  ;;  %v1545_v18 = vrot.slane %v1543_v16, 1 }
 0x12c   : > { %v10688_v33 = vadd.f32 %v1040_v24, %v841_v6  ;;  %v1548_v24 = vrot.slane %v1546_v9, 2 }
 0x12d   : > { %v1070_v25 = vpop.f32.mrf.mxu3 }
 0x12e   : > { %v704_v12 = vpop.f32.mrf.mxu0  ;;  %v10692_v39 = vadd.f32 %v1070_v25, %v10587_v52  ;;  %v1870_v25 = vsel %vm14336_vm4, %v1867_v54, %v1869_v22  ;;  %v1549_v60 = vor.u32 %v1548_v24, %v1545_v18 }
 0x12f   : > { %v843_v14 = vadd.f32 %v842_v63, %v704_v12 }
 0x130   : > { %v845_v45 = vpop.f32.mrf.mxu1 }
 0x133   : > { %9017 = vmatmul.msk.bf16.gmra.mxu1 %vm589_vm1, %v1868_v48  ;;  %v1042_v51 = vpop.f32.mrf.mxu2  ;;  %v1268_v48 = vrot.slane %v10722_v36, 1 }
 0x134   : > { %v10699_v53 = vadd.f32 %v1042_v51, %v843_v14 }
 0x135   : > { %v1072_v52 = vpop.f32.mrf.mxu3 }
 0x136   : > { %v707_v56 = vpop.f32.mrf.mxu0  ;;  %v10705_v3 = vadd.f32 %v1072_v52, %v10601_v13  ;;  %v9907_v13 = vld [vmem:[%s10337_s18 + $0x40] sm:$0xff] }
 0x137   : > { %v846_v8 = vadd.f32 %v845_v45, %v707_v56  ;;  %v2230_v34 = vrot.slane %v9907_v13, 2  ;;  %v1550_v56 = vsel %vm1488_vm5, %v1540_v17, %v1549_v60  ;;  %v1871_v17 = vrot.slane %v10696_v57, 2 }
 0x138   : > { %v847_v2 = vpop.f32.mrf.mxu1  ;;  %9104 = vmatmul.msk.bf16.gmra.mxu2 %vm589_vm1, %v2229_v55 }
 0x139   : > { %8998 = vmatmul.msk.bf16.gmra.mxu0 %vm589_vm1, %v1541_v35  ;;  %v2231_v51 = vsel %vm14336_vm4, %v2228_v50, %v2230_v34  ;;  %v1555_v50 = vshll.u32 %v10696_v57, 16  ;;  %v1872_v24 = vsel %vm14336_vm4, %v1869_v22, %v1871_v17 }
 0x13a   : > { %8981 = vmatmul.msk.bf16.gmra.mxu3 %vm589_vm1, %v1267_v1 }
 0x13b   : > { %v1045_v6 = vpop.f32.mrf.mxu2 }
 0x13c   : > { %v10714_v63 = vadd.f32 %v1045_v6, %v846_v8  ;;  %v1269_v8 = vsel %vm891_vm2, %v1266_v43, %v1268_v48 }
 0x13d   : > { %v1075_v26 = vpop.f32.mrf.mxu3 }
 0x13e   : > { %v709_v58 = vpop.f32.mrf.mxu0  ;;  %v10718_v23 = vadd.f32 %v1075_v26, %v10614_v30 }
 0x13f   : > { %v848_v7 = vadd.f32 %v847_v2, %v709_v58  ;;  %v1552_v2 = vshrl.u32 %v10696_v57, 16  ;;  %v1557_v58 = vrot.slane %v1555_v50, 2 }
 0x140   : > { %v850_v12 = vpop.f32.mrf.mxu1 }
 0x141   : > { %v1554_v13 = vrot.slane %v1552_v2, 1  ;;  %v1561_v2 = vshrl.u32 %v10722_v36, 16 }
 0x143   : > { %9018 = vmatmul.msk.bf16.gmra.mxu1 %vm589_vm1, %v1870_v25  ;;  %v1047_v14 = vpop.f32.mrf.mxu2  ;;  %v1558_v57 = vor.u32 %v1557_v58, %v1554_v13 }
 0x144   : > { %v10725_v45 = vadd.f32 %v1047_v14, %v848_v7  ;;  %v10748_v7 = vld [vmem:[%s10337_s18 + $0x50] sm:$0xff] }
 0x145   : > { %v1077_v30 = vpop.f32.mrf.mxu3 }
 0x146   : > { %v712_v55 = vpop.f32.mrf.mxu0  ;;  %v10731_v54 = vadd.f32 %v1077_v30, %v10627_v37  ;;  %v9908_v37 = vld [vmem:[%s10337_s18 + $0x48] sm:$0xff] }
 0x147   : > { %v851_v52 = vadd.f32 %v850_v12, %v712_v55  ;;  %v2232_v12 = vrot.slane %v9908_v37, 2 }
 0x148   : > { %v852_v35 = vpop.f32.mrf.mxu1  ;;  %9105 = vmatmul.msk.bf16.gmra.mxu2 %vm589_vm1, %v2231_v51  ;;  %v1270_v51 = vrot.slane %v10748_v7, 1 }
 0x149   : > { %8999 = vmatmul.msk.bf16.gmra.mxu0 %vm589_vm1, %v1550_v56  ;;  %v2233_v55 = vsel %vm14336_vm4, %v2230_v34, %v2232_v12  ;;  %v1559_v56 = vsel %vm1488_vm5, %v1549_v60, %v1558_v57  ;;  %v1564_v34 = vshll.u32 %v10722_v36, 16  ;;  %v1873_v60 = vrot.slane %v10722_v36, 2 }
 0x14a   : > { %8982 = vmatmul.msk.bf16.gmra.mxu3 %vm589_vm1, %v1269_v8  ;;  %v1271_v8 = vsel %vm891_vm2, %v1268_v48, %v1270_v51 }
 0x14b   : > { %v1050_v1 = vpop.f32.mrf.mxu2  ;;  %v1566_v13 = vrot.slane %v1564_v34, 2 }
 0x14c   : > { %v10740_v16 = vadd.f32 %v1050_v1, %v851_v52 }
 0x14d   : > { %v1080_v6 = vpop.f32.mrf.mxu3 }
 0x14e   : > { %v714_v9 = vpop.f32.mrf.mxu0  ;;  %v10744_v26 = vadd.f32 %v1080_v6, %v10640_v10  ;;  %v1563_v6 = vrot.slane %v1561_v2, 1 }
 0x14f   : > { %v853_v43 = vadd.f32 %v852_v35, %v714_v9 }
 0x150   : > { %v855_v18 = vpop.f32.mrf.mxu1 }
 0x153   : > { %9019 = vmatmul.msk.bf16.gmra.mxu1 %vm589_vm1, %v1872_v24  ;;  %v1052_v25 = vpop.f32.mrf.mxu2  ;;  %v10772_v24 = vld [vmem:[%s10337_s18 + $0x58] sm:$0xff] }
 0x154   : > { %v10751_v14 = vadd.f32 %v1052_v25, %v853_v43 }
 0x155   : > { %v1082_v10 = vpop.f32.mrf.mxu3 }
 0x156   : > { %v717_v30 = vpop.f32.mrf.mxu0  ;;  %v10757_v22 = vadd.f32 %v1082_v10, %v10653_v27  ;;  %v9909_v27 = vld [vmem:[%s10337_s18 + $0x50] sm:$0xff]  ;;  %v1272_v10 = vrot.slane %v10772_v24, 1 }
 0x157   : > { %v856_v52 = vadd.f32 %v855_v18, %v717_v30  ;;  %v1874_v18 = vsel %vm14336_vm4, %v1871_v17, %v1873_v60  ;;  %v2234_v25 = vrot.slane %v9909_v27, 2 }
 0x158   : > { %v857_v35 = vpop.f32.mrf.mxu1  ;;  %9106 = vmatmul.msk.bf16.gmra.mxu2 %vm589_vm1, %v2233_v55  ;;  %v1567_v55 = vor.u32 %v1566_v13, %v1563_v6  ;;  %v1273_v34 = vsel %vm891_vm2, %v1270_v51, %v1272_v10 }
 0x159   : > { %9000 = vmatmul.msk.bf16.gmra.mxu0 %vm589_vm1, %v1559_v56  ;;  %v2235_v56 = vsel %vm14336_vm4, %v2232_v12, %v2234_v25  ;;  %v1573_v12 = vshll.u32 %v10748_v7, 16 }
 0x15a   : > { %8983 = vmatmul.msk.bf16.gmra.mxu3 %vm589_vm1, %v1271_v8 }
 0x15b   : > { %v1055_v50 = vpop.f32.mrf.mxu2 }
 0x15c   : > { %v10766_v1 = vadd.f32 %v1055_v50, %v856_v52  ;;  %v1570_v50 = vshrl.u32 %v10748_v7, 16 }
 0x15d   : > { %v1356_v9 = vpop.f32.mrf.mxu3 }
 0x15e   : > { %v719_v37 = vpop.f32.mrf.mxu0  ;;  %v1446_v58 = vadd.f32 %v1356_v9, %v10450_v15  ;;  %v1568_v15 = vsel %vm1488_vm5, %v1558_v57, %v1567_v55  ;;  %v1875_v57 = vrot.slane %v10748_v7, 2  ;;  %v1572_v13 = vrot.slane %v1570_v50, 1 }
 0x15f   : > { %v858_v48 = vadd.f32 %v857_v35, %v719_v37 }
 0x160   : > { %v860_v43 = vpop.f32.mrf.mxu1 }
 0x163   : > { %9020 = vmatmul.msk.bf16.gmra.mxu1 %vm589_vm1, %v1874_v18  ;;  %v1057_v36 = vpop.f32.mrf.mxu2 }
 0x164   : > { %v10775_v30 = vadd.f32 %v1057_v36, %v858_v48  ;;  %v1575_v48 = vrot.slane %v1573_v12, 2  ;;  %v1876_v36 = vsel %vm14336_vm4, %v1873_v60, %v1875_v57 }
 0x165   : > { %v1358_v35 = vpop.f32.mrf.mxu3 }
 0x166   : > { %v722_v52 = vpop.f32.mrf.mxu0  ;;  %v1447_v17 = vadd.f32 %v1358_v35, %v10459_v19  ;;  %v9910_v19 = vld [vmem:[%s10337_s18 + $0x58] sm:$0xff]  ;;  %v1576_v35 = vor.u32 %v1575_v48, %v1572_v13 }
 0x167   : > { %v861_v8 = vadd.f32 %v860_v43, %v722_v52  ;;  %v2236_v52 = vrot.slane %v9910_v19, 2 }
 0x168   : > { %v862_v2 = vpop.f32.mrf.mxu1  ;;  %9107 = vmatmul.msk.bf16.gmra.mxu2 %vm589_vm1, %v2235_v56  ;;  %v10794_v56 = vld [vmem:[%s10337_s18 + $0x60] sm:$0xff] }
 0x169   : > { %9001 = vmatmul.msk.bf16.gmra.mxu0 %vm589_vm1, %v1568_v15 }
 0x16a   : > { %8984 = vmatmul.msk.bf16.gmra.mxu3 %vm589_vm1, %v1273_v34  ;;  %v2237_v34 = vsel %vm14336_vm4, %v2234_v25, %v2236_v52  ;;  %v1582_v25 = vshll.u32 %v10772_v24, 16 }
 0x16b   : > { %v1060_v27 = vpop.f32.mrf.mxu2 }
 0x16c   : > { %v10788_v37 = vadd.f32 %v1060_v27, %v861_v8  ;;  %v1274_v8 = vrot.slane %v10794_v56, 1 }
 0x16d   : > { %v1361_v6 = vpop.f32.mrf.mxu3 }
 0x16e   : > { %v724_v9 = vpop.f32.mrf.mxu0  ;;  %v1448_v43 = vadd.f32 %v1361_v6, %v10475_v32  ;;  %v1577_v32 = vsel %vm1488_vm5, %v1567_v55, %v1576_v35  ;;  %v1275_v19 = vsel %vm891_vm2, %v1272_v10, %v1274_v8  ;;  %v1579_v6 = vshrl.u32 %v10772_v24, 16 }
 0x16f   : > { %v863_v51 = vadd.f32 %v862_v2, %v724_v9  ;;  %v1877_v55 = vrot.slane %v10772_v24, 2  ;;  %v1584_v10 = vrot.slane %v1582_v25, 2 }
 0x170   : > { %v1961_v18 = vpop.f32.mrf.mxu1 }
 0x173   : > { %9021 = vmatmul.msk.bf16.gmra.mxu1 %vm589_vm1, %v1876_v36  ;;  %v1062_v7 = vpop.f32.mrf.mxu2  ;;  %v1581_v36 = vrot.slane %v1579_v6, 1 }
 0x174   : > { %v10797_v15 = vadd.f32 %v1062_v7, %v863_v51 }
 0x175   : > { %v1363_v50 = vpop.f32.mrf.mxu3 }
 0x176   : > { %v1725_v2 = vpop.f32.mrf.mxu0  ;;  %v1449_v60 = vadd.f32 %v1363_v50, %v10480_v44  ;;  %v1878_v50 = vsel %vm14336_vm4, %v1875_v57, %v1877_v55 }
 0x177   : > { %v1815_v12 = vadd.f32 %v1725_v2, %v1446_v58  ;;  %v9911_v58 = vld [vmem:[%s10337_s18 + $0x60] sm:$0xff]  ;;  %v9969_v2 = vld [vmem:[%s14322_s2 + $0x78] sm:$0xff] }
 0x178   : > { %v1963_v27 = vpop.f32.mrf.mxu1  ;;  %9108 = vmatmul.msk.bf16.gmra.mxu2 %vm589_vm1, %v2237_v34 }
 0x179   : > { %9002 = vmatmul.msk.bf16.gmra.mxu0 %vm589_vm1, %v1577_v32  ;;  %v2051_v9 = vadd.f32 %v1961_v18, %v1815_v12  ;;  %v10819_v32 = vld [vmem:[%s10337_s18 + $0x68] sm:$0xff]  ;;  %v2238_v12 = vrot.slane %v9911_v58, 2  ;;  %5901 = vmatpush.bf16.msra.mxu2 %v9969_v2 }
 0x17a   : > { %8985 = vmatmul.msk.bf16.gmra.mxu3 %vm589_vm1, %v1275_v19  ;;  %v1585_v19 = vor.u32 %v1584_v10, %v1581_v36 }
 0x17b   : > { %v2322_v13 = vpop.f32.mrf.mxu2  ;;  %v2239_v57 = vsel %vm14336_vm4, %v2236_v52, %v2238_v12  ;;  %v1588_v52 = vshrl.u32 %v10794_v56, 16 }
 0x17c   : > { %v10810_v44 = vadd.f32 %v2322_v13, %v2051_v9  ;;  %v1586_v58 = vsel %vm1488_vm5, %v1576_v35, %v1585_v19  ;;  %v1879_v35 = vrot.slane %v10794_v56, 2 }
 0x17d   : > { %v1366_v48 = vpop.f32.mrf.mxu3 }
 0x17e   : > { %v1727_v51 = vpop.f32.mrf.mxu0  ;;  %v1450_v7 = vadd.f32 %v1366_v48, %v10492_v47  ;;  %v1276_v47 = vrot.slane %v10819_v32, 1 }
 0x17f   : > { %v1816_v18 = vadd.f32 %v1727_v51, %v1447_v17  ;;  %v5104_v17 = vld [vmem:[%s14323_s3] sm:$0x3] }
 0x180   : > { %v1966_v34 = vpop.f32.mrf.mxu1  ;;  %v5423_v25 = vsel %vm644_vm0, %v5104_v17, 0  ;;  %v1277_v10 = vsel %vm891_vm2, %v1274_v8, %v1276_v47  ;;  %v1590_v17 = vrot.slane %v1588_v52, 1 }
 0x181   : > { %v2052_v24 = vadd.f32 %v1963_v27, %v1816_v18  ;;  %5432 = vmatpush.bf16.msra.mxu1 %v5423_v25 }
 0x183   : > { %9022 = vmatmul.msk.bf16.gmra.mxu1 %vm589_vm1, %v1878_v50  ;;  %v2324_v9 = vpop.f32.mrf.mxu2  ;;  %v1591_v50 = vshll.u32 %v10794_v56, 16 }
 0x184   : > { %v10822_v6 = vadd.f32 %v2324_v9, %v2052_v24 }
 0x185   : > { %v1368_v13 = vpop.f32.mrf.mxu3  ;;  %v1593_v8 = vrot.slane %v1591_v50, 2 }
 0x186   : > { %v1730_v27 = vpop.f32.mrf.mxu0  ;;  %v1451_v48 = vadd.f32 %v1368_v13, %v10497_v4  ;;  %v1880_v13 = vsel %vm14336_vm4, %v1877_v55, %v1879_v35 }
 0x187   : > { %v1817_v51 = vadd.f32 %v1730_v27, %v1448_v43  ;;  %v9912_v43 = vld [vmem:[%s10337_s18 + $0x68] sm:$0xff]  ;;  %v10845_v27 = vld [vmem:[%s10337_s18 + $0x70] sm:$0xff]  ;;  %v1594_v56 = vor.u32 %v1593_v8, %v1590_v17  ;;  %v1597_v17 = vshrl.u32 %v10819_v32, 16 }
 0x188   : > { %v1968_v36 = vpop.f32.mrf.mxu1  ;;  %9109 = vmatmul.msk.bf16.gmra.mxu2 %vm589_vm1, %v2239_v57 }
 0x189   : > { %9003 = vmatmul.msk.bf16.gmra.mxu0 %vm589_vm1, %v1586_v58  ;;  %v2053_v18 = vadd.f32 %v1966_v34, %v1817_v51  ;;  %v2240_v51 = vrot.slane %v9912_v43, 2 }
 0x18a   : > { %8986 = vmatmul.msk.bf16.gmra.mxu3 %vm589_vm1, %v1277_v10 }
 0x18b   : > { %v2327_v2 = vpop.f32.mrf.mxu2  ;;  %v2241_v52 = vsel %vm14336_vm4, %v2238_v12, %v2240_v51  ;;  %v1600_v12 = vshll.u32 %v10819_v32, 16 }
 0x18c   : > { %v10839_v4 = vadd.f32 %v2327_v2, %v2053_v18  ;;  %v1278_v2 = vrot.slane %v10845_v27, 1 }
 0x18d   : > { %v1371_v24 = vpop.f32.mrf.mxu3 }
 0x18e   : > { %v1732_v9 = vpop.f32.mrf.mxu0  ;;  %v1452_v57 = vadd.f32 %v1371_v24, %v10513_v20  ;;  %v1279_v43 = vsel %vm891_vm2, %v1276_v47, %v1278_v2  ;;  %v1602_v47 = vrot.slane %v1600_v12, 2 }
 0x18f   : > { %v1818_v34 = vadd.f32 %v1732_v9, %v1449_v60  ;;  %v1595_v60 = vsel %vm1488_vm5, %v1585_v19, %v1594_v56  ;;  %v1881_v19 = vrot.slane %v10819_v32, 2 }
 0x190   : > { %v1971_v25 = vpop.f32.mrf.mxu1 }
 0x191   : > { %v2054_v58 = vadd.f32 %v1968_v36, %v1818_v34 }
 0x193   : > { %9023 = vmatmul.msk.bf16.gmra.mxu1 %vm589_vm1, %v1880_v13  ;;  %v2329_v10 = vpop.f32.mrf.mxu2 }
 0x194   : > { %v10848_v18 = vadd.f32 %v2329_v10, %v2054_v58  ;;  %v1599_v58 = vrot.slane %v1597_v17, 1 }
 0x195   : > { %v1373_v50 = vpop.f32.mrf.mxu3 }
 0x196   : > { %v1735_v20 = vpop.f32.mrf.mxu0  ;;  %v1453_v55 = vadd.f32 %v1373_v50, %v10528_v41  ;;  %v1882_v50 = vsel %vm14336_vm4, %v1879_v35, %v1881_v19  ;;  %v1603_v32 = vor.u32 %v1602_v47, %v1599_v58  ;;  %v1609_v47 = vshll.u32 %v10845_v27, 16 }
 0x197   : > { %v1819_v24 = vadd.f32 %v1735_v20, %v1450_v7  ;;  %v9913_v7 = vld [vmem:[%s10337_s18 + $0x70] sm:$0xff]  ;;  %v10867_v20 = vld [vmem:[%s10337_s18 + $0x78] sm:$0xff] }
 0x198   : > { %v1973_v36 = vpop.f32.mrf.mxu1  ;;  %9110 = vmatmul.msk.bf16.gmra.mxu2 %vm589_vm1, %v2241_v52 }
 0x199   : > { %9004 = vmatmul.msk.bf16.gmra.mxu0 %vm589_vm1, %v1595_v60  ;;  %v2055_v9 = vadd.f32 %v1971_v25, %v1819_v24  ;;  %v2242_v24 = vrot.slane %v9913_v7, 2 }
 0x19a   : > { %8987 = vmatmul.msk.bf16.gmra.mxu3 %vm589_vm1, %v1279_v43 }
 0x19b   : > { %v2332_v8 = vpop.f32.mrf.mxu2 }
 0x19c   : > { %v10861_v41 = vadd.f32 %v2332_v8, %v2055_v9  ;;  %v1280_v8 = vrot.slane %v10867_v20, 1 }
 0x19d   : > { %v1376_v34 = vpop.f32.mrf.mxu3 }
 0x19e   : > { %v1737_v13 = vpop.f32.mrf.mxu0  ;;  %v1454_v10 = vadd.f32 %v1376_v34, %v10544_v59  ;;  %v9968_v59 = vld [vmem:[%s14322_s2 + $0x70] sm:$0xff] }
 0x19f   : > { %v1820_v25 = vadd.f32 %v1737_v13, %v1451_v48  ;;  %v2243_v48 = vsel %vm14336_vm4, %v2240_v51, %v2242_v24  ;;  %5902 = vmatpush.bf16.msra.mxu2 %v9968_v59  ;;  %v1281_v13 = vsel %vm891_vm2, %v1278_v2, %v1280_v8  ;;  %v1606_v51 = vshrl.u32 %v10845_v27, 16 }
 0x1a0   : > { %v1976_v52 = vpop.f32.mrf.mxu1  ;;  %v1611_v2 = vrot.slane %v1609_v47, 2 }
 0x1a1   : > { %v2056_v60 = vadd.f32 %v1973_v36, %v1820_v25  ;;  %v1604_v36 = vsel %vm1488_vm5, %v1594_v56, %v1603_v32  ;;  %v1883_v56 = vrot.slane %v10845_v27, 2 }
 0x1a3   : > { %9024 = vmatmul.msk.bf16.gmra.mxu1 %vm589_vm1, %v1882_v50  ;;  %v2334_v43 = vpop.f32.mrf.mxu2 }
 0x1a4   : > { %v10870_v9 = vadd.f32 %v2334_v43, %v2056_v60  ;;  %v1608_v43 = vrot.slane %v1606_v51, 1 }
 0x1a5   : > { %v1378_v17 = vpop.f32.mrf.mxu3 }
 0x1a6   : > { %v1740_v35 = vpop.f32.mrf.mxu0  ;;  %v1455_v12 = vadd.f32 %v1378_v17, %v10554_v11  ;;  %v1884_v17 = vsel %vm14336_vm4, %v1881_v19, %v1883_v56  ;;  %v1612_v27 = vor.u32 %v1611_v2, %v1608_v43  ;;  %v1615_v43 = vshrl.u32 %v10867_v20, 16 }
 0x1a7   : > { %v1821_v7 = vadd.f32 %v1740_v35, %v1452_v57  ;;  %v9914_v57 = vld [vmem:[%s10337_s18 + $0x78] sm:$0xff]  ;;  %v10892_v35 = vld [vmem:[%s10337_s18 + $0x80] sm:$0xff] }
 0x1a8   : > { %v1978_v34 = vpop.f32.mrf.mxu1  ;;  %9111 = vmatmul.msk.bf16.gmra.mxu2 %vm589_vm1, %v2243_v48 }
 0x1a9   : > { %9005 = vmatmul.msk.bf16.gmra.mxu0 %vm589_vm1, %v1604_v36  ;;  %v2057_v58 = vadd.f32 %v1976_v52, %v1821_v7  ;;  %v2244_v7 = vrot.slane %v9914_v57, 2 }
 0x1aa   : > { %8988 = vmatmul.msk.bf16.gmra.mxu3 %vm589_vm1, %v1281_v13 }
 0x1ab   : > { %v2337_v25 = vpop.f32.mrf.mxu2  ;;  %v2245_v51 = vsel %vm14336_vm4, %v2242_v24, %v2244_v7  ;;  %v1618_v24 = vshll.u32 %v10867_v20, 16 }
 0x1ac   : > { %v10886_v11 = vadd.f32 %v2337_v25, %v2057_v58  ;;  %v1282_v25 = vrot.slane %v10892_v35, 1 }
 0x1ad   : > { %v1381_v50 = vpop.f32.mrf.mxu3 }
 0x1ae   : > { %v1742_v60 = vpop.f32.mrf.mxu0  ;;  %v1456_v59 = vadd.f32 %v1381_v50, %v10579_v38  ;;  %v1283_v57 = vsel %vm891_vm2, %v1280_v8, %v1282_v25  ;;  %v1620_v8 = vrot.slane %v1618_v24, 2 }
 0x1af   : > { %v1822_v52 = vadd.f32 %v1742_v60, %v1453_v55  ;;  %v1613_v55 = vsel %vm1488_vm5, %v1603_v32, %v1612_v27  ;;  %v1885_v32 = vrot.slane %v10867_v20, 2 }
 0x1b0   : > { %v1981_v48 = vpop.f32.mrf.mxu1 }
 0x1b1   : > { %v2058_v36 = vadd.f32 %v1978_v34, %v1822_v52 }
 0x1b3   : > { %9025 = vmatmul.msk.bf16.gmra.mxu1 %vm589_vm1, %v1884_v17  ;;  %v2339_v13 = vpop.f32.mrf.mxu2 }
 0x1b4   : > { %v10895_v58 = vadd.f32 %v2339_v13, %v2058_v36  ;;  %v1617_v36 = vrot.slane %v1615_v43, 1 }
 0x1b5   : > { %v1383_v47 = vpop.f32.mrf.mxu3 }
 0x1b6   : > { %v1745_v38 = vpop.f32.mrf.mxu0  ;;  %v1457_v19 = vadd.f32 %v1383_v47, %v10595_v0  ;;  %v1886_v47 = vsel %vm14336_vm4, %v1883_v56, %v1885_v32  ;;  %v1621_v20 = vor.u32 %v1620_v8, %v1617_v36  ;;  %v1624_v36 = vshrl.u32 %v10892_v35, 16 }
 0x1b7   : > { %v1823_v50 = vadd.f32 %v1745_v38, %v1454_v10  ;;  %v9915_v10 = vld [vmem:[%s10337_s18 + $0x80] sm:$0xff]  ;;  %v10914_v38 = vld [vmem:[%s10337_s18 + $0x88] sm:$0xff] }
 0x1b8   : > { %v1983_v34 = vpop.f32.mrf.mxu1  ;;  %9112 = vmatmul.msk.bf16.gmra.mxu2 %vm589_vm1, %v2245_v51 }
 0x1b9   : > { %9006 = vmatmul.msk.bf16.gmra.mxu0 %vm589_vm1, %v1613_v55  ;;  %v2059_v60 = vadd.f32 %v1981_v48, %v1823_v50  ;;  %v2246_v50 = vrot.slane %v9915_v10, 2 }
 0x1ba   : > { %8989 = vmatmul.msk.bf16.gmra.mxu3 %vm589_vm1, %v1283_v57 }
 0x1bb   : > { %v2342_v2 = vpop.f32.mrf.mxu2  ;;  %v2247_v43 = vsel %vm14336_vm4, %v2244_v7, %v2246_v50 }
 0x1bc   : > { %v10908_v0 = vadd.f32 %v2342_v2, %v2059_v60  ;;  %v1284_v2 = vrot.slane %v10914_v38, 1 }
 0x1bd   : > { %v1386_v52 = vpop.f32.mrf.mxu3 }
 0x1be   : > { %v1747_v17 = vpop.f32.mrf.mxu0  ;;  %v1458_v13 = vadd.f32 %v1386_v52, %v10610_v28  ;;  %v1285_v10 = vsel %vm891_vm2, %v1282_v25, %v1284_v2  ;;  %v9916_v25 = vld [vmem:[%s10337_s18 + $0x88] sm:$0xff] }
 0x1bf   : > { %v1824_v48 = vadd.f32 %v1747_v17, %v1455_v12  ;;  %v1622_v12 = vsel %vm1488_vm5, %v1612_v27, %v1621_v20  ;;  %v9967_v17 = vld [vmem:[%s14322_s2 + $0x68] sm:$0xff]  ;;  %v1627_v27 = vshll.u32 %v10892_v35, 16 }
 0x1c0   : > { %v1986_v51 = vpop.f32.mrf.mxu1  ;;  %5903 = vmatpush.bf16.msra.mxu2 %v9967_v17  ;;  %v2248_v17 = vrot.slane %v9916_v25, 2 }
 0x1c1   : > { %v2060_v55 = vadd.f32 %v1983_v34, %v1824_v48 }
 0x1c3   : > { %9026 = vmatmul.msk.bf16.gmra.mxu1 %vm589_vm1, %v1886_v47  ;;  %v2344_v57 = vpop.f32.mrf.mxu2 }
 0x1c4   : > { %v10917_v60 = vadd.f32 %v2344_v57, %v2060_v55  ;;  %v1626_v55 = vrot.slane %v1624_v36, 1  ;;  %v1629_v57 = vrot.slane %v1627_v27, 2  ;;  %v2249_v27 = vsel %vm14336_vm4, %v2246_v50, %v2248_v17 }
 0x1c5   : > { %v1388_v24 = vpop.f32.mrf.mxu3  ;;  %v1636_v50 = vshll.u32 %v10914_v38, 16 }
 0x1c6   : > { %v1750_v28 = vpop.f32.mrf.mxu0  ;;  %v1459_v56 = vadd.f32 %v1388_v24, %v10621_v42 }
 0x1c7   : > { %v1825_v52 = vadd.f32 %v1750_v28, %v1456_v59  ;;  %v1887_v59 = vrot.slane %v10892_v35, 2  ;;  %v1630_v35 = vor.u32 %v1629_v57, %v1626_v55  ;;  %v1157_v55 = vld [vmem:[%s10337_s18 + $0x98] sm:$0x1]  ;;  %v1633_v57 = vshrl.u32 %v10914_v38, 16 }
 0x1c8   : > { %v1988_v34 = vpop.f32.mrf.mxu1  ;;  %9113 = vmatmul.msk.bf16.gmra.mxu2 %vm589_vm1, %v2247_v43 }
 0x1c9   : > { %9007 = vmatmul.msk.bf16.gmra.mxu0 %vm589_vm1, %v1622_v12  ;;  %v2061_v7 = vadd.f32 %v1986_v51, %v1825_v52  ;;  %v1888_v28 = vsel %vm14336_vm4, %v1885_v32, %v1887_v59  ;;  %v10939_v12 = vld [vmem:[%s10337_s18 + $0x90] sm:$0xff] }
 0x1ca   : > { %8990 = vmatmul.msk.bf16.gmra.mxu3 %vm589_vm1, %v1285_v10  ;;  %v1286_v36 = vrot.slane %v10939_v12, 1 }
 0x1cb   : > { %v2347_v42 = vpop.f32.mrf.mxu2 }
 0x1cc   : > { %v10933_v8 = vadd.f32 %v2347_v42, %v2061_v7  ;;  %v1631_v42 = vsel %vm1488_vm5, %v1621_v20, %v1630_v35  ;;  %v1889_v20 = vrot.slane %v10914_v38, 2 }
 0x1cd   : > { %v1391_v48 = vpop.f32.mrf.mxu3 }
 0x1ce   : > { %14362 = vst [vmem:[#allocation3_spill] sm:$0xff] %v10933_v8  ;;  %v1752_v47 = vpop.f32.mrf.mxu0  ;;  %v1460_v51 = vadd.f32 %v1391_v48, %v10636_v62  ;;  %v1287_v48 = vsel %vm891_vm2, %v1284_v2, %v1286_v36 }
 0x1cf   : > { %v1826_v43 = vadd.f32 %v1752_v47, %v1457_v19 }
 0x1d0   : > { %v1991_v24 = vpop.f32.mrf.mxu1 }
 0x1d1   : > { %v2062_v52 = vadd.f32 %v1988_v34, %v1826_v43 }
 0x1d3   : > { %9027 = vmatmul.msk.bf16.gmra.mxu1 %vm589_vm1, %v1888_v28  ;;  %v2349_v10 = vpop.f32.mrf.mxu2  ;;  %v10959_v28 = vld [vmem:[%s10337_s18 + $0x90] sm:$0xff] }
 0x1d4   : > { %v10942_v7 = vadd.f32 %v2349_v10, %v2062_v52  ;;  %v1635_v10 = vrot.slane %v1633_v57, 1  ;;  %v2250_v38 = vrot.slane %v10959_v28, 2 }
 0x1d5   : > { %v1393_v62 = vpop.f32.mrf.mxu3 }
 0x1d6   : > { %14363 = vst [vmem:[#allocation4_spill] sm:$0xff] %v10942_v7  ;;  %v1755_v19 = vpop.f32.mrf.mxu0  ;;  %v1461_v32 = vadd.f32 %v1393_v62, %v10647_v49  ;;  %v2251_v57 = vsel %vm14336_vm4, %v2248_v17, %v2250_v38  ;;  %v1642_v17 = vshrl.u32 %v10939_v12, 16 }
 0x1d7   : > { %v1827_v34 = vadd.f32 %v1755_v19, %v1458_v13  ;;  %v1233_v13 = vunpack.c.l.b16 %v1157_v55 }
 0x1d8   : > { %v1993_v25 = vpop.f32.mrf.mxu1  ;;  %9114 = vmatmul.msk.bf16.gmra.mxu2 %vm589_vm1, %v2249_v27  ;;  %v1638_v27 = vrot.slane %v1636_v50, 2 }
 0x1d9   : > { %9008 = vmatmul.msk.bf16.gmra.mxu0 %vm589_vm1, %v1631_v42  ;;  %v2063_v47 = vadd.f32 %v1991_v24, %v1827_v34  ;;  %v1890_v42 = vsel %vm14336_vm4, %v1887_v59, %v1889_v20  ;;  %v1252_v34 = vpack.c.b16 %v1233_v13, %v1233_v13 }
 0x1da   : > { %8991 = vmatmul.msk.bf16.gmra.mxu3 %vm589_vm1, %v1287_v48 }
 0x1db   : > { %v2352_v43 = vpop.f32.mrf.mxu2 }
 0x1dc   : > { %v10956_v49 = vadd.f32 %v2352_v43, %v2063_v47  ;;  %v1639_v47 = vor.u32 %v1638_v27, %v1635_v10  ;;  %v1288_v43 = vrot.slane %v1252_v34, 1  ;;  %v2459_v27 = vshll.u32 %v10584_v40, 16  ;;  %v10996_v34 = vld [vmem:[%s10337_s18 + $0x98] sm:$0xff] }
 0x1dd   : > { %v1396_v52 = vpop.f32.mrf.mxu3 }
 0x1de   : > { %14364 = vst [vmem:[#allocation5_spill] sm:$0xff] %v10956_v49  ;;  %v1757_v2 = vpop.f32.mrf.mxu0  ;;  %v10962_v24 = vadd.f32 %v1396_v52, %v10662_v46  ;;  %v1289_v28 = vsel %vm891_vm2, %v1286_v36, %v1288_v43  ;;  %v1482_v49 = vld [vmem:[%s10337_s18 + $0x98] sm:$0x3] }
 0x1df   : > { %v1828_v62 = vadd.f32 %v1757_v2, %v1459_v56  ;;  %v1640_v56 = vsel %vm1488_vm5, %v1630_v35, %v1639_v47  ;;  %v1645_v2 = vshll.u32 %v10939_v12, 16 }
 0x1e0   : > { %v1996_v19 = vpop.f32.mrf.mxu1 }
 0x1e1   : > { %v10965_v48 = vadd.f32 %v1993_v25, %v1828_v62  ;;  %v10988_v62 = vld [vmem:[%s10337_s18 + $0x18] sm:$0xff] }
 0x1e2   : > { %v2464_v36 = vshrl.u32 %v10988_v62, 16 }
 0x1e3   : > { %9028 = vmatmul.msk.bf16.gmra.mxu1 %vm589_vm1, %v1890_v42  ;;  %v10969_v55 = vpop.f32.mrf.mxu2  ;;  %v9966_v42 = vld [vmem:[%s14322_s2 + $0x60] sm:$0xff] }
 0x1e4   : > { %5904 = vmatpush.bf16.msra.mxu2 %v9966_v42  ;;  %v2466_v29 = vrot.slane %v2464_v36, 2 }
 0x1e5   : > { %v1398_v50 = vpop.f32.mrf.mxu3 }
 0x1e6   : > { %v1760_v46 = vpop.f32.mrf.mxu0  ;;  %v10974_v59 = vadd.f32 %v1398_v50, %v10673_v5  ;;  %v1891_v5 = vrot.slane %v10939_v12, 2  ;;  %v1644_v50 = vrot.slane %v1642_v17, 1  ;;  %v2252_v17 = vrot.slane %v10996_v34, 2 }
 0x1e7   : > { %v1829_v25 = vadd.f32 %v1760_v46, %v1460_v51  ;;  %v2456_v51 = vshrl.u32 %v10584_v40, 16  ;;  %v1647_v46 = vrot.slane %v1645_v2, 2 }
 0x1e8   : > { %v1998_v13 = vpop.f32.mrf.mxu1  ;;  %9115 = vmatmul.msk.bf16.gmra.mxu2 %vm589_vm1, %v2251_v57 }
 0x1e9   : > { %9009 = vmatmul.msk.bf16.gmra.mxu0 %vm589_vm1, %v1640_v56  ;;  %v2065_v52 = vadd.f32 %v1996_v19, %v1829_v25  ;;  %v2467_v19 = vshll.u32 %v10988_v62, 16 }
 0x1ea   : > { %8992 = vmatmul.msk.bf16.gmra.mxu3 %vm589_vm1, %v1289_v28  ;;  %v1892_v28 = vsel %vm14336_vm4, %v1889_v20, %v1891_v5  ;;  %v2253_v20 = vsel %vm14336_vm4, %v2250_v38, %v2252_v17 }
 0x1eb   : > { %v2357_v10 = vpop.f32.mrf.mxu2 }
 0x1ec   : > { %v10984_v35 = vadd.f32 %v2357_v10, %v2065_v52  ;;  %v2458_v52 = vrot.slane %v2456_v51, 2  ;;  %v2461_v10 = vrot.slane %v2459_v27, 3 }
 0x1ed   : > { %v1401_v43 = vpop.f32.mrf.mxu3 }
 0x1ee   : > { %14365 = vst [vmem:[#allocation6_spill] sm:$0xff] %v10984_v35  ;;  %v1762_v57 = vpop.f32.mrf.mxu0  ;;  %v10999_v40 = vadd.f32 %v1401_v43, %v10688_v33  ;;  %v2469_v35 = vrot.slane %v2467_v19, 3  ;;  %v1648_v33 = vor.u32 %v1647_v46, %v1644_v50  ;;  %v2462_v42 = vor.u32 %v2461_v10, %v2458_v52  ;;  %v11030_v52 = vld [vmem:[%s10337_s18 + $0x20] sm:$0xff] }
 0x1ef   : > { %v1830_v56 = vadd.f32 %v1762_v57, %v1461_v32  ;;  %v1486_v32 = vunpack.c.l.b16 %v1482_v49  ;;  %v2473_v10 = vshrl.u32 %v11030_v52, 16 }
 0x1f0   : > { %v2001_v25 = vpop.f32.mrf.mxu1  ;;  %v11011_v43 = vor.u32 %v2469_v35, %v2466_v29  ;;  %v1649_v36 = vsel %vm1488_vm5, %v1639_v47, %v1648_v33 }
 0x1f1   : > { %v11005_v7 = vadd.f32 %v1998_v13, %v1830_v56  ;;  %v2123_v13 = vld [vmem:[%s10337_s18 + $0xa0] sm:$0x3]  ;;  %v1487_v57 = vpack.c.b16 %v1486_v32, %v1486_v32  ;;  %v9158_v56 = vld [vmem:[%s10337_s18 + $0x8] sm:$0xe]  ;;  %v2476_v32 = vshll.u32 %v11030_v52, 16 }
 0x1f2   : > { %v2471_v29 = vsel %vm2454_vm6, %v2462_v42, %v11011_v43  ;;  %v2199_v47 = vunpack.c.l.b16 %v2123_v13 }
 0x1f3   : > { %9029 = vmatmul.msk.bf16.gmra.mxu1 %vm589_vm1, %v1892_v28  ;;  %v11009_v2 = vpop.f32.mrf.mxu2  ;;  %v1651_v35 = vshrl.u32 %v1487_v57, 16  ;;  %v1654_v50 = vshll.u32 %v1487_v57, 16 }
 0x1f4   : > { %v2218_v42 = vpack.c.b16 %v2199_v47, %v2199_v47 }
 0x1f5   : > { %v1403_v51 = vpop.f32.mrf.mxu3 }
 0x1f6   : > { %v1765_v27 = vpop.f32.mrf.mxu0  ;;  %v11017_v19 = vadd.f32 %v1403_v51, %v10699_v53  ;;  %v1893_v53 = vrot.slane %v1487_v57, 2  ;;  %v1653_v51 = vrot.slane %v1651_v35, 1  ;;  %v2254_v47 = vrot.slane %v2218_v42, 2 }
 0x1f7   : > { %v1831_v34 = vadd.f32 %v1765_v27, %v10962_v24  ;;  %v9919_v24 = vld [vmem:[%s10337_s18 + $0x8] sm:$0xf0]  ;;  %v1656_v27 = vrot.slane %v1654_v50, 2 }
 0x1f8   : > { %v2003_v49 = vpop.f32.mrf.mxu1  ;;  %9116 = vmatmul.msk.bf16.gmra.mxu2 %vm589_vm1, %v2253_v20  ;;  %v2255_v12 = vsel %vm14336_vm4, %v2252_v17, %v2254_v47 }
 0x1f9   : > { %9010 = vmatmul.msk.bf16.gmra.mxu0 %vm589_vm1, %v1649_v36  ;;  %v2067_v38 = vadd.f32 %v2001_v25, %v1831_v34  ;;  %v9159_v36 = vor.u32 %v9919_v24, %v9158_v56  ;;  %v1657_v35 = vor.u32 %v1656_v27, %v1653_v51 }
 0x1fa   : > { %9119 = vmatmul.msk.bf16.vlgmr.msra.gmra.mxu3 %vm589_vm1, %v2471_v29  ;;  %v1894_v29 = vsel %vm14336_vm4, %v1891_v5, %v1893_v53 }
 0x1fb   : > { %v2362_v46 = vpop.f32.mrf.mxu2  ;;  %v5199_v50 = vshrl.u32 %v9159_v36, 16  ;;  %v5202_v56 = vshll.u32 %v9159_v36, 16 }
 0x1fc   : > { %v11027_v28 = vadd.f32 %v2362_v46, %v2067_v38  ;;  %v9920_v38 = vld [vmem:[%s10337_s18 + $0x10] sm:$0xff]  ;;  %v2475_v46 = vrot.slane %v2473_v10, 2  ;;  %v1658_v10 = vsel %vm1488_vm5, %v1648_v33, %v1657_v35 }
 0x1fd   : > { %v1406_v25 = vpop.f32.mrf.mxu3  ;;  %v5210_v24 = vshll.u32 %v9920_v38, 16 }
 0x1fe   : > { %14366 = vst [vmem:[#allocation7_spill] sm:$0xff] %v11027_v28  ;;  %v1767_v20 = vpop.f32.mrf.mxu0  ;;  %v11035_v13 = vadd.f32 %v1406_v25, %v10714_v63  ;;  %v2478_v28 = vrot.slane %v2476_v32, 3  ;;  %v5204_v32 = vrot.slane %v5202_v56, 2  ;;  %v14367_v56 = vunpack.c.l.b16 %v10564_v21 }
 0x1ff   : > { %v1832_v34 = vadd.f32 %v1767_v20, %v10974_v59  ;;  %v5207_v59 = vshrl.u32 %v9920_v38, 16  ;;  %v5212_v36 = vrot.slane %v5210_v24, 2 }
 0x200   : > { %v2006_v57 = vpop.f32.mrf.mxu1  ;;  %v2479_v25 = vor.u32 %v2478_v28, %v2475_v46  ;;  %v11060_v46 = vld [vmem:[%s10337_s18 + $0x28] sm:$0xff] }
 0x201   : > { %v11042_v8 = vadd.f32 %v2003_v49, %v1832_v34  ;;  %v5201_v49 = vrot.slane %v5199_v50, 1  ;;  %v5209_v27 = vrot.slane %v5207_v59, 1  ;;  %v2817_v34 = vld [vmem:[%s10337_s18 + $0x10] sm:$0x8]  ;;  %v2482_v47 = vshrl.u32 %v11060_v46, 16 }
 0x202   : > { %v2480_v17 = vsel %vm2454_vm6, %v11011_v43, %v2479_v25  ;;  %v2821_v33 = vunpack.c.l.b16 %v2817_v34  ;;  %v2485_v35 = vshll.u32 %v11060_v46, 16 }
 0x203   : > { %9030 = vmatmul.msk.bf16.gmra.mxu1 %vm589_vm1, %v1894_v29  ;;  %v11045_v63 = vpop.f32.mrf.mxu2  ;;  %v5213_v38 = vor.u32 %v5212_v36, %v5209_v27 }
 0x205   : > { %v1408_v5 = vpop.f32.mrf.mxu3 }
 0x206   : > { %v1770_v53 = vpop.f32.mrf.mxu0  ;;  %v1467_v42 = vadd.f32 %v1408_v5, %v10725_v45  ;;  %v5205_v45 = vor.u32 %v5204_v32, %v5201_v49  ;;  %v2484_v49 = vrot.slane %v2482_v47, 2  ;;  %v2487_v32 = vrot.slane %v2485_v35, 3 }
 0x207   : > { %v1833_v20 = vadd.f32 %v1770_v53, %v10999_v40  ;;  %v9921_v53 = vld [vmem:[%s10337_s18 + $0x18] sm:$0xff] }
 0x208   : > { %v2008_v51 = vpop.f32.mrf.mxu1  ;;  %9117 = vmatmul.msk.bf16.gmra.mxu2 %vm589_vm1, %v2255_v12  ;;  %v5214_v5 = vsel %vm1488_vm5, %v5205_v45, %v5213_v38  ;;  %v5219_v36 = vshll.u32 %v9921_v53, 16  ;;  %v2488_v34 = vor.u32 %v2487_v32, %v2484_v49  ;;  %v9922_v32 = vld [vmem:[%s10337_s18 + $0x20] sm:$0xff] }
 0x209   : > { %9011 = vmatmul.msk.bf16.gmra.mxu0 %vm589_vm1, %v1658_v10  ;;  %v2069_v28 = vadd.f32 %v2006_v57, %v1833_v20  ;;  %v2822_v57 = vpack.c.b16 %v14367_v56, %v2821_v33  ;;  %v9965_v10 = vld [vmem:[%s14322_s2 + $0x58] sm:$0xff] }
 0x20a   : > { %9120 = vmatmul.msk.bf16.gmra.mxu3 %vm589_vm1, %v2480_v17  ;;  %5905 = vmatpush.bf16.msra.mxu2 %v9965_v10  ;;  %v5221_v35 = vrot.slane %v5219_v36, 2 }
 0x20b   : > { %v2367_v29 = vpop.f32.mrf.mxu2  ;;  %v2824_v21 = vrot.slane %v2822_v57, 3 }
 0x20c   : > { %v11057_v40 = vadd.f32 %v2367_v29, %v2069_v28 }
 0x20d   : > { %v1411_v50 = vpop.f32.mrf.mxu3 }
 0x20e   : > { %v1772_v43 = vpop.f32.mrf.mxu0  ;;  %v1468_v59 = vadd.f32 %v1411_v50, %v10740_v16  ;;  %v2825_v16 = vrot.slane %v10988_v62, 3  ;;  %v2489_v62 = vsel %vm2454_vm6, %v2479_v25, %v2488_v34 }
 0x20f   : > { %v1834_v24 = vadd.f32 %v1772_v43, %v11017_v19  ;;  %v5216_v19 = vshrl.u32 %v9921_v53, 16 }
 0x210   : > { %v2011_v12 = vpop.f32.mrf.mxu1  ;;  %v2826_v33 = vsel %vm2823_vm7, %v2824_v21, %v2825_v16 }
 0x211   : > { %v11073_v20 = vadd.f32 %v2008_v51, %v1834_v24  ;;  %v5218_v47 = vrot.slane %v5216_v19, 1  ;;  %v11088_v24 = vld [vmem:[%s10337_s18 + $0x30] sm:$0xff] }
 0x213   : > { %9228 = vmatmul.msk.bf16.vlgmr.msra.gmra.mxu1 %vm589_vm1, %v5214_v5  ;;  %v11077_v27 = vpop.f32.mrf.mxu2  ;;  %v5222_v56 = vor.u32 %v5221_v35, %v5218_v47 }
 0x215   : > { %v1413_v17 = vpop.f32.mrf.mxu3 }
 0x216   : > { %v1775_v28 = vpop.f32.mrf.mxu0  ;;  %v1469_v51 = vadd.f32 %v1413_v17, %v10751_v14  ;;  %v2491_v14 = vshrl.u32 %v11088_v24, 16  ;;  %v2827_v17 = vrot.slane %v11030_v52, 3 }
 0x217   : > { %v1835_v29 = vadd.f32 %v1775_v28, %v11035_v13  ;;  %v2494_v13 = vshll.u32 %v11088_v24, 16 }
 0x218   : > { %v2013_v45 = vpop.f32.mrf.mxu1  ;;  %v2493_v21 = vrot.slane %v2491_v14, 2  ;;  %v2828_v35 = vsel %vm2823_vm7, %v2825_v16, %v2827_v17 }
 0x219   : > { %9138 = vmatmul.msk.bf16.vlgmr.msra.gmra.mxu0 %vm589_vm1, %v2826_v33  ;;  %v2071_v50 = vadd.f32 %v2011_v12, %v1835_v29  ;;  %v5223_v12 = vsel %vm1488_vm5, %v5213_v38, %v5222_v56  ;;  %v2496_v19 = vrot.slane %v2494_v13, 3  ;;  %v5225_v33 = vshrl.u32 %v9922_v32, 16 }
 0x21a   : > { %9121 = vmatmul.msk.bf16.gmra.mxu3 %vm589_vm1, %v2489_v62  ;;  %v5228_v29 = vshll.u32 %v9922_v32, 16 }
 0x21b   : > { %v2372_v43 = vpop.f32.mrf.mxu2  ;;  %v2497_v47 = vor.u32 %v2496_v19, %v2493_v21  ;;  %v9923_v19 = vld [vmem:[%s10337_s18 + $0x28] sm:$0xff] }
 0x21c   : > { %v11085_v57 = vadd.f32 %v2372_v43, %v2071_v50  ;;  %v5230_v43 = vrot.slane %v5228_v29, 2 }
 0x21d   : > { %v1416_v5 = vpop.f32.mrf.mxu3  ;;  %v2498_v14 = vsel %vm2454_vm6, %v2488_v34, %v2497_v47 }
 0x21e   : > { %v1777_v53 = vpop.f32.mrf.mxu0  ;;  %v1470_v25 = vadd.f32 %v1416_v5, %v10766_v1 }
 0x21f   : > { %v1836_v10 = vadd.f32 %v1777_v53, %v1467_v42 }
 0x220   : > { %v2016_v49 = vpop.f32.mrf.mxu1 }
 0x221   : > { %v11095_v36 = vadd.f32 %v2013_v45, %v1836_v10  ;;  %v5227_v45 = vrot.slane %v5225_v33, 1  ;;  %v11109_v10 = vld [vmem:[%s10337_s18 + $0x38] sm:$0xff] }
 0x223   : > { %9229 = vmatmul.msk.bf16.gmra.mxu1 %vm589_vm1, %v5223_v12  ;;  %v11099_v28 = vpop.f32.mrf.mxu2  ;;  %v5231_v5 = vor.u32 %v5230_v43, %v5227_v45  ;;  %v5237_v45 = vshll.u32 %v9923_v19, 16 }
 0x225   : > { %v1418_v1 = vpop.f32.mrf.mxu3 }
 0x226   : > { %v1780_v42 = vpop.f32.mrf.mxu0  ;;  %v1471_v38 = vadd.f32 %v1418_v1, %v10775_v30  ;;  %v2500_v30 = vshrl.u32 %v11109_v10, 16 }
 0x227   : > { %v1837_v62 = vadd.f32 %v1780_v42, %v1468_v59  ;;  %v2503_v59 = vshll.u32 %v11109_v10, 16  ;;  %v2829_v42 = vrot.slane %v11060_v46, 3 }
 0x228   : > { %v2018_v50 = vpop.f32.mrf.mxu1  ;;  %v2502_v33 = vrot.slane %v2500_v30, 2  ;;  %v5239_v30 = vrot.slane %v5237_v45, 2  ;;  %v9924_v45 = vld [vmem:[%s10337_s18 + $0x30] sm:$0xff] }
 0x229   : > { %9139 = vmatmul.msk.bf16.gmra.mxu0 %vm589_vm1, %v2828_v35  ;;  %v2073_v52 = vadd.f32 %v2016_v49, %v1837_v62  ;;  %v5232_v49 = vsel %vm1488_vm5, %v5222_v56, %v5231_v5  ;;  %v2505_v29 = vrot.slane %v2503_v59, 3  ;;  %v5234_v62 = vshrl.u32 %v9923_v19, 16 }
 0x22a   : > { %9122 = vmatmul.msk.bf16.gmra.mxu3 %vm589_vm1, %v2498_v14  ;;  %v2830_v14 = vsel %vm2823_vm7, %v2827_v17, %v2829_v42  ;;  %v11133_v17 = vld [vmem:[%s10337_s18 + $0x40] sm:$0xff] }
 0x22b   : > { %v2377_v13 = vpop.f32.mrf.mxu2  ;;  %v2506_v43 = vor.u32 %v2505_v29, %v2502_v33  ;;  %v5236_v46 = vrot.slane %v5234_v62, 1 }
 0x22c   : > { %v11106_v53 = vadd.f32 %v2377_v13, %v2073_v52 }
 0x22d   : > { %v1421_v16 = vpop.f32.mrf.mxu3  ;;  %v2507_v59 = vsel %vm2454_vm6, %v2497_v47, %v2506_v43 }
 0x22e   : > { %v1782_v12 = vpop.f32.mrf.mxu0  ;;  %v1472_v34 = vadd.f32 %v1421_v16, %v10788_v37  ;;  %v9964_v37 = vld [vmem:[%s14322_s2 + $0x50] sm:$0xff] }
 0x22f   : > { %v1838_v32 = vadd.f32 %v1782_v12, %v1469_v51  ;;  %5906 = vmatpush.bf16.msra.mxu2 %v9964_v37 }
 0x230   : > { %v2021_v21 = vpop.f32.mrf.mxu1 }
 0x231   : > { %v11116_v1 = vadd.f32 %v2018_v50, %v1838_v32  ;;  %v5240_v32 = vor.u32 %v5239_v30, %v5236_v46  ;;  %v5243_v46 = vshrl.u32 %v9924_v45, 16  ;;  %v5246_v30 = vshll.u32 %v9924_v45, 16  ;;  %v11154_v45 = vld [vmem:[%s10337_s18 + $0x48] sm:$0xff] }
 0x233   : > { %9230 = vmatmul.msk.bf16.gmra.mxu1 %vm589_vm1, %v5232_v49  ;;  %v11120_v35 = vpop.f32.mrf.mxu2 }
 0x235   : > { %v1423_v51 = vpop.f32.mrf.mxu3 }
 0x236   : > { %v1785_v56 = vpop.f32.mrf.mxu0  ;;  %v1473_v50 = vadd.f32 %v1423_v51, %v10797_v15  ;;  %v2509_v15 = vshrl.u32 %v11133_v17, 16 }
 0x237   : > { %v1839_v52 = vadd.f32 %v1785_v56, %v1470_v25  ;;  %v2512_v25 = vshll.u32 %v11133_v17, 16 }
 0x238   : > { %v2023_v13 = vpop.f32.mrf.mxu1  ;;  %v2511_v37 = vrot.slane %v2509_v15, 2  ;;  %v5245_v15 = vrot.slane %v5243_v46, 1 }
 0x239   : > { %9140 = vmatmul.msk.bf16.gmra.mxu0 %vm589_vm1, %v2830_v14  ;;  %v2075_v16 = vadd.f32 %v2021_v21, %v1839_v52  ;;  %v5241_v21 = vsel %vm1488_vm5, %v5231_v5, %v5240_v32  ;;  %v2514_v51 = vrot.slane %v2512_v25, 3  ;;  %v2831_v14 = vrot.slane %v11088_v24, 3 }
 0x23a   : > { %9123 = vmatmul.msk.bf16.gmra.mxu3 %vm589_vm1, %v2507_v59  ;;  %v5248_v25 = vrot.slane %v5246_v30, 2 }
 0x23b   : > { %v2382_v12 = vpop.f32.mrf.mxu2  ;;  %v2515_v59 = vor.u32 %v2514_v51, %v2511_v37  ;;  %v9925_v51 = vld [vmem:[%s10337_s18 + $0x38] sm:$0xff] }
 0x23c   : > { %v11130_v49 = vadd.f32 %v2382_v12, %v2075_v16  ;;  %v2832_v16 = vsel %vm2823_vm7, %v2829_v42, %v2831_v14 }
 0x23d   : > { %v1426_v19 = vpop.f32.mrf.mxu3 }
 0x23e   : > { %14368 = vst [vmem:[#allocation8_spill] sm:$0xff] %v11130_v49  ;;  %v1787_v33 = vpop.f32.mrf.mxu0  ;;  %v1474_v47 = vadd.f32 %v1426_v19, %v10666_v31  ;;  %v2516_v19 = vsel %vm2454_vm6, %v2506_v43, %v2515_v59 }
 0x23f   : > { %v1840_v29 = vadd.f32 %v1787_v33, %v1471_v38 }
 0x240   : > { %v2026_v62 = vpop.f32.mrf.mxu1 }
 0x241   : > { %v11140_v56 = vadd.f32 %v2023_v13, %v1840_v29  ;;  %v5249_v29 = vor.u32 %v5248_v25, %v5245_v15  ;;  %v5252_v15 = vshrl.u32 %v9925_v51, 16  ;;  %v5255_v25 = vshll.u32 %v9925_v51, 16 }
 0x243   : > { %9231 = vmatmul.msk.bf16.gmra.mxu1 %vm589_vm1, %v5241_v21  ;;  %v11144_v52 = vpop.f32.mrf.mxu2  ;;  %v5250_v30 = vsel %vm1488_vm5, %v5240_v32, %v5249_v29  ;;  %v5257_v32 = vrot.slane %v5255_v25, 2 }
 0x245   : > { %v1428_v31 = vpop.f32.mrf.mxu3 }
 0x246   : > { %v1790_v38 = vpop.f32.mrf.mxu0  ;;  %v1475_v5 = vadd.f32 %v1428_v31, %v10679_v61  ;;  %v2518_v61 = vshrl.u32 %v11154_v45, 16 }
 0x247   : > { %v1841_v12 = vadd.f32 %v1790_v38, %v1472_v34  ;;  %v2521_v34 = vshll.u32 %v11154_v45, 16 }
 0x248   : > { %v2028_v13 = vpop.f32.mrf.mxu1  ;;  %v2520_v31 = vrot.slane %v2518_v61, 2 }
 0x249   : > { %9141 = vmatmul.msk.bf16.gmra.mxu0 %vm589_vm1, %v2832_v16  ;;  %v2077_v24 = vadd.f32 %v2026_v62, %v1841_v12  ;;  %v2523_v38 = vrot.slane %v2521_v34, 3  ;;  %v2833_v12 = vrot.slane %v11109_v10, 3  ;;  %v9963_v10 = vld [vmem:[%s14322_s2 + $0x48] sm:$0xff] }
 0x24a   : > { %9124 = vmatmul.msk.bf16.gmra.mxu3 %vm589_vm1, %v2516_v19  ;;  %5907 = vmatpush.bf16.msra.mxu2 %v9963_v10 }
 0x24b   : > { %v2387_v33 = vpop.f32.mrf.mxu2 }
 0x24c   : > { %v11151_v21 = vadd.f32 %v2387_v33, %v2077_v24  ;;  %v2524_v24 = vor.u32 %v2523_v38, %v2520_v31 }
 0x24d   : > { %v1431_v42 = vpop.f32.mrf.mxu3 }
 0x24e   : > { %14369 = vst [vmem:[#allocation9_spill] sm:$0xff] %v11151_v21  ;;  %v1792_v37 = vpop.f32.mrf.mxu0  ;;  %v11160_v43 = vadd.f32 %v1431_v42, %v10692_v39  ;;  %v5254_v42 = vrot.slane %v5252_v15, 1 }
 0x24f   : > { %v1842_v46 = vadd.f32 %v1792_v37, %v1473_v50  ;;  %v2834_v50 = vsel %vm2823_vm7, %v2831_v14, %v2833_v12  ;;  %v2525_v37 = vsel %vm2454_vm6, %v2515_v59, %v2524_v24  ;;  %v11179_v14 = vld [vmem:[%s10337_s18 + $0x50] sm:$0xff] }
 0x250   : > { %v2031_v62 = vpop.f32.mrf.mxu1 }
 0x251   : > { %v11163_v16 = vadd.f32 %v2028_v13, %v1842_v46  ;;  %v5258_v46 = vor.u32 %v5257_v32, %v5254_v42 }
 0x253   : > { %14370 = vst [vmem:[#allocation10_spill] sm:$0xff] %v11163_v16  ;;  %9232 = vmatmul.msk.bf16.gmra.mxu1 %vm589_vm1, %v5250_v30  ;;  %v11167_v19 = vpop.f32.mrf.mxu2  ;;  %v2527_v30 = vshrl.u32 %v11179_v14, 16  ;;  %v5259_v59 = vsel %vm1488_vm5, %v5249_v29, %v5258_v46  ;;  %v3053_v29 = vlaneseq }
 0x254   : > { %14371 = vst [vmem:[#allocation11_spill] sm:$0xff] %v11167_v19 }
 0x255   : > { %v1433_v39 = vpop.f32.mrf.mxu3 }
 0x256   : > { %v1795_v33 = vpop.f32.mrf.mxu0  ;;  %v11171_v13 = vadd.f32 %v1433_v39, %v10705_v3  ;;  %v2530_v3 = vshll.u32 %v11179_v14, 16 }
 0x257   : > { %v1843_v61 = vadd.f32 %v1795_v33, %v1474_v47  ;;  %v9926_v47 = vld [vmem:[%s10337_s18 + $0x40] sm:$0xff] }
 0x258   : > { %v2033_v34 = vpop.f32.mrf.mxu1  ;;  %v2532_v39 = vrot.slane %v2530_v3, 3  ;;  %v5261_v32 = vshrl.u32 %v9926_v47, 16 }
 0x259   : > { %9142 = vmatmul.msk.bf16.gmra.mxu0 %vm589_vm1, %v2834_v50  ;;  %v2079_v51 = vadd.f32 %v2031_v62, %v1843_v61  ;;  %v2529_v62 = vrot.slane %v2527_v30, 2  ;;  %v5264_v61 = vshll.u32 %v9926_v47, 16  ;;  %v9927_v47 = vld [vmem:[%s10337_s18 + $0x48] sm:$0xff] }
 0x25a   : > { %9125 = vmatmul.msk.bf16.gmra.mxu3 %vm589_vm1, %v2525_v37  ;;  %v14330_v37 = vrot.slane %v11133_v17, 3  ;;  %v5263_v30 = vrot.slane %v5261_v32, 1  ;;  %v5270_v21 = vshrl.u32 %v9927_v47, 16 }
 0x25b   : > { %v2392_v31 = vpop.f32.mrf.mxu2  ;;  %v5266_v3 = vrot.slane %v5264_v61, 2 }
 0x25c   : > { %v11185_v38 = vadd.f32 %v2392_v31, %v2079_v51  ;;  %v11195_v51 = vor.u32 %v2532_v39, %v2529_v62  ;;  %v2836_v62 = vsel %vm2823_vm7, %v2833_v12, %v14330_v37  ;;  %v11222_v12 = vadd.f32 %v10969_v55, %v10965_v48 }
 0x25d   : > { %v1436_v15 = vpop.f32.mrf.mxu3  ;;  %v14333_v55 = vrot.slane %v11154_v45, 3 }
 0x25e   : > { %14372 = vst [vmem:[#allocation12_spill] sm:$0xff] %v11185_v38  ;;  %v1797_v25 = vpop.f32.mrf.mxu0  ;;  %v11189_v33 = vadd.f32 %v1436_v15, %v10718_v23  ;;  %v11200_v23 = vld [vmem:[%s10337_s18 + $0x58] sm:$0xff]  ;;  %v2534_v39 = vsel %vm2454_vm6, %v2524_v24, %v11195_v51 }
 0x25f   : > { %v1844_v50 = vadd.f32 %v1797_v25, %v1475_v5  ;;  %v2536_v5 = vshrl.u32 %v11200_v23, 16  ;;  %v2539_v15 = vshll.u32 %v11200_v23, 16 }
 0x260   : > { %v2036_v42 = vpop.f32.mrf.mxu1 }
 0x261   : > { %v11191_v10 = vadd.f32 %v2033_v34, %v1844_v50  ;;  %v11205_v34 = vshrl.u32 %v3053_v29, 7  ;;  %v2538_v29 = vrot.slane %v2536_v5, 2 }
 0x263   : > { %14373 = vst [vmem:[#allocation13_spill] sm:$0xff] %v11191_v10  ;;  %9233 = vmatmul.msk.bf16.gmra.mxu1 %vm589_vm1, %v5259_v59  ;;  %v11197_v31 = vpop.f32.mrf.mxu2  ;;  %v3093_v50 = vand.u32 65535, %v11205_v34  ;;  %v2541_v10 = vrot.slane %v2539_v15, 3  ;;  %v3094_v49 = vshrl.u32 %v11205_v34, 16 }
 0x264   : > { %14374 = vst [vmem:[#allocation14_spill] sm:$0xff] %v11197_v31  ;;  %v11217_v31 = vor.u32 %v5266_v3, %v5263_v30  ;;  %v11227_v30 = vadd.f32 %v11009_v2, %v11005_v7  ;;  %v11231_v3 = vadd.f32 %v11045_v63, %v11042_v8 }
 0x265   : > { %v1438_v25 = vpop.f32.mrf.mxu3  ;;  %v3097_v19 = vmul.u32 58254, %v3093_v50  ;;  %v3098_v37 = vmul.u32 14564, %v3094_v49  ;;  %v11239_v15 = vor.u32 %v2541_v10, %v2538_v29  ;;  %v3099_v7 = vmul.u32 58254, %v3094_v49 }
 0x266   : > { %v1800_v59 = vpop.f32.mrf.mxu0  ;;  %v11214_v32 = vadd.f32 %v1438_v25, %v10731_v54  ;;  %v5273_v54 = vshll.u32 %v9927_v47, 16  ;;  %v3096_v25 = vmul.u32 14564, %v3093_v50  ;;  %v5268_v48 = vsel %vm1488_vm5, %v5258_v46, %v11217_v31  ;;  %v11242_v50 = vld [vmem:[%s10337_s18 + $0x60] sm:$0xff] }
 0x267   : > { %v1845_v61 = vadd.f32 %v1800_v59, %v11160_v43  ;;  %v3100_v43 = vshll.u32 %v3097_v19, 16  ;;  %v5272_v47 = vrot.slane %v5270_v21, 1  ;;  %v3102_v2 = vshll.u32 %v3098_v37, 16 }
 0x268   : > { %v2038_v38 = vpop.f32.mrf.mxu1  ;;  %v14331_v46 = vmov 0   ;;  %v11248_v10 = vadd.s32 8, %v11205_v34 }
 0x269   : > { %9143 = vmatmul.msk.bf16.gmra.mxu0 %vm589_vm1, %v2836_v62  ;;  %v2081_v24 = vadd.f32 %v2036_v42, %v1845_v61  ;;  %vm3104_vm8 = vc.u32 %v3096_v25, %v3100_v43  ;;  %v3106_v59 = vadd.s32 %v3100_v43, %v3096_v25  ;;  %v5275_v62 = vrot.slane %v5273_v54, 2  ;;  %4574 = vst [vmem:[#allocation2] sm:$0xf] %v14331_v46  ;;  %v9928_v54 = vld [vmem:[%s10337_s18 + $0x50] sm:$0xff] }
 0x26a   : > { %9126 = vmatmul.msk.bf16.gmra.mxu3 %vm589_vm1, %v2534_v39  ;;  %v2545_v39 = vshrl.u32 %v11242_v50, 16  ;;  %v3105_v61 = vsel %vm3104_vm8, 1, %v14331_v46  ;;  %4575 = vst [vmem:[#allocation2 + $0x4] sm:$0xf] %v14331_v46  ;;  %v3101_v25 = vshrl.u32 %v3097_v19, 16  ;;  %v3103_v19 = vshrl.u32 %v3098_v37, 16 }
 0x26b   : > { %v2397_v5 = vpop.f32.mrf.mxu2  ;;  %v3107_v29 = vadd.s32 %v3105_v61, %v3099_v7  ;;  %vm3108_vm9 = vc.u32 %v3106_v59, %v3102_v2  ;;  %4588 = vst [vmem:[#allocation2 + $0x9c] sm:$0xf] %v14331_v46  ;;  %v3123_v2 = vshrl.u32 %v11248_v10, 16  ;;  %v5279_v37 = vshrl.u32 %v9928_v54, 16 }
 0x26c   : > { %v11237_v42 = vadd.f32 %v2397_v5, %v2081_v24  ;;  %v11257_v24 = vadd.f32 %v11077_v27, %v11073_v20  ;;  %v3109_v43 = vsel %vm3108_vm9, 1, %v14331_v46  ;;  %v3122_v5 = vand.u32 65535, %v11248_v10  ;;  %4589 = vst [vmem:[#allocation2 + $0xa0] sm:$0xf] %v14331_v46 }
 0x26d   : > { %v1441_v8 = vpop.f32.mrf.mxu3  ;;  %v3111_v7 = vadd.s32 %v3109_v43, %v3107_v29  ;;  %v11270_v20 = vadd.f32 %v11099_v28, %v11095_v36  ;;  %v11274_v27 = vadd.f32 %v11120_v35, %v11116_v1  ;;  %v2543_v36 = vsel %vm2454_vm6, %v11195_v51, %v11239_v15 }
 0x26e   : > { %14375 = vst [vmem:[#allocation15_spill] sm:$0xff] %v11237_v42  ;;  %v1802_v63 = vpop.f32.mrf.mxu0  ;;  %v11251_v49 = vadd.f32 %v1441_v8, %v10744_v26  ;;  %v11287_v1 = vmul.u32 14564, %v3123_v2  ;;  %v11289_v35 = vor.u32 %v5275_v62, %v5272_v47  ;;  %v2547_v29 = vrot.slane %v2545_v39, 2 }
 0x26f   : > { %v1846_v21 = vadd.f32 %v1802_v63, %v11171_v13  ;;  %v2548_v13 = vshll.u32 %v11242_v50, 16  ;;  %14377 = vst [vmem:[#allocation17_spill] sm:$0xff] %v11274_v27  ;;  %v14379_v63 = vrot.slane %v11133_v17, 3  ;;  %v3112_v28 = vadd.s32 %v3111_v7, %v3101_v25 }
 0x270   : > { %v2041_v26 = vpop.f32.mrf.mxu1  ;;  %v3128_v25 = vmul.u32 58254, %v3123_v2  ;;  %v3131_v7 = vshll.u32 %v11287_v1, 16  ;;  %v14380_v2 = vmov 0   ;;  %v11305_v27 = vadd.s32 16, %v11205_v34 }
 0x271   : > { %v11263_v8 = vadd.f32 %v2038_v38, %v1846_v21  ;;  %v3126_v38 = vmul.u32 58254, %v3122_v5  ;;  %v2838_v61 = vsel %vm2823_vm7, %v14379_v63, %v14333_v55  ;;  %v3125_v21 = vmul.u32 14564, %v3122_v5  ;;  %v11293_v55 = vld [vmem:[%s10337_s18 + $0x68] sm:$0xff] }
 0x272   : > { %v2550_v43 = vrot.slane %v2548_v13, 3  ;;  %v3113_v46 = vadd.s32 %v3112_v28, %v3103_v19  ;;  %v2554_v51 = vshrl.u32 %v11293_v55, 16  ;;  %v5281_v5 = vrot.slane %v5279_v37, 1 }
 0x273   : > { %14376 = vst [vmem:[#allocation16_spill] sm:$0xff] %v11263_v8  ;;  %9234 = vmatmul.msk.bf16.gmra.mxu1 %vm589_vm1, %v5268_v48  ;;  %v11277_v59 = vpop.f32.mrf.mxu2  ;;  %v5282_v48 = vshll.u32 %v9928_v54, 16  ;;  %v3129_v42 = vshll.u32 %v3126_v38, 16  ;;  %v2557_v54 = vshll.u32 %v11293_v55, 16  ;;  %vm4583_vm8 = vsmask.f32 7942 }
 0x274   : > { %14378 = vst [vmem:[#allocation18_spill] sm:$0xff] %v11277_v59  ;;  %v3114_v39 = vshrl.u32 %v3113_v46, 4  ;;  %vm11349_vm0 = vmand %vm4582_vm14, %vm4583_vm8 }
 0x275   : > { %v1443_v17 = vpop.f32.mrf.mxu3  ;;  %v5284_v13 = vrot.slane %v5282_v48, 2  ;;  %vm3133_vm10 = vc.u32 %v3125_v21, %v3129_v42  ;;  %v3135_v19 = vadd.s32 %v3129_v42, %v3125_v21  ;;  %v5277_v42 = vsel %vm1488_vm5, %v11217_v31, %v11289_v35  ;;  %v9929_v21 = vld [vmem:[%s10337_s18 + $0x58] sm:$0xff] }
 0x276   : > { %v1805_v59 = vpop.f32.mrf.mxu0  ;;  %v11298_v47 = vadd.f32 %v1443_v17, %v10757_v22  ;;  %v3115_v63 = vmul.u32 18, %v3114_v39  ;;  %v3134_v8 = vsel %vm3133_vm10, 1, %v14380_v2  ;;  %v11309_v22 = vadd.f32 %v11144_v52, %v11140_v56 }
 0x277   : > { %v1847_v62 = vadd.f32 %v1805_v59, %v11189_v33  ;;  %v3130_v33 = vshrl.u32 %v3126_v38, 16  ;;  %v3136_v46 = vadd.s32 %v3134_v8, %v3128_v25  ;;  %vm3137_vm11 = vc.u32 %v3135_v19, %v3131_v7 }
 0x278   : > { %14381 = vst [vmem:[#allocation19_spill] sm:$0xff] %v11309_v22  ;;  %v2043_v59 = vpop.f32.mrf.mxu1  ;;  %v3138_v48 = vsel %vm3137_vm11, 1, %v14380_v2  ;;  %v2551_v56 = vor.u32 %v2550_v43, %v2547_v29  ;;  %v11320_v52 = vsub.s32 %v11205_v34, %v3115_v63  ;;  %v14383_v38 = vrot.slane %v11179_v14, 3 }
 0x279   : > { %9144 = vmatmul.msk.bf16.gmra.mxu0 %vm589_vm1, %v2838_v61  ;;  %v2083_v28 = vadd.f32 %v2041_v26, %v1847_v62  ;;  %v2556_v26 = vrot.slane %v2554_v51, 2  ;;  %v2559_v61 = vrot.slane %v2557_v54, 3  ;;  %v3140_v8 = vadd.s32 %v3138_v48, %v3136_v46 }
 0x27a   : > { %9127 = vmatmul.msk.bf16.gmra.mxu3 %vm589_vm1, %v2543_v36  ;;  %v14384_v36 = vrot.slane %v11154_v45, 3  ;;  %v11329_v31 = vor.u32 %v5284_v13, %v5281_v5  ;;  %v3132_v51 = vshrl.u32 %v11287_v1, 16  ;;  %v3151_v7 = vand.u32 65535, %v11305_v27  ;;  %v4579_v5 = vld [vmem:[#allocation2 + $0x8] sm:$0x3] }
 0x27b   : > { %v2402_v37 = vpop.f32.mrf.mxu2  ;;  %v14335_v29 = vrot.slane %v11200_v23, 3  ;;  %v3141_v43 = vadd.s32 %v3140_v8, %v3130_v33  ;;  %v3152_v63 = vshrl.u32 %v11305_v27, 16  ;;  %v14385_v45 = vmov 0  ;;  %v4585_v1 = vld [vmem:[#allocation2 + $0x98] sm:$0xe] }
 0x27c   : > { %v11317_v17 = vadd.f32 %v2402_v37, %v2083_v28  ;;  %v11327_v25 = vsel %vm2823_vm7, %v14384_v36, %v14383_v38  ;;  %v14386_v45 = vsel %vm11338_vm13, 4294967295, %v14385_v45  ;;  %v11342_v13 = vor.u32 %v2559_v61, %v2556_v26 }
 0x27d   : > { %v2691_v39 = vpop.f32.mrf.mxu3  ;;  %14387 = vst [vmem:[#allocation21_spill] sm:$0xff] %v14386_v45  ;;  %v5288_v19 = vshrl.u32 %v9929_v21, 16  ;;  %vm4134_vm15 = vcmp.ne.s32.totalorder %v11320_v52, 0  ;;  %v4580_v28 = vsel %vm11338_vm13, 0, %v4579_v5  ;;  %v5291_v33 = vshll.u32 %v9929_v21, 16 }
 0x27e   : > { %14382 = vst [vmem:[#allocation20_spill] sm:$0xff] %v11317_v17  ;;  %v1807_v62 = vpop.f32.mrf.mxu0  ;;  %v3142_v37 = vadd.s32 %v3141_v43, %v3132_v51  ;;  %v3154_v48 = vmul.u32 14564, %v3151_v7  ;;  %v3155_v8 = vmul.u32 58254, %v3151_v7  ;;  %vm4170_vm9 = vcmp.lt.s32.totalorder %v11320_v52, 0 }
 0x27f   : > { %v1848_v54 = vadd.f32 %v1807_v62, %v11214_v32  ;;  %4581 = vst [vmem:[#allocation2 + $0x8] sm:$0x3] %v4580_v28  ;;  %v4586_v26 = vsel %vm11349_vm0, 0, %v4585_v1  ;;  %v11357_v61 = vmul.u32 14564, %v3152_v63  ;;  %v2552_v38 = vsel %vm2454_vm6, %v11239_v15, %v2551_v56  ;;  %vm11379_vm10 = vmand %vm4170_vm9, %vm4134_vm15 }
 0x280   : > { %4587 = vst [vmem:[#allocation2 + $0x98] sm:$0xe] %v4586_v26  ;;  %v3143_v36 = vshrl.u32 %v3142_v37, 4  ;;  %v3157_v51 = vmul.u32 58254, %v3152_v63  ;;  %v3158_v7 = vshll.u32 %v3155_v8, 16  ;;  %v11372_v62 = vadd.s32 18, %v11320_v52  ;;  %v2046_v5 = vpop.f32.mrf.mxu1 }
 0x281   : > { %v11347_v32 = vadd.f32 %v2043_v59, %v1848_v54  ;;  %v11360_v59 = vadd.s32 24, %v11205_v34  ;;  %v5290_v43 = vrot.slane %v5288_v19, 1  ;;  %v3160_v54 = vshll.u32 %v11357_v61, 16 }
 0x282   : > { %v3144_v63 = vmul.u32 18, %v3143_v36  ;;  %v5293_v1 = vrot.slane %v5291_v33, 2  ;;  %vm3162_vm11 = vc.u32 %v3154_v48, %v3158_v7  ;;  %v14394_v19 = vrot.slane %v11179_v14, 3 }
 0x283   : > { %14388 = vst [vmem:[#allocation22_spill] sm:$0xff] %v11347_v32  ;;  %9235 = vmatmul.msk.bf16.gmra.mxu1 %vm589_vm1, %v5277_v42  ;;  %v11362_v21 = vpop.f32.mrf.mxu2  ;;  %v11369_v42 = vsel %vm1488_vm5, %v11289_v35, %v11329_v31  ;;  %v3164_v35 = vadd.s32 %v3158_v7, %v3154_v48  ;;  %v11394_v45 = vsel %vm2454_vm6, %v2551_v56, %v11342_v13  ;;  %v3163_v17 = vsel %vm3162_vm11, 1, %v14380_v2  ;;  %v11400_v7 = vld [vmem:[%s10337_s18 + $0x70] sm:$0xff] }
 0x284   : > { %14391 = vst [vmem:[#allocation23_spill] sm:$0xff] %v11362_v21  ;;  %v11390_v26 = vsel %vm2823_vm7, %v14394_v19, %v14335_v29  ;;  %v3180_v33 = vand.u32 65535, %v11360_v59  ;;  %v3165_v36 = vadd.s32 %v3163_v17, %v3157_v51  ;;  %v2563_v21 = vshrl.u32 %v11400_v7, 16  ;;  %v9962_v17 = vld [vmem:[%s14322_s2 + $0x40] sm:$0xff] }
 0x285   : > { %v11383_v37 = vpop.f32.mrf.mxu3  ;;  %v3181_v14 = vshrl.u32 %v11360_v59, 16  ;;  %v11405_v19 = vadd.f32 %v2691_v39, %v10810_v44  ;;  %v4278_v56 = vsel %vm11379_vm10, %v11372_v62, %v11320_v52  ;;  %vm3166_vm14 = vc.u32 %v3164_v35, %v3160_v54  ;;  %v9930_v35 = vld [vmem:[%s10337_s18 + $0x60] sm:$0xff]  ;;  %5908 = vmatpush.bf16.msra.mxu2 %v9962_v17 }
 0x286   : > { %v1810_v28 = vpop.f32.mrf.mxu0  ;;  %v2566_v29 = vshll.u32 %v11400_v7, 16  ;;  %v11418_v51 = vsub.s32 %v11248_v10, %v3144_v63  ;;  %v11420_v44 = vor.u32 %v5293_v1, %v5290_v43  ;;  %v3159_v39 = vshrl.u32 %v3155_v8, 16 }
 0x287   : > { %v1849_v48 = vadd.f32 %v1810_v28, %v11251_v49  ;;  %v3161_v15 = vshrl.u32 %v11357_v61, 16  ;;  %v3167_v52 = vsel %vm3166_vm14, 1, %v14380_v2  ;;  %v3183_v62 = vmul.u32 14564, %v3180_v33 }
 0x288   : > { %v3184_v54 = vmul.u32 58254, %v3180_v33  ;;  %v3185_v10 = vmul.u32 14564, %v3181_v14  ;;  %v2568_v43 = vrot.slane %v2566_v29, 3  ;;  %v3186_v8 = vmul.u32 58254, %v3181_v14  ;;  %v2048_v14 = vpop.f32.mrf.mxu1 }
 0x289   : > { %9145 = vmatmul.msk.bf16.gmra.mxu0 %vm589_vm1, %v11327_v25  ;;  %v2085_v49 = vadd.f32 %v2046_v5, %v1849_v48  ;;  %v3169_v25 = vadd.s32 %v3167_v52, %v3165_v36  ;;  %v2565_v48 = vrot.slane %v2563_v21, 2  ;;  %vm4135_vm15 = vcmp.ne.s32.totalorder %v11418_v51, 0 }
 0x28a   : > { %9128 = vmatmul.msk.bf16.gmra.mxu3 %vm589_vm1, %v2552_v38  ;;  %v3187_v1 = vshll.u32 %v3184_v54, 16  ;;  %vm4171_vm8 = vcmp.lt.s32.totalorder %v11418_v51, 0  ;;  %v3189_v33 = vshll.u32 %v3185_v10, 16  ;;  %v5297_v36 = vshrl.u32 %v9930_v35, 16 }
 0x28b   : > { %v2407_v28 = vpop.f32.mrf.mxu2  ;;  %v3170_v61 = vadd.s32 %v3169_v25, %v3159_v39  ;;  %v5300_v17 = vshll.u32 %v9930_v35, 16  ;;  %vm11448_vm11 = vmand %vm4171_vm8, %vm4135_vm15  ;;  %vm11458_vm14 = vcmp.lt.s32.totalorder %v4278_v56, 16 }
 0x28c   : > { %v11427_v63 = vadd.f32 %v2407_v28, %v2085_v49  ;;  %vm3191_vm9 = vc.u32 %v3183_v62, %v3187_v1  ;;  %v3193_v38 = vadd.s32 %v3187_v1, %v3183_v62  ;;  %v3188_v49 = vshrl.u32 %v3184_v54, 16 }
 0x28d   : > { %v2696_v22 = vpop.f32.mrf.mxu3  ;;  %v3171_v52 = vadd.s32 %v3170_v61, %v3161_v15  ;;  %v3192_v29 = vsel %vm3191_vm9, 1, %v14380_v2  ;;  %v5299_v5 = vrot.slane %v5297_v36, 1  ;;  %v11437_v62 = vadd.s32 32, %v11205_v34 }
 0x28e   : > { %14395 = vst [vmem:[#allocation24_spill] sm:$0xff] %v11427_v63  ;;  %v1812_v32 = vpop.f32.mrf.mxu0  ;;  %v3194_v28 = vadd.s32 %v3192_v29, %v3186_v8  ;;  %vm3195_vm10 = vc.u32 %v3193_v38, %v3189_v33  ;;  %v5302_v63 = vrot.slane %v5300_v17, 2  ;;  %v3190_v15 = vshrl.u32 %v3185_v10, 16 }
 0x28f   : > { %v1850_v21 = vadd.f32 %v1812_v32, %v11298_v47  ;;  %v3172_v39 = vshrl.u32 %v3171_v52, 4  ;;  %v3196_v25 = vsel %vm3195_vm10, 1, %v14380_v2  ;;  %v4243_v47 = vadd.s32 18, %v11418_v51 }
 0x290   : > { %v11442_v32 = vor.u32 %v2568_v43, %v2565_v48  ;;  %v3198_v54 = vadd.s32 %v3196_v25, %v3194_v28  ;;  %v11452_v1 = vor.u32 %v5302_v63, %v5299_v5  ;;  %v3209_v61 = vand.u32 65535, %v11437_v62  ;;  %v11470_v5 = vld [vmem:[%s14324_s4] ss:$0 sm:$0xff] }
 0x291   : > { %v11433_v16 = vadd.f32 %v2048_v14, %v1850_v21  ;;  %v3173_v8 = vmul.u32 18, %v3172_v39  ;;  %v2782_v48 = vadd.f32 %v11383_v37, %v10822_v6  ;;  %v11465_v43 = vsel %vm1488_vm5, %v11329_v31, %v11420_v44  ;;  %v11499_v14 = vld [vmem:[%s14325_s5] ss:$0 sm:$0xff] }
 0x292   : > { %v3199_v33 = vadd.s32 %v3198_v54, %v3188_v49  ;;  %v14400_v6 = vrot.slane %v11242_v50, 3  ;;  %v14401_v37 = vrot.slane %v11200_v23, 3  ;;  %v3213_v38 = vmul.u32 58254, %v3209_v61 }
 0x293   : > { %9236 = vmatmul.msk.bf16.gmra.mxu1 %vm589_vm1, %v11369_v42  ;;  %v3210_v42 = vshrl.u32 %v11437_v62, 16  ;;  %v11473_v63 = vsub.s32 %v11305_v27, %v3173_v8  ;;  %v4279_v21 = vsel %vm11448_vm11, %v4243_v47, %v11418_v51  ;;  %v11490_v27 = vsel %vm2454_vm6, %v11342_v13, %v11442_v32 }
 0x294   : > { %v11480_v56 = vsel %vm2823_vm7, %v14401_v37, %v14400_v6  ;;  %v3200_v52 = vadd.s32 %v3199_v33, %v3190_v15  ;;  %v3212_v23 = vmul.u32 14564, %v3209_v61  ;;  %v11493_v49 = vadd.f32 %v2696_v22, %v10839_v4  ;;  %v11510_v4 = vld [vmem:[%s10337_s18 + $0x78] sm:$0xff] }
 0x295   : > { %v11482_v31 = vmul.u32 14564, %v3210_v42  ;;  %v2698_v36 = vpop.f32.mrf.mxu3  ;;  %v11504_v51 = vsel %vm1488_vm5, %v11420_v44, %v11452_v1  ;;  %v11507_v13 = vadd.s32 40, %v11205_v34  ;;  %v3215_v39 = vmul.u32 58254, %v3210_v42 }
 0x296   : > { %v2927_v17 = vpop.f32.mrf.mxu0  ;;  %v3201_v28 = vshrl.u32 %v3200_v52, 4  ;;  %v3216_v25 = vshll.u32 %v3213_v38, 16  ;;  %v2572_v22 = vshrl.u32 %v11510_v4, 16  ;;  %vm4136_vm15 = vcmp.ne.s32.totalorder %v11473_v63, 0 }
 0x297   : > { %v3017_v29 = vadd.f32 %v2927_v17, %v11405_v19  ;;  %vm4172_vm8 = vcmp.lt.s32.totalorder %v11473_v63, 0  ;;  %v3218_v44 = vshll.u32 %v11482_v31, 16  ;;  %v2575_v54 = vshll.u32 %v11510_v4, 16 }
 0x298   : > { %v3202_v47 = vmul.u32 18, %v3201_v28  ;;  %vm3220_vm9 = vc.u32 %v3212_v23, %v3216_v25  ;;  %v3222_v15 = vadd.s32 %v3216_v25, %v3212_v23  ;;  %v4244_v8 = vadd.s32 18, %v11473_v63  ;;  %vm11529_vm11 = vmand %vm4172_vm8, %vm4136_vm15 }
 0x299   : > { %v4354_v19 = vmul.f32 %v11470_v5, %v3017_v29  ;;  %9146 = vmatmul.msk.bf16.gmra.mxu0 %vm589_vm1, %v11390_v26  ;;  %v3217_v61 = vshrl.u32 %v3213_v38, 16  ;;  %v3221_v26 = vsel %vm3220_vm9, 1, %v14380_v2  ;;  %vm11525_vm10 = vcmp.lt.s32.totalorder %v4279_v21, 16 }
 0x29a   : > { %9129 = vmatmul.msk.bf16.gmra.mxu3 %vm589_vm1, %v11394_v45  ;;  %v11534_v6 = vsub.s32 %v11360_v59, %v3202_v47  ;;  %v3223_v37 = vadd.s32 %v3221_v26, %v3215_v39  ;;  %vm3224_vm4 = vc.u32 %v3222_v15, %v3218_v44  ;;  %v2845_v45 = vrot.slane %v11293_v55, 3 }
 0x29b   : > { %v4394_v35 = vadd.f32 %v11499_v14, %v4354_v19  ;;  %v3225_v38 = vsel %vm3224_vm4, 1, %v14380_v2  ;;  %v2574_v52 = vrot.slane %v2572_v22, 2  ;;  %v3238_v21 = vand.u32 65535, %v11507_v13 }
 0x29c   : > { %v11540_v23 = vadd.f32 %v2698_v36, %v10848_v18  ;;  %v3219_v25 = vshrl.u32 %v11482_v31, 16  ;;  %v3227_v19 = vadd.s32 %v3225_v38, %v3223_v37  ;;  %v3239_v59 = vshrl.u32 %v11507_v13, 16 }
 0x29d   : > { %v4430_v17 = vmax.f32 %v4394_v35, 0.0  ;;  %v2701_v29 = vpop.f32.mrf.mxu3  ;;  %v4280_v22 = vsel %vm11529_vm11, %v4244_v8, %v11473_v63  ;;  %v2577_v47 = vrot.slane %v2575_v54, 3  ;;  %vm4137_vm4 = vcmp.ne.s32.totalorder %v11534_v6, 0 }
 0x29e   : > { %v2929_v28 = vpop.f32.mrf.mxu0  ;;  %v3228_v18 = vadd.s32 %v3227_v19, %v3217_v61  ;;  %v14406_v31 = vrot.slane %v11242_v50, 3  ;;  %v11559_v35 = vmul.u32 58254, %v3238_v21  ;;  %vm4628_vm15 = vsmask.f32 5392 }
 0x29f   : > { %v4538_v39 = vsel %vm11458_vm14, %v4430_v17, 0.0  ;;  %v3018_v44 = vadd.f32 %v2929_v28, %v2782_v48  ;;  %vm4173_vm14 = vcmp.lt.s32.totalorder %v11534_v6, 0  ;;  %v3241_v48 = vmul.u32 14564, %v3238_v21 }
 0x2a0   : > { %v4592_v15 = vpack.c.bf16 %v4538_v39, %v4538_v39  ;;  %v11555_v36 = vsel %vm2823_vm7, %v14406_v31, %v2845_v45  ;;  %v3229_v8 = vadd.s32 %v3228_v18, %v3219_v25  ;;  %v11563_v61 = vmul.u32 14564, %v3239_v59  ;;  %vm11578_vm9 = vmand %vm4173_vm14, %vm4137_vm4 }
 0x2a1   : > { %v4355_v10 = vmul.f32 %v11470_v5, %v3018_v44  ;;  %v4245_v26 = vadd.s32 18, %v11534_v6  ;;  %v11567_v33 = vor.u32 %v2577_v47, %v2574_v52  ;;  %v3245_v37 = vshll.u32 %v11559_v35, 16  ;;  %v5026_v52 = vld [vmem:[#allocation2 + $0x8] sm:$0xe] }
 0x2a2   : > { %v4631_v63 = vshrl.u32 %v4592_v15, 16  ;;  %v4634_v54 = vshll.u32 %v4592_v15, 16  ;;  %vm11570_vm8 = vcmp.lt.s32.totalorder %v4280_v22, 16  ;;  %v3230_v28 = vshrl.u32 %v3229_v8, 4  ;;  %v9931_v22 = vld [vmem:[%s10337_s18 + $0x68] sm:$0xff] }
 0x2a3   : > { %9237 = vmatmul.msk.bf16.gmra.mxu1 %vm589_vm1, %v11465_v43  ;;  %v4395_v50 = vadd.f32 %v11499_v14, %v4355_v10  ;;  %v3244_v25 = vmul.u32 58254, %v3239_v59  ;;  %v3247_v39 = vshll.u32 %v11563_v61, 16  ;;  %vm3249_vm11 = vc.u32 %v3241_v48, %v3245_v37 }
 0x2a4   : > { %v4633_v17 = vrot.slane %v4631_v63, 6  ;;  %v4636_v38 = vrot.slane %v4634_v54, 7  ;;  %v3251_v44 = vadd.s32 %v3245_v37, %v3241_v48  ;;  %v11585_v15 = vadd.f32 %v2701_v29, %v10861_v41  ;;  %v10065_v41 = vld [vmem:[#allocation2] sm:$0xff]  }
 0x2a5   : > { %v4431_v19 = vmax.f32 %v4395_v50, 0.0  ;;  %v2703_v18 = vpop.f32.mrf.mxu3  ;;  %v3231_v10 = vmul.u32 18, %v3230_v28  ;;  %v3250_v63 = vsel %vm3249_vm11, 1, %v14380_v2  ;;  %v4281_v8 = vsel %vm11578_vm9, %v4245_v26, %v11534_v6  ;;  %vm11624_vm9 = vmor %vm4577_vm12, %vm4628_vm15 }
 0x2a6   : > { %v4637_v47 = vor.u32 %v4636_v38, %v4633_v17  ;;  %v2932_v31 = vpop.f32.mrf.mxu0  ;;  %v11597_v48 = vsel %vm2454_vm6, %v11442_v32, %v11567_v33  ;;  %v3252_v42 = vadd.s32 %v3250_v63, %v3244_v25  ;;  %v9961_v32 = vld [vmem:[%s14322_s2 + $0x38] sm:$0xff]  ;;  %v3246_v6 = vshrl.u32 %v11559_v35, 16 }
 0x2a7   : > { %v4539_v54 = vsel %vm11525_vm10, %v4431_v19, 0.0  ;;  %v3019_v59 = vadd.f32 %v2932_v31, %v11493_v49  ;;  %v11602_v37 = vsub.s32 %v11437_v62, %v3231_v10  ;;  %vm3253_vm10 = vc.u32 %v3251_v44, %v3247_v39  ;;  %6066 = vmatpush.bf16.msrb.mxu3 %v9961_v32 }
 0x2a8   : > { %v5027_v29 = vsel %vm11349_vm0, %v4637_v47, %v5026_v52  ;;  %v4593_v50 = vpack.c.bf16 %v4539_v54, %v4539_v54  ;;  %v5306_v46 = vshrl.u32 %v9931_v22, 16  ;;  %v3248_v62 = vshrl.u32 %v11563_v61, 16 }
 0x2a9   : > { %5028 = vst [vmem:[#allocation2 + $0x8] sm:$0xe] %v5027_v29  ;;  %v4356_v49 = vmul.f32 %v11470_v5, %v3019_v59  ;;  %9147 = vmatmul.msk.bf16.gmra.mxu0 %vm589_vm1, %v11480_v56  ;;  %v5690_v38 = vshll.u32 %v10065_v41, 16  ;;  %vm4138_vm0 = vcmp.ne.s32.totalorder %v11602_v37, 0  ;;  %vm4174_vm4 = vcmp.lt.s32.totalorder %v11602_v37, 0 }
 0x2aa   : > { %v4640_v26 = vshrl.u32 %v4593_v50, 16  ;;  %v4643_v17 = vshll.u32 %v4593_v50, 16  ;;  %9130 = vmatmul.msk.bf16.gmra.mxu3 %vm589_vm1, %v11490_v27  ;;  %v3254_v56 = vsel %vm3253_vm10, 1, %v14380_v2  ;;  %vm11618_vm14 = vcmp.lt.s32.totalorder %v4281_v8, 16  ;;  %vm11633_vm11 = vmand %vm4174_vm4, %vm4138_vm0 }
 0x2ab   : > { %v4396_v43 = vadd.f32 %v11499_v14, %v4356_v49  ;;  %v3256_v61 = vadd.s32 %v3254_v56, %v3252_v42  ;;  %v5688_v52 = vshrl.u32 %v10065_v41, 16  ;;  %v4246_v39 = vadd.s32 18, %v11602_v37 }
 0x2ac   : > { %v4642_v28 = vrot.slane %v4640_v26, 6  ;;  %v4645_v35 = vrot.slane %v4643_v17, 7  ;;  %v5308_v44 = vrot.slane %v5306_v46, 1  ;;  %v5309_v31 = vshll.u32 %v9931_v22, 16 }
 0x2ad   : > { %v4432_v27 = vmax.f32 %v4396_v43, 0.0  ;;  %v4638_v10 = vrot.slane %v4637_v47, 4  ;;  %v2706_v54 = vpop.f32.mrf.mxu3  ;;  %v3257_v41 = vadd.s32 %v3256_v61, %v3246_v6  ;;  %v11638_v29 = vadd.s32 48, %v11205_v34 }
 0x2ae   : > { %v4646_v63 = vor.u32 %v4645_v35, %v4642_v28  ;;  %v2934_v59 = vpop.f32.mrf.mxu0  ;;  %v5692_v47 = vrot.slane %v5690_v38, 1  ;;  %v5311_v42 = vrot.slane %v5309_v31, 2  ;;  %v11646_v32 = vadd.f32 %v2703_v18, %v10870_v9  ;;  %v9977_v9 = vld [vmem:[%s14322_s2 + $0xb8] sm:$0xff] }
 0x2af   : > { %v4540_v50 = vsel %vm11570_vm8, %v4432_v27, 0.0  ;;  %v3020_v22 = vadd.f32 %v2934_v59, %v11540_v23  ;;  %v3258_v26 = vadd.s32 %v3257_v41, %v3248_v62  ;;  %v4282_v21 = vsel %vm11633_vm11, %v4246_v39, %v11602_v37  ;;  %v10010_v23 = vld [vmem:[%s14322_s2 + $0x138] sm:$0xff]  ;;  %6289 = vmatpush.bf16.msrb.mxu0 %v9977_v9 }
 0x2b0   : > { %v4647_v49 = vsel %vm11624_vm9, %v4638_v10, %v4646_v63  ;;  %v4594_v46 = vpack.c.bf16 %v4540_v50, %v4540_v50  ;;  %v11655_v17 = vor.u32 %v5311_v42, %v5308_v44  ;;  %v10002_v18 = vld [vmem:[%s14322_s2 + $0xf8] sm:$0xff]  ;;  %v3267_v62 = vand.u32 65535, %v11638_v29  ;;  %7066 = vmatpush.bf16.msrb.mxu2 %v10010_v23 }
 0x2b1   : > { %5029 = vst [vmem:[#allocation2 + $0xc] sm:$0xf] %v4647_v49  ;;  %v4357_v6 = vmul.f32 %v11470_v5, %v3020_v22  ;;  %v3259_v37 = vshrl.u32 %v3258_v26, 4  ;;  %v3268_v56 = vshrl.u32 %v11638_v29, 16  ;;  %v5693_v35 = vor.u32 %v5692_v47, %v5688_v52  ;;  %6674 = vmatpush.bf16.msrb.mxu1 %v10002_v18 }
 0x2b2   : > { %v4650_v38 = vshrl.u32 %v4594_v46, 16  ;;  %v4653_v43 = vshll.u32 %v4594_v46, 16  ;;  %v3270_v61 = vmul.u32 14564, %v3267_v62  ;;  %v11668_v27 = vmul.u32 58254, %v3267_v62 }
 0x2b3   : > { %9238 = vmatmul.msk.bf16.gmra.mxu1 %vm589_vm1, %v11504_v51  ;;  %v4397_v28 = vadd.f32 %v11499_v14, %v4357_v6  ;;  %v3260_v31 = vmul.u32 18, %v3259_v37  ;;  %v11670_v10 = vmul.u32 14564, %v3268_v56  ;;  %v11673_v59 = vadd.f32 %v2706_v54, %v10886_v11 }
 0x2b4   : > { %v4652_v39 = vrot.slane %v4650_v38, 6  ;;  %v4655_v44 = vrot.slane %v4653_v43, 7  ;;  %vm11675_vm12 = vcmp.lt.s32.totalorder %v4282_v21, 16  ;;  %v3274_v52 = vshll.u32 %v11668_v27, 16 }
 0x2b5   : > { %v4433_v51 = vmax.f32 %v4397_v28, 0.0  ;;  %v4648_v41 = vrot.slane %v4646_v63, 4  ;;  %v2708_v22 = vpop.f32.mrf.mxu3  ;;  %v3261_v42 = vsub.s32 %v11507_v13, %v3260_v31  ;;  %v5313_v49 = vsel %vm1488_vm5, %v11452_v1, %v11655_v17 }
 0x2b6   : > { %v4656_v50 = vor.u32 %v4655_v44, %v4652_v39  ;;  %v2937_v47 = vpop.f32.mrf.mxu0  ;;  %v3273_v46 = vmul.u32 58254, %v3268_v56  ;;  %vm3278_vm15 = vc.u32 %v3270_v61, %v3274_v52  ;;  %v3275_v21 = vshrl.u32 %v11668_v27, 16  ;;  %v11707_v44 = vpop.f32.mrf.mxu1 }
 0x2b7   : > { %v4541_v11 = vsel %vm11618_vm14, %v4433_v51, 0.0  ;;  %v3021_v54 = vadd.f32 %v2937_v47, %v11585_v15  ;;  %v3276_v13 = vshll.u32 %v11670_v10, 16  ;;  %vm4139_vm8 = vcmp.ne.s32.totalorder %v3261_v42, 0  ;;  %14421 = vst [vmem:[#allocation25_spill] sm:$0xff] %v11707_v44 }
 0x2b8   : > { %v4657_v26 = vsel %vm11624_vm9, %v4648_v41, %v4656_v50  ;;  %v4595_v63 = vpack.c.bf16 %v4541_v11, %v4541_v11  ;;  %v11689_v6 = vld [vmem:[#allocation2 + $0x8] sm:$0xff]  ;;  %vm4175_vm10 = vcmp.lt.s32.totalorder %v3261_v42, 0  ;;  %v3279_v15 = vsel %vm3278_vm15, 1, %v14380_v2 }
 0x2b9   : > { %5030 = vst [vmem:[#allocation2 + $0x10] sm:$0xf] %v4657_v26  ;;  %v4358_v1 = vmul.f32 %v11470_v5, %v3021_v54  ;;  %9148 = vmatmul.msk.bf16.gmra.mxu0 %vm589_vm1, %v11555_v36  ;;  %v5695_v9 = vshll.u32 %v11689_v6, 16  ;;  %v3280_v18 = vadd.s32 %v3274_v52, %v3270_v61  ;;  %v4247_v38 = vadd.s32 18, %v3261_v42  ;;  %vm11703_vm0 = vmand %vm4175_vm10, %vm4139_vm8 }
 0x2ba   : > { %v4660_v25 = vshrl.u32 %v4595_v63, 16  ;;  %v4663_v23 = vshll.u32 %v4595_v63, 16  ;;  %9131 = vmatmul.msk.bf16.gmra.mxu3 %vm589_vm1, %v11597_v48  ;;  %v3277_v43 = vshrl.u32 %v11670_v10, 16  ;;  %v3281_v37 = vadd.s32 %v3279_v15, %v3273_v46  ;;  %v11711_v48 = vld [vmem:[%s10337_s18 + $0x80] sm:$0xff] }
 0x2bb   : > { %v4398_v62 = vadd.f32 %v11499_v14, %v4358_v1  ;;  %v4658_v36 = vrot.slane %v4656_v50, 4  ;;  %v5697_v39 = vrot.slane %v5695_v9, 1  ;;  %vm3282_vm4 = vc.u32 %v3280_v18, %v3276_v13  ;;  %v11734_v9 = vld [vmem:[%s10337_s18 + $0x70] sm:$0xff] }
 0x2bc   : > { %v4662_v56 = vrot.slane %v4660_v25, 6  ;;  %v4665_v28 = vrot.slane %v4663_v23, 7  ;;  %v2847_v31 = vrot.slane %v11400_v7, 3  ;;  %v2581_v10 = vshrl.u32 %v11711_v48, 16 }
 0x2bd   : > { %v4434_v61 = vmax.f32 %v4398_v62, 0.0  ;;  %v11714_v52 = vpop.f32.mrf.mxu3  ;;  %v5698_v50 = vsel %vm440_vm3, %v5693_v35, %v5697_v39  ;;  %v3283_v47 = vsel %vm3282_vm4, 1, %v14380_v2  ;;  %v2584_v11 = vshll.u32 %v11711_v48, 16 }
 0x2be   : > { %v4666_v51 = vor.u32 %v4665_v28, %v4662_v56  ;;  %v2939_v41 = vpop.f32.mrf.mxu0  ;;  %v4283_v26 = vsel %vm11703_vm0, %v4247_v38, %v3261_v42  ;;  %5909 = vmatmul.bf16.vlgmr.msra.gmra.mxu2 %v5698_v50  ;;  %v3285_v63 = vadd.s32 %v3283_v47, %v3281_v37  ;;  %v11727_v35 = vadd.f32 %v2708_v22, %v10895_v58 }
 0x2bf   : > { %v4542_v54 = vsel %vm11675_vm12, %v4434_v61, 0.0  ;;  %v3022_v46 = vadd.f32 %v2939_v41, %v11646_v32  ;;  %v2583_v15 = vrot.slane %v2581_v10, 2  ;;  %v2586_v23 = vrot.slane %v2584_v11, 3 }
 0x2c0   : > { %v4667_v13 = vsel %vm11624_vm9, %v4658_v36, %v4666_v51  ;;  %v4596_v1 = vpack.c.bf16 %v4542_v54, %v4542_v54  ;;  %v3286_v8 = vadd.s32 %v3285_v63, %v3275_v21  ;;  %v11731_v32 = vadd.s32 56, %v11205_v34 }
 0x2c1   : > { %5031 = vst [vmem:[#allocation2 + $0x14] sm:$0xf] %v4667_v13  ;;  %v4359_v25 = vmul.f32 %v11470_v5, %v3022_v46  ;;  %vm11736_vm14 = vcmp.lt.s32.totalorder %v4283_v26, 16  ;;  %v2848_v58 = vsel %vm2823_vm7, %v2845_v45, %v2847_v31  ;;  %v4668_v22 = vrot.slane %v4666_v51, 4 }
 0x2c2   : > { %v4670_v42 = vshrl.u32 %v4596_v1, 16  ;;  %v4673_v18 = vshll.u32 %v4596_v1, 16  ;;  %v3287_v38 = vadd.s32 %v3286_v8, %v3277_v43  ;;  %v3296_v37 = vand.u32 65535, %v11731_v32  ;;  %v11755_v43 = vpop.f32.mrf.mxu1 }
 0x2c3   : > { %9239 = vmatmul.msk.bf16.gmra.mxu1 %vm589_vm1, %v5313_v49  ;;  %v4399_v21 = vadd.f32 %v11499_v14, %v4359_v25  ;;  %v11748_v28 = vor.u32 %v2586_v23, %v2583_v15  ;;  %v3297_v27 = vshrl.u32 %v11731_v32, 16  ;;  %v5699_v10 = vshrl.u32 %v11689_v6, 16  ;;  %14424 = vst [vmem:[#allocation26_spill] sm:$0xff] %v11755_v43 }
 0x2c4   : > { %v4672_v36 = vrot.slane %v4670_v42, 6  ;;  %v4675_v56 = vrot.slane %v4673_v18, 7  ;;  %v3288_v49 = vshrl.u32 %v3287_v38, 4  ;;  %v5315_v55 = vshrl.u32 %v11734_v9, 16 }
 0x2c5   : > { %v4435_v61 = vmax.f32 %v4399_v21, 0.0  ;;  %v3299_v51 = vmul.u32 14564, %v3296_v37  ;;  %v3300_v50 = vmul.u32 58254, %v3296_v37  ;;  %v11753_v47 = vmul.u32 14564, %v3297_v27  ;;  %v11759_v54 = vpop.f32.mrf.mxu3 }
 0x2c6   : > { %v4676_v41 = vor.u32 %v4675_v56, %v4672_v36  ;;  %v2942_v45 = vpop.f32.mrf.mxu0  ;;  %v3289_v26 = vmul.u32 18, %v3288_v49  ;;  %v5701_v63 = vor.u32 %v5699_v10, %v5697_v39  ;;  %v2588_v1 = vsel %vm2454_vm6, %v11567_v33, %v11748_v28 }
 0x2c7   : > { %v4543_v11 = vsel %vm11736_vm14, %v4435_v61, 0.0  ;;  %v3023_v46 = vadd.f32 %v2942_v45, %v11673_v59  ;;  %v3303_v15 = vshll.u32 %v3300_v50, 16  ;;  %v3302_v59 = vmul.u32 58254, %v3297_v27 }
 0x2c8   : > { %v4677_v6 = vsel %vm11624_vm9, %v4668_v22, %v4676_v41  ;;  %v4597_v13 = vpack.c.bf16 %v4543_v11, %v4543_v11  ;;  %v4678_v25 = vrot.slane %v4676_v41, 4  ;;  %v3290_v8 = vsub.s32 %v11638_v29, %v3289_v26  ;;  %v11770_v42 = vld [vmem:[#allocation2 + $0x10] sm:$0xff] }
 0x2c9   : > { %5032 = vst [vmem:[#allocation2 + $0x18] sm:$0xf] %v4677_v6  ;;  %v4360_v23 = vmul.f32 %v11470_v5, %v3023_v46  ;;  %9149 = vmatmul.msk.bf16.gmra.mxu0 %vm589_vm1, %v2848_v58  ;;  %v3305_v62 = vshll.u32 %v11753_v47, 16  ;;  %vm3307_vm11 = vc.u32 %v3299_v51, %v3303_v15  ;;  %v3309_v38 = vadd.s32 %v3303_v15, %v3299_v51 }
 0x2ca   : > { %v4680_v39 = vshrl.u32 %v4597_v13, 16  ;;  %v4683_v18 = vshll.u32 %v4597_v13, 16  ;;  %vm4140_vm12 = vcmp.ne.s32.totalorder %v3290_v8, 0  ;;  %vm4176_vm15 = vcmp.lt.s32.totalorder %v3290_v8, 0  ;;  %9132 = vmatmul.msk.bf16.gmra.mxu3 %vm589_vm1, %v2588_v1  ;;  %v11782_v1 = vpop.f32.mrf.mxu1 }
 0x2cb   : > { %v4248_v33 = vadd.s32 18, %v3290_v8  ;;  %v4400_v22 = vadd.f32 %v11499_v14, %v4360_v23  ;;  %vm4212_vm8 = vmand %vm4176_vm15, %vm4140_vm12  ;;  %v3308_v58 = vsel %vm3307_vm11, 1, %v14380_v2  ;;  %v5703_v27 = vshll.u32 %v11770_v42, 16  ;;  %14425 = vst [vmem:[#allocation27_spill] sm:$0xff] %v11782_v1 }
 0x2cc   : > { %v4682_v29 = vrot.slane %v4680_v39, 6  ;;  %v4685_v21 = vrot.slane %v4683_v18, 7  ;;  %v3310_v56 = vadd.s32 %v3308_v58, %v3302_v59  ;;  %v3304_v10 = vshrl.u32 %v3300_v50, 16 }
 0x2cd   : > { %v4284_v37 = vsel %vm4212_vm8, %v4248_v33, %v3290_v8  ;;  %v4436_v36 = vmax.f32 %v4400_v22, 0.0  ;;  %vm3311_vm0 = vc.u32 %v3309_v38, %v3305_v62  ;;  %v3306_v11 = vshrl.u32 %v11753_v47, 16  ;;  %v2716_v15 = vpop.f32.mrf.mxu3 }
 0x2ce   : > { %v4686_v61 = vor.u32 %v4685_v21, %v4682_v29  ;;  %vm4320_vm10 = vcmp.lt.s32.totalorder %v4284_v37, 16  ;;  %v2944_v49 = vpop.f32.mrf.mxu0  ;;  %v3312_v46 = vsel %vm3311_vm0, 1, %v14380_v2  ;;  %v5317_v13 = vrot.slane %v5315_v55, 1 }
 0x2cf   : > { %v4544_v41 = vsel %vm4320_vm10, %v4436_v36, 0.0  ;;  %v3024_v45 = vadd.f32 %v2944_v49, %v11727_v35  ;;  %v3314_v6 = vadd.s32 %v3312_v46, %v3310_v56  ;;  %v11785_v8 = vrot.slane %v5703_v27, 1 }
 0x2d0   : > { %v4687_v51 = vsel %vm11624_vm9, %v4678_v25, %v4686_v61  ;;  %v4598_v26 = vpack.c.bf16 %v4544_v41, %v4544_v41  ;;  %v5318_v35 = vshll.u32 %v11734_v9, 16  ;;  %v11789_v47 = vadd.s32 64, %v11205_v34 }
 0x2d1   : > { %5033 = vst [vmem:[#allocation2 + $0x1c] sm:$0xf] %v4687_v51  ;;  %v4361_v50 = vmul.f32 %v11470_v5, %v3024_v45  ;;  %v2789_v23 = vadd.f32 %v11714_v52, %v10908_v0  ;;  %v3315_v39 = vadd.s32 %v3314_v6, %v3304_v10  ;;  %v5706_v18 = vsel %vm440_vm3, %v5701_v63, %v11785_v8 }
 0x2d2   : > { %v4690_v25 = vshrl.u32 %v4598_v26, 16  ;;  %v4693_v59 = vshll.u32 %v4598_v26, 16  ;;  %v5320_v62 = vrot.slane %v5318_v35, 2  ;;  %v3325_v33 = vand.u32 65535, %v11789_v47  ;;  %5914 = vmatmul.bf16.gmra.mxu2 %v5706_v18  ;;  %v11823_v35 = vpop.f32.mrf.mxu1 }
 0x2d3   : > { %v11794_v55 = vadd.f32 %v11499_v14, %v4361_v50  ;;  %v3316_v29 = vadd.s32 %v3315_v39, %v3306_v11  ;;  %v3326_v21 = vshrl.u32 %v11789_v47, 16  ;;  %v4688_v58 = vrot.slane %v4686_v61, 4  ;;  %14426 = vst [vmem:[#allocation28_spill] sm:$0xff] %v11823_v35 }
 0x2d4   : > { %v4692_v22 = vrot.slane %v4690_v25, 6  ;;  %v4695_v9 = vrot.slane %v4693_v59, 7  ;;  %v11800_v0 = vor.u32 %v5320_v62, %v5317_v13  ;;  %v3328_v52 = vmul.u32 14564, %v3325_v33  ;;  %v11827_v59 = vld [vmem:[%s10337_s18 + $0x88] sm:$0xff] }
 0x2d5   : > { %v3329_v38 = vmul.u32 58254, %v3325_v33  ;;  %v3317_v36 = vshrl.u32 %v3316_v29, 4  ;;  %v3330_v27 = vmul.u32 14564, %v3326_v21  ;;  %v2849_v63 = vrot.slane %v11510_v4, 3 }
 0x2d6   : > { %v11802_v37 = vor.u32 %v4695_v9, %v4692_v22  ;;  %v2947_v56 = vpop.f32.mrf.mxu0  ;;  %v5322_v49 = vsel %vm1488_vm5, %v11655_v17, %v11800_v0  ;;  %v3331_v41 = vmul.u32 58254, %v3326_v21  ;;  %v2790_v61 = vadd.f32 %v11759_v54, %v10917_v60  ;;  %v14427_v22 = vld [vmem:[#allocation3_spill] sm:$0xff]  ;;  %v14428_v21 = vld [vmem:[#allocation4_spill] sm:$0xff] }
 0x2d7   : > { %v3025_v10 = vadd.f32 %v2947_v56, %v2789_v23  ;;  %v3332_v45 = vshll.u32 %v3329_v38, 16  ;;  %v3318_v46 = vmul.u32 18, %v3317_v36  ;;  %v4437_v51 = vmax.f32 %v11794_v55, 0.0  ;;  %9240 = vmatmul.msk.bf16.gmra.mxu1 %vm589_vm1, %v5322_v49  ;;  %v2718_v23 = vpop.f32.mrf.mxu3 }
 0x2d8   : > { %v4697_v11 = vsel %vm11624_vm9, %v4688_v58, %v11802_v37  ;;  %v3333_v26 = vshrl.u32 %v3329_v38, 16  ;;  %v3334_v6 = vshll.u32 %v3330_v27, 16  ;;  %v2850_v54 = vsel %vm2823_vm7, %v2847_v31, %v2849_v63  ;;  %v11841_v36 = vld [vmem:[#allocation2 + $0x18] sm:$0xff] }
 0x2d9   : > { %5034 = vst [vmem:[#allocation2 + $0x20] sm:$0xf] %v4697_v11  ;;  %vm3336_vm4 = vc.u32 %v3328_v52, %v3332_v45  ;;  %v3338_v17 = vadd.s32 %v3332_v45, %v3328_v52  ;;  %v3319_v13 = vsub.s32 %v11731_v32, %v3318_v46  ;;  %v4362_v60 = vmul.f32 %v11470_v5, %v3025_v10 }
 0x2da   : > { %v3337_v50 = vsel %vm3336_vm4, 1, %v14380_v2  ;;  %9150 = vmatmul.msk.bf16.gmra.mxu0 %vm589_vm1, %v2850_v54  ;;  %v2590_v32 = vshrl.u32 %v11827_v59, 16  ;;  %v2593_v39 = vshll.u32 %v11827_v59, 16  ;;  %v3335_v31 = vshrl.u32 %v3330_v27, 16 }
 0x2db   : > { %v3339_v25 = vadd.s32 %v3337_v50, %v3331_v41  ;;  %vm3340_vm14 = vc.u32 %v3338_v17, %v3334_v6  ;;  %vm4141_vm11 = vcmp.ne.s32.totalorder %v3319_v13, 0  ;;  %vm4177_vm12 = vcmp.lt.s32.totalorder %v3319_v13, 0 }
 0x2dc   : > { %v4249_v55 = vadd.s32 18, %v3319_v13  ;;  %v3341_v7 = vsel %vm3340_vm14, 1, %v14380_v2  ;;  %vm4213_vm15 = vmand %vm4177_vm12, %vm4141_vm11  ;;  %v2592_v62 = vrot.slane %v2590_v32, 2  ;;  %v2595_v33 = vrot.slane %v2593_v39, 3  ;;  %v9933_v39 = vld [vmem:[%s10337_s18 + $0x78] sm:$0xff] }
 0x2dd   : > { %v3343_v18 = vadd.s32 %v3341_v7, %v3339_v25  ;;  %v11833_v9 = vadd.f32 %v2716_v15, %v14427_v22  ;;  %v11836_v58 = vadd.f32 %v2718_v23, %v14428_v21  ;;  %v11839_v38 = vadd.s32 72, %v11205_v34 }
 0x2de   : > { %v4285_v29 = vsel %vm4213_vm15, %v4249_v55, %v3319_v13  ;;  %v2949_v52 = vpop.f32.mrf.mxu0  ;;  %v4698_v56 = vrot.slane %v11802_v37, 4  ;;  %v11844_v49 = vor.u32 %v2595_v33, %v2592_v62  ;;  %v11847_v15 = vadd.f32 %v11499_v14, %v4362_v60  ;;  %v11860_v55 = vpop.f32.mrf.mxu1 }
 0x2df   : > { %vm4321_vm8 = vcmp.lt.s32.totalorder %v4285_v29, 16  ;;  %v3344_v27 = vadd.s32 %v3343_v18, %v3333_v26  ;;  %v3026_v41 = vadd.f32 %v2949_v52, %v2790_v61  ;;  %v3354_v45 = vand.u32 65535, %v11839_v38  ;;  %14429 = vst [vmem:[#allocation3_spill] sm:$0xff] %v11860_v55  ;;  %v2721_v62 = vpop.f32.mrf.mxu3  ;;  %v9960_v29 = vld [vmem:[%s14322_s2 + $0x30] sm:$0xff] }
 0x2e0   : > { %v4545_v10 = vsel %vm4321_vm8, %v4437_v51, 0.0  ;;  %v2597_v6 = vsel %vm2454_vm6, %v11748_v28, %v11844_v49  ;;  %v3355_v37 = vshrl.u32 %v11839_v38, 16  ;;  %v5707_v51 = vshrl.u32 %v11770_v42, 16  ;;  %v10009_v52 = vld [vmem:[%s14322_s2 + $0x130] sm:$0xff]  ;;  %6067 = vmatpush.bf16.msrb.mxu3 %v9960_v29 }
 0x2e1   : > { %v4599_v11 = vpack.c.bf16 %v4545_v10, %v4545_v10  ;;  %v3345_v46 = vadd.s32 %v3344_v27, %v3335_v31  ;;  %9133 = vmatmul.msk.bf16.gmra.mxu3 %vm589_vm1, %v2597_v6  ;;  %v3357_v26 = vmul.u32 14564, %v3354_v45  ;;  %v3358_v17 = vmul.u32 58254, %v3354_v45  ;;  %7067 = vmatpush.bf16.msrb.mxu2 %v10009_v52 }
 0x2e2   : > { %v5711_v13 = vshll.u32 %v11841_v36, 16  ;;  %v3359_v54 = vmul.u32 14564, %v3355_v37  ;;  %v4438_v23 = vmax.f32 %v11847_v15, 0.0  ;;  %v3360_v25 = vmul.u32 58254, %v3355_v37 }
 0x2e3   : > { %v4700_v61 = vshrl.u32 %v4599_v11, 16  ;;  %v4703_v50 = vshll.u32 %v4599_v11, 16  ;;  %v3346_v60 = vshrl.u32 %v3345_v46, 4  ;;  %v3361_v32 = vshll.u32 %v3358_v17, 16 }
 0x2e4   : > { %v4363_v28 = vmul.f32 %v11470_v5, %v3026_v41  ;;  %v3363_v42 = vshll.u32 %v3359_v54, 16  ;;  %v3362_v33 = vshrl.u32 %v3358_v17, 16  ;;  %v5709_v21 = vor.u32 %v5707_v51, %v11785_v8 }
 0x2e5   : > { %v4702_v7 = vrot.slane %v4700_v61, 6  ;;  %v4705_v31 = vrot.slane %v4703_v50, 7  ;;  %v3347_v18 = vmul.u32 18, %v3346_v60  ;;  %vm3365_vm10 = vc.u32 %v3357_v26, %v3361_v32 }
 0x2e6   : > { %v3367_v22 = vadd.s32 %v3361_v32, %v3357_v26  ;;  %v3366_v15 = vsel %vm3365_vm10, 1, %v14380_v2  ;;  %v11873_v41 = vrot.slane %v5711_v13, 1  ;;  %v5324_v11 = vshrl.u32 %v9933_v39, 16  ;;  %v2952_v6 = vpop.f32.mrf.mxu0 }
 0x2e7   : > { %v11869_v27 = vor.u32 %v4705_v31, %v4702_v7  ;;  %v3348_v10 = vsub.s32 %v11789_v47, %v3347_v18  ;;  %v3368_v45 = vadd.s32 %v3366_v15, %v3360_v25  ;;  %v5327_v46 = vshll.u32 %v9933_v39, 16  ;;  %v14430_v25 = vld [vmem:[#allocation5_spill] sm:$0xff]  ;;  %v2723_v52 = vpop.f32.mrf.mxu3 }
 0x2e8   : > { %vm3369_vm0 = vc.u32 %v3367_v22, %v3363_v42  ;;  %v11879_v37 = vadd.f32 %v11499_v14, %v4363_v28  ;;  %v5714_v17 = vsel %vm440_vm3, %v5709_v21, %v11873_v41  ;;  %v5326_v51 = vrot.slane %v5324_v11, 1  ;;  %v11902_v22 = vpop.f32.mrf.mxu1 }
 0x2e9   : > { %v4707_v8 = vsel %vm11624_vm9, %v4698_v56, %v11869_v27  ;;  %vm4142_vm4 = vcmp.ne.s32.totalorder %v3348_v10, 0  ;;  %vm4178_vm14 = vcmp.lt.s32.totalorder %v3348_v10, 0  ;;  %v4250_v47 = vadd.s32 18, %v3348_v10  ;;  %5919 = vmatmul.bf16.gmra.mxu2 %v5714_v17  ;;  %14431 = vst [vmem:[#allocation4_spill] sm:$0xff] %v11902_v22 }
 0x2ea   : > { %5035 = vst [vmem:[#allocation2 + $0x24] sm:$0xf] %v4707_v8  ;;  %vm4214_vm11 = vmand %vm4178_vm14, %vm4142_vm4  ;;  %v3370_v26 = vsel %vm3369_vm0, 1, %v14380_v2  ;;  %v3364_v13 = vshrl.u32 %v3359_v54, 16  ;;  %v5329_v50 = vrot.slane %v5327_v46, 2  ;;  %v3027_v56 = vadd.f32 %v2952_v6, %v11833_v9 }
 0x2eb   : > { %v3372_v61 = vadd.s32 %v3370_v26, %v3368_v45  ;;  %v4286_v60 = vsel %vm4214_vm11, %v4250_v47, %v3348_v10  ;;  %v11886_v32 = vadd.f32 %v2721_v62, %v14430_v25  ;;  %v11889_v28 = vadd.s32 80, %v11205_v34 }
 0x2ec   : > { %v2851_v39 = vrot.slane %v11711_v48, 3  ;;  %vm4322_vm12 = vcmp.lt.s32.totalorder %v4286_v60, 16  ;;  %v4439_v31 = vmax.f32 %v11879_v37, 0.0  ;;  %v11893_v18 = vor.u32 %v5329_v50, %v5326_v51 }
 0x2ed   : > { %v3373_v7 = vadd.s32 %v3372_v61, %v3362_v33  ;;  %v4546_v54 = vsel %vm4322_vm12, %v4438_v23, 0.0  ;;  %v3383_v42 = vand.u32 65535, %v11889_v28  ;;  %v3384_v9 = vshrl.u32 %v11889_v28, 16 }
 0x2ee   : > { %v2852_v62 = vsel %vm2823_vm7, %v2849_v63, %v2851_v39  ;;  %v4600_v29 = vpack.c.bf16 %v4546_v54, %v4546_v54  ;;  %v5331_v21 = vsel %vm1488_vm5, %v11800_v0, %v11893_v18  ;;  %v4364_v23 = vmul.f32 %v11470_v5, %v3027_v56  ;;  %v11913_v63 = vld [vmem:[%s10337_s18 + $0x90] sm:$0xff] }
 0x2ef   : > { %v3374_v33 = vadd.s32 %v3373_v7, %v3364_v13  ;;  %9151 = vmatmul.msk.bf16.gmra.mxu0 %vm589_vm1, %v2852_v62  ;;  %9241 = vmatmul.msk.bf16.gmra.mxu1 %vm589_vm1, %v5331_v21  ;;  %v3386_v10 = vmul.u32 14564, %v3383_v42  ;;  %v3387_v15 = vmul.u32 58254, %v3383_v42  ;;  %v11910_v4 = vmul.u32 14564, %v3384_v9  ;;  %v2954_v7 = vpop.f32.mrf.mxu0 }
 0x2f0   : > { %v2599_v45 = vshrl.u32 %v11913_v63, 16  ;;  %v4708_v11 = vrot.slane %v11869_v27, 4  ;;  %v4710_v46 = vshrl.u32 %v4600_v29, 16  ;;  %v4713_v6 = vshll.u32 %v4600_v29, 16  ;;  %v9976_v27 = vld [vmem:[%s14322_s2 + $0xb0] sm:$0xff] }
 0x2f1   : > { %v3375_v0 = vshrl.u32 %v3374_v33, 4  ;;  %v11918_v8 = vadd.f32 %v2723_v52, %v11222_v12  ;;  %v3389_v47 = vmul.u32 58254, %v3384_v9  ;;  %v3390_v26 = vshll.u32 %v3387_v15, 16  ;;  %v10001_v12 = vld [vmem:[%s14322_s2 + $0xf0] sm:$0xff]  ;;  %6290 = vmatpush.bf16.msrb.mxu0 %v9976_v27 }
 0x2f2   : > { %v3392_v17 = vshll.u32 %v11910_v4, 16  ;;  %v4712_v51 = vrot.slane %v4710_v46, 6  ;;  %v4715_v13 = vrot.slane %v4713_v6, 7  ;;  %v11922_v50 = vadd.f32 %v11499_v14, %v4364_v23  ;;  %6675 = vmatpush.bf16.msrb.mxu1 %v10001_v12  ;;  %v11958_v12 = vld [vmem:[#allocation2 + $0x20] sm:$0xff] }
 0x2f3   : > { %v3376_v61 = vmul.u32 18, %v3375_v0  ;;  %vm3394_vm15 = vc.u32 %v3386_v10, %v3390_v26  ;;  %v3396_v56 = vadd.s32 %v3390_v26, %v3386_v10  ;;  %v2601_v60 = vrot.slane %v2599_v45, 2  ;;  %v11946_v45 = vpop.f32.mrf.mxu1 }
 0x2f4   : > { %v2602_v25 = vshll.u32 %v11913_v63, 16  ;;  %v11931_v54 = vor.u32 %v4715_v13, %v4712_v51  ;;  %v3391_v14 = vshrl.u32 %v3387_v15, 16  ;;  %v3395_v9 = vsel %vm3394_vm15, 1, %v14380_v2  ;;  %14432 = vst [vmem:[#allocation5_spill] sm:$0xff] %v11946_v45 }
 0x2f5   : > { %v3377_v42 = vsub.s32 %v11839_v38, %v3376_v61  ;;  %v3397_v62 = vadd.s32 %v3395_v9, %v3389_v47  ;;  %vm3398_vm8 = vc.u32 %v3396_v56, %v3392_v17  ;;  %v11936_v33 = vadd.s32 88, %v11205_v34 }
 0x2f6   : > { %v2604_v29 = vrot.slane %v2602_v25, 3  ;;  %v4717_v21 = vsel %vm11624_vm9, %v4708_v11, %v11931_v54  ;;  %v3028_v52 = vadd.f32 %v2954_v7, %v11836_v58  ;;  %v3399_v23 = vsel %vm3398_vm8, 1, %v14380_v2  ;;  %v9934_v25 = vld [vmem:[%s10337_s18 + $0x80] sm:$0xff] }
 0x2f7   : > { %vm4143_vm10 = vcmp.ne.s32.totalorder %v3377_v42, 0  ;;  %vm4179_vm0 = vcmp.lt.s32.totalorder %v3377_v42, 0  ;;  %5036 = vst [vmem:[#allocation2 + $0x28] sm:$0xf] %v4717_v21  ;;  %v4251_v38 = vadd.s32 18, %v3377_v42  ;;  %v3412_v15 = vand.u32 65535, %v11936_v33 }
 0x2f8   : > { %vm4215_vm4 = vmand %vm4179_vm0, %vm4143_vm10  ;;  %v11943_v10 = vor.u32 %v2604_v29, %v2601_v60  ;;  %v4718_v46 = vrot.slane %v11931_v54, 4  ;;  %v3393_v6 = vshrl.u32 %v11910_v4, 16  ;;  %v3401_v11 = vadd.s32 %v3399_v23, %v3397_v62 }
 0x2f9   : > { %v3413_v0 = vshrl.u32 %v11936_v33, 16  ;;  %v4287_v58 = vsel %vm4215_vm4, %v4251_v38, %v3377_v42  ;;  %v3415_v26 = vmul.u32 14564, %v3412_v15  ;;  %v3416_v17 = vmul.u32 58254, %v3412_v15  ;;  %v2957_v38 = vpop.f32.mrf.mxu0 }
 0x2fa   : > { %v2606_v47 = vsel %vm2454_vm6, %v11844_v49, %v11943_v10  ;;  %vm4323_vm14 = vcmp.lt.s32.totalorder %v4287_v58, 16  ;;  %v3402_v51 = vadd.s32 %v3401_v11, %v3391_v14  ;;  %v4365_v61 = vmul.f32 %v11470_v5, %v3028_v52 }
 0x2fb   : > { %9134 = vmatmul.msk.bf16.gmra.mxu3 %vm589_vm1, %v2606_v47  ;;  %v3417_v13 = vmul.u32 14564, %v3413_v0  ;;  %v4547_v4 = vsel %vm4323_vm14, %v4439_v31, 0.0  ;;  %v3418_v56 = vmul.u32 58254, %v3413_v0  ;;  %v3419_v27 = vshll.u32 %v3416_v17, 16 }
 0x2fc   : > { %v5715_v60 = vshrl.u32 %v11841_v36, 16  ;;  %v4601_v49 = vpack.c.bf16 %v4547_v4, %v4547_v4  ;;  %v3403_v7 = vadd.s32 %v3402_v51, %v3393_v6  ;;  %v3420_v54 = vshrl.u32 %v3416_v17, 16 }
 0x2fd   : > { %v3421_v42 = vshll.u32 %v3417_v13, 16  ;;  %v3422_v14 = vshrl.u32 %v3417_v13, 16  ;;  %vm3423_vm11 = vc.u32 %v3415_v26, %v3419_v27  ;;  %v3425_v9 = vadd.s32 %v3419_v27, %v3415_v26  ;;  %v11968_v26 = vpop.f32.mrf.mxu1  ;;  %v11976_v13 = vld [vmem:[%s14325_s5] ss:$0 sm:$0xff]  ;;  %v2726_v27 = vpop.f32.mrf.mxu3 }
 0x2fe   : > { %v5717_v62 = vor.u32 %v5715_v60, %v11873_v41  ;;  %v4720_v5 = vshrl.u32 %v4601_v49, 16  ;;  %v4723_v29 = vshll.u32 %v4601_v49, 16  ;;  %v3404_v37 = vshrl.u32 %v3403_v7, 4  ;;  %14433 = vst [vmem:[#allocation29_spill] sm:$0xff] %v11968_v26 }
 0x2ff   : > { %v3424_v31 = vsel %vm3423_vm11, 1, %v14380_v2  ;;  %vm3427_vm12 = vc.u32 %v3425_v9, %v3421_v42  ;;  %v5719_v52 = vshll.u32 %v11958_v12, 16  ;;  %v5333_v36 = vshrl.u32 %v9934_v25, 16 }
 0x300   : > { %v3426_v21 = vadd.s32 %v3424_v31, %v3418_v56  ;;  %v4722_v23 = vrot.slane %v4720_v5, 6  ;;  %v4725_v15 = vrot.slane %v4723_v29, 7  ;;  %v3405_v6 = vmul.u32 18, %v3404_v37 }
 0x301   : > { %v3428_v11 = vsel %vm3427_vm12, 1, %v14380_v2  ;;  %v11966_v58 = vrot.slane %v5719_v52, 1  ;;  %v5335_v41 = vrot.slane %v5333_v36, 1  ;;  %v5336_v47 = vshll.u32 %v9934_v25, 16 }
 0x302   : > { %v3430_v0 = vadd.s32 %v3428_v11, %v3426_v21  ;;  %v11970_v17 = vor.u32 %v4725_v15, %v4722_v23  ;;  %v3406_v51 = vsub.s32 %v11889_v28, %v3405_v6  ;;  %v11979_v4 = vadd.f32 %v11976_v13, %v4365_v61  ;;  %v9959_v15 = vld [vmem:[%s14322_s2 + $0x28] sm:$0xff] }
 0x303   : > { %v3029_v56 = vadd.f32 %v2957_v38, %v11886_v32  ;;  %v5722_v25 = vsel %vm440_vm3, %v5717_v62, %v11966_v58  ;;  %v5338_v49 = vrot.slane %v5336_v47, 2  ;;  %v11985_v7 = vadd.s32 96, %v11205_v34  ;;  %v14434_v62 = vld [vmem:[#allocation6_spill] sm:$0xff]  ;;  %6068 = vmatpush.bf16.msrb.mxu3 %v9959_v15  ;;  %v2959_v15 = vpop.f32.mrf.mxu0 }
 0x304   : > { %v3431_v60 = vadd.s32 %v3430_v0, %v3420_v54  ;;  %v4727_v28 = vsel %vm11624_vm9, %v4718_v46, %v11970_v17  ;;  %vm4144_vm15 = vcmp.ne.s32.totalorder %v3406_v51, 0  ;;  %vm4180_vm8 = vcmp.lt.s32.totalorder %v3406_v51, 0  ;;  %5924 = vmatmul.bf16.gmra.mxu2 %v5722_v25 }
 0x305   : > { %v4440_v61 = vmax.f32 %v11922_v50, 0.0  ;;  %5037 = vst [vmem:[#allocation2 + $0x2c] sm:$0xf] %v4727_v28  ;;  %vm4216_vm10 = vmand %vm4180_vm8, %vm4144_vm15  ;;  %v4252_v32 = vadd.s32 18, %v3406_v51  ;;  %v11991_v42 = vor.u32 %v5338_v49, %v5335_v41  ;;  %v3441_v9 = vand.u32 65535, %v11985_v7  ;;  %v12028_v48 = vpop.f32.mrf.mxu1 }
 0x306   : > { %v3432_v54 = vadd.s32 %v3431_v60, %v3422_v14  ;;  %v11995_v5 = vadd.f32 %v2726_v27, %v14434_v62  ;;  %v4441_v29 = vmax.f32 %v11979_v4, 0.0  ;;  %v3442_v46 = vshrl.u32 %v11985_v7, 16  ;;  %v12006_v14 = vld [vmem:[%s14324_s4] ss:$0 sm:$0xff]  ;;  %v12025_v60 = vld [vmem:[%s10337_s18 + $0x98] sm:$0xff]  ;;  %14435 = vst [vmem:[#allocation6_spill] sm:$0xff] %v12028_v48 }
 0x307   : > { %v2853_v37 = vrot.slane %v11827_v59, 3  ;;  %v4288_v31 = vsel %vm4216_vm10, %v4252_v32, %v3406_v51  ;;  %v5340_v21 = vsel %vm1488_vm5, %v11893_v18, %v11991_v42  ;;  %v4366_v52 = vmul.f32 %v12006_v14, %v3029_v56 }
 0x308   : > { %v3433_v50 = vshrl.u32 %v3432_v54, 4  ;;  %vm4324_vm0 = vcmp.lt.s32.totalorder %v4288_v31, 16  ;;  %9242 = vmatmul.msk.bf16.gmra.mxu1 %vm589_vm1, %v5340_v21  ;;  %v3444_v36 = vmul.u32 14564, %v3441_v9  ;;  %v3445_v38 = vmul.u32 58254, %v3441_v9  ;;  %v2728_v9 = vpop.f32.mrf.mxu3 }
 0x309   : > { %v3446_v23 = vmul.u32 14564, %v3442_v46  ;;  %v4728_v18 = vrot.slane %v11970_v17, 4  ;;  %v4548_v6 = vsel %vm4324_vm0, %v4440_v61, 0.0  ;;  %v2854_v0 = vsel %vm2823_vm7, %v2851_v39, %v2853_v37 }
 0x30a   : > { %v3434_v11 = vmul.u32 18, %v3433_v50  ;;  %v4602_v41 = vpack.c.bf16 %v4548_v6, %v4548_v6  ;;  %v3447_v47 = vmul.u32 58254, %v3442_v46  ;;  %v3448_v51 = vshll.u32 %v3445_v38, 16  ;;  %9152 = vmatmul.msk.bf16.gmra.mxu0 %vm589_vm1, %v2854_v0 }
 0x30b   : > { %v3450_v4 = vshll.u32 %v3446_v23, 16  ;;  %v3449_v27 = vshrl.u32 %v3445_v38, 16  ;;  %v12022_v17 = vadd.f32 %v11976_v13, %v4366_v52  ;;  %v2608_v25 = vshrl.u32 %v12025_v60, 16 }
 0x30c   : > { %v3435_v56 = vsub.s32 %v11936_v33, %v3434_v11  ;;  %v4730_v39 = vshrl.u32 %v4602_v41, 16  ;;  %v4733_v49 = vshll.u32 %v4602_v41, 16  ;;  %vm3452_vm4 = vc.u32 %v3444_v36, %v3448_v51 }
 0x30d   : > { %v3454_v28 = vadd.s32 %v3448_v51, %v3444_v36  ;;  %v3453_v32 = vsel %vm3452_vm4, 1, %v14380_v2  ;;  %v2610_v50 = vrot.slane %v2608_v25, 2  ;;  %v2611_v21 = vshll.u32 %v12025_v60, 16 }
 0x30e   : > { %vm4145_vm14 = vcmp.ne.s32.totalorder %v3435_v56, 0  ;;  %vm4181_vm11 = vcmp.lt.s32.totalorder %v3435_v56, 0  ;;  %v4253_v61 = vadd.s32 18, %v3435_v56  ;;  %v4732_v33 = vrot.slane %v4730_v39, 6 }
 0x30f   : > { %v4735_v54 = vrot.slane %v4733_v49, 7  ;;  %vm4217_vm12 = vmand %vm4181_vm11, %vm4145_vm14  ;;  %v3455_v62 = vadd.s32 %v3453_v32, %v3447_v47  ;;  %vm3456_vm15 = vc.u32 %v3454_v28, %v3450_v4  ;;  %v3451_v36 = vshrl.u32 %v3446_v23, 16  ;;  %v9958_v23 = vld [vmem:[%s14322_s2 + $0x20] sm:$0xff] }
 0x310   : > { %v4289_v46 = vsel %vm4217_vm12, %v4253_v61, %v3435_v56  ;;  %v3457_v31 = vsel %vm3456_vm15, 1, %v14380_v2  ;;  %v12034_v11 = vadd.f32 %v2728_v9, %v11227_v30  ;;  %v2613_v0 = vrot.slane %v2611_v21, 3  ;;  %6069 = vmatpush.bf16.msrb.mxu3 %v9958_v23 }
 0x311   : > { %v4736_v52 = vor.u32 %v4735_v54, %v4732_v33  ;;  %vm4325_vm8 = vcmp.lt.s32.totalorder %v4289_v46, 16  ;;  %v3459_v38 = vadd.s32 %v3457_v31, %v3455_v62  ;;  %v12037_v41 = vadd.s32 104, %v11205_v34  ;;  %v12057_v62 = vpop.f32.mrf.mxu1 }
 0x312   : > { %v4549_v6 = vsel %vm4325_vm8, %v4441_v29, 0.0  ;;  %v4442_v56 = vmax.f32 %v12022_v17, 0.0  ;;  %v12045_v29 = vor.u32 %v2613_v0, %v2610_v50  ;;  %v3030_v30 = vadd.f32 %v2959_v15, %v11918_v8  ;;  %v9935_v8 = vld [vmem:[%s10337_s18 + $0x88] sm:$0xff]  ;;  %14436 = vst [vmem:[#allocation30_spill] sm:$0xff] %v12057_v62 }
 0x313   : > { %v4737_v47 = vsel %vm11624_vm9, %v4728_v18, %v4736_v52  ;;  %v4603_v51 = vpack.c.bf16 %v4549_v6, %v4549_v6  ;;  %v3460_v4 = vadd.s32 %v3459_v38, %v3449_v27  ;;  %v3470_v25 = vand.u32 65535, %v12037_v41  ;;  %v12050_v27 = vld [vmem:[#allocation2 + $0x28] sm:$0xff] }
 0x314   : > { %5038 = vst [vmem:[#allocation2 + $0x30] sm:$0xf] %v4737_v47  ;;  %v3471_v39 = vshrl.u32 %v12037_v41, 16  ;;  %v5723_v61 = vshrl.u32 %v11958_v12, 16  ;;  %v2615_v32 = vsel %vm2454_vm6, %v11943_v10, %v12045_v29  ;;  %v4738_v46 = vrot.slane %v4736_v52, 4  ;;  %v9957_v12 = vld [vmem:[%s14322_s2 + $0x18] sm:$0xff]  ;;  %v2731_v47 = vpop.f32.mrf.mxu3 }
 0x315   : > { %v4740_v49 = vshrl.u32 %v4603_v51, 16  ;;  %v4743_v18 = vshll.u32 %v4603_v51, 16  ;;  %v3461_v28 = vadd.s32 %v3460_v4, %v3451_v36  ;;  %v3473_v33 = vmul.u32 14564, %v3470_v25  ;;  %9135 = vmatmul.msk.bf16.gmra.mxu3 %vm589_vm1, %v2615_v32 }
 0x316   : > { %v3474_v54 = vmul.u32 58254, %v3470_v25  ;;  %v3475_v9 = vmul.u32 14564, %v3471_v39  ;;  %v3476_v36 = vmul.u32 58254, %v3471_v39  ;;  %v4367_v10 = vmul.f32 %v12006_v14, %v3030_v30  ;;  %6070 = vmatpush.bf16.msrb.mxu3 %v9957_v12 }
 0x317   : > { %v4742_v31 = vrot.slane %v4740_v49, 6  ;;  %v4745_v50 = vrot.slane %v4743_v18, 7  ;;  %v3462_v21 = vshrl.u32 %v3461_v28, 4  ;;  %v5725_v52 = vor.u32 %v5723_v61, %v11966_v58  ;;  %v2962_v61 = vpop.f32.mrf.mxu0 }
 0x318   : > { %v3477_v38 = vshll.u32 %v3474_v54, 16  ;;  %v3479_v15 = vshll.u32 %v3475_v9, 16  ;;  %v5727_v51 = vshll.u32 %v12050_v27, 16  ;;  %v5342_v23 = vshrl.u32 %v9935_v8, 16 }
 0x319   : > { %v12064_v6 = vor.u32 %v4745_v50, %v4742_v31  ;;  %v3463_v0 = vmul.u32 18, %v3462_v21  ;;  %v5345_v25 = vshll.u32 %v9935_v8, 16  ;;  %v3478_v30 = vshrl.u32 %v3474_v54, 16  ;;  %v14437_v21 = vld [vmem:[#allocation7_spill] sm:$0xff] }
 0x31a   : > { %vm3481_vm10 = vc.u32 %v3473_v33, %v3477_v38  ;;  %v3483_v4 = vadd.s32 %v3477_v38, %v3473_v33  ;;  %v3480_v28 = vshrl.u32 %v3475_v9, 16  ;;  %v12073_v58 = vrot.slane %v5727_v51, 1  ;;  %v12088_v51 = vpop.f32.mrf.mxu1 }
 0x31b   : > { %v4747_v39 = vsel %vm11624_vm9, %v4738_v46, %v12064_v6  ;;  %v3464_v49 = vsub.s32 %v11985_v7, %v3463_v0  ;;  %v3482_v18 = vsel %vm3481_vm10, 1, %v14380_v2  ;;  %v5344_v54 = vrot.slane %v5342_v23, 1  ;;  %14438 = vst [vmem:[#allocation7_spill] sm:$0xff] %v12088_v51 }
 0x31c   : > { %5039 = vst [vmem:[#allocation2 + $0x34] sm:$0xf] %v4747_v39  ;;  %v3484_v32 = vadd.s32 %v3482_v18, %v3476_v36  ;;  %vm3485_vm0 = vc.u32 %v3483_v4, %v3479_v15  ;;  %v5730_v7 = vsel %vm440_vm3, %v5725_v52, %v12073_v58  ;;  %v5347_v46 = vrot.slane %v5345_v25, 2 }
 0x31d   : > { %vm4146_vm4 = vcmp.ne.s32.totalorder %v3464_v49, 0  ;;  %vm4182_vm14 = vcmp.lt.s32.totalorder %v3464_v49, 0  ;;  %v4254_v33 = vadd.s32 18, %v3464_v49  ;;  %v3486_v8 = vsel %vm3485_vm0, 1, %v14380_v2  ;;  %5929 = vmatmul.bf16.gmra.mxu2 %v5730_v7 }
 0x31e   : > { %vm4218_vm11 = vmand %vm4182_vm14, %vm4146_vm4  ;;  %v3488_v31 = vadd.s32 %v3486_v8, %v3484_v32  ;;  %v12079_v9 = vadd.f32 %v2731_v47, %v14437_v21  ;;  %v3031_v12 = vadd.f32 %v2962_v61, %v11995_v5  ;;  %v12083_v36 = vadd.s32 112, %v11205_v34  ;;  %v2448_v61 = vld [vmem:[%s10337_s18 + $0xa0] sm:$0x7] }
 0x31f   : > { %v4290_v50 = vsel %vm4218_vm11, %v4254_v33, %v3464_v49  ;;  %v12085_v15 = vor.u32 %v5347_v46, %v5344_v54  ;;  %v2855_v0 = vrot.slane %v11913_v63, 3  ;;  %v12093_v47 = vadd.f32 %v11976_v13, %v4367_v10  ;;  %v2733_v10 = vpop.f32.mrf.mxu3 }
 0x320   : > { %vm4326_vm12 = vcmp.lt.s32.totalorder %v4290_v50, 16  ;;  %v3489_v38 = vadd.s32 %v3488_v31, %v3478_v30  ;;  %v3499_v4 = vand.u32 65535, %v12083_v36  ;;  %v3500_v5 = vshrl.u32 %v12083_v36, 16 }
 0x321   : > { %v4550_v52 = vsel %vm4326_vm12, %v4442_v56, 0.0  ;;  %v5349_v39 = vsel %vm1488_vm5, %v11991_v42, %v12085_v15  ;;  %v2856_v17 = vsel %vm2823_vm7, %v2853_v37, %v2855_v0  ;;  %v9956_v56 = vld [vmem:[%s14322_s2 + $0x10] sm:$0xff]  ;;  %v4748_v42 = vrot.slane %v12064_v6, 4  ;;  %v9955_v6 = vld [vmem:[%s14322_s2 + $0x8] sm:$0xff] }
 0x322   : > { %v4604_v23 = vpack.c.bf16 %v4550_v52, %v4550_v52  ;;  %v3490_v25 = vadd.s32 %v3489_v38, %v3480_v28  ;;  %9243 = vmatmul.msk.bf16.gmra.mxu1 %vm589_vm1, %v5349_v39  ;;  %v3502_v49 = vmul.u32 14564, %v3499_v4  ;;  %v3503_v30 = vmul.u32 58254, %v3499_v4  ;;  %9153 = vmatmul.msk.bf16.gmra.mxu0 %vm589_vm1, %v2856_v17  ;;  %v10008_v52 = vld [vmem:[%s14322_s2 + $0x128] sm:$0xff] }
 0x323   : > { %v12109_v18 = vmul.u32 14564, %v3500_v5  ;;  %v4368_v28 = vmul.f32 %v12006_v14, %v3031_v12  ;;  %6071 = vmatpush.bf16.msrb.mxu3 %v9956_v56  ;;  %v4443_v33 = vmax.f32 %v12093_v47, 0.0  ;;  %v3505_v8 = vmul.u32 58254, %v3500_v5  ;;  %v9975_v47 = vld [vmem:[%s14322_s2 + $0xa8] sm:$0xff]  ;;  %v2964_v5 = vpop.f32.mrf.mxu0  ;;  %7068 = vmatpush.bf16.msrb.mxu2 %v10008_v52 }
 0x324   : > { %v4750_v59 = vshrl.u32 %v4604_v23, 16  ;;  %v4753_v32 = vshll.u32 %v4604_v23, 16  ;;  %v3491_v37 = vshrl.u32 %v3490_v25, 4  ;;  %v3506_v31 = vshll.u32 %v3503_v30, 16  ;;  %6291 = vmatpush.bf16.msrb.mxu0 %v9975_v47 }
 0x325   : > { %v3508_v7 = vshll.u32 %v12109_v18, 16  ;;  %v12118_v21 = vadd.f32 %v2733_v10, %v11231_v3  ;;  %v12124_v38 = vadd.f32 %v11976_v13, %v4368_v28  ;;  %v2452_v4 = vunpack.c.l.b16 %v2448_v61  ;;  %v10000_v3 = vld [vmem:[%s14322_s2 + $0xe8] sm:$0xff] }
 0x326   : > { %v4752_v54 = vrot.slane %v4750_v59, 6  ;;  %v4755_v46 = vrot.slane %v4753_v32, 7  ;;  %v3492_v50 = vmul.u32 18, %v3491_v37  ;;  %vm3510_vm15 = vc.u32 %v3502_v49, %v3506_v31  ;;  %6676 = vmatpush.bf16.msrb.mxu1 %v10000_v3 }
 0x327   : > { %v3512_v12 = vadd.s32 %v3506_v31, %v3502_v49  ;;  %v3507_v39 = vshrl.u32 %v3503_v30, 16  ;;  %v3511_v17 = vsel %vm3510_vm15, 1, %v14380_v2  ;;  %6072 = vmatpush.bf16.msrb.mxu3 %v9955_v6  ;;  %v12139_v10 = vpack.c.b16 %v2452_v4, %v2452_v4  ;;  %v12148_v30 = vpop.f32.mrf.mxu1 }
 0x328   : > { %v12135_v23 = vor.u32 %v4755_v46, %v4752_v54  ;;  %v3493_v25 = vsub.s32 %v12037_v41, %v3492_v50  ;;  %v3513_v56 = vadd.s32 %v3511_v17, %v3505_v8  ;;  %v12142_v49 = vadd.s32 120, %v11205_v34  ;;  %14439 = vst [vmem:[#allocation31_spill] sm:$0xff] %v12148_v30 }
 0x329   : > { %vm3514_vm8 = vc.u32 %v3512_v12, %v3508_v7  ;;  %v3032_v41 = vadd.f32 %v2964_v5, %v12034_v11  ;;  %v2617_v37 = vshrl.u32 %v12139_v10, 16  ;;  %v2620_v61 = vshll.u32 %v12139_v10, 16  ;;  %v9954_v11 = vld [vmem:[%s14322_s2] sm:$0xff] }
 0x32a   : > { %v4757_v28 = vsel %vm11624_vm9, %v4748_v42, %v12135_v23  ;;  %vm4147_vm10 = vcmp.ne.s32.totalorder %v3493_v25, 0  ;;  %vm4183_vm0 = vcmp.lt.s32.totalorder %v3493_v25, 0  ;;  %v4255_v59 = vadd.s32 18, %v3493_v25 }
 0x32b   : > { %5040 = vst [vmem:[#allocation2 + $0x38] sm:$0xf] %v4757_v28  ;;  %vm4219_vm4 = vmand %vm4183_vm0, %vm4147_vm10  ;;  %v3515_v32 = vsel %vm3514_vm8, 1, %v14380_v2  ;;  %v3509_v8 = vshrl.u32 %v12109_v18, 16  ;;  %v3528_v42 = vand.u32 65535, %v12142_v49  ;;  %v3529_v7 = vshrl.u32 %v12142_v49, 16  ;;  %6073 = vmatpush.bf16.msrb.mxu3 %v9954_v11 }
 0x32c   : > { %v3517_v31 = vadd.s32 %v3515_v32, %v3513_v56  ;;  %v4758_v54 = vrot.slane %v12135_v23, 4  ;;  %v4291_v46 = vsel %vm4219_vm4, %v4255_v59, %v3493_v25  ;;  %v2619_v50 = vrot.slane %v2617_v37, 2  ;;  %v2736_v25 = vpop.f32.mrf.mxu3 }
 0x32d   : > { %v2622_v6 = vrot.slane %v2620_v61, 3  ;;  %vm4327_vm14 = vcmp.lt.s32.totalorder %v4291_v46, 16  ;;  %v3531_v52 = vmul.u32 14564, %v3528_v42  ;;  %v3532_v47 = vmul.u32 58254, %v3528_v42 }
 0x32e   : > { %v3518_v12 = vadd.s32 %v3517_v31, %v3507_v39  ;;  %v4551_v18 = vsel %vm4327_vm14, %v4443_v33, 0.0  ;;  %v3533_v3 = vmul.u32 14564, %v3529_v7  ;;  %v4369_v5 = vmul.f32 %v12006_v14, %v3032_v41  ;;  %v12163_v39 = vld [vmem:[#allocation2 + $0x30] sm:$0xff]  ;;  %v2967_v41 = vpop.f32.mrf.mxu0 }
 0x32f   : > { %v2623_v4 = vor.u32 %v2622_v6, %v2619_v50  ;;  %v4605_v17 = vpack.c.bf16 %v4551_v18, %v4551_v18  ;;  %v3534_v28 = vmul.u32 58254, %v3529_v7  ;;  %v3535_v32 = vshll.u32 %v3532_v47, 16  ;;  %v9936_v31 = vld [vmem:[%s10337_s18 + $0x90] sm:$0xff]  ;;  %v12175_v18 = vpop.f32.mrf.mxu1 }
 0x330   : > { %v3519_v56 = vadd.s32 %v3518_v12, %v3509_v8  ;;  %v3536_v59 = vshrl.u32 %v3532_v47, 16  ;;  %v3537_v37 = vshll.u32 %v3533_v3, 16  ;;  %v5731_v61 = vshrl.u32 %v12050_v27, 16  ;;  %v9999_v27 = vld [vmem:[%s14322_s2 + $0xe0] sm:$0xff]  ;;  %14440 = vst [vmem:[#allocation32_spill] sm:$0xff] %v12175_v18 }
 0x331   : > { %v2624_v23 = vsel %vm2454_vm6, %v12045_v29, %v2623_v4  ;;  %v4760_v33 = vshrl.u32 %v4605_v17, 16  ;;  %v4763_v42 = vshll.u32 %v4605_v17, 16  ;;  %vm3539_vm11 = vc.u32 %v3531_v52, %v3535_v32  ;;  %6677 = vmatpush.bf16.msrb.mxu1 %v9999_v27 }
 0x332   : > { %v3520_v11 = vshrl.u32 %v3519_v56, 4  ;;  %9136 = vmatmul.msk.bf16.gmra.mxu3 %vm589_vm1, %v2624_v23  ;;  %v3538_v8 = vshrl.u32 %v3533_v3, 16  ;;  %v3540_v7 = vsel %vm3539_vm11, 1, %v14380_v2  ;;  %v3541_v46 = vadd.s32 %v3535_v32, %v3531_v52 }
 0x333   : > { %v12170_v29 = vadd.f32 %v11976_v13, %v4369_v5  ;;  %v4762_v50 = vrot.slane %v4760_v33, 6  ;;  %v4765_v6 = vrot.slane %v4763_v42, 7  ;;  %v3542_v47 = vadd.s32 %v3540_v7, %v3534_v28 }
 0x334   : > { %v3521_v12 = vmul.u32 18, %v3520_v11  ;;  %vm3543_vm12 = vc.u32 %v3541_v46, %v3537_v37  ;;  %v5735_v4 = vshll.u32 %v12163_v39, 16  ;;  %v5351_v3 = vshrl.u32 %v9936_v31, 16 }
 0x335   : > { %v5354_v17 = vshll.u32 %v9936_v31, 16  ;;  %v12178_v56 = vor.u32 %v4765_v6, %v4762_v50  ;;  %v3544_v5 = vsel %vm3543_vm12, 1, %v14380_v2  ;;  %v5733_v32 = vor.u32 %v5731_v61, %v12073_v58 }
 0x336   : > { %v3522_v52 = vsub.s32 %v12083_v36, %v3521_v12  ;;  %v3546_v28 = vadd.s32 %v3544_v5, %v3542_v47  ;;  %v12183_v23 = vrot.slane %v5735_v4, 1  ;;  %v5353_v33 = vrot.slane %v5351_v3, 1  ;;  %v12205_v47 = vpop.f32.mrf.mxu3 }
 0x337   : > { %v5356_v42 = vrot.slane %v5354_v17, 2  ;;  %v4767_v37 = vsel %vm11624_vm9, %v4758_v54, %v12178_v56  ;;  %v4444_v31 = vmax.f32 %v12124_v38, 0.0  ;;  %v12194_v7 = vadd.f32 %v2736_v25, %v11057_v40  ;;  %v12222_v5 = vpop.f32.mrf.mxu1 }
 0x338   : > { %vm4148_vm15 = vcmp.ne.s32.totalorder %v3522_v52, 0  ;;  %vm4184_vm8 = vcmp.lt.s32.totalorder %v3522_v52, 0  ;;  %5041 = vst [vmem:[#allocation2 + $0x3c] sm:$0xf] %v4767_v37  ;;  %v4256_v36 = vadd.s32 18, %v3522_v52  ;;  %v3547_v11 = vadd.s32 %v3546_v28, %v3536_v59 }
 0x339   : > { %vm4220_vm10 = vmand %vm4184_vm8, %vm4148_vm15  ;;  %v5738_v58 = vsel %vm440_vm3, %v5733_v32, %v12183_v23  ;;  %v12191_v61 = vor.u32 %v5356_v42, %v5353_v33  ;;  %v3033_v46 = vadd.f32 %v2967_v41, %v12079_v9  ;;  %v12198_v54 = vadd.s32 128, %v11205_v34  ;;  %v2969_v41 = vpop.f32.mrf.mxu0  ;;  %14441 = vst [vmem:[#allocation33_spill] sm:$0xff] %v12222_v5 }
 0x33a   : > { %5934 = vmatmul.bf16.gmra.mxu2 %v5738_v58  ;;  %v2857_v38 = vrot.slane %v12025_v60, 3  ;;  %v4292_v50 = vsel %vm4220_vm10, %v4256_v36, %v3522_v52  ;;  %v3548_v6 = vadd.s32 %v3547_v11, %v3538_v8  ;;  %v4445_v59 = vmax.f32 %v12170_v29, 0.0 }
 0x33b   : > { %v5358_v12 = vsel %vm1488_vm5, %v12085_v15, %v12191_v61  ;;  %vm4328_vm0 = vcmp.lt.s32.totalorder %v4292_v50, 16  ;;  %v3557_v40 = vand.u32 65535, %v12198_v54  ;;  %v3558_v9 = vshrl.u32 %v12198_v54, 16 }
 0x33c   : > { %9244 = vmatmul.msk.bf16.gmra.mxu1 %vm589_vm1, %v5358_v12  ;;  %v4370_v25 = vmul.f32 %v12006_v14, %v3033_v46  ;;  %v4552_v27 = vsel %vm4328_vm0, %v4444_v31, 0.0  ;;  %v3549_v8 = vshrl.u32 %v3548_v6, 4  ;;  %v2858_v15 = vsel %vm2823_vm7, %v2855_v0, %v2857_v38  ;;  %v10218_v12 = vld [vmem:[#allocation2] sm:$0xff]  }
 0x33d   : > { %v12217_v29 = vadd.s32 136, %v11205_v34  ;;  %v4606_v4 = vpack.c.bf16 %v4552_v27, %v4552_v27  ;;  %v3560_v3 = vmul.u32 14564, %v3557_v40  ;;  %v3561_v17 = vmul.u32 58254, %v3557_v40  ;;  %9154 = vmatmul.msk.bf16.gmra.mxu0 %vm589_vm1, %v2858_v15 }
 0x33e   : > { %v12219_v52 = vmul.u32 14564, %v3558_v9  ;;  %v4768_v32 = vrot.slane %v12178_v56, 4  ;;  %v3550_v28 = vmul.u32 18, %v3549_v8  ;;  %v3563_v33 = vmul.u32 58254, %v3558_v9  ;;  %v2741_v15 = vpop.f32.mrf.mxu3 }
 0x33f   : > { %v12226_v63 = vadd.f32 %v2969_v41, %v12118_v21  ;;  %v4770_v0 = vshrl.u32 %v4606_v4, 16  ;;  %v4773_v42 = vshll.u32 %v4606_v4, 16  ;;  %v3564_v37 = vshll.u32 %v3561_v17, 16  ;;  %v9998_v21 = vld [vmem:[%s14322_s2 + $0xd8] sm:$0xff] }
 0x340   : > { %v12229_v31 = vadd.f32 %v11976_v13, %v4370_v25  ;;  %v3551_v36 = vsub.s32 %v12142_v49, %v3550_v28  ;;  %v3565_v11 = vshrl.u32 %v3561_v17, 16  ;;  %v3566_v58 = vshll.u32 %v12219_v52, 16  ;;  %6678 = vmatpush.bf16.msrb.mxu1 %v9998_v21  ;;  %v9974_v17 = vld [vmem:[%s14322_s2 + $0xa0] sm:$0xff] }
 0x341   : > { %v3586_v46 = vand.u32 65535, %v12217_v29  ;;  %v4772_v50 = vrot.slane %v4770_v0, 6  ;;  %v4775_v56 = vrot.slane %v4773_v42, 7  ;;  %vm3568_vm4 = vc.u32 %v3560_v3, %v3564_v37  ;;  %v9997_v42 = vld [vmem:[%s14322_s2 + $0xd0] sm:$0xff]  ;;  %6292 = vmatpush.bf16.msrb.mxu0 %v9974_v17 }
 0x342   : > { %v3570_v6 = vadd.s32 %v3564_v37, %v3560_v3  ;;  %6074 = vmatmul.bf16.vlgmr.msrb.gmra.mxu3 %v10218_v12  ;;  %vm4149_vm14 = vcmp.ne.s32.totalorder %v3551_v36, 0  ;;  %vm4185_vm11 = vcmp.lt.s32.totalorder %v3551_v36, 0  ;;  %v4257_v40 = vadd.s32 18, %v3551_v36 }
 0x343   : > { %v3569_v49 = vsel %vm3568_vm4, 1, %v14380_v2  ;;  %v12238_v9 = vor.u32 %v4775_v56, %v4772_v50  ;;  %vm4221_vm12 = vmand %vm4185_vm11, %vm4149_vm14  ;;  %v3587_v41 = vshrl.u32 %v12217_v29, 16  ;;  %v3589_v4 = vmul.u32 14564, %v3586_v46 }
 0x344   : > { %v3571_v25 = vadd.s32 %v3569_v49, %v3563_v33  ;;  %vm3572_vm15 = vc.u32 %v3570_v6, %v3566_v58  ;;  %v4293_v27 = vsel %vm4221_vm12, %v4257_v40, %v3551_v36  ;;  %v3590_v3 = vmul.u32 58254, %v3586_v46  ;;  %6679 = vmatpush.bf16.msrb.mxu1 %v9997_v42  ;;  %v12262_v40 = vld [vmem:[#allocation2 + $0x38] sm:$0xff] }
 0x345   : > { %v3573_v8 = vsel %vm3572_vm15, 1, %v14380_v2  ;;  %v4777_v28 = vsel %vm11624_vm9, %v4768_v32, %v12238_v9  ;;  %vm4329_vm8 = vcmp.lt.s32.totalorder %v4293_v27, 16  ;;  %v3567_v33 = vshrl.u32 %v12219_v52, 16  ;;  %v12259_v52 = vpop.f32.mrf.mxu1 }
 0x346   : > { %v3575_v0 = vadd.s32 %v3573_v8, %v3571_v25  ;;  %5042 = vst [vmem:[#allocation2 + $0x40] sm:$0xf] %v4777_v28  ;;  %v4553_v37 = vsel %vm4329_vm8, %v4445_v59, 0.0  ;;  %v3591_v36 = vmul.u32 14564, %v3587_v41  ;;  %v3592_v58 = vmul.u32 58254, %v3587_v41  ;;  %v9996_v25 = vld [vmem:[%s14322_s2 + $0xc8] sm:$0xff] }
 0x347   : > { %v3593_v46 = vshll.u32 %v3590_v3, 16  ;;  %v4607_v50 = vpack.c.bf16 %v4553_v37, %v4553_v37  ;;  %v12254_v56 = vadd.f32 %v12205_v47, %v11257_v24  ;;  %v12257_v6 = vadd.f32 %v2741_v15, %v11085_v57  ;;  %14442 = vst [vmem:[#allocation34_spill] sm:$0xff] %v12259_v52  ;;  %v9973_v24 = vld [vmem:[%s14322_s2 + $0x98] sm:$0xff] }
 0x348   : > { %v3576_v32 = vadd.s32 %v3575_v0, %v3565_v11  ;;  %v4446_v12 = vmax.f32 %v12229_v31, 0.0  ;;  %v3595_v59 = vshll.u32 %v3591_v36, 16  ;;  %v3594_v41 = vshrl.u32 %v3590_v3, 16  ;;  %v5103_v15 = vld [vmem:[%s10337_s18 + $0x98] sm:$0x3]  ;;  %6293 = vmatpush.bf16.msrb.mxu0 %v9973_v24  ;;  %6680 = vmatpush.bf16.msrb.mxu1 %v9996_v25 }
 0x349   : > { %vm3597_vm10 = vc.u32 %v3589_v4, %v3593_v46  ;;  %v3599_v21 = vadd.s32 %v3593_v46, %v3589_v4  ;;  %v4780_v47 = vshrl.u32 %v4607_v50, 16  ;;  %v4783_v11 = vshll.u32 %v4607_v50, 16 }
 0x34a   : > { %v3577_v49 = vadd.s32 %v3576_v32, %v3567_v33  ;;  %v3598_v57 = vsel %vm3597_vm10, 1, %v14380_v2  ;;  %v4371_v8 = vmul.f32 %v12006_v14, %v12226_v63  ;;  %v3596_v33 = vshrl.u32 %v3591_v36, 16 }
 0x34b   : > { %v3600_v27 = vadd.s32 %v3598_v57, %v3592_v58  ;;  %vm3601_vm0 = vc.u32 %v3599_v21, %v3595_v59  ;;  %v4782_v4 = vrot.slane %v4780_v47, 6  ;;  %v4785_v17 = vrot.slane %v4783_v11, 7  ;;  %v2972_v11 = vpop.f32.mrf.mxu0 }
 0x34c   : > { %v3578_v28 = vshrl.u32 %v3577_v49, 4  ;;  %v3602_v0 = vsel %vm3601_vm0, 1, %v14380_v2  ;;  %v5739_v37 = vshrl.u32 %v12163_v39, 16  ;;  %v5743_v46 = vshll.u32 %v12262_v40, 16 }
 0x34d   : > { %v3604_v42 = vadd.s32 %v3602_v0, %v3600_v27  ;;  %v4778_v3 = vrot.slane %v12238_v9, 4  ;;  %v12278_v58 = vor.u32 %v4785_v17, %v4782_v4  ;;  %v5178_v63 = vunpack.c.l.b16 %v5103_v15  ;;  %v12303_v15 = vpop.f32.mrf.mxu3  ;;  %v12305_v4 = vld [vmem:[#allocation2 + $0x8] sm:$0xff]  ;;  %v12308_v17 = vpop.f32.mrf.mxu1 }
 0x34e   : > { %v3579_v50 = vmul.u32 18, %v3578_v28  ;;  %v5741_v59 = vor.u32 %v5739_v37, %v12183_v23  ;;  %v12281_v21 = vrot.slane %v5743_v46, 1  ;;  %v12284_v24 = vadd.s32 144, %v11205_v34  ;;  %v9972_v23 = vld [vmem:[%s14322_s2 + $0x90] sm:$0xff]  ;;  %14443 = vst [vmem:[#allocation35_spill] sm:$0xff] %v12308_v17 }
 0x34f   : > { %v3605_v32 = vadd.s32 %v3604_v42, %v3594_v41  ;;  %v4787_v39 = vsel %vm11624_vm9, %v4778_v3, %v12278_v58  ;;  %v12291_v9 = vadd.f32 %v11976_v13, %v4371_v8  ;;  %v5197_v47 = vpack.c.b16 %v5178_v63, %v5178_v63  ;;  %6294 = vmatpush.bf16.msrb.mxu0 %v9972_v23  ;;  %v9971_v63 = vld [vmem:[%s14322_s2 + $0x88] sm:$0xff] }
 0x350   : > { %v3580_v36 = vsub.s32 %v12198_v54, %v3579_v50  ;;  %5043 = vst [vmem:[#allocation2 + $0x44] sm:$0xf] %v4787_v39  ;;  %v5746_v57 = vsel %vm440_vm3, %v5741_v59, %v12281_v21  ;;  %v3615_v25 = vand.u32 65535, %v12284_v24  ;;  %v3616_v41 = vshrl.u32 %v12284_v24, 16  ;;  %v9995_v54 = vld [vmem:[%s14322_s2 + $0xc0] sm:$0xff]  ;;  %v14459_v17 = vld [vmem:[#allocation19_spill] sm:$0xff] }
 0x351   : > { %v3606_v49 = vadd.s32 %v3605_v32, %v3596_v33  ;;  %5939 = vmatmul.bf16.gmra.mxu2 %v5746_v57  ;;  %v5360_v8 = vshrl.u32 %v5197_v47, 16  ;;  %v5363_v0 = vshll.u32 %v5197_v47, 16  ;;  %6681 = vmatpush.bf16.msrb.mxu1 %v9995_v54  ;;  %v4447_v46 = vmax.f32 %v12291_v9, 0.0 }
 0x352   : > { %vm4150_vm4 = vcmp.ne.s32.totalorder %v3580_v36, 0  ;;  %vm4186_vm14 = vcmp.lt.s32.totalorder %v3580_v36, 0  ;;  %v4258_v27 = vadd.s32 18, %v3580_v36  ;;  %6079 = vmatmul.bf16.gmra.mxu3 %v12305_v4  ;;  %v3618_v33 = vmul.u32 14564, %v3615_v25 }
 0x353   : > { %vm4222_vm11 = vmand %vm4186_vm14, %vm4150_vm4  ;;  %v3607_v28 = vshrl.u32 %v3606_v49, 4  ;;  %v3619_v42 = vmul.u32 58254, %v3615_v25  ;;  %v5362_v3 = vrot.slane %v5360_v8, 1  ;;  %v3620_v50 = vmul.u32 14564, %v3616_v41  ;;  %6295 = vmatpush.bf16.msrb.mxu0 %v9971_v63 }
 0x354   : > { %v4294_v37 = vsel %vm4222_vm11, %v4258_v27, %v3580_v36  ;;  %v5365_v59 = vrot.slane %v5363_v0, 2  ;;  %v3035_v49 = vadd.f32 %v2972_v11, %v12194_v7  ;;  %v3621_v23 = vmul.u32 58254, %v3616_v41  ;;  %v10007_v36 = vld [vmem:[%s14322_s2 + $0x120] sm:$0xff] }
 0x355   : > { %vm4330_vm12 = vcmp.lt.s32.totalorder %v4294_v37, 16  ;;  %v3608_v32 = vmul.u32 18, %v3607_v28  ;;  %v3622_v39 = vshll.u32 %v3619_v42, 16  ;;  %v3624_v57 = vshll.u32 %v3620_v50, 16  ;;  %7069 = vmatpush.bf16.msrb.mxu2 %v10007_v36 }
 0x356   : > { %v4554_v47 = vsel %vm4330_vm12, %v4446_v12, 0.0  ;;  %v5366_v54 = vor.u32 %v5365_v59, %v5362_v3  ;;  %v3623_v27 = vshrl.u32 %v3619_v42, 16  ;;  %v2859_v31 = vrot.slane %v12139_v10, 3  ;;  %v2974_v42 = vpop.f32.mrf.mxu0 }
 0x357   : > { %v4608_v9 = vpack.c.bf16 %v4554_v47, %v4554_v47  ;;  %v3609_v25 = vsub.s32 %v12217_v29, %v3608_v32  ;;  %vm3626_vm15 = vc.u32 %v3618_v33, %v3622_v39  ;;  %v3628_v28 = vadd.s32 %v3622_v39, %v3618_v33  ;;  %v2746_v39 = vpop.f32.mrf.mxu3  ;;  %v12342_v36 = vld [vmem:[#allocation2 + $0x40] sm:$0xff] }
 0x358   : > { %v3627_v8 = vsel %vm3626_vm15, 1, %v14380_v2  ;;  %v5367_v29 = vsel %vm1488_vm5, %v12191_v61, %v5366_v54  ;;  %v4372_v3 = vmul.f32 %v12006_v14, %v3035_v49  ;;  %v3625_v32 = vshrl.u32 %v3620_v50, 16 }
 0x359   : > { %v4790_v7 = vshrl.u32 %v4608_v9, 16  ;;  %v4793_v12 = vshll.u32 %v4608_v9, 16  ;;  %vm4151_vm8 = vcmp.ne.s32.totalorder %v3609_v25, 0  ;;  %vm4187_vm10 = vcmp.lt.s32.totalorder %v3609_v25, 0  ;;  %9245 = vmatmul.msk.bf16.gmra.mxu1 %vm589_vm1, %v5367_v29 }
 0x35a   : > { %vm12323_vm0 = vmand %vm4187_vm10, %vm4151_vm8  ;;  %v4259_v41 = vadd.s32 18, %v3609_v25  ;;  %v3629_v0 = vadd.s32 %v3627_v8, %v3621_v23  ;;  %vm3630_vm4 = vc.u32 %v3628_v28, %v3624_v57  ;;  %v2860_v61 = vsel %vm2823_vm7, %v2857_v38, %v2859_v31  ;;  %v12338_v23 = vpop.f32.mrf.mxu1 }
 0x35b   : > { %v4792_v37 = vrot.slane %v4790_v7, 6  ;;  %v4795_v33 = vrot.slane %v4793_v12, 7  ;;  %v3631_v10 = vsel %vm3630_vm4, 1, %v14380_v2  ;;  %v4788_v47 = vrot.slane %v12278_v58, 4  ;;  %14446 = vst [vmem:[#allocation36_spill] sm:$0xff] %v12338_v23  ;;  %9155 = vmatmul.msk.bf16.gmra.mxu0 %vm589_vm1, %v2860_v61 }
 0x35c   : > { %v4295_v63 = vsel %vm12323_vm0, %v4259_v41, %v3609_v25  ;;  %v3633_v59 = vadd.s32 %v3631_v10, %v3629_v0  ;;  %v3036_v49 = vadd.f32 %v2974_v42, %v12254_v56  ;;  %v12346_v50 = vadd.f32 %v12303_v15, %v11270_v20 }
 0x35d   : > { %v4796_v57 = vor.u32 %v4795_v33, %v4792_v37  ;;  %vm4331_vm14 = vcmp.lt.s32.totalorder %v4295_v63, 16  ;;  %v12349_v38 = vadd.s32 152, %v11205_v34  ;;  %v12354_v54 = vadd.f32 %v11976_v13, %v4372_v3  ;;  %v12370_v33 = vld [vmem:[#allocation2 + $0xc] sm:$0xf] }
 0x35e   : > { %v4555_v9 = vsel %vm4331_vm14, %v4447_v46, 0.0  ;;  %v3634_v60 = vadd.s32 %v3633_v59, %v3623_v27  ;;  %v12357_v56 = vadd.f32 %v2746_v39, %v11106_v53  ;;  %v5747_v15 = vshrl.u32 %v12262_v40, 16  ;;  %v12366_v53 = vld [vmem:[#allocation2 + $0x10] sm:$0xff] }
 0x35f   : > { %v4797_v58 = vsel %vm11624_vm9, %v4788_v47, %v4796_v57  ;;  %v4609_v25 = vpack.c.bf16 %v4555_v9, %v4555_v9  ;;  %v3644_v8 = vand.u32 65535, %v12349_v38  ;;  %v3645_v20 = vshrl.u32 %v12349_v38, 16 }
 0x360   : > { %5044 = vst [vmem:[#allocation2 + $0x48] sm:$0xf] %v4797_v58  ;;  %v3635_v46 = vadd.s32 %v3634_v60, %v3625_v32  ;;  %v4373_v31 = vmul.f32 %v12006_v14, %v3036_v49  ;;  %v5751_v7 = vshll.u32 %v12342_v36, 16  ;;  %v4798_v0 = vrot.slane %v4796_v57, 4  ;;  %v6424_v32 = vld [vmem:[#allocation2 + $0x8] sm:$0xe] }
 0x361   : > { %v4800_v27 = vshrl.u32 %v4609_v25, 16  ;;  %v4803_v28 = vshll.u32 %v4609_v25, 16  ;;  %v3647_v11 = vmul.u32 14564, %v3644_v8  ;;  %v3648_v41 = vmul.u32 58254, %v3644_v8  ;;  %v12381_v57 = vld [vmem:[#allocation2 + $0x10] sm:$0xff] }
 0x362   : > { %v3636_v12 = vshrl.u32 %v3635_v46, 4  ;;  %v12364_v29 = vmul.u32 14564, %v3645_v20  ;;  %6084 = vmatmul.bf16.gmra.mxu3 %v12366_v53  ;;  %v4448_v40 = vmax.f32 %v12354_v54, 0.0  ;;  %v3650_v14 = vmul.u32 58254, %v3645_v20  ;;  %v12385_v58 = vpop.f32.mrf.mxu1  ;;  %v2977_v46 = vpop.f32.mrf.mxu0 }
 0x363   : > { %v4802_v42 = vrot.slane %v4800_v27, 6  ;;  %v4805_v37 = vrot.slane %v4803_v28, 7  ;;  %v3651_v3 = vshll.u32 %v3648_v41, 16  ;;  %v5749_v63 = vor.u32 %v5747_v15, %v12281_v21  ;;  %14447 = vst [vmem:[#allocation37_spill] sm:$0xff] %v12385_v58  ;;  %v10161_v28 = vld [vmem:[#allocation2] sm:$0xf0] }
 0x364   : > { %v3637_v10 = vmul.u32 18, %v3636_v12  ;;  %v3653_v61 = vshll.u32 %v12364_v29, 16  ;;  %v12377_v39 = vadd.f32 %v11976_v13, %v4373_v31  ;;  %v12379_v47 = vrot.slane %v5751_v7, 1  ;;  %v10162_v31 = vld [vmem:[#allocation2] sm:$0xe] }
 0x365   : > { %v12373_v59 = vor.u32 %v4805_v37, %v4802_v42  ;;  %vm3655_vm1 = vc.u32 %v3647_v11, %v3651_v3  ;;  %v3657_v9 = vadd.s32 %v3651_v3, %v3647_v11  ;;  %v14337_v60 = vunpack.c.l.b16 %v12370_v33 }
 0x366   : > { %v3638_v49 = vsub.s32 %v12284_v24, %v3637_v10  ;;  %v3656_v25 = vsel %vm3655_vm1, 1, %v14380_v2  ;;  %v5754_v13 = vsel %vm440_vm3, %v5749_v63, %v12379_v47  ;;  %v6515_v54 = vunpack.c.l.b16 %v6424_v32 }
 0x367   : > { %v4807_v21 = vsel %vm11624_vm9, %v4798_v0, %v12373_v59  ;;  %v3658_v8 = vadd.s32 %v3656_v25, %v3650_v14  ;;  %5944 = vmatmul.bf16.gmra.mxu2 %v5754_v13  ;;  %v3652_v20 = vshrl.u32 %v3648_v41, 16  ;;  %vm3659_vm8 = vc.u32 %v3657_v9, %v3653_v61 }
 0x368   : > { %5045 = vst [vmem:[#allocation2 + $0x4c] sm:$0xf] %v4807_v21  ;;  %vm4152_vm11 = vcmp.ne.s32.totalorder %v3638_v49, 0  ;;  %vm4188_vm12 = vcmp.lt.s32.totalorder %v3638_v49, 0  ;;  %v4260_v24 = vadd.s32 18, %v3638_v49  ;;  %v12395_v15 = vpack.c.b16 %v14337_v60, %v6515_v54 }
 0x369   : > { %vm4224_vm15 = vmand %vm4188_vm12, %vm4152_vm11  ;;  %v6572_v27 = vrot.slane %v12381_v57, 1  ;;  %v3660_v12 = vsel %vm3659_vm8, 1, %v14380_v2  ;;  %v3037_v11 = vadd.f32 %v2977_v46, %v12257_v6  ;;  %v12401_v0 = vadd.s32 160, %v11205_v34 }
 0x36a   : > { %v4296_v7 = vsel %vm4224_vm15, %v4260_v24, %v3638_v49  ;;  %v3654_v41 = vshrl.u32 %v12364_v29, 16  ;;  %v3662_v42 = vadd.s32 %v3660_v12, %v3658_v8  ;;  %v6571_v37 = vrot.slane %v12395_v15, 1  ;;  %v12413_v49 = vld [vmem:[%s14324_s4] ss:$0 sm:$0xff]  ;;  %v12421_v12 = vpop.f32.mrf.mxu1 }
 0x36b   : > { %vm4332_vm10 = vcmp.lt.s32.totalorder %v4296_v7, 16  ;;  %v3673_v14 = vand.u32 65535, %v12401_v0  ;;  %v3674_v3 = vshrl.u32 %v12401_v0, 16  ;;  %v10163_v63 = vor.u32 %v10162_v31, %v10161_v28  ;;  %v9970_v31 = vld [vmem:[%s14322_s2 + $0x80] sm:$0xff]  ;;  %14448 = vst [vmem:[#allocation38_spill] sm:$0xff] %v12421_v12 }
 0x36c   : > { %v4556_v10 = vsel %vm4332_vm10, %v4448_v40, 0.0  ;;  %v3663_v61 = vadd.s32 %v3662_v42, %v3652_v20  ;;  %v6573_v6 = vsel %vm891_vm2, %v6571_v37, %v6572_v27  ;;  %v4374_v29 = vmul.f32 %v12413_v49, %v3037_v11  ;;  %6296 = vmatpush.bf16.msrb.mxu0 %v9970_v31 }
 0x36d   : > { %v4610_v32 = vpack.c.bf16 %v4556_v10, %v4556_v10  ;;  %v4449_v40 = vmax.f32 %v12377_v39, 0.0  ;;  %6682 = vmatmul.bf16.vlgmr.msrb.gmra.mxu1 %v6573_v6  ;;  %v3676_v9 = vmul.u32 14564, %v3673_v14  ;;  %v3677_v21 = vmul.u32 58254, %v3673_v14  ;;  %v2979_v10 = vpop.f32.mrf.mxu0 }
 0x36e   : > { %v3678_v25 = vmul.u32 14564, %v3674_v3  ;;  %v4808_v13 = vrot.slane %v12373_v59, 4  ;;  %v3664_v24 = vadd.s32 %v3663_v61, %v3654_v41  ;;  %v3679_v8 = vmul.u32 58254, %v3674_v3  ;;  %v12426_v59 = vld [vmem:[%s14325_s5] ss:$0 sm:$0xff] }
 0x36f   : > { %v4810_v54 = vshrl.u32 %v4610_v32, 16  ;;  %v4813_v46 = vshll.u32 %v4610_v32, 16  ;;  %v3680_v20 = vshll.u32 %v3677_v21, 16  ;;  %v6186_v7 = vrot.slane %v10163_v63, 1  ;;  %v12432_v32 = vld [vmem:[#allocation2 + $0x18] sm:$0xff] }
 0x370   : > { %v3682_v28 = vshll.u32 %v3678_v25, 16  ;;  %v3665_v37 = vshrl.u32 %v3664_v24, 4  ;;  %v12429_v41 = vadd.f32 %v12426_v59, %v4374_v29  ;;  %v3681_v14 = vshrl.u32 %v3677_v21, 16  ;;  %v12439_v29 = vld [vmem:[#allocation2 + $0x18] sm:$0xff] }
 0x371   : > { %v4812_v11 = vrot.slane %v4810_v54, 6  ;;  %v4815_v42 = vrot.slane %v4813_v46, 7  ;;  %vm3684_vm0 = vc.u32 %v3676_v9, %v3680_v20  ;;  %v3686_v3 = vadd.s32 %v3680_v20, %v3676_v9 }
 0x372   : > { %v14338_v63 = vrot.slane %v12305_v4, 1  ;;  %6089 = vmatmul.bf16.gmra.mxu3 %v12432_v32  ;;  %v3666_v6 = vmul.u32 18, %v3665_v37  ;;  %v3685_v54 = vsel %vm3684_vm0, 1, %v14380_v2  ;;  %v3038_v46 = vadd.f32 %v2979_v10, %v12346_v50 }
 0x373   : > { %v12435_v61 = vor.u32 %v4815_v42, %v4812_v11  ;;  %v3687_v24 = vadd.s32 %v3685_v54, %v3679_v8  ;;  %vm3688_vm4 = vc.u32 %v3686_v3, %v3682_v28  ;;  %v12445_v21 = vadd.s32 168, %v11205_v34 }
 0x374   : > { %v6188_v9 = vsel %vm891_vm2, %v6186_v7, %v14338_v63  ;;  %v3667_v31 = vsub.s32 %v12349_v38, %v3666_v6  ;;  %v3683_v11 = vshrl.u32 %v3678_v25, 16  ;;  %v3689_v50 = vsel %vm3688_vm4, 1, %v14380_v2  ;;  %v12463_v63 = vpop.f32.mrf.mxu1 }
 0x375   : > { %v4817_v20 = vsel %vm11624_vm9, %v4808_v13, %v12435_v61  ;;  %6297 = vmatmul.bf16.vlgmr.msrb.gmra.mxu0 %v6188_v9  ;;  %v3691_v8 = vadd.s32 %v3689_v50, %v3687_v24  ;;  %v3702_v28 = vand.u32 65535, %v12445_v21  ;;  %v3703_v42 = vshrl.u32 %v12445_v21, 16  ;;  %14449 = vst [vmem:[#allocation39_spill] sm:$0xff] %v12463_v63 }
 0x376   : > { %5046 = vst [vmem:[#allocation2 + $0x50] sm:$0xf] %v4817_v20  ;;  %v4375_v7 = vmul.f32 %v12413_v49, %v3038_v46  ;;  %vm4153_vm14 = vcmp.ne.s32.totalorder %v3667_v31, 0  ;;  %vm4189_vm1 = vcmp.lt.s32.totalorder %v3667_v31, 0  ;;  %v4261_v37 = vadd.s32 18, %v3667_v31  ;;  %v2748_v20 = vpop.f32.mrf.mxu3 }
 0x377   : > { %v14339_v10 = vrot.slane %v12439_v29, 1  ;;  %vm4225_vm11 = vmand %vm4189_vm1, %vm4153_vm14  ;;  %v3692_v13 = vadd.s32 %v3691_v8, %v3681_v14  ;;  %v3705_v38 = vmul.u32 14564, %v3702_v28  ;;  %v3706_v25 = vmul.u32 58254, %v3702_v28 }
 0x378   : > { %v12456_v3 = vmul.u32 14564, %v3703_v42  ;;  %v4818_v6 = vrot.slane %v12435_v61, 4  ;;  %v4297_v54 = vsel %vm4225_vm11, %v4261_v37, %v3667_v31  ;;  %v3708_v9 = vmul.u32 58254, %v3703_v42  ;;  %v12468_v61 = vld [vmem:[#allocation2 + $0x48] sm:$0xff]  ;;  %v2982_v37 = vpop.f32.mrf.mxu0 }
 0x379   : > { %vm4333_vm12 = vcmp.lt.s32.totalorder %v4297_v54, 16  ;;  %v3693_v46 = vadd.s32 %v3692_v13, %v3683_v11  ;;  %v3709_v50 = vshll.u32 %v3706_v25, 16  ;;  %v12461_v60 = vadd.f32 %v12426_v59, %v4375_v7 }
 0x37a   : > { %v4557_v14 = vsel %vm4333_vm12, %v4449_v40, 0.0  ;;  %v3710_v8 = vshrl.u32 %v3706_v25, 16  ;;  %v3711_v28 = vshll.u32 %v12456_v3, 16  ;;  %v6575_v31 = vsel %vm891_vm2, %v6572_v27, %v14339_v10 }
 0x37b   : > { %v4611_v11 = vpack.c.bf16 %v4557_v14, %v4557_v14  ;;  %v3694_v42 = vshrl.u32 %v3693_v46, 4  ;;  %vm3713_vm15 = vc.u32 %v3705_v38, %v3709_v50  ;;  %v3715_v7 = vadd.s32 %v3709_v50, %v3705_v38 }
 0x37c   : > { %v3712_v13 = vshrl.u32 %v12456_v3, 16  ;;  %v3714_v39 = vsel %vm3713_vm15, 1, %v14380_v2  ;;  %v5755_v40 = vshrl.u32 %v12342_v36, 16  ;;  %v5759_v25 = vshll.u32 %v12468_v61, 16 }
 0x37d   : > { %v4820_v54 = vshrl.u32 %v4611_v11, 16  ;;  %v4823_v24 = vshll.u32 %v4611_v11, 16  ;;  %v3695_v63 = vmul.u32 18, %v3694_v42  ;;  %v3716_v12 = vadd.s32 %v3714_v39, %v3708_v9  ;;  %6687 = vmatmul.bf16.gmra.mxu1 %v6575_v31  ;;  %v14452_v39 = vld [vmem:[#allocation17_spill] sm:$0xff] }
 0x37e   : > { %vm3717_vm8 = vc.u32 %v3715_v7, %v3711_v28  ;;  %v5757_v57 = vor.u32 %v5755_v40, %v12379_v47  ;;  %v12480_v27 = vrot.slane %v5759_v25, 1  ;;  %v3039_v38 = vadd.f32 %v2982_v37, %v12357_v56 }
 0x37f   : > { %v4822_v46 = vrot.slane %v4820_v54, 6  ;;  %v4825_v3 = vrot.slane %v4823_v24, 7  ;;  %v3696_v50 = vsub.s32 %v12401_v0, %v3695_v63  ;;  %v3718_v14 = vsel %vm3717_vm8, 1, %v14380_v2  ;;  %v12493_v24 = vld [vmem:[#allocation2 + $0x20] sm:$0xff]  ;;  %v2751_v54 = vpop.f32.mrf.mxu3 }
 0x380   : > { %v3720_v10 = vadd.s32 %v3718_v14, %v3716_v12  ;;  %v5762_v11 = vsel %vm440_vm3, %v5757_v57, %v12480_v27  ;;  %v12488_v9 = vadd.s32 176, %v11205_v34  ;;  %v4376_v28 = vmul.f32 %v12413_v49, %v3039_v38  ;;  %v14450_v0 = vld [vmem:[#allocation10_spill] sm:$0xff]  ;;  %v14451_v12 = vld [vmem:[#allocation11_spill] sm:$0xff] }
 0x381   : > { %v12491_v47 = vor.u32 %v4825_v3, %v4822_v46  ;;  %vm4154_vm10 = vcmp.ne.s32.totalorder %v3696_v50, 0  ;;  %vm4190_vm0 = vcmp.lt.s32.totalorder %v3696_v50, 0  ;;  %v4262_v56 = vadd.s32 18, %v3696_v50  ;;  %5949 = vmatmul.bf16.gmra.mxu2 %v5762_v11  ;;  %v12507_v38 = vld [vmem:[#allocation2 + $0x20] sm:$0xff]  ;;  %v12509_v46 = vpop.f32.mrf.mxu1 }
 0x382   : > { %6094 = vmatmul.bf16.gmra.mxu3 %v12493_v24  ;;  %v12498_v63 = vadd.f32 %v14451_v12, %v14450_v0  ;;  %vm4226_vm4 = vmand %vm4190_vm0, %vm4154_vm10  ;;  %v3721_v31 = vadd.s32 %v3720_v10, %v3710_v8  ;;  %v3731_v42 = vand.u32 65535, %v12488_v9  ;;  %v3732_v7 = vshrl.u32 %v12488_v9, 16  ;;  %14453 = vst [vmem:[#allocation10_spill] sm:$0xff] %v12509_v46 }
 0x383   : > { %v4827_v37 = vsel %vm11624_vm9, %v4818_v6, %v12491_v47  ;;  %v2804_v40 = vadd.f32 %v2748_v20, %v14452_v39  ;;  %v4298_v25 = vsel %vm4226_vm4, %v4262_v56, %v3696_v50  ;;  %v14340_v57 = vrot.slane %v12366_v53, 1 }
 0x384   : > { %5047 = vst [vmem:[#allocation2 + $0x54] sm:$0xf] %v4827_v37  ;;  %vm4334_vm14 = vcmp.lt.s32.totalorder %v4298_v25, 16  ;;  %v3722_v10 = vadd.s32 %v3721_v31, %v3712_v13  ;;  %v3734_v8 = vmul.u32 14564, %v3731_v42  ;;  %v3735_v3 = vmul.u32 58254, %v3731_v42 }
 0x385   : > { %v14454_v14 = vmax.f32 %v12429_v41, 0.0  ;;  %v4451_v6 = vmax.f32 %v12461_v60, 0.0  ;;  %v12514_v0 = vmul.u32 14564, %v3732_v7  ;;  %v12517_v20 = vadd.f32 %v12426_v59, %v4376_v28 }
 0x386   : > { %v3723_v56 = vshrl.u32 %v3722_v10, 4  ;;  %v3737_v12 = vmul.u32 58254, %v3732_v7  ;;  %v3738_v37 = vshll.u32 %v3735_v3, 16  ;;  %v4828_v39 = vrot.slane %v12491_v47, 4 }
 0x387   : > { %v4558_v11 = vsel %vm4334_vm14, %v14454_v14, 0.0  ;;  %v3740_v13 = vshll.u32 %v12514_v0, 16  ;;  %v14455_v41 = vrot.slane %v12305_v4, 1  ;;  %v14341_v60 = vrot.slane %v12507_v38, 1 }
 0x388   : > { %v4612_v50 = vpack.c.bf16 %v4558_v11, %v4558_v11  ;;  %v3724_v28 = vmul.u32 18, %v3723_v56  ;;  %vm3742_vm1 = vc.u32 %v3734_v8, %v3738_v37  ;;  %v3739_v10 = vshrl.u32 %v3735_v3, 16 }
 0x389   : > { %v6190_v31 = vsel %vm891_vm2, %v14455_v41, %v14340_v57  ;;  %v3743_v7 = vsel %vm3742_vm1, 1, %v14380_v2  ;;  %v3744_v14 = vadd.s32 %v3738_v37, %v3734_v8  ;;  %v12529_v47 = vadd.s32 184, %v11205_v34  ;;  %v2984_v57 = vpop.f32.mrf.mxu0 }
 0x38a   : > { %v4830_v42 = vshrl.u32 %v4612_v50, 16  ;;  %v4833_v25 = vshll.u32 %v4612_v50, 16  ;;  %6302 = vmatmul.bf16.gmra.mxu0 %v6190_v31  ;;  %v3725_v4 = vsub.s32 %v12445_v21, %v3724_v28  ;;  %v3745_v58 = vadd.s32 %v3743_v7, %v3737_v12  ;;  %v2753_v21 = vpop.f32.mrf.mxu3 }
 0x38b   : > { %v3741_v41 = vshrl.u32 %v12514_v0, 16  ;;  %vm3746_vm11 = vc.u32 %v3744_v14, %v3740_v13  ;;  %v3760_v50 = vand.u32 65535, %v12529_v47  ;;  %v14456_v3 = vrot.slane %v12439_v29, 1  ;;  %v12552_v52 = vld [vmem:[#allocation2 + $0x50] sm:$0xff] }
 0x38c   : > { %v4832_v11 = vrot.slane %v4830_v42, 6  ;;  %v4835_v46 = vrot.slane %v4833_v25, 7  ;;  %vm4155_vm12 = vcmp.ne.s32.totalorder %v3725_v4, 0  ;;  %vm4191_vm15 = vcmp.lt.s32.totalorder %v3725_v4, 0  ;;  %v12546_v42 = vpop.f32.mrf.mxu1 }
 0x38d   : > { %v6577_v8 = vsel %vm891_vm2, %v14456_v3, %v14341_v60  ;;  %v4263_v37 = vadd.s32 18, %v3725_v4  ;;  %vm4227_vm8 = vmand %vm4191_vm15, %vm4155_vm12  ;;  %v3747_v12 = vsel %vm3746_vm11, 1, %v14380_v2  ;;  %v3761_v0 = vshrl.u32 %v12529_v47, 16  ;;  %14457 = vst [vmem:[#allocation11_spill] sm:$0xff] %v12546_v42  ;;  %v14458_v3 = vld [vmem:[#allocation8_spill] sm:$0xff] }
 0x38e   : > { %v12539_v56 = vor.u32 %v4835_v46, %v4832_v11  ;;  %v3763_v13 = vmul.u32 14564, %v3760_v50  ;;  %v3764_v31 = vmul.u32 58254, %v3760_v50  ;;  %6692 = vmatmul.bf16.gmra.mxu1 %v6577_v8  ;;  %v3749_v25 = vadd.s32 %v3747_v12, %v3745_v58  ;;  %v12557_v58 = vpop.f32.mrf.mxu2 }
 0x38f   : > { %v4299_v46 = vsel %vm4227_vm8, %v4263_v37, %v3725_v4  ;;  %v3040_v28 = vadd.f32 %v2984_v57, %v2804_v40  ;;  %v3765_v7 = vmul.u32 14564, %v3761_v0  ;;  %v3766_v14 = vmul.u32 58254, %v3761_v0  ;;  %v12560_v37 = vld [vmem:[#allocation2 + $0x28] sm:$0xff] }
 0x390   : > { %v4837_v29 = vsel %vm11624_vm9, %v4828_v39, %v12539_v56  ;;  %vm4335_vm10 = vcmp.lt.s32.totalorder %v4299_v46, 16  ;;  %v3767_v11 = vshll.u32 %v3764_v31, 16  ;;  %v2805_v60 = vadd.f32 %v2751_v54, %v14458_v3  ;;  %v10006_v39 = vld [vmem:[%s14322_s2 + $0x118] sm:$0xff] }
 0x391   : > { %5048 = vst [vmem:[#allocation2 + $0x58] sm:$0xf] %v4837_v29  ;;  %v4559_v23 = vsel %vm4335_vm10, %v4451_v6, 0.0  ;;  %v12550_v50 = vadd.f32 %v2753_v21, %v14459_v17  ;;  %v3750_v8 = vadd.s32 %v3749_v25, %v3739_v10  ;;  %v4452_v57 = vmax.f32 %v12517_v20, 0.0  ;;  %7070 = vmatpush.bf16.msrb.mxu2 %v10006_v39 }
 0x392   : > { %v4613_v40 = vpack.c.bf16 %v4559_v23, %v4559_v23  ;;  %v3769_v4 = vshll.u32 %v3765_v7, 16  ;;  %vm3771_vm0 = vc.u32 %v3763_v13, %v3767_v11  ;;  %6099 = vmatmul.bf16.gmra.mxu3 %v12560_v37  ;;  %v3768_v54 = vshrl.u32 %v3764_v31, 16 }
 0x393   : > { %v3751_v17 = vadd.s32 %v3750_v8, %v3741_v41  ;;  %v3772_v6 = vsel %vm3771_vm0, 1, %v14380_v2  ;;  %v3773_v10 = vadd.s32 %v3767_v11, %v3763_v13  ;;  %v4377_v29 = vmul.f32 %v12413_v49, %v3040_v28 }
 0x394   : > { %v4840_v21 = vshrl.u32 %v4613_v40, 16  ;;  %v4843_v12 = vshll.u32 %v4613_v40, 16  ;;  %v3774_v0 = vadd.s32 %v3772_v6, %v3766_v14  ;;  %v5763_v20 = vshrl.u32 %v12468_v61, 16  ;;  %v2987_v14 = vpop.f32.mrf.mxu0  ;;  %v2756_v40 = vpop.f32.mrf.mxu3 }
 0x395   : > { %v3752_v23 = vshrl.u32 %v3751_v17, 4  ;;  %vm3775_vm4 = vc.u32 %v3773_v10, %v3769_v4  ;;  %v5767_v46 = vshll.u32 %v12552_v52, 16  ;;  %v3770_v42 = vshrl.u32 %v3765_v7, 16  ;;  %v12580_v7 = vpop.f32.mrf.mxu1 }
 0x396   : > { %v4842_v25 = vrot.slane %v4840_v21, 6  ;;  %v4845_v3 = vrot.slane %v4843_v12, 7  ;;  %v3776_v41 = vsel %vm3775_vm4, 1, %v14380_v2  ;;  %v5765_v13 = vor.u32 %v5763_v20, %v12480_v27  ;;  %14460 = vst [vmem:[#allocation17_spill] sm:$0xff] %v12580_v7  ;;  %v12589_v12 = vpop.f32.mrf.mxu2  ;;  %v14461_v20 = vld [vmem:[#allocation9_spill] sm:$0xff] }
 0x397   : > { %v3753_v31 = vmul.u32 18, %v3752_v23  ;;  %v3778_v8 = vadd.s32 %v3776_v41, %v3774_v0  ;;  %v12569_v11 = vrot.slane %v5767_v46, 1  ;;  %v4838_v28 = vrot.slane %v12539_v56, 4 }
 0x398   : > { %v12572_v39 = vor.u32 %v4845_v3, %v4842_v25  ;;  %v12575_v4 = vadd.f32 %v12426_v59, %v4377_v29  ;;  %v12578_v17 = vadd.s32 192, %v11205_v34  ;;  %v14342_v21 = vrot.slane %v12432_v32, 1 }
 0x399   : > { %v3754_v6 = vsub.s32 %v12488_v9, %v3753_v31  ;;  %v3779_v10 = vadd.s32 %v3778_v8, %v3768_v54  ;;  %v5770_v27 = vsel %vm440_vm3, %v5765_v13, %v12569_v11  ;;  %v3041_v0 = vadd.f32 %v2987_v14, %v2805_v60 }
 0x39a   : > { %v4847_v56 = vsel %vm11624_vm9, %v4838_v28, %v12572_v39  ;;  %5954 = vmatmul.bf16.gmra.mxu2 %v5770_v27  ;;  %v3789_v29 = vand.u32 65535, %v12578_v17  ;;  %v3790_v23 = vshrl.u32 %v12578_v17, 16  ;;  %v12594_v46 = vadd.f32 %v2756_v40, %v14461_v20 }
 0x39b   : > { %5049 = vst [vmem:[#allocation2 + $0x5c] sm:$0xf] %v4847_v56  ;;  %vm4156_vm14 = vcmp.ne.s32.totalorder %v3754_v6, 0  ;;  %vm4192_vm1 = vcmp.lt.s32.totalorder %v3754_v6, 0  ;;  %v4264_v9 = vadd.s32 18, %v3754_v6  ;;  %v3780_v54 = vadd.s32 %v3779_v10, %v3770_v42 }
 0x39c   : > { %vm4228_vm11 = vmand %vm4192_vm1, %vm4156_vm14  ;;  %v3792_v25 = vmul.u32 14564, %v3789_v29  ;;  %v3793_v3 = vmul.u32 58254, %v3789_v29  ;;  %v3794_v41 = vmul.u32 14564, %v3790_v23  ;;  %v4453_v60 = vmax.f32 %v12575_v4, 0.0 }
 0x39d   : > { %v4300_v31 = vsel %vm4228_vm11, %v4264_v9, %v3754_v6  ;;  %v3781_v8 = vshrl.u32 %v3780_v54, 4  ;;  %v14462_v13 = vrot.slane %v12366_v53, 1  ;;  %v3795_v28 = vmul.u32 58254, %v3790_v23 }
 0x39e   : > { %vm4336_vm12 = vcmp.lt.s32.totalorder %v4300_v31, 16  ;;  %v3796_v42 = vshll.u32 %v3793_v3, 16  ;;  %v3798_v10 = vshll.u32 %v3794_v41, 16  ;;  %v4378_v56 = vmul.f32 %v12413_v49, %v3041_v0  ;;  %v12611_v0 = vld [vmem:[#allocation2 + $0x30] sm:$0xff] }
 0x39f   : > { %v6192_v14 = vsel %vm891_vm2, %v14462_v13, %v14342_v21  ;;  %v4560_v40 = vsel %vm4336_vm12, %v4452_v57, 0.0  ;;  %v3782_v27 = vmul.u32 18, %v3781_v8  ;;  %v3797_v9 = vshrl.u32 %v3793_v3, 16  ;;  %v12609_v57 = vpop.f32.mrf.mxu3  ;;  %v12614_v3 = vpop.f32.mrf.mxu1  ;;  %v12625_v21 = vld [vmem:[#allocation2 + $0x28] sm:$0xff] }
 0x3a0   : > { %6307 = vmatmul.bf16.gmra.mxu0 %v6192_v14  ;;  %v4614_v29 = vpack.c.bf16 %v4560_v40, %v4560_v40  ;;  %vm3800_vm15 = vc.u32 %v3792_v25, %v3796_v42  ;;  %v3802_v4 = vadd.s32 %v3796_v42, %v3792_v25  ;;  %v3799_v53 = vshrl.u32 %v3794_v41, 16  ;;  %14463 = vst [vmem:[#allocation8_spill] sm:$0xff] %v12614_v3  ;;  %v2989_v41 = vpop.f32.mrf.mxu0  ;;  %v12617_v40 = vpop.f32.mrf.mxu2 }
 0x3a1   : > { %v3783_v54 = vsub.s32 %v12529_v47, %v3782_v27  ;;  %v3801_v20 = vsel %vm3800_vm15, 1, %v14380_v2  ;;  %v12607_v23 = vadd.s32 200, %v11205_v34 }
 0x3a2   : > { %v4850_v31 = vshrl.u32 %v4614_v29, 16  ;;  %v4853_v13 = vshll.u32 %v4614_v29, 16  ;;  %v3803_v8 = vadd.s32 %v3801_v20, %v3795_v28  ;;  %vm3804_vm8 = vc.u32 %v3802_v4, %v3798_v10  ;;  %6104 = vmatmul.bf16.gmra.mxu3 %v12611_v0 }
 0x3a3   : > { %vm4157_vm10 = vcmp.ne.s32.totalorder %v3783_v54, 0  ;;  %vm4193_vm0 = vcmp.lt.s32.totalorder %v3783_v54, 0  ;;  %v4265_v47 = vadd.s32 18, %v3783_v54  ;;  %v3805_v25 = vsel %vm3804_vm8, 1, %v14380_v2 }
 0x3a4   : > { %v4852_v14 = vrot.slane %v4850_v31, 6  ;;  %v4855_v42 = vrot.slane %v4853_v13, 7  ;;  %vm4229_vm4 = vmand %vm4193_vm0, %vm4157_vm10  ;;  %v3807_v27 = vadd.s32 %v3805_v25, %v3803_v8  ;;  %v12620_v28 = vadd.f32 %v12426_v59, %v4378_v56 }
 0x3a5   : > { %v4848_v10 = vrot.slane %v12572_v39, 4  ;;  %v4301_v29 = vsel %vm4229_vm4, %v4265_v47, %v3783_v54  ;;  %v3818_v4 = vand.u32 65535, %v12607_v23  ;;  %v3819_v20 = vshrl.u32 %v12607_v23, 16 }
 0x3a6   : > { %v4856_v6 = vor.u32 %v4855_v42, %v4852_v14  ;;  %vm4337_vm14 = vcmp.lt.s32.totalorder %v4301_v29, 16  ;;  %v3808_v31 = vadd.s32 %v3807_v27, %v3797_v9  ;;  %v3042_v13 = vadd.f32 %v2989_v41, %v12550_v50  ;;  %v12633_v41 = vld [vmem:[#allocation2 + $0x58] sm:$0xff] }
 0x3a7   : > { %v4561_v3 = vsel %vm4337_vm14, %v4453_v60, 0.0  ;;  %v3821_v7 = vmul.u32 14564, %v3818_v4  ;;  %v3822_v8 = vmul.u32 58254, %v3818_v4  ;;  %v3823_v25 = vmul.u32 14564, %v3819_v20 }
 0x3a8   : > { %v4857_v56 = vsel %vm11624_vm9, %v4848_v10, %v4856_v6  ;;  %v4615_v39 = vpack.c.bf16 %v4561_v3, %v4561_v3  ;;  %v3809_v54 = vadd.s32 %v3808_v31, %v3799_v53  ;;  %v3824_v5 = vmul.u32 58254, %v3819_v20  ;;  %v2761_v31 = vpop.f32.mrf.mxu3 }
 0x3a9   : > { %5050 = vst [vmem:[#allocation2 + $0x60] sm:$0xf] %v4857_v56  ;;  %v3825_v18 = vshll.u32 %v3822_v8, 16  ;;  %v3827_v30 = vshll.u32 %v3823_v25, 16  ;;  %v4379_v60 = vmul.f32 %v12413_v49, %v3042_v13  ;;  %v4858_v27 = vrot.slane %v4856_v6, 4  ;;  %v12636_v56 = vpop.f32.mrf.mxu1  ;;  %v2992_v13 = vpop.f32.mrf.mxu0 }
 0x3aa   : > { %v4860_v9 = vshrl.u32 %v4615_v39, 16  ;;  %v4863_v42 = vshll.u32 %v4615_v39, 16  ;;  %v3810_v50 = vshrl.u32 %v3809_v54, 4  ;;  %v3826_v29 = vshrl.u32 %v3822_v8, 16  ;;  %14464 = vst [vmem:[#allocation19_spill] sm:$0xff] %v12636_v56  ;;  %v12641_v6 = vpop.f32.mrf.mxu2 }
 0x3ab   : > { %vm3829_vm1 = vc.u32 %v3821_v7, %v3825_v18  ;;  %v3831_v3 = vadd.s32 %v3825_v18, %v3821_v7  ;;  %v3828_v47 = vshrl.u32 %v3823_v25, 16  ;;  %v5771_v39 = vshrl.u32 %v12552_v52, 16 }
 0x3ac   : > { %v4862_v53 = vrot.slane %v4860_v9, 6  ;;  %v4865_v10 = vrot.slane %v4863_v42, 7  ;;  %v3811_v4 = vmul.u32 18, %v3810_v50  ;;  %v3830_v20 = vsel %vm3829_vm1, 1, %v14380_v2 }
 0x3ad   : > { %v3832_v14 = vadd.s32 %v3830_v20, %v3824_v5  ;;  %vm3833_vm11 = vc.u32 %v3831_v3, %v3827_v30  ;;  %v5775_v8 = vshll.u32 %v12633_v41, 16  ;;  %v12647_v42 = vadd.f32 %v12426_v59, %v4379_v60 }
 0x3ae   : > { %v12639_v54 = vor.u32 %v4865_v10, %v4862_v53  ;;  %v3812_v18 = vsub.s32 %v12578_v17, %v3811_v4  ;;  %v3834_v7 = vsel %vm3833_vm11, 1, %v14380_v2  ;;  %v5773_v5 = vor.u32 %v5771_v39, %v12569_v11  ;;  %v14469_v10 = vld [vmem:[#allocation13_spill] sm:$0xff]  ;;  %v14470_v4 = vld [vmem:[#allocation14_spill] sm:$0xff] }
 0x3af   : > { %v3836_v9 = vadd.s32 %v3834_v7, %v3832_v14  ;;  %v14465_v30 = vrot.slane %v12625_v21, 1  ;;  %v14466_v25 = vrot.slane %v12507_v38, 1  ;;  %v3043_v14 = vadd.f32 %v2992_v13, %v12594_v46  ;;  %v14471_v46 = vld [vmem:[#allocation12_spill] sm:$0xff] }
 0x3b0   : > { %v4867_v17 = vsel %vm11624_vm9, %v4858_v27, %v12639_v54  ;;  %vm4158_vm12 = vcmp.ne.s32.totalorder %v3812_v18, 0  ;;  %vm4194_vm15 = vcmp.lt.s32.totalorder %v3812_v18, 0  ;;  %v4266_v11 = vadd.s32 18, %v3812_v18 }
 0x3b1   : > { %v6579_v50 = vsel %vm891_vm2, %v14466_v25, %v14465_v30  ;;  %5051 = vst [vmem:[#allocation2 + $0x64] sm:$0xf] %v4867_v17  ;;  %vm12659_vm8 = vmand %vm4194_vm15, %vm4158_vm12  ;;  %v3837_v3 = vadd.s32 %v3836_v9, %v3826_v29  ;;  %v12663_v53 = vrot.slane %v5775_v8, 1  ;;  %v12666_v38 = vadd.s32 208, %v11205_v34  ;;  %v12682_v8 = vld [vmem:[#allocation2 + $0x30] sm:$0xff]  ;;  %v12684_v9 = vld [vmem:[#allocation2 + $0x38] sm:$0xff] }
 0x3b2   : > { %6697 = vmatmul.bf16.gmra.mxu1 %v6579_v50  ;;  %v12670_v27 = vadd.f32 %v14470_v4, %v14469_v10  ;;  %v2808_v20 = vadd.f32 %v12609_v57, %v12498_v63  ;;  %v12675_v39 = vadd.f32 %v2761_v31, %v14471_v46  ;;  %v14472_v13 = vrot.slane %v12493_v24, 1  ;;  %6109 = vmatmul.bf16.gmra.mxu3 %v12684_v9 }
 0x3b3   : > { %v14473_v7 = vrot.slane %v12432_v32, 1  ;;  %v4302_v30 = vsel %vm12659_vm8, %v4266_v11, %v3812_v18  ;;  %v3838_v25 = vadd.s32 %v3837_v3, %v3828_v47  ;;  %v5778_v63 = vsel %vm440_vm3, %v5773_v5, %v12663_v53  ;;  %v12698_v3 = vpop.f32.mrf.mxu3 }
 0x3b4   : > { %v3847_v57 = vand.u32 65535, %v12666_v38  ;;  %vm4338_vm10 = vcmp.lt.s32.totalorder %v4302_v30, 16  ;;  %v4455_v32 = vmax.f32 %v12647_v42, 0.0  ;;  %5959 = vmatmul.bf16.gmra.mxu2 %v5778_v63  ;;  %v3848_v31 = vshrl.u32 %v12666_v38, 16  ;;  %v12701_v42 = vpop.f32.mrf.mxu1 }
 0x3b5   : > { %v6194_v29 = vsel %vm891_vm2, %v14473_v7, %v14472_v13  ;;  %v4380_v50 = vmul.f32 %v12413_v49, %v3043_v14  ;;  %v14474_v17 = vmax.f32 %v12620_v28, 0.0  ;;  %v3839_v60 = vshrl.u32 %v3838_v25, 4  ;;  %14475 = vst [vmem:[#allocation9_spill] sm:$0xff] %v12701_v42  ;;  %v12704_v25 = vpop.f32.mrf.mxu2 }
 0x3b6   : > { %6312 = vmatmul.bf16.gmra.mxu0 %v6194_v29  ;;  %v3850_v18 = vmul.u32 14564, %v3847_v57  ;;  %v3851_v47 = vmul.u32 58254, %v3847_v57  ;;  %v4868_v11 = vrot.slane %v12639_v54, 4  ;;  %v3852_v4 = vmul.u32 14564, %v3848_v31 }
 0x3b7   : > { %v4562_v10 = vsel %vm4338_vm10, %v14474_v17, 0.0  ;;  %v3840_v13 = vmul.u32 18, %v3839_v60  ;;  %v3853_v7 = vmul.u32 58254, %v3848_v31  ;;  %v12707_v54 = vadd.f32 %v12426_v59, %v4380_v50 }
 0x3b8   : > { %v4616_v5 = vpack.c.bf16 %v4562_v10, %v4562_v10  ;;  %v3854_v29 = vshll.u32 %v3851_v47, 16  ;;  %v3856_v63 = vshll.u32 %v3852_v4, 16  ;;  %v12711_v10 = vadd.s32 216, %v11205_v34 }
 0x3b9   : > { %v3841_v57 = vsub.s32 %v12607_v23, %v3840_v13  ;;  %v14476_v14 = vrot.slane %v12682_v8, 1  ;;  %v2994_v23 = vpop.f32.mrf.mxu0 }
 0x3ba   : > { %v4870_v28 = vshrl.u32 %v4616_v5, 16  ;;  %v4873_v30 = vshll.u32 %v4616_v5, 16  ;;  %vm3858_vm0 = vc.u32 %v3850_v18, %v3854_v29  ;;  %v3860_v17 = vadd.s32 %v3854_v29, %v3850_v18 }
 0x3bb   : > { %v3859_v46 = vsel %vm3858_vm0, 1, %v14380_v2  ;;  %v14477_v5 = vrot.slane %v12625_v21, 1  ;;  %vm4159_vm4 = vcmp.ne.s32.totalorder %v3841_v57, 0  ;;  %vm4195_vm14 = vcmp.lt.s32.totalorder %v3841_v57, 0 }
 0x3bc   : > { %v4872_v60 = vrot.slane %v4870_v28, 6  ;;  %v4875_v31 = vrot.slane %v4873_v30, 7  ;;  %v4267_v50 = vadd.s32 18, %v3841_v57  ;;  %v3861_v56 = vadd.s32 %v3859_v46, %v3853_v7  ;;  %vm4231_vm1 = vmand %vm4195_vm14, %vm4159_vm4 }
 0x3bd   : > { %v6581_v42 = vsel %vm891_vm2, %v14477_v5, %v14476_v14  ;;  %v3855_v18 = vshrl.u32 %v3851_v47, 16  ;;  %vm3862_vm11 = vc.u32 %v3860_v17, %v3856_v63  ;;  %v3876_v29 = vand.u32 65535, %v12711_v10 }
 0x3be   : > { %v4876_v13 = vor.u32 %v4875_v31, %v4872_v60  ;;  %v4303_v28 = vsel %vm4231_vm1, %v4267_v50, %v3841_v57  ;;  %v3857_v30 = vshrl.u32 %v3852_v4, 16  ;;  %v3863_v51 = vsel %vm3862_vm11, 1, %v14380_v2  ;;  %v12725_v4 = vpop.f32.mrf.mxu3 }
 0x3bf   : > { %v3877_v62 = vshrl.u32 %v12711_v10, 16  ;;  %vm4339_vm12 = vcmp.lt.s32.totalorder %v4303_v28, 16  ;;  %v3865_v14 = vadd.s32 %v3863_v51, %v3861_v56  ;;  %v3044_v5 = vadd.f32 %v2994_v23, %v2808_v20  ;;  %v12732_v56 = vpop.f32.mrf.mxu1 }
 0x3c0   : > { %v4877_v21 = vsel %vm11624_vm9, %v4868_v11, %v4876_v13  ;;  %v4563_v46 = vsel %vm4339_vm12, %v4455_v32, 0.0  ;;  %v3879_v7 = vmul.u32 14564, %v3876_v29  ;;  %v3880_v60 = vmul.u32 58254, %v3876_v29  ;;  %14480 = vst [vmem:[#allocation13_spill] sm:$0xff] %v12732_v56 }
 0x3c1   : > { %5052 = vst [vmem:[#allocation2 + $0x68] sm:$0xf] %v4877_v21  ;;  %v3881_v47 = vmul.u32 14564, %v3877_v62  ;;  %v4617_v63 = vpack.c.bf16 %v4563_v46, %v4563_v46  ;;  %v3866_v17 = vadd.s32 %v3865_v14, %v3855_v18  ;;  %v14478_v31 = vrot.slane %v12560_v37, 1  ;;  %v12734_v18 = vpop.f32.mrf.mxu2  ;;  %v2997_v56 = vpop.f32.mrf.mxu0 }
 0x3c2   : > { %6702 = vmatmul.bf16.gmra.mxu1 %v6581_v42  ;;  %v14479_v50 = vrot.slane %v12493_v24, 1  ;;  %v4878_v51 = vrot.slane %v4876_v13, 4  ;;  %v3882_v20 = vmul.u32 58254, %v3877_v62  ;;  %v3883_v32 = vshll.u32 %v3880_v60, 16  ;;  %v12737_v42 = vld [vmem:[#allocation2 + $0x60] sm:$0xff]  ;;  %v10005_v24 = vld [vmem:[%s14322_s2 + $0x110] sm:$0xff]  ;;  %6114 = vmatmul.bf16.gmra.mxu3 %v12342_v36 }
 0x3c3   : > { %v3885_v23 = vshll.u32 %v3881_v47, 16  ;;  %v4880_v29 = vshrl.u32 %v4617_v63, 16  ;;  %v4883_v28 = vshll.u32 %v4617_v63, 16  ;;  %v3867_v21 = vadd.s32 %v3866_v17, %v3857_v30  ;;  %7071 = vmatpush.bf16.msrb.mxu2 %v10005_v24 }
 0x3c4   : > { %v6196_v11 = vsel %vm891_vm2, %v14479_v50, %v14478_v31  ;;  %v4381_v14 = vmul.f32 %v12413_v49, %v3044_v5  ;;  %v3884_v13 = vshrl.u32 %v3880_v60, 16  ;;  %vm3887_vm15 = vc.u32 %v3879_v7, %v3883_v32 }
 0x3c5   : > { %v3889_v62 = vadd.s32 %v3883_v32, %v3879_v7  ;;  %v12744_v46 = vadd.s32 224, %v11205_v34  ;;  %v4882_v63 = vrot.slane %v4880_v29, 6  ;;  %v4885_v31 = vrot.slane %v4883_v28, 7 }
 0x3c6   : > { %6317 = vmatmul.bf16.gmra.mxu0 %v6196_v11  ;;  %v3868_v30 = vshrl.u32 %v3867_v21, 4  ;;  %v3888_v5 = vsel %vm3887_vm15, 1, %v14380_v2  ;;  %v3886_v17 = vshrl.u32 %v3881_v47, 16  ;;  %v5779_v57 = vshrl.u32 %v12633_v41, 16 }
 0x3c7   : > { %v3890_v50 = vadd.s32 %v3888_v5, %v3882_v20  ;;  %vm3891_vm8 = vc.u32 %v3889_v62, %v3885_v23  ;;  %v12748_v36 = vor.u32 %v4885_v31, %v4882_v63  ;;  %v5783_v32 = vshll.u32 %v12737_v42, 16 }
 0x3c8   : > { %v3869_v60 = vmul.u32 18, %v3868_v30  ;;  %v3892_v7 = vsel %vm3891_vm8, 1, %v14380_v2  ;;  %v12753_v29 = vadd.f32 %v12426_v59, %v4381_v14  ;;  %v5781_v28 = vor.u32 %v5779_v57, %v12663_v53  ;;  %v12767_v30 = vpop.f32.mrf.mxu3 }
 0x3c9   : > { %v3894_v11 = vadd.s32 %v3892_v7, %v3890_v50  ;;  %v3905_v47 = vand.u32 65535, %v12744_v46  ;;  %v4887_v20 = vsel %vm11624_vm9, %v4878_v51, %v12748_v36  ;;  %v12761_v21 = vrot.slane %v5783_v32, 1  ;;  %v12771_v51 = vpop.f32.mrf.mxu1  ;;  %v12773_v50 = vpop.f32.mrf.mxu2 }
 0x3ca   : > { %v3870_v23 = vsub.s32 %v12666_v38, %v3869_v60  ;;  %v3045_v24 = vadd.f32 %v2997_v56, %v12675_v39  ;;  %5053 = vst [vmem:[#allocation2 + $0x6c] sm:$0xf] %v4887_v20  ;;  %v3906_v63 = vshrl.u32 %v12744_v46, 16  ;;  %v2810_v38 = vadd.f32 %v12698_v3, %v12670_v27 }
 0x3cb   : > { %v3895_v62 = vadd.s32 %v3894_v11, %v3884_v13  ;;  %v3908_v14 = vmul.u32 14564, %v3905_v47  ;;  %v3909_v31 = vmul.u32 58254, %v3905_v47  ;;  %v5786_v57 = vsel %vm440_vm3, %v5781_v28, %v12761_v21  ;;  %14481 = vst [vmem:[#allocation14_spill] sm:$0xff] %v12771_v51 }
 0x3cc   : > { %vm4160_vm10 = vcmp.ne.s32.totalorder %v3870_v23, 0  ;;  %vm4196_vm0 = vcmp.lt.s32.totalorder %v3870_v23, 0  ;;  %v4268_v53 = vadd.s32 18, %v3870_v23  ;;  %5964 = vmatmul.bf16.gmra.mxu2 %v5786_v57  ;;  %v3910_v56 = vmul.u32 14564, %v3906_v63 }
 0x3cd   : > { %vm4232_vm4 = vmand %vm4196_vm0, %vm4160_vm10  ;;  %v3896_v39 = vadd.s32 %v3895_v62, %v3886_v17  ;;  %v3912_v13 = vshll.u32 %v3909_v31, 16  ;;  %v3911_v60 = vmul.u32 58254, %v3906_v63  ;;  %v4382_v7 = vmul.f32 %v12413_v49, %v3045_v24  ;;  %v2999_v24 = vpop.f32.mrf.mxu0 }
 0x3ce   : > { %v4304_v5 = vsel %vm4232_vm4, %v4268_v53, %v3870_v23  ;;  %v4457_v28 = vmax.f32 %v12753_v29, 0.0  ;;  %v3914_v27 = vshll.u32 %v3910_v56, 16  ;;  %v14482_v3 = vmax.f32 %v12707_v54, 0.0 }
 0x3cf   : > { %vm4340_vm14 = vcmp.lt.s32.totalorder %v4304_v5, 16  ;;  %v3897_v11 = vshrl.u32 %v3896_v39, 4  ;;  %vm3916_vm1 = vc.u32 %v3908_v14, %v3912_v13  ;;  %v3918_v17 = vadd.s32 %v3912_v13, %v3908_v14 }
 0x3d0   : > { %v4564_v47 = vsel %vm4340_vm14, %v14482_v3, 0.0  ;;  %v12781_v20 = vadd.s32 232, %v11205_v34  ;;  %v3913_v63 = vshrl.u32 %v3909_v31, 16  ;;  %v3917_v49 = vsel %vm3916_vm1, 1, %v14380_v2 }
 0x3d1   : > { %v4618_v23 = vpack.c.bf16 %v4564_v47, %v4564_v47  ;;  %v3898_v62 = vmul.u32 18, %v3897_v11  ;;  %v3915_v53 = vshrl.u32 %v3910_v56, 16  ;;  %v3919_v57 = vadd.s32 %v3917_v49, %v3911_v60 }
 0x3d2   : > { %vm3920_vm11 = vc.u32 %v3918_v17, %v3914_v27  ;;  %v12785_v29 = vadd.f32 %v12426_v59, %v4382_v7  ;;  %v3046_v3 = vadd.f32 %v2999_v24, %v2810_v38  ;;  %v3934_v11 = vand.u32 65535, %v12781_v20  ;;  %6119 = vmatmul.bf16.gmra.mxu3 %v12468_v61  ;;  %v12796_v27 = vpop.f32.mrf.mxu3 }
 0x3d3   : > { %v4890_v39 = vshrl.u32 %v4618_v23, 16  ;;  %v4893_v54 = vshll.u32 %v4618_v23, 16  ;;  %v3899_v5 = vsub.s32 %v12711_v10, %v3898_v62  ;;  %v3921_v14 = vsel %vm3920_vm11, 1, %v14380_v2  ;;  %v12799_v62 = vpop.f32.mrf.mxu1 }
 0x3d4   : > { %v3923_v13 = vadd.s32 %v3921_v14, %v3919_v57  ;;  %v3935_v31 = vshrl.u32 %v12781_v20, 16  ;;  %v3937_v47 = vmul.u32 14564, %v3934_v11  ;;  %v3938_v38 = vmul.u32 58254, %v3934_v11  ;;  %14485 = vst [vmem:[#allocation12_spill] sm:$0xff] %v12799_v62  ;;  %v12804_v57 = vpop.f32.mrf.mxu2 }
 0x3d5   : > { %v4892_v56 = vrot.slane %v4890_v39, 6  ;;  %v4895_v60 = vrot.slane %v4893_v54, 7  ;;  %vm4161_vm12 = vcmp.ne.s32.totalorder %v3899_v5, 0  ;;  %vm4197_vm15 = vcmp.lt.s32.totalorder %v3899_v5, 0 }
 0x3d6   : > { %vm12792_vm8 = vmand %vm4197_vm15, %vm4161_vm12  ;;  %v4269_v7 = vadd.s32 18, %v3899_v5  ;;  %v3924_v10 = vadd.s32 %v3923_v13, %v3913_v63  ;;  %v4888_v17 = vrot.slane %v12748_v36, 4  ;;  %v3939_v49 = vmul.u32 14564, %v3935_v31  ;;  %v12811_v36 = vld [vmem:[%s14324_s4] ss:$0 sm:$0xff] }
 0x3d7   : > { %v4896_v23 = vor.u32 %v4895_v60, %v4892_v56  ;;  %v3940_v54 = vmul.u32 58254, %v3935_v31  ;;  %v3941_v63 = vshll.u32 %v3938_v38, 16  ;;  %v4383_v11 = vmul.f32 %v12811_v36, %v3046_v3  ;;  %v12814_v56 = vld [vmem:[#allocation2 + $0x68] sm:$0xff] }
 0x3d8   : > { %v4305_v24 = vsel %vm12792_vm8, %v4269_v7, %v3899_v5  ;;  %v3925_v39 = vadd.s32 %v3924_v10, %v3915_v53  ;;  %v3943_v13 = vshll.u32 %v3939_v49, 16  ;;  %v12816_v5 = vld [vmem:[#allocation2 + $0x38] sm:$0xff]  ;;  %v3942_v60 = vshrl.u32 %v3938_v38, 16 }
 0x3d9   : > { %v4897_v14 = vsel %vm11624_vm9, %v4888_v17, %v4896_v23  ;;  %vm4341_vm10 = vcmp.lt.s32.totalorder %v4305_v24, 16  ;;  %vm3945_vm0 = vc.u32 %v3937_v47, %v3941_v63  ;;  %v3944_v7 = vshrl.u32 %v3939_v49, 16 }
 0x3da   : > { %5054 = vst [vmem:[#allocation2 + $0x70] sm:$0xf] %v4897_v14  ;;  %v4565_v53 = vsel %vm4341_vm10, %v4457_v28, 0.0  ;;  %v3926_v31 = vshrl.u32 %v3925_v39, 4  ;;  %v3946_v10 = vsel %vm3945_vm0, 1, %v14380_v2  ;;  %v3947_v17 = vadd.s32 %v3941_v63, %v3937_v47 }
 0x3db   : > { %v4619_v59 = vpack.c.bf16 %v4565_v53, %v4565_v53  ;;  %v3948_v61 = vadd.s32 %v3946_v10, %v3940_v54  ;;  %v5787_v32 = vshrl.u32 %v12737_v42, 16  ;;  %v5791_v3 = vshll.u32 %v12814_v56, 16 }
 0x3dc   : > { %v3927_v24 = vmul.u32 18, %v3926_v31  ;;  %vm3949_vm4 = vc.u32 %v3947_v17, %v3943_v13  ;;  %v14343_v14 = vrot.slane %v12816_v5, 1  ;;  %v14486_v53 = vrot.slane %v12682_v8, 1  ;;  %v14488_v8 = vld [vmem:[#allocation16_spill] sm:$0xff] }
 0x3dd   : > { %v4900_v62 = vshrl.u32 %v4619_v59, 16  ;;  %v4903_v51 = vshll.u32 %v4619_v59, 16  ;;  %v3950_v38 = vsel %vm3949_vm4, 1, %v14380_v2  ;;  %v5789_v49 = vor.u32 %v5787_v32, %v12761_v21  ;;  %v12834_v59 = vpop.f32.mrf.mxu3 }
 0x3de   : > { %v3928_v28 = vsub.s32 %v12744_v46, %v3927_v24  ;;  %v12825_v39 = vrot.slane %v5791_v3, 1  ;;  %v3952_v54 = vadd.s32 %v3950_v38, %v3948_v61  ;;  %v6583_v31 = vsel %vm891_vm2, %v14486_v53, %v14343_v14  ;;  %v14489_v61 = vld [vmem:[#allocation18_spill] sm:$0xff]  ;;  %v12842_v24 = vpop.f32.mrf.mxu2  ;;  %v3002_v3 = vpop.f32.mrf.mxu0  ;;  %v14492_v53 = vld [vmem:[#allocation15_spill] sm:$0xff] }
 0x3df   : > { %v4902_v47 = vrot.slane %v4900_v62, 6  ;;  %v4905_v63 = vrot.slane %v4903_v51, 7  ;;  %6707 = vmatmul.bf16.gmra.mxu1 %v6583_v31  ;;  %v4898_v21 = vrot.slane %v4896_v23, 4  ;;  %v12838_v51 = vpop.f32.mrf.mxu1  ;;  %v2443_v10 = vadd.f32 %v14489_v61, %v14488_v8  ;;  %v14495_v8 = vld [vmem:[#allocation23_spill] sm:$0xff] }
 0x3e0   : > { %vm4162_vm14 = vcmp.ne.s32.totalorder %v3928_v28, 0  ;;  %vm4198_vm1 = vcmp.lt.s32.totalorder %v3928_v28, 0  ;;  %v4270_v13 = vadd.s32 18, %v3928_v28  ;;  %v5794_v46 = vsel %vm440_vm3, %v5789_v49, %v12825_v39  ;;  %14487 = vst [vmem:[#allocation40_spill] sm:$0xff] %v12838_v51 }
 0x3e1   : > { %v12836_v32 = vor.u32 %v4905_v63, %v4902_v47  ;;  %vm4234_vm11 = vmand %vm4198_vm1, %vm4162_vm14  ;;  %v3953_v62 = vadd.s32 %v3952_v54, %v3942_v60  ;;  %5969 = vmatmul.bf16.gmra.mxu2 %v5794_v46  ;;  %v12845_v38 = vadd.s32 240, %v11205_v34  ;;  %v14490_v49 = vrot.slane %v12611_v0, 1 }
 0x3e2   : > { %v4306_v17 = vsel %vm4234_vm11, %v4270_v13, %v3928_v28  ;;  %v14491_v23 = vrot.slane %v12560_v37, 1  ;;  %v12858_v28 = vld [vmem:[%s14325_s5] ss:$0 sm:$0xff]  ;;  %v2811_v31 = vadd.f32 %v12725_v4, %v14492_v53  ;;  %v14493_v37 = vmax.f32 %v12785_v29, 0.0  ;;  %6124 = vmatmul.bf16.gmra.mxu3 %v12552_v52 }
 0x3e3   : > { %v4907_v60 = vsel %vm11624_vm9, %v4898_v21, %v12836_v32  ;;  %vm4342_vm12 = vcmp.lt.s32.totalorder %v4306_v17, 16  ;;  %v3954_v63 = vadd.s32 %v3953_v62, %v3944_v7  ;;  %v4423_v54 = vadd.f32 %v12858_v28, %v4383_v11  ;;  %v12867_v7 = vld [vmem:[#allocation2 + $0x40] sm:$0xff] }
 0x3e4   : > { %v6198_v47 = vsel %vm891_vm2, %v14491_v23, %v14490_v49  ;;  %5055 = vst [vmem:[#allocation2 + $0x74] sm:$0xf] %v4907_v60  ;;  %v4566_v13 = vsel %vm4342_vm12, %v14493_v37, 0.0  ;;  %v3963_v46 = vand.u32 65535, %v12845_v38  ;;  %v3964_v21 = vshrl.u32 %v12845_v38, 16  ;;  %v14494_v62 = vld [vmem:[#allocation22_spill] sm:$0xff] }
 0x3e5   : > { %6322 = vmatmul.bf16.gmra.mxu0 %v6198_v47  ;;  %v12872_v61 = vadd.f32 %v14495_v8, %v14494_v62  ;;  %v2812_v11 = vadd.f32 %v12767_v30, %v2443_v10  ;;  %v4620_v17 = vpack.c.bf16 %v4566_v13, %v4566_v13  ;;  %v3955_v4 = vshrl.u32 %v3954_v63, 4 }
 0x3e6   : > { %v3047_v49 = vadd.f32 %v3002_v3, %v2811_v31  ;;  %v3966_v23 = vmul.u32 14564, %v3963_v46  ;;  %v3967_v29 = vmul.u32 58254, %v3963_v46  ;;  %v3968_v47 = vmul.u32 14564, %v3964_v21  ;;  %v12879_v31 = vpop.f32.mrf.mxu3 }
 0x3e7   : > { %v4910_v60 = vshrl.u32 %v4620_v17, 16  ;;  %v4913_v53 = vshll.u32 %v4620_v17, 16  ;;  %v3956_v37 = vmul.u32 18, %v3955_v4  ;;  %v4459_v14 = vmax.f32 %v4423_v54, 0.0  ;;  %v12886_v46 = vpop.f32.mrf.mxu1  ;;  %v12888_v17 = vpop.f32.mrf.mxu2 }
 0x3e8   : > { %v4908_v51 = vrot.slane %v12836_v32, 4  ;;  %v3970_v48 = vshll.u32 %v3967_v29, 16  ;;  %v3972_v52 = vshll.u32 %v3968_v47, 16  ;;  %v14344_v26 = vrot.slane %v12867_v7, 1  ;;  %14496 = vst [vmem:[#allocation16_spill] sm:$0xff] %v12886_v46 }
 0x3e9   : > { %v4912_v62 = vrot.slane %v4910_v60, 6  ;;  %v4915_v8 = vrot.slane %v4913_v53, 7  ;;  %v3957_v30 = vsub.s32 %v12781_v20, %v3956_v37  ;;  %v3969_v10 = vmul.u32 58254, %v3964_v21 }
 0x3ea   : > { %vm3974_vm15 = vc.u32 %v3966_v23, %v3970_v48  ;;  %v3976_v3 = vadd.s32 %v3970_v48, %v3966_v23  ;;  %v4384_v63 = vmul.f32 %v12811_v36, %v3047_v49  ;;  %v12882_v13 = vadd.s32 248, %v11205_v34  ;;  %v3004_v48 = vpop.f32.mrf.mxu0 }
 0x3eb   : > { %v12884_v54 = vor.u32 %v4915_v8, %v4912_v62  ;;  %vm4163_vm8 = vcmp.ne.s32.totalorder %v3957_v30, 0  ;;  %vm4199_vm10 = vcmp.lt.s32.totalorder %v3957_v30, 0  ;;  %v4271_v32 = vadd.s32 18, %v3957_v30 }
 0x3ec   : > { %vm4235_vm0 = vmand %vm4199_vm10, %vm4163_vm8  ;;  %v3975_v20 = vsel %vm3974_vm15, 1, %v14380_v2  ;;  %vm3978_vm4 = vc.u32 %v3976_v3, %v3972_v52  ;;  %v14497_v21 = vrot.slane %v12816_v5, 1  ;;  %v3971_v53 = vshrl.u32 %v3967_v29, 16 }
 0x3ed   : > { %v4917_v23 = vsel %vm11624_vm9, %v4908_v51, %v12884_v54  ;;  %v4307_v60 = vsel %vm4235_vm0, %v4271_v32, %v3957_v30  ;;  %v3977_v37 = vadd.s32 %v3975_v20, %v3969_v10  ;;  %v3979_v52 = vsel %vm3978_vm4, 1, %v14380_v2  ;;  %v14498_v51 = vld [vmem:[#allocation20_spill] sm:$0xff] }
 0x3ee   : > { %v6585_v4 = vsel %vm891_vm2, %v14497_v21, %v14344_v26  ;;  %5056 = vst [vmem:[#allocation2 + $0x78] sm:$0xf] %v4917_v23  ;;  %vm4343_vm14 = vcmp.lt.s32.totalorder %v4307_v60, 16  ;;  %v3992_v62 = vand.u32 65535, %v12882_v13  ;;  %v3993_v8 = vshrl.u32 %v12882_v13, 16 }
 0x3ef   : > { %v4567_v5 = vsel %vm4343_vm14, %v4459_v14, 0.0  ;;  %v3973_v3 = vshrl.u32 %v3968_v47, 16  ;;  %v3981_v21 = vadd.s32 %v3979_v52, %v3977_v37  ;;  %v3048_v26 = vadd.f32 %v3004_v48, %v2812_v11  ;;  %6712 = vmatmul.bf16.gmra.mxu1 %v6585_v4 }
 0x3f0   : > { %v4621_v49 = vpack.c.bf16 %v4567_v5, %v4567_v5  ;;  %v3995_v46 = vmul.u32 14564, %v3992_v62  ;;  %v3996_v45 = vmul.u32 58254, %v3992_v62  ;;  %v3997_v22 = vmul.u32 14564, %v3993_v8 }
 0x3f1   : > { %v2813_v29 = vadd.f32 %v12796_v27, %v14498_v51  ;;  %v3982_v30 = vadd.s32 %v3981_v21, %v3971_v53  ;;  %v12906_v10 = vadd.f32 %v12858_v28, %v4384_v63  ;;  %v14499_v32 = vrot.slane %v12684_v9, 1  ;;  %v12915_v53 = vld [vmem:[#allocation2 + $0x70] sm:$0xff]  ;;  %v12927_v21 = vpop.f32.mrf.mxu2 }
 0x3f2   : > { %v14500_v20 = vrot.slane %v12611_v0, 1  ;;  %v4920_v47 = vshrl.u32 %v4621_v49, 16  ;;  %v4923_v11 = vshll.u32 %v4621_v49, 16  ;;  %v3998_v48 = vmul.u32 58254, %v3993_v8  ;;  %v12917_v0 = vpop.f32.mrf.mxu3  ;;  %6129 = vmatmul.bf16.gmra.mxu3 %v12633_v41  ;;  %v12920_v8 = vpop.f32.mrf.mxu1 }
 0x3f3   : > { %v3999_v23 = vshll.u32 %v3996_v45, 16  ;;  %v4918_v60 = vrot.slane %v12884_v54, 4  ;;  %v3983_v4 = vadd.s32 %v3982_v30, %v3973_v3  ;;  %v4001_v37 = vshll.u32 %v3997_v22, 16  ;;  %14501 = vst [vmem:[#allocation18_spill] sm:$0xff] %v12920_v8 }
 0x3f4   : > { %v6200_v14 = vsel %vm891_vm2, %v14500_v20, %v14499_v32  ;;  %v4385_v27 = vmul.f32 %v12811_v36, %v3048_v26  ;;  %v4922_v63 = vrot.slane %v4920_v47, 6  ;;  %v4925_v52 = vrot.slane %v4923_v11, 7  ;;  %v3007_v47 = vpop.f32.mrf.mxu0 }
 0x3f5   : > { %6327 = vmatmul.bf16.gmra.mxu0 %v6200_v14  ;;  %vm4003_vm1 = vc.u32 %v3995_v46, %v3999_v23  ;;  %v4005_v62 = vadd.s32 %v3999_v23, %v3995_v46  ;;  %v3984_v49 = vshrl.u32 %v3983_v4, 4  ;;  %v5795_v5 = vshrl.u32 %v12814_v56, 16  ;;  %v12929_v46 = vld [vmem:[#allocation2 + $0x48] sm:$0xff] }
 0x3f6   : > { %v4004_v54 = vsel %vm4003_vm1, 1, %v14380_v2  ;;  %v5799_v26 = vshll.u32 %v12915_v53, 16  ;;  %v12925_v3 = vor.u32 %v4925_v52, %v4922_v63  ;;  %v4000_v51 = vshrl.u32 %v3996_v45, 16 }
 0x3f7   : > { %v4006_v30 = vadd.s32 %v4004_v54, %v3998_v48  ;;  %vm4007_vm11 = vc.u32 %v4005_v62, %v4001_v37  ;;  %v3985_v32 = vmul.u32 18, %v3984_v49  ;;  %v5797_v20 = vor.u32 %v5795_v5, %v12825_v39  ;;  %v12956_v54 = vld [vmem:[#allocation2 + $0x40] sm:$0xff] }
 0x3f8   : > { %v4008_v41 = vsel %vm4007_vm11, 1, %v14380_v2  ;;  %v12933_v14 = vrot.slane %v5799_v26, 1  ;;  %v4927_v11 = vsel %vm11624_vm9, %v4918_v60, %v12925_v3  ;;  %v4002_v23 = vshrl.u32 %v3997_v22, 16 }
 0x3f9   : > { %v4010_v4 = vadd.s32 %v4008_v41, %v4006_v30  ;;  %v12939_v45 = vadd.f32 %v12858_v28, %v4385_v27  ;;  %5057 = vst [vmem:[#allocation2 + $0x7c] sm:$0xf] %v4927_v11  ;;  %v12943_v48 = vadd.f32 %v12834_v59, %v12872_v61  ;;  %v3986_v37 = vsub.s32 %v12845_v38, %v3985_v32 }
 0x3fa   : > { %v5802_v39 = vsel %vm440_vm3, %v5797_v20, %v12933_v14  ;;  %v12949_v63 = vadd.s32 256, %v11205_v34  ;;  %v4460_v60 = vmax.f32 %v12906_v10, 0.0  ;;  %v3049_v52 = vadd.f32 %v3007_v47, %v2813_v29  ;;  %v12965_v11 = vpop.f32.mrf.mxu1 }
 0x3fb   : > { %v4011_v22 = vadd.s32 %v4010_v4, %v4000_v51  ;;  %5974 = vmatmul.bf16.gmra.mxu2 %v5802_v39  ;;  %v14345_v27 = vrot.slane %v12929_v46, 1  ;;  %vm4164_vm12 = vcmp.ne.s32.totalorder %v3986_v37, 0  ;;  %vm4200_vm15 = vcmp.lt.s32.totalorder %v3986_v37, 0  ;;  %14503 = vst [vmem:[#allocation15_spill] sm:$0xff] %v12965_v11  ;;  %v12968_v39 = vpop.f32.mrf.mxu2 }
 0x3fc   : > { %v4272_v62 = vadd.s32 18, %v3986_v37  ;;  %v4021_v59 = vand.u32 65535, %v12949_v63  ;;  %vm4236_vm8 = vmand %vm4200_vm15, %vm4164_vm12  ;;  %v4461_v61 = vmax.f32 %v12939_v45, 0.0  ;;  %v4022_v49 = vshrl.u32 %v12949_v63, 16 }
 0x3fd   : > { %v4012_v38 = vadd.s32 %v4011_v22, %v4002_v23  ;;  %v14346_v10 = vrot.slane %v12956_v54, 1  ;;  %v4928_v5 = vrot.slane %v12925_v3, 4  ;;  %v14502_v41 = vrot.slane %v12867_v7, 1 }
 0x3fe   : > { %v4308_v29 = vsel %vm4236_vm8, %v4272_v62, %v3986_v37  ;;  %v4024_v26 = vmul.u32 14564, %v4021_v59  ;;  %v4025_v51 = vmul.u32 58254, %v4021_v59  ;;  %v4026_v32 = vmul.u32 14564, %v4022_v49  ;;  %v10004_v59 = vld [vmem:[%s14322_s2 + $0x108] sm:$0xff] }
 0x3ff   : > { %vm4344_vm10 = vcmp.lt.s32.totalorder %v4308_v29, 16  ;;  %v4013_v30 = vshrl.u32 %v4012_v38, 4  ;;  %v6587_v20 = vsel %vm891_vm2, %v14502_v41, %v14345_v27  ;;  %v4027_v23 = vmul.u32 58254, %v4022_v49  ;;  %v12981_v38 = vld [vmem:[#allocation2 + $0x48] sm:$0xff]  ;;  %7072 = vmatpush.bf16.msrb.mxu2 %v10004_v59 }
 0x400   : > { %v4568_v47 = vsel %vm4344_vm10, %v4460_v60, 0.0  ;;  %v4028_v4 = vshll.u32 %v4025_v51, 16  ;;  %v4386_v45 = vmul.f32 %v12811_v36, %v3049_v52  ;;  %v4030_v22 = vshll.u32 %v4026_v32, 16  ;;  %6717 = vmatmul.bf16.gmra.mxu1 %v6587_v20  ;;  %v12986_v20 = vld [vmem:[#allocation2 + $0x50] sm:$0xff]  ;;  %v13273_v44 = vld [vmem:[#allocation2 + $0x78] sm:$0xff] }
 0x401   : > { %v4622_v3 = vpack.c.bf16 %v4568_v47, %v4568_v47  ;;  %v4014_v37 = vmul.u32 18, %v4013_v30  ;;  %v14504_v62 = vrot.slane %v12684_v9, 1  ;;  %v12979_v52 = vadd.s32 264, %v11205_v34  ;;  %14527 = vst [vmem:[#allocation47_spill] sm:$0xff] %v13273_v44 }
 0x402   : > { %vm4032_vm0 = vc.u32 %v4024_v26, %v4028_v4  ;;  %v4034_v60 = vadd.s32 %v4028_v4, %v4024_v26  ;;  %v4029_v26 = vshrl.u32 %v4025_v51, 16  ;;  %v4031_v49 = vshrl.u32 %v4026_v32, 16  ;;  %v12995_v8 = vpop.f32.mrf.mxu1 }
 0x403   : > { %v6202_v7 = vsel %vm891_vm2, %v14504_v62, %v14346_v10  ;;  %v4930_v29 = vshrl.u32 %v4622_v3, 16  ;;  %v4933_v30 = vshll.u32 %v4622_v3, 16  ;;  %v4015_v41 = vsub.s32 %v12882_v13, %v4014_v37  ;;  %v3009_v10 = vpop.f32.mrf.mxu0  ;;  %14505 = vst [vmem:[#allocation22_spill] sm:$0xff] %v12995_v8 }
 0x404   : > { %v4033_v9 = vsel %vm4032_vm0, 1, %v14380_v2  ;;  %vm4036_vm4 = vc.u32 %v4034_v60, %v4030_v22  ;;  %v4050_v4 = vand.u32 65535, %v12979_v52  ;;  %v4051_v37 = vshrl.u32 %v12979_v52, 16 }
 0x405   : > { %v4035_v47 = vadd.s32 %v4033_v9, %v4027_v23  ;;  %6332 = vmatmul.bf16.gmra.mxu0 %v6202_v7  ;;  %v4932_v62 = vrot.slane %v4930_v29, 6  ;;  %v4935_v27 = vrot.slane %v4933_v30, 7  ;;  %vm4165_vm14 = vcmp.ne.s32.totalorder %v4015_v41, 0 }
 0x406   : > { %vm4201_vm1 = vcmp.lt.s32.totalorder %v4015_v41, 0  ;;  %v4273_v3 = vadd.s32 18, %v4015_v41  ;;  %v4037_v13 = vsel %vm4036_vm4, 1, %v14380_v2  ;;  %v4054_v23 = vmul.u32 58254, %v4050_v4 }
 0x407   : > { %vm4237_vm11 = vmand %vm4201_vm1, %vm4165_vm14  ;;  %v4936_v11 = vor.u32 %v4935_v27, %v4932_v62  ;;  %v4039_v51 = vadd.s32 %v4037_v13, %v4035_v47  ;;  %v14347_v22 = vrot.slane %v12986_v20, 1  ;;  %v3050_v7 = vadd.f32 %v3009_v10, %v12943_v48 }
 0x408   : > { %v4309_v60 = vsel %vm4237_vm11, %v4273_v3, %v4015_v41  ;;  %v4053_v59 = vmul.u32 14564, %v4050_v4  ;;  %v4055_v29 = vmul.u32 14564, %v4051_v37  ;;  %v4056_v55 = vmul.u32 58254, %v4051_v37  ;;  %v12998_v3 = vpop.f32.mrf.mxu2  ;;  %v13006_v4 = vld [vmem:[#allocation2 + $0x78] sm:$0xff] }
 0x409   : > { %v4937_v30 = vsel %vm11624_vm9, %v4928_v5, %v4936_v11  ;;  %vm4345_vm12 = vcmp.lt.s32.totalorder %v4309_v60, 16  ;;  %v4040_v9 = vadd.s32 %v4039_v51, %v4029_v26  ;;  %v4057_v27 = vshll.u32 %v4054_v23, 16 }
 0x40a   : > { %5058 = vst [vmem:[#allocation2 + $0x80] sm:$0xf] %v4937_v30  ;;  %v4569_v32 = vsel %vm4345_vm12, %v4461_v61, 0.0  ;;  %v4059_v47 = vshll.u32 %v4055_v29, 16  ;;  %v4426_v41 = vadd.f32 %v12858_v28, %v4386_v45  ;;  %v14506_v48 = vrot.slane %v12981_v38, 1 }
 0x40b   : > { %v4623_v62 = vpack.c.bf16 %v4569_v32, %v4569_v32  ;;  %v4041_v13 = vadd.s32 %v4040_v9, %v4031_v49  ;;  %v14507_v10 = vrot.slane %v12956_v54, 1  ;;  %vm4061_vm15 = vc.u32 %v4053_v59, %v4057_v27  ;;  %v13014_v32 = vpop.f32.mrf.mxu3 }
 0x40c   : > { %v4063_v26 = vadd.s32 %v4057_v27, %v4053_v59  ;;  %v4387_v61 = vmul.f32 %v12811_v36, %v3050_v7  ;;  %v14508_v49 = vrot.slane %v12929_v46, 1  ;;  %v4062_v30 = vsel %vm4061_vm15, 1, %v14380_v2 }
 0x40d   : > { %v6204_v5 = vsel %vm891_vm2, %v14507_v10, %v14506_v48  ;;  %v4940_v37 = vshrl.u32 %v4623_v62, 16  ;;  %v4943_v51 = vshll.u32 %v4623_v62, 16  ;;  %v4042_v60 = vshrl.u32 %v4041_v13, 4 }
 0x40e   : > { %v6589_v45 = vsel %vm891_vm2, %v14508_v49, %v14347_v22  ;;  %v4058_v54 = vshrl.u32 %v4054_v23, 16  ;;  %v4064_v9 = vadd.s32 %v4062_v30, %v4056_v55  ;;  %vm4065_vm8 = vc.u32 %v4063_v26, %v4059_v47  ;;  %v13038_v30 = vpop.f32.mrf.mxu1 }
 0x40f   : > { %v5803_v7 = vshrl.u32 %v12915_v53, 16  ;;  %v4942_v59 = vrot.slane %v4940_v37, 6  ;;  %v4945_v27 = vrot.slane %v4943_v51, 7  ;;  %v4043_v48 = vmul.u32 18, %v4042_v60  ;;  %14511 = vst [vmem:[#allocation23_spill] sm:$0xff] %v13038_v30 }
 0x410   : > { %v4066_v10 = vsel %vm4065_vm8, 1, %v14380_v2  ;;  %v4060_v46 = vshrl.u32 %v4055_v29, 16  ;;  %v5807_v49 = vshll.u32 %v13006_v4, 16  ;;  %v13020_v62 = vadd.s32 272, %v11205_v34  ;;  %6722 = vmatmul.bf16.gmra.mxu1 %v6589_v45 }
 0x411   : > { %v4068_v8 = vadd.s32 %v4066_v10, %v4064_v9  ;;  %v4938_v13 = vrot.slane %v4936_v11, 4  ;;  %v13022_v23 = vor.u32 %v4945_v27, %v4942_v59  ;;  %v4044_v55 = vsub.s32 %v12949_v63, %v4043_v48  ;;  %v13042_v9 = vpop.f32.mrf.mxu2  ;;  %v13044_v48 = vld [vmem:[#allocation2 + $0x58] sm:$0xff] }
 0x412   : > { %v5805_v47 = vor.u32 %v5803_v7, %v12933_v14  ;;  %v13026_v37 = vrot.slane %v5807_v49, 1  ;;  %v4079_v51 = vand.u32 65535, %v13020_v62  ;;  %v4080_v29 = vshrl.u32 %v13020_v62, 16  ;;  %v3012_v7 = vpop.f32.mrf.mxu0 }
 0x413   : > { %v4069_v26 = vadd.s32 %v4068_v8, %v4058_v54  ;;  %v4947_v60 = vsel %vm11624_vm9, %v4938_v13, %v13022_v23  ;;  %vm4166_vm10 = vcmp.ne.s32.totalorder %v4044_v55, 0  ;;  %vm4202_vm0 = vcmp.lt.s32.totalorder %v4044_v55, 0  ;;  %v13050_v22 = vpop.f32.mrf.mxu3  ;;  %6134 = vmatmul.bf16.gmra.mxu3 %v12737_v42 }
 0x414   : > { %v4462_v11 = vmax.f32 %v4426_v41, 0.0  ;;  %5059 = vst [vmem:[#allocation2 + $0x84] sm:$0xf] %v4947_v60  ;;  %vm13033_vm4 = vmand %vm4202_vm0, %vm4166_vm10  ;;  %v4274_v14 = vadd.s32 18, %v4044_v55  ;;  %v4427_v45 = vadd.f32 %v12858_v28, %v4387_v61  ;;  %v5810_v54 = vsel %vm440_vm3, %v5805_v47, %v13026_v37 }
 0x415   : > { %v4070_v8 = vadd.s32 %v4069_v26, %v4060_v46  ;;  %6337 = vmatmul.bf16.gmra.mxu0 %v6204_v5  ;;  %5979 = vmatmul.bf16.gmra.mxu2 %v5810_v54  ;;  %v4082_v41 = vmul.u32 14564, %v4079_v51  ;;  %v4083_v59 = vmul.u32 58254, %v4079_v51  ;;  %v4084_v27 = vmul.u32 14564, %v4080_v29  ;;  %v14512_v26 = vld [vmem:[#allocation24_spill] sm:$0xff] }
 0x416   : > { %v4310_v10 = vsel %vm13033_vm4, %v4274_v14, %v4044_v55  ;;  %v4085_v61 = vmul.u32 58254, %v4080_v29  ;;  %v2815_v5 = vadd.f32 %v12879_v31, %v14512_v26  ;;  %v4463_v54 = vmax.f32 %v4427_v45, 0.0 }
 0x417   : > { %v4071_v46 = vshrl.u32 %v4070_v8, 4  ;;  %vm4346_vm14 = vcmp.lt.s32.totalorder %v4310_v10, 16  ;;  %v4086_v49 = vshll.u32 %v4083_v59, 16  ;;  %v4088_v13 = vshll.u32 %v4084_v27, 16 }
 0x418   : > { %v4570_v47 = vsel %vm4346_vm14, %v4462_v11, 0.0  ;;  %v6590_v55 = vrot.slane %v13044_v48, 1  ;;  %v4087_v29 = vshrl.u32 %v4083_v59, 16  ;;  %v4089_v14 = vshrl.u32 %v4084_v27, 16 }
 0x419   : > { %v4072_v60 = vmul.u32 18, %v4071_v46  ;;  %v4624_v51 = vpack.c.bf16 %v4570_v47, %v4570_v47  ;;  %vm4090_vm1 = vc.u32 %v4082_v41, %v4086_v49  ;;  %v4092_v30 = vadd.s32 %v4086_v49, %v4082_v41  ;;  %v13061_v47 = vpop.f32.mrf.mxu1 }
 0x41a   : > { %v4091_v8 = vsel %vm4090_vm1, 1, %v14380_v2  ;;  %v13058_v49 = vadd.s32 280, %v11205_v34  ;;  %v3051_v27 = vadd.f32 %v3012_v7, %v2815_v5  ;;  %14513 = vst [vmem:[#allocation20_spill] sm:$0xff] %v13061_v47 }
 0x41b   : > { %v4073_v63 = vsub.s32 %v12979_v52, %v4072_v60  ;;  %v4950_v10 = vshrl.u32 %v4624_v51, 16  ;;  %v4953_v31 = vshll.u32 %v4624_v51, 16  ;;  %v4093_v11 = vadd.s32 %v4091_v8, %v4085_v61  ;;  %v13063_v61 = vld [vmem:[#allocation2 + $0x50] sm:$0xff]  ;;  %v13066_v51 = vpop.f32.mrf.mxu2  ;;  %v3014_v8 = vpop.f32.mrf.mxu0 }
 0x41c   : > { %vm4094_vm11 = vc.u32 %v4092_v30, %v4088_v13  ;;  %v4948_v52 = vrot.slane %v13022_v23, 4  ;;  %v6205_v30 = vrot.slane %v13063_v61, 1  ;;  %v14514_v23 = vrot.slane %v12986_v20, 1  ;;  %v13160_v61 = vld [vmem:[#allocation2 + $0x14] sm:$0xf] }
 0x41d   : > { %vm4167_vm12 = vcmp.ne.s32.totalorder %v4073_v63, 0  ;;  %vm4203_vm15 = vcmp.lt.s32.totalorder %v4073_v63, 0  ;;  %v4275_v45 = vadd.s32 18, %v4073_v63  ;;  %v4095_v42 = vsel %vm4094_vm11, 1, %v14380_v2 }
 0x41e   : > { %v4952_v46 = vrot.slane %v4950_v10, 6  ;;  %v4955_v26 = vrot.slane %v4953_v31, 7  ;;  %vm4239_vm8 = vmand %vm4203_vm15, %vm4167_vm12  ;;  %v4097_v41 = vadd.s32 %v4095_v42, %v4093_v11  ;;  %v4108_v10 = vand.u32 65535, %v13058_v49 }
 0x41f   : > { %v4311_v59 = vsel %vm4239_vm8, %v4275_v45, %v4073_v63  ;;  %v4109_v31 = vshrl.u32 %v13058_v49, 16  ;;  %v6591_v7 = vsel %vm891_vm2, %v14514_v23, %v6590_v55  ;;  %v14515_v20 = vrot.slane %v12981_v38, 1 }
 0x420   : > { %v4956_v13 = vor.u32 %v4955_v26, %v4952_v46  ;;  %vm4347_vm10 = vcmp.lt.s32.totalorder %v4311_v59, 16  ;;  %v4098_v60 = vadd.s32 %v4097_v41, %v4087_v29  ;;  %6727 = vmatmul.bf16.gmra.mxu1 %v6591_v7  ;;  %v4388_v29 = vmul.f32 %v12811_v36, %v3051_v27 }
 0x421   : > { %v4571_v34 = vsel %vm4347_vm10, %v4463_v54, 0.0  ;;  %v4111_v45 = vmul.u32 14564, %v4108_v10  ;;  %v4112_v42 = vmul.u32 58254, %v4108_v10  ;;  %v4113_v54 = vmul.u32 14564, %v4109_v31 }
 0x422   : > { %v4957_v5 = vsel %vm11624_vm9, %v4948_v52, %v4956_v13  ;;  %v4625_v63 = vpack.c.bf16 %v4571_v34, %v4571_v34  ;;  %v4099_v11 = vadd.s32 %v4098_v60, %v4089_v14  ;;  %v6206_v59 = vsel %vm891_vm2, %v14515_v20, %v6205_v30 }
 0x423   : > { %5060 = vst [vmem:[#allocation2 + $0x88] sm:$0xf] %v4957_v5  ;;  %v4114_v23 = vmul.u32 58254, %v4109_v31  ;;  %v4115_v52 = vshll.u32 %v4112_v42, 16  ;;  %v4117_v34 = vshll.u32 %v4113_v54, 16  ;;  %v2447_v27 = vadd.f32 %v12557_v58, %v11433_v16  ;;  %v13097_v16 = vpop.f32.mrf.mxu3  ;;  %v13099_v58 = vpop.f32.mrf.mxu1 }
 0x424   : > { %v4960_v46 = vshrl.u32 %v4625_v63, 16  ;;  %v4963_v26 = vshll.u32 %v4625_v63, 16  ;;  %v4100_v41 = vshrl.u32 %v4099_v11, 4  ;;  %v4428_v10 = vadd.f32 %v12858_v28, %v4388_v29  ;;  %v13106_v29 = vld [vmem:[#allocation2 + $0x60] sm:$0xff] }
 0x425   : > { %6342 = vmatmul.bf16.gmra.mxu0 %v6206_v59  ;;  %vm4119_vm0 = vc.u32 %v4111_v45, %v4115_v52  ;;  %v4121_v5 = vadd.s32 %v4115_v52, %v4111_v45  ;;  %v4958_v63 = vrot.slane %v4956_v13, 4  ;;  %v2816_v20 = vadd.f32 %v12917_v0, %v2447_v27  ;;  %v13101_v13 = vld [vmem:[#allocation2 + $0x80] sm:$0xff]  ;;  %v6298_v45 = vpop.f32.mrf.mxu0 }
 0x426   : > { %v4962_v14 = vrot.slane %v4960_v46, 6  ;;  %v4965_v60 = vrot.slane %v4963_v26, 7  ;;  %v4101_v7 = vmul.u32 18, %v4100_v41  ;;  %v4120_v31 = vsel %vm4119_vm0, 1, %v14380_v2 }
 0x427   : > { %v6076_v46 = vadd.f32 %v13014_v32, %v12589_v12  ;;  %v4122_v26 = vadd.s32 %v4120_v31, %v4114_v23  ;;  %vm13093_vm4 = vc.u32 %v4121_v5, %v4117_v34  ;;  %v4116_v0 = vshrl.u32 %v4112_v42, 16  ;;  %v13111_v32 = vpop.f32.mrf.mxu2 }
 0x428   : > { %v13086_v11 = vor.u32 %v4965_v60, %v4962_v14  ;;  %v4102_v38 = vsub.s32 %v13020_v62, %v4101_v7  ;;  %v10003_v62 = vld [vmem:[%s14322_s2 + $0x100] sm:$0xff]  ;;  %v4464_v23 = vmax.f32 %v4428_v10, 0.0  ;;  %v4118_v52 = vshrl.u32 %v4113_v54, 16 }
 0x429   : > { %v4124_v34 = vsel %vm13093_vm4, 1, %v14380_v2  ;;  %7073 = vmatpush.bf16.msrb.mxu2 %v10003_v62  ;;  %v5811_v60 = vshrl.u32 %v13006_v4, 16  ;;  %v5815_v7 = vshll.u32 %v13101_v13, 16  ;;  %v13118_v27 = vadd.f32 %v6298_v45, %v6076_v46  ;;  %v13123_v62 = vld [vmem:[#allocation2 + $0x58] sm:$0xff] }
 0x42a   : > { %v4967_v12 = vsel %vm11624_vm9, %v4958_v63, %v13086_v11  ;;  %vm4168_vm14 = vcmp.ne.s32.totalorder %v4102_v38, 0  ;;  %vm4204_vm1 = vcmp.lt.s32.totalorder %v4102_v38, 0  ;;  %v4276_v59 = vadd.s32 18, %v4102_v38 }
 0x42b   : > { %5061 = vst [vmem:[#allocation2 + $0x8c] sm:$0xf] %v4967_v12  ;;  %vm4240_vm11 = vmand %vm4204_vm1, %vm4168_vm14  ;;  %v4126_v14 = vadd.s32 %v4124_v34, %v4122_v26  ;;  %v3052_v5 = vadd.f32 %v3014_v8, %v2816_v20  ;;  %v6592_v63 = vrot.slane %v13106_v29, 1  ;;  %v5813_v54 = vor.u32 %v5811_v60, %v13026_v37  ;;  %v6082_v20 = vpop.f32.mrf.mxu3  ;;  %v13129_v46 = vpop.f32.mrf.mxu1  ;;  %6139 = vmatmul.bf16.gmra.mxu3 %v12814_v56 }
 0x42c   : > { %v4312_v42 = vsel %vm4240_vm11, %v4276_v59, %v4102_v38  ;;  %v5817_v10 = vrot.slane %v5815_v7, 1  ;;  %v6207_v34 = vrot.slane %v13123_v62, 1  ;;  %v6078_v38 = vadd.f32 %v13050_v22, %v12617_v40  ;;  %v10235_v62 = vld [vmem:[#allocation2 + $0x68] sm:$0xff] }
 0x42d   : > { %vm4348_vm12 = vcmp.lt.s32.totalorder %v4312_v42, 16  ;;  %v4127_v31 = vadd.s32 %v4126_v14, %v4116_v0  ;;  %v4389_v8 = vmul.f32 %v12811_v36, %v3052_v5  ;;  %v6593_v37 = vsel %vm891_vm2, %v6590_v55, %v6592_v63  ;;  %v6300_v40 = vpop.f32.mrf.mxu0  ;;  %v10018_v36 = vld [vmem:[%s14322_s2 + $0x178] sm:$0xff] }
 0x42e   : > { %v4572_v12 = vsel %vm4348_vm12, %v4464_v23, 0.0  ;;  %v5818_v26 = vsel %vm440_vm3, %v5813_v54, %v5817_v10  ;;  %v6208_v56 = vsel %vm891_vm2, %v6205_v30, %v6207_v34  ;;  %7325 = vmatpush.bf16.msra.mxu3 %v10018_v36  ;;  %v4968_v7 = vrot.slane %v13086_v11, 4 }
 0x42f   : > { %v4626_v41 = vpack.c.bf16 %v4572_v12, %v4572_v12  ;;  %v4128_v2 = vadd.s32 %v4127_v31, %v4118_v52  ;;  %5984 = vmatmul.bf16.gmra.mxu2 %v5818_v26  ;;  %v13137_v23 = vpop.f32.mrf.mxu2  ;;  %v13144_v52 = vadd.f32 %v6300_v40, %v6078_v38  ;;  %v4429_v60 = vadd.f32 %v12858_v28, %v4389_v8  ;;  %v8237_v8 = vld [vmem:[#allocation2 + $0x10] sm:$0x8]  ;;  %v13174_v40 = vld [vmem:[#allocation2 + $0x18] sm:$0xff] }
 0x430   : > { %6732 = vmatmul.bf16.gmra.mxu1 %v6593_v37  ;;  %v6081_v11 = vadd.f32 %v13097_v16, %v12641_v6  ;;  %v8256_v16 = vunpack.c.l.b16 %v8237_v8  ;;  %v10051_v8 = vld [vmem:[%s14322_s2 + $0x1f8] sm:$0xff] }
 0x431   : > { %v4970_v0 = vshrl.u32 %v4626_v41, 16  ;;  %v4973_v45 = vshll.u32 %v4626_v41, 16  ;;  %v4129_v59 = vshrl.u32 %v4128_v2, 4  ;;  %v4465_v30 = vmax.f32 %v4429_v60, 0.0  ;;  %8102 = vmatpush.bf16.msra.mxu1 %v10051_v8 }
 0x432   : > { %v13139_v22 = vld [vmem:[#allocation2 + $0x88] sm:$0xff] }
 0x433   : > { %v4972_v48 = vrot.slane %v4970_v0, 6  ;;  %v4975_v14 = vrot.slane %v4973_v45, 7  ;;  %v4130_v55 = vmul.u32 18, %v4129_v59  ;;  %v5823_v31 = vshll.u32 %v13139_v22, 16  ;;  %v6085_v12 = vpop.f32.mrf.mxu3  ;;  %v13164_v41 = vpop.f32.mrf.mxu1 }
 0x434   : > { %v14348_v45 = vunpack.c.l.b16 %v13160_v61 }
 0x435   : > { %6347 = vmatmul.bf16.gmra.mxu0 %v6208_v56  ;;  %v13153_v42 = vor.u32 %v4975_v14, %v4972_v48  ;;  %v4131_v5 = vsub.s32 %v13058_v49, %v4130_v55  ;;  %v5819_v49 = vshrl.u32 %v13101_v13, 16  ;;  %v13167_v2 = vrot.slane %v5823_v31, 1  ;;  %v6303_v38 = vpop.f32.mrf.mxu0 }
 0x436   : > { %v13171_v0 = vadd.f32 %v6303_v38, %v6081_v11  ;;  %v8257_v14 = vpack.c.b16 %v14348_v45, %v8256_v16  ;;  %v10043_v11 = vld [vmem:[%s14322_s2 + $0x1b8] sm:$0xff] }
 0x437   : > { %v4977_v54 = vsel %vm11624_vm9, %v4968_v7, %v13153_v42  ;;  %vm4169_vm15 = vcmp.ne.s32.totalorder %v4131_v5, 0  ;;  %vm4205_vm8 = vcmp.lt.s32.totalorder %v4131_v5, 0  ;;  %v4277_v28 = vadd.s32 18, %v4131_v5  ;;  %v13169_v26 = vpop.f32.mrf.mxu2  ;;  %7710 = vmatpush.bf16.msra.mxu0 %v10043_v11 }
 0x438   : > { %5062 = vst [vmem:[#allocation2 + $0x90] sm:$0xf] %v4977_v54  ;;  %vm4241_vm10 = vmand %vm4205_vm8, %vm4169_vm15  ;;  %v5821_v59 = vor.u32 %v5819_v49, %v5817_v10  ;;  %v8259_v7 = vrot.slane %v13174_v40, 3  ;;  %v4978_v16 = vrot.slane %v13153_v42, 4 }
 0x439   : > { %v4313_v37 = vsel %vm4241_vm10, %v4277_v28, %v4131_v5  ;;  %v6083_v5 = vadd.f32 %v6082_v20, %v12704_v25  ;;  %v10059_v28 = vld [vmem:[%s14322_s2 + $0x238] sm:$0xff] }
 0x43a   : > { %vm4349_vm0 = vcmp.lt.s32.totalorder %v4313_v37, 16  ;;  %v5826_v48 = vsel %vm440_vm3, %v5821_v59, %v13167_v2  ;;  %v10234_v37 = vld [vmem:[#allocation2 + $0x60] sm:$0xff]  ;;  %8361 = vmatpush.bf16.msra.mxu2 %v10059_v28 }
 0x43b   : > { %v4573_v6 = vsel %vm4349_vm0, %v4465_v30, 0.0  ;;  %v6087_v10 = vpop.f32.mrf.mxu3  ;;  %v13182_v31 = vpop.f32.mrf.mxu1  ;;  %v13187_v30 = vld [vmem:[#allocation2 + $0x68] sm:$0xff]  ;;  %6144 = vmatmul.bf16.gmra.mxu3 %v12915_v53  ;;  %v6209_v59 = vrot.slane %v10234_v37, 1  ;;  %v5827_v37 = vshrl.u32 %v13139_v22, 16 }
 0x43c   : > { %v4627_v36 = vpack.c.bf16 %v4573_v6, %v4573_v6  ;;  %v8258_v6 = vrot.slane %v8257_v14, 3  ;;  %v5064_v14 = vld [vmem:[#allocation2 + $0x98] sm:$0x3] }
 0x43d   : > { %v6305_v20 = vpop.f32.mrf.mxu0 }
 0x43e   : > { %v4980_v55 = vshrl.u32 %v4627_v36, 16  ;;  %v4983_v56 = vshll.u32 %v4627_v36, 16  ;;  %v13199_v36 = vadd.f32 %v6305_v20, %v6083_v5  ;;  %v13208_v45 = vsel %vm2823_vm7, %v8258_v6, %v8259_v7 }
 0x43f   : > { %v5576_v60 = vld [vmem:[#allocation2 + $0x90] sm:$0x1]  ;;  %5989 = vmatmul.bf16.gmra.mxu2 %v5826_v48  ;;  %v13193_v25 = vpop.f32.mrf.mxu2  ;;  %v6594_v48 = vrot.slane %v13187_v30, 1  ;;  %14518 = vst [vmem:[#allocation24_spill] sm:$0xff] %v13208_v45 }
 0x440   : > { %v5667_v54 = vunpack.c.l.b16 %v5576_v60  ;;  %v4982_v49 = vrot.slane %v4980_v55, 6  ;;  %v4985_v38 = vrot.slane %v4983_v56, 7  ;;  %v6210_v60 = vsel %vm891_vm2, %v6207_v34, %v6209_v59 }
 0x441   : > { %v6595_v42 = vsel %vm891_vm2, %v6592_v63, %v6594_v48 }
 0x442   : > { %v4986_v55 = vor.u32 %v4985_v38, %v4982_v49  ;;  %v13202_v56 = vpack.c.b16 %v5667_v54, %v5667_v54  ;;  %6737 = vmatmul.bf16.gmra.mxu1 %v6595_v42  ;;  %v13215_v54 = vld [vmem:[#allocation2 + $0x20] sm:$0xff]  ;;  %v6086_v49 = vadd.f32 %v6085_v12, %v12734_v18  ;;  %v6088_v12 = vadd.f32 %v6087_v10, %v12773_v50  ;;  %v13237_v42 = vld [vmem:[#allocation2 + $0x70] sm:$0xff] }
 0x443   : > { %v6090_v29 = vpop.f32.mrf.mxu3  ;;  %v13221_v38 = vpop.f32.mrf.mxu1  ;;  %v8261_v20 = vrot.slane %v13215_v54, 3  ;;  %14522 = vst [vmem:[#allocation42_spill] sm:$0xff] %v13237_v42 }
 0x444   : > { %v4987_v5 = vsel %vm11624_vm9, %v4978_v16, %v4986_v55  ;;  %v4988_v28 = vrot.slane %v4986_v55, 4  ;;  %v5831_v11 = vshll.u32 %v13202_v56, 16  ;;  %v5829_v55 = vor.u32 %v5827_v37, %v13167_v2 }
 0x445   : > { %6352 = vmatmul.bf16.gmra.mxu0 %v6210_v60  ;;  %5063 = vst [vmem:[#allocation2 + $0x94] sm:$0xf] %v4987_v5  ;;  %v6308_v19 = vpop.f32.mrf.mxu0  ;;  %v13230_v16 = vsel %vm2823_vm7, %v8259_v7, %v8261_v20  ;;  %v6211_v7 = vrot.slane %v10235_v62, 1  ;;  %v6596_v2 = vrot.slane %v13237_v42, 1  ;;  %v6831_v37 = vshrl.u32 %v12395_v15, 16 }
 0x446   : > { %v5065_v34 = vsel %vm11338_vm13, %v4988_v28, %v5064_v14  ;;  %v13226_v8 = vadd.f32 %v6308_v19, %v6086_v49  ;;  %v5833_v6 = vrot.slane %v5831_v11, 1  ;;  %14520 = vst [vmem:[#allocation21_spill] sm:$0xff] %v13230_v16  ;;  %v13245_v11 = vld [vmem:[#allocation2 + $0x10] sm:$0xff] }
 0x447   : > { %5066 = vst [vmem:[#allocation2 + $0x98] sm:$0x3] %v5065_v34  ;;  %v13223_v63 = vpop.f32.mrf.mxu2  ;;  %v6839_v50 = vshrl.u32 %v13245_v11, 16  ;;  %v6842_v10 = vshll.u32 %v13245_v11, 16  ;;  %v6212_v49 = vsel %vm891_vm2, %v6209_v59, %v6211_v7  ;;  %v6597_v19 = vsel %vm891_vm2, %v6594_v48, %v6596_v2 }
 0x448   : > { %v5834_v18 = vsel %vm440_vm3, %v5829_v55, %v5833_v6  ;;  %v6834_v6 = vshll.u32 %v12395_v15, 16  ;;  %v13253_v55 = vld [vmem:[#allocation2 + $0x28] sm:$0xff]  ;;  %v6833_v59 = vrot.slane %v6831_v37, 1  ;;  %v10017_v15 = vld [vmem:[%s14322_s2 + $0x170] sm:$0xff]  ;;  %vm14550_vm3 = vcmask 1045504  }
 0x449   : > { %v8263_v35 = vrot.slane %v13253_v55, 3  ;;  %7326 = vmatpush.bf16.msra.mxu3 %v10017_v15 }
 0x44a   : > { %v6836_v1 = vrot.slane %v6834_v6, 2 }
 0x44b   : > { %v6092_v60 = vpop.f32.mrf.mxu3  ;;  %v13235_v14 = vpop.f32.mrf.mxu1  ;;  %6149 = vmatmul.bf16.gmra.mxu3 %v13006_v4 }
 0x44c   : > { %14521 = vst [vmem:[#allocation41_spill] sm:$0xff] %v13235_v14  ;;  %v6093_v37 = vadd.f32 %v6092_v60, %v12842_v24  ;;  %v10050_v24 = vld [vmem:[%s14322_s2 + $0x1f0] sm:$0xff]  ;;  %v6213_v60 = vrot.slane %v12915_v53, 1 }
 0x44d   : > { %v6310_v28 = vpop.f32.mrf.mxu0  ;;  %8103 = vmatpush.bf16.msra.mxu1 %v10050_v24  ;;  %v13297_v53 = vld [vmem:[#allocation2 + $0x30] sm:$0xff] }
 0x44e   : > { %v13242_v34 = vadd.f32 %v6310_v28, %v6088_v12  ;;  %v6844_v12 = vrot.slane %v6842_v10, 2  ;;  %v6091_v28 = vadd.f32 %v6090_v29, %v12804_v57  ;;  %v6837_v29 = vor.u32 %v6836_v1, %v6833_v59  ;;  %v10042_v1 = vld [vmem:[%s14322_s2 + $0x1b0] sm:$0xff] }
 0x44f   : > { %5994 = vmatmul.bf16.gmra.mxu2 %v5834_v18  ;;  %v13240_v5 = vpop.f32.mrf.mxu2  ;;  %v6841_v18 = vrot.slane %v6839_v50, 1  ;;  %v13267_v50 = vsel %vm2823_vm7, %v8261_v20, %v8263_v35  ;;  %v6598_v59 = vrot.slane %v13273_v44, 1  ;;  %7711 = vmatpush.bf16.msra.mxu0 %v10042_v1  ;;  %v8265_v44 = vrot.slane %v13297_v53, 3 }
 0x450   : > { %14525 = vst [vmem:[#allocation45_spill] sm:$0xff] %v13267_v50 }
 0x451   : > { %v6845_v57 = vor.u32 %v6844_v12, %v6841_v18  ;;  %v6599_v50 = vsel %vm891_vm2, %v6596_v2, %v6598_v59 }
 0x452   : > { %6742 = vmatmul.bf16.gmra.mxu1 %v6597_v19 }
 0x453   : > { %v6095_v62 = vpop.f32.mrf.mxu3  ;;  %v13256_v47 = vpop.f32.mrf.mxu1  ;;  %v6846_v10 = vsel %vm1488_vm5, %v6837_v29, %v6845_v57 }
 0x454   : > { %14523 = vst [vmem:[#allocation43_spill] sm:$0xff] %v13256_v47 }
 0x455   : > { %6357 = vmatmul.bf16.gmra.mxu0 %v6212_v49  ;;  %v6313_v49 = vpop.f32.mrf.mxu0 }
 0x456   : > { %v13264_v19 = vadd.f32 %v6313_v49, %v6091_v28  ;;  %v10058_v28 = vld [vmem:[%s14322_s2 + $0x230] sm:$0xff]  ;;  %v13291_v49 = vld [vmem:[#allocation2 + $0x18] sm:$0xff] }
 0x457   : > { %v13259_v48 = vpop.f32.mrf.mxu2  ;;  %8362 = vmatpush.bf16.msra.mxu2 %v10058_v28  ;;  %v6848_v15 = vshrl.u32 %v13291_v49, 16  ;;  %v6851_v29 = vshll.u32 %v13291_v49, 16  ;;  %v6096_v28 = vadd.f32 %v6095_v62, %v12888_v17 }
 0x458   : > { %14524 = vst [vmem:[#allocation44_spill] sm:$0xff] %v13264_v19 }
 0x45b   : > { %v6097_v6 = vpop.f32.mrf.mxu3  ;;  %v13271_v43 = vpop.f32.mrf.mxu1  ;;  %6154 = vmatmul.bf16.gmra.mxu3 %v13101_v13 }
 0x45c   : > { %14526 = vst [vmem:[#allocation46_spill] sm:$0xff] %v13271_v43 }
 0x45d   : > { %v6315_v18 = vpop.f32.mrf.mxu0 }
 0x45e   : > { %v13288_v12 = vadd.f32 %v6315_v18, %v6093_v37  ;;  %v6850_v37 = vrot.slane %v6848_v15, 1  ;;  %v6853_v18 = vrot.slane %v6851_v29, 2  ;;  %v6098_v15 = vadd.f32 %v6097_v6, %v12927_v21  ;;  %v13314_v29 = vld [vmem:[#allocation2 + $0x80] sm:$0xff] }
 0x45f   : > { %7074 = vmatmul.bf16.vlgmr.msrb.gmra.mxu2 %v6846_v10  ;;  %v13279_v20 = vpop.f32.mrf.mxu2  ;;  %v6214_v10 = vsel %vm891_vm2, %v6211_v7, %v6213_v60  ;;  %v13308_v7 = vsel %vm2823_vm7, %v8263_v35, %v8265_v44  ;;  %14533 = vst [vmem:[#allocation53_spill] sm:$0xff] %v13314_v29 }
 0x460   : > { %14528 = vst [vmem:[#allocation48_spill] sm:$0xff] %v13288_v12  ;;  %v6854_v2 = vor.u32 %v6853_v18, %v6850_v37  ;;  %v6600_v37 = vrot.slane %v13314_v29, 1 }
 0x461   : > { %14531 = vst [vmem:[#allocation51_spill] sm:$0xff] %v13308_v7  ;;  %v13329_v7 = vld [vmem:[#allocation2 + $0x38] sm:$0xff] }
 0x462   : > { %6747 = vmatmul.bf16.gmra.mxu1 %v6599_v50  ;;  %v6855_v50 = vsel %vm1488_vm5, %v6845_v57, %v6854_v2  ;;  %v13323_v57 = vld [vmem:[#allocation2 + $0x20] sm:$0xff] }
 0x463   : > { %v6100_v16 = vpop.f32.mrf.mxu3  ;;  %v13300_v45 = vpop.f32.mrf.mxu1  ;;  %v6857_v21 = vshrl.u32 %v13323_v57, 16  ;;  %v6860_v6 = vshll.u32 %v13323_v57, 16 }
 0x464   : > { %14529 = vst [vmem:[#allocation49_spill] sm:$0xff] %v13300_v45 }
 0x465   : > { %6362 = vmatmul.bf16.gmra.mxu0 %v6214_v10  ;;  %v6318_v1 = vpop.f32.mrf.mxu0 }
 0x466   : > { %v13305_v24 = vadd.f32 %v6318_v1, %v6096_v28  ;;  %v6215_v1 = vrot.slane %v13006_v4, 1  ;;  %v6862_v4 = vrot.slane %v6860_v6, 2  ;;  %v13346_v6 = vld [vmem:[#allocation2 + $0x88] sm:$0xff] }
 0x467   : > { %v13303_v43 = vpop.f32.mrf.mxu2  ;;  %14539 = vst [vmem:[#allocation59_spill] sm:$0xff] %v13346_v6 }
 0x468   : > { %14530 = vst [vmem:[#allocation50_spill] sm:$0xff] %v13305_v24  ;;  %v6216_v18 = vsel %vm891_vm2, %v6213_v60, %v6215_v1 }
 0x46b   : > { %v6102_v17 = vpop.f32.mrf.mxu3  ;;  %v13312_v62 = vpop.f32.mrf.mxu1  ;;  %6159 = vmatmul.bf16.gmra.mxu3 %v13139_v22 }
 0x46c   : > { %14532 = vst [vmem:[#allocation52_spill] sm:$0xff] %v13312_v62  ;;  %v6859_v62 = vrot.slane %v6857_v21, 1  ;;  %v6103_v21 = vadd.f32 %v6102_v17, %v12998_v3  ;;  %v10041_v3 = vld [vmem:[%s14322_s2 + $0x1a8] sm:$0xff] }
 0x46d   : > { %v6320_v28 = vpop.f32.mrf.mxu0  ;;  %7712 = vmatpush.bf16.msra.mxu0 %v10041_v3 }
 0x46e   : > { %v13320_v35 = vadd.f32 %v6320_v28, %v6098_v15  ;;  %v6101_v15 = vadd.f32 %v6100_v16, %v12968_v39 }
 0x46f   : > { %7079 = vmatmul.bf16.gmra.mxu2 %v6855_v50  ;;  %v13317_v10 = vpop.f32.mrf.mxu2  ;;  %v6601_v50 = vsel %vm891_vm2, %v6598_v59, %v6600_v37  ;;  %v6863_v59 = vor.u32 %v6862_v4, %v6859_v62  ;;  %v6602_v62 = vrot.slane %v13346_v6, 1  ;;  %v10015_v4 = vld [vmem:[%s14322_s2 + $0x160] sm:$0xff]  ;;  %v10014_v6 = vld [vmem:[%s14322_s2 + $0x158] sm:$0xff] }
 0x470   : > { %14534 = vst [vmem:[#allocation54_spill] sm:$0xff] %v13320_v35  ;;  %v8267_v35 = vrot.slane %v13329_v7, 3 }
 0x472   : > { %6752 = vmatmul.bf16.gmra.mxu1 %v6601_v50  ;;  %v13340_v60 = vsel %vm2823_vm7, %v8265_v44, %v8267_v35  ;;  %v10016_v50 = vld [vmem:[%s14322_s2 + $0x168] sm:$0xff] }
 0x473   : > { %v6105_v28 = vpop.f32.mrf.mxu3  ;;  %v13332_v29 = vpop.f32.mrf.mxu1  ;;  %14537 = vst [vmem:[#allocation57_spill] sm:$0xff] %v13340_v60  ;;  %v10057_v44 = vld [vmem:[%s14322_s2 + $0x228] sm:$0xff]  ;;  %7327 = vmatpush.bf16.msra.mxu3 %v10016_v50  ;;  %v6603_v50 = vsel %vm891_vm2, %v6600_v37, %v6602_v62 }
 0x474   : > { %14535 = vst [vmem:[#allocation55_spill] sm:$0xff] %v13332_v29  ;;  %v13369_v60 = vld [vmem:[#allocation2 + $0x28] sm:$0xff]  ;;  %8363 = vmatpush.bf16.msra.mxu2 %v10057_v44 }
 0x475   : > { %6367 = vmatmul.bf16.gmra.mxu0 %v6216_v18  ;;  %v6323_v24 = vpop.f32.mrf.mxu0  ;;  %v6864_v18 = vsel %vm1488_vm5, %v6854_v2, %v6863_v59  ;;  %v6217_v2 = vrot.slane %v13101_v13, 1  ;;  %v6866_v13 = vshrl.u32 %v13369_v60, 16 }
 0x476   : > { %v13337_v12 = vadd.f32 %v6323_v24, %v6101_v15 }
 0x477   : > { %v13335_v45 = vpop.f32.mrf.mxu2  ;;  %7328 = vmatpush.bf16.msra.mxu3 %v10015_v4 }
 0x478   : > { %14536 = vst [vmem:[#allocation56_spill] sm:$0xff] %v13337_v12  ;;  %v6106_v12 = vadd.f32 %v6105_v28, %v13042_v9 }
 0x47b   : > { %v6107_v39 = vpop.f32.mrf.mxu3  ;;  %v13344_v16 = vpop.f32.mrf.mxu1  ;;  %7329 = vmatpush.bf16.msra.mxu3 %v10014_v6  ;;  %v7201_v6 = vld [vmem:[#allocation2 + $0x8] sm:$0xc] }
 0x47c   : > { %14538 = vst [vmem:[#allocation58_spill] sm:$0xff] %v13344_v16  ;;  %v6869_v16 = vshll.u32 %v13369_v60, 16 }
 0x47d   : > { %v6325_v15 = vpop.f32.mrf.mxu0 }
 0x47e   : > { %v13360_v17 = vadd.f32 %v6325_v15, %v6103_v21  ;;  %v6218_v21 = vsel %vm891_vm2, %v6215_v1, %v6217_v2  ;;  %v13375_v15 = vld [vmem:[#allocation2 + $0x40] sm:$0xff]  ;;  %v6871_v29 = vrot.slane %v6869_v16, 2  ;;  %v6108_v16 = vadd.f32 %v6107_v39, %v13066_v51 }
 0x47f   : > { %7084 = vmatmul.bf16.gmra.mxu2 %v6864_v18  ;;  %v13351_v24 = vpop.f32.mrf.mxu2  ;;  %v10049_v18 = vld [vmem:[%s14322_s2 + $0x1e8] sm:$0xff]  ;;  %v8269_v1 = vrot.slane %v13375_v15, 3 }
 0x480   : > { %14540 = vst [vmem:[#allocation60_spill] sm:$0xff] %v13360_v17  ;;  %8104 = vmatpush.bf16.msra.mxu1 %v10049_v18  ;;  %v6868_v17 = vrot.slane %v6866_v13, 1 }
 0x481   : > { %v13389_v4 = vsel %vm2823_vm7, %v8267_v35, %v8269_v1 }
 0x482   : > { %6757 = vmatmul.bf16.gmra.mxu1 %v6603_v50  ;;  %v6872_v18 = vor.u32 %v6871_v29, %v6868_v17  ;;  %14543 = vst [vmem:[#allocation63_spill] sm:$0xff] %v13389_v4  ;;  %v13398_v50 = vld [vmem:[#allocation2 + $0x90] sm:$0xff] }
 0x483   : > { %v6110_v44 = vpop.f32.mrf.mxu3  ;;  %v13381_v42 = vpop.f32.mrf.mxu1  ;;  %14545 = vst [vmem:[#allocation65_spill] sm:$0xff] %v13398_v50  ;;  %v6604_v35 = vrot.slane %v13398_v50, 1  ;;  %v10011_v50 = vld [vmem:[%s14322_s2 + $0x140] sm:$0xff] }
 0x484   : > { %14541 = vst [vmem:[#allocation61_spill] sm:$0xff] %v13381_v42  ;;  %v6873_v13 = vsel %vm1488_vm5, %v6863_v59, %v6872_v18  ;;  %v13403_v59 = vld [vmem:[#allocation2 + $0x30] sm:$0xff] }
 0x485   : > { %6372 = vmatmul.bf16.gmra.mxu0 %v6218_v21  ;;  %v6328_v37 = vpop.f32.mrf.mxu0  ;;  %v6875_v51 = vshrl.u32 %v13403_v59, 16  ;;  %v6878_v39 = vshll.u32 %v13403_v59, 16  ;;  %v6605_v4 = vsel %vm891_vm2, %v6602_v62, %v6604_v35  ;;  %v6111_v62 = vadd.f32 %v6110_v44, %v13111_v32 }
 0x486   : > { %v13384_v3 = vadd.f32 %v6328_v37, %v6106_v12  ;;  %v10013_v12 = vld [vmem:[%s14322_s2 + $0x150] sm:$0xff]  ;;  %v10012_v37 = vld [vmem:[%s14322_s2 + $0x148] sm:$0xff] }
 0x487   : > { %v13386_v21 = vpop.f32.mrf.mxu2  ;;  %7330 = vmatpush.bf16.msra.mxu3 %v10013_v12 }
 0x488   : > { %14542 = vst [vmem:[#allocation62_spill] sm:$0xff] %v13384_v3  ;;  %v6880_v3 = vrot.slane %v6878_v39, 2 }
 0x48b   : > { %v6112_v9 = vpop.f32.mrf.mxu3  ;;  %v13393_v28 = vpop.f32.mrf.mxu1  ;;  %7331 = vmatpush.bf16.msra.mxu3 %v10012_v37 }
 0x48c   : > { %14544 = vst [vmem:[#allocation64_spill] sm:$0xff] %v13393_v28  ;;  %v7220_v28 = vunpack.c.l.b16 %v7201_v6 }
 0x48d   : > { %v6330_v29 = vpop.f32.mrf.mxu0 }
 0x48e   : > { %v13400_v17 = vadd.f32 %v6330_v29, %v6108_v16  ;;  %v13415_v29 = vld [vmem:[#allocation2 + $0x48] sm:$0xff] }
 0x48f   : > { %7089 = vmatmul.bf16.gmra.mxu2 %v6873_v13  ;;  %v6219_v13 = vrot.slane %v13139_v22, 1  ;;  %v13412_v16 = vpop.f32.mrf.mxu2  ;;  %v6877_v22 = vrot.slane %v6875_v51, 1  ;;  %7332 = vmatpush.bf16.msra.mxu3 %v10011_v50 }
 0x490   : > { %14546 = vst [vmem:[#allocation66_spill] sm:$0xff] %v13400_v17  ;;  %v14547_v17 = vunpack.c.l.b16 %v12370_v33  ;;  %v10048_v33 = vld [vmem:[%s14322_s2 + $0x1e0] sm:$0xff] }
 0x491   : > { %v6220_v12 = vsel %vm891_vm2, %v6217_v2, %v6219_v13  ;;  %v7223_v2 = vrot.slane %v13245_v11, 2  ;;  %8105 = vmatpush.bf16.msra.mxu1 %v10048_v33  ;;  %v7460_v33 = vld [vmem:[#allocation2 + $0x10] sm:$0xc] }
 0x492   : > { %6762 = vmatmul.bf16.gmra.mxu1 %v6605_v4  ;;  %v7221_v42 = vpack.c.b16 %v14547_v17, %v7220_v28  ;;  %v8271_v4 = vrot.slane %v13415_v29, 3  ;;  %v6460_v17 = vld [vmem:[#allocation2 + $0x98] sm:$0x1] }
 0x493   : > { %v6115_v6 = vpop.f32.mrf.mxu3  ;;  %v13423_v47 = vpop.f32.mrf.mxu1  ;;  %v6551_v39 = vunpack.c.l.b16 %v6460_v17  ;;  %v10039_v17 = vld [vmem:[%s14322_s2 + $0x198] sm:$0xff] }
 0x494   : > { %14548 = vst [vmem:[#allocation67_spill] sm:$0xff] %v13423_v47  ;;  %v7222_v14 = vrot.slane %v7221_v42, 2  ;;  %v13435_v32 = vsel %vm2823_vm7, %v8269_v1, %v8271_v4  ;;  %v6113_v42 = vadd.f32 %v6112_v9, %v13137_v23  ;;  %v10047_v23 = vld [vmem:[%s14322_s2 + $0x1d8] sm:$0xff]  ;;  %v10040_v9 = vld [vmem:[%s14322_s2 + $0x1a0] sm:$0xff] }
 0x495   : > { %6377 = vmatmul.bf16.gmra.mxu0 %v6220_v12  ;;  %v6333_v37 = vpop.f32.mrf.mxu0  ;;  %v13429_v12 = vor.u32 %v6880_v3, %v6877_v22  ;;  %14549 = vst [vmem:[#allocation68_spill] sm:$0xff] %v13435_v32  ;;  %v13447_v22 = vld [vmem:[#allocation2 + $0x38] sm:$0xff]  ;;  %8106 = vmatpush.bf16.msra.mxu1 %v10047_v23  ;;  %v6116_v23 = vadd.f32 %v6115_v6, %v13169_v26  ;;  %v10045_v26 = vld [vmem:[%s14322_s2 + $0x1c8] sm:$0xff]  ;;  %v10056_v6 = vld [vmem:[%s14322_s2 + $0x220] sm:$0xff] }
 0x496   : > { %v13427_v19 = vadd.f32 %v6333_v37, %v6111_v62  ;;  %v7224_v44 = vsel %vm14550_vm3, %v7222_v14, %v7223_v2  ;;  %v6884_v14 = vshrl.u32 %v13447_v22, 16  ;;  %v6887_v62 = vshll.u32 %v13447_v22, 16  ;;  %7713 = vmatpush.bf16.msra.mxu0 %v10040_v9  ;;  %8364 = vmatpush.bf16.msra.mxu2 %v10056_v6 }
 0x497   : > { %7333 = vmatmul.bf16.vlgmr.msra.gmra.mxu3 %v7224_v44  ;;  %v6882_v11 = vsel %vm1488_vm5, %v6872_v18, %v13429_v12  ;;  %v6570_v18 = vpack.c.b16 %v6551_v39, %v6551_v39  ;;  %v6221_v37 = vrot.slane %v13202_v56, 1 }
 0x498   : > { %v13440_v28 = vpop.f32.mrf.mxu2  ;;  %v6886_v39 = vrot.slane %v6884_v14, 1  ;;  %v6889_v32 = vrot.slane %v6887_v62, 2  ;;  %v14553_v14 = vunpack.c.l.b16 %v13160_v61  ;;  %v7878_v61 = vshll.u32 %v13174_v40, 16 }
 0x499   : > { %v6606_v44 = vrot.slane %v6570_v18, 1  ;;  %v7551_v18 = vunpack.c.l.b16 %v7460_v33 }
 0x49a   : > { %7714 = vmatpush.bf16.msra.mxu0 %v10039_v17  ;;  %v6890_v33 = vor.u32 %v6889_v32, %v6886_v39 }
 0x49b   : > { %v6117_v3 = vpop.f32.mrf.mxu3  ;;  %v13443_v50 = vpop.f32.mrf.mxu1  ;;  %v6607_v56 = vsel %vm891_vm2, %v6604_v35, %v6606_v44  ;;  %v7588_v62 = vpack.c.b16 %v14553_v14, %v7551_v18  ;;  %v10038_v44 = vld [vmem:[%s14322_s2 + $0x190] sm:$0xff] }
 0x49c   : > { %14551 = vst [vmem:[#allocation69_spill] sm:$0xff] %v13443_v50 }
 0x49d   : > { %v6335_v51 = vpop.f32.mrf.mxu0  ;;  %v7867_v17 = vshrl.u32 %v7588_v62, 16  ;;  %v7870_v39 = vshll.u32 %v7588_v62, 16 }
 0x49e   : > { %v13445_v1 = vadd.f32 %v6335_v51, %v6113_v42  ;;  %v6222_v42 = vsel %vm891_vm2, %v6219_v13, %v6221_v37  ;;  %v13465_v51 = vld [vmem:[#allocation2 + $0x50] sm:$0xff]  ;;  %v14359_v13 = vrot.slane %v13291_v49, 2  ;;  %vm14555_vm2 = vmmov %vm14550_vm3  ;;  %7715 = vmatpush.bf16.msra.mxu0 %v10038_v44 }
 0x49f   : > { %7094 = vmatmul.bf16.gmra.mxu2 %v6882_v11  ;;  %v10046_v11 = vld [vmem:[%s14322_s2 + $0x1d0] sm:$0xff]  ;;  %v14360_v37 = vrot.slane %v13465_v51, 3  ;;  %v7872_v6 = vrot.slane %v7870_v39, 3  ;;  %v13521_v39 = vld [vmem:[#allocation2 + $0x58] sm:$0xff]  ;;  %vm14559_vm13 = vmmov %vm14555_vm2 }
 0x4a0   : > { %14552 = vst [vmem:[#allocation70_spill] sm:$0xff] %v13445_v1  ;;  %v13473_v1 = vpop.f32.mrf.mxu2  ;;  %8107 = vmatpush.bf16.msra.mxu1 %v10046_v11  ;;  %v7875_v11 = vshrl.u32 %v13174_v40, 16  ;;  %v7226_v32 = vsel %vm14555_vm2, %v7223_v2, %v14359_v13  ;;  %v7869_v13 = vrot.slane %v7867_v17, 2  ;;  %vm14563_vm9 = vmmov %vm14555_vm2 }
 0x4a1   : > { %vm14567_vm4 = vmmov %vm14555_vm2 }
 0x4a2   : > { %6767 = vmatmul.bf16.gmra.mxu1 %v6607_v56  ;;  %v6891_v56 = vsel %vm1488_vm5, %v13429_v12, %v6890_v33  ;;  %v7877_v18 = vrot.slane %v7875_v11, 2  ;;  %v13513_v11 = vld [vmem:[#allocation2 + $0x40] sm:$0xff]  ;;  %v7873_v17 = vor.u32 %v7872_v6, %v7869_v13  ;;  %vm14570_vm14 = vmmov %vm14555_vm2 }
 0x4a3   : > { %v6120_v9 = vpop.f32.mrf.mxu3  ;;  %v13469_v50 = vpop.f32.mrf.mxu1  ;;  %vm14574_vm1 = vmmov %vm14555_vm2 }
 0x4a4   : > { %8108 = vmatpush.bf16.msra.mxu1 %v10045_v26  ;;  %v10037_v26 = vld [vmem:[%s14322_s2 + $0x188] sm:$0xff]  ;;  %vm14577_vm11 = vmmov %vm14574_vm1 }
 0x4a5   : > { %6382 = vmatmul.bf16.gmra.mxu0 %v6222_v42  ;;  %v6338_v47 = vpop.f32.mrf.mxu0  ;;  %v10044_v42 = vld [vmem:[%s14322_s2 + $0x1c0] sm:$0xff]  ;;  %vm14579_vm12 = vmmov %vm14574_vm1 }
 0x4a6   : > { %v13477_v35 = vadd.f32 %v6338_v47, %v6116_v23  ;;  %v13493_v47 = vsel %vm2823_vm7, %v8271_v4, %v14360_v37  ;;  %v7880_v4 = vrot.slane %v7878_v61, 3  ;;  %v6118_v23 = vadd.f32 %v6117_v3, %v13193_v25  ;;  %7716 = vmatpush.bf16.msra.mxu0 %v10037_v26  ;;  %vm14581_vm15 = vmmov %vm14574_vm1 }
 0x4a7   : > { %14554 = vst [vmem:[#allocation71_spill] sm:$0xff] %v13493_v47  ;;  %7338 = vmatmul.bf16.gmra.mxu3 %v7226_v32  ;;  %v6893_v25 = vshrl.u32 %v13513_v11, 16  ;;  %v6896_v3 = vshll.u32 %v13513_v11, 16  ;;  %v6121_v47 = vadd.f32 %v6120_v9, %v13223_v63  ;;  %v7887_v63 = vshll.u32 %v13215_v54, 16  ;;  %vm14582_vm8 = vmmov %vm14574_vm1 }
 0x4a8   : > { %8109 = vmatpush.bf16.msra.mxu1 %v10044_v42  ;;  %v7881_v61 = vor.u32 %v7880_v4, %v7877_v18  ;;  %v7608_v42 = vrot.slane %v13174_v40, 2  ;;  %v7227_v4 = vrot.slane %v13323_v57, 2  ;;  %v8275_v40 = vrot.slane %v13521_v39, 3  ;;  %vm14584_vm10 = vmmov %vm14574_vm1 }
 0x4a9   : > { %v6895_v26 = vrot.slane %v6893_v25, 1  ;;  %v14560_v9 = vrot.slane %v13465_v51, 3  ;;  %v14562_v57 = vrot.slane %v13291_v49, 2  ;;  %vm14585_vm0 = vmmov %vm14574_vm1 }
 0x4aa   : > { %v7882_v37 = vsel %vm2454_vm6, %v7873_v17, %v7881_v61  ;;  %vm14589_vm3 = vmmov %vm14585_vm0 }
 0x4ab   : > { %v6122_v14 = vpop.f32.mrf.mxu3  ;;  %v13504_v2 = vpop.f32.mrf.mxu1  ;;  %vm14593_vm2 = vmmov %vm14585_vm0 }
 0x4ac   : > { %14556 = vst [vmem:[#allocation72_spill] sm:$0xff] %v13504_v2 }
 0x4ad   : > { %v6340_v32 = vpop.f32.mrf.mxu0 }
 0x4ae   : > { %v13509_v44 = vadd.f32 %v6340_v32, %v6118_v23  ;;  %v7607_v23 = vrot.slane %v7588_v62, 2  ;;  %v6898_v32 = vrot.slane %v6896_v3, 2  ;;  %v7884_v3 = vshrl.u32 %v13215_v54, 16 }
 0x4af   : > { %7099 = vmatmul.bf16.gmra.mxu2 %v6891_v56  ;;  %v10036_v56 = vld [vmem:[%s14322_s2 + $0x180] sm:$0xff] }
 0x4b0   : > { %14557 = vst [vmem:[#allocation73_spill] sm:$0xff] %v13509_v44  ;;  %7717 = vmatpush.bf16.msra.mxu0 %v10036_v56  ;;  %v7609_v18 = vsel %vm14559_vm13, %v7607_v23, %v7608_v42  ;;  %v6899_v25 = vor.u32 %v6898_v32, %v6895_v26  ;;  %v7228_v56 = vsel %vm14563_vm9, %v14562_v57, %v7227_v4  ;;  %v7886_v17 = vrot.slane %v7884_v3, 2  ;;  %vm14598_vm13 = vmmov %vm14585_vm0 }
 0x4b1   : > { %v7889_v23 = vrot.slane %v7887_v63, 3  ;;  %v6123_v26 = vadd.f32 %v6122_v14, %v13240_v5  ;;  %v7610_v3 = vrot.slane %v13215_v54, 2  ;;  %v13557_v63 = vld [vmem:[#allocation2 + $0x60] sm:$0xff]  ;;  %vm14604_vm9 = vmmov %vm14585_vm0 }
 0x4b2   : > { %v13511_v12 = vpop.f32.mrf.mxu2  ;;  %8110 = vmatmul.bf16.vlgmr.msra.gmra.mxu1 %v7882_v37  ;;  %v13539_v37 = vsel %vm2823_vm7, %v14560_v9, %v8275_v40 }
 0x4b3   : > { %v6125_v2 = vpop.f32.mrf.mxu3  ;;  %v13525_v44 = vpop.f32.mrf.mxu1  ;;  %14561 = vst [vmem:[#allocation75_spill] sm:$0xff] %v13539_v37  ;;  %v13552_v37 = vld [vmem:[#allocation2 + $0x48] sm:$0xff] }
 0x4b4   : > { %14558 = vst [vmem:[#allocation74_spill] sm:$0xff] %v13525_v44  ;;  %v6902_v49 = vshrl.u32 %v13552_v37, 16  ;;  %v6905_v57 = vshll.u32 %v13552_v37, 16 }
 0x4b5   : > { %v6343_v13 = vpop.f32.mrf.mxu0  ;;  %7718 = vmatmul.bf16.vlgmr.msra.gmra.mxu0 %v7609_v18 }
 0x4b6   : > { %v13530_v6 = vadd.f32 %v6343_v13, %v6121_v47  ;;  %v6900_v47 = vsel %vm1488_vm5, %v6890_v33, %v6899_v25  ;;  %v7890_v33 = vor.u32 %v7889_v23, %v7886_v17  ;;  %v6904_v5 = vrot.slane %v6902_v49, 1 }
 0x4b7   : > { %7343 = vmatmul.bf16.gmra.mxu3 %v7228_v56  ;;  %v6907_v14 = vrot.slane %v6905_v57, 2  ;;  %v8277_v17 = vrot.slane %v13557_v63, 3 }
 0x4b8   : > { %v7891_v56 = vsel %vm2454_vm6, %v7881_v61, %v7890_v33  ;;  %v7893_v61 = vshrl.u32 %v13253_v55, 16 }
 0x4b9   : > { %v6908_v57 = vor.u32 %v6907_v14, %v6904_v5  ;;  %v10055_v5 = vld [vmem:[%s14322_s2 + $0x218] sm:$0xff] }
 0x4ba   : > { %v13532_v62 = vpop.f32.mrf.mxu2  ;;  %8365 = vmatpush.bf16.msra.mxu2 %v10055_v5 }
 0x4bb   : > { %v6127_v32 = vpop.f32.mrf.mxu3  ;;  %v13546_v18 = vpop.f32.mrf.mxu1 }
 0x4bc   : > { %14564 = vst [vmem:[#allocation76_spill] sm:$0xff] %v13546_v18  ;;  %v7611_v18 = vsel %vm14567_vm4, %v7608_v42, %v7610_v3  ;;  %vm14608_vm4 = vmmov %vm14585_vm0 }
 0x4bd   : > { %v6345_v13 = vpop.f32.mrf.mxu0 }
 0x4be   : > { %v13548_v44 = vadd.f32 %v6345_v13, %v6123_v26 }
 0x4bf   : > { %7104 = vmatmul.bf16.gmra.mxu2 %v6900_v47  ;;  %v6126_v47 = vadd.f32 %v6125_v2, %v13259_v48  ;;  %v7896_v48 = vshll.u32 %v13253_v55, 16  ;;  %v13573_v2 = vsel %vm2823_vm7, %v8275_v40, %v8277_v17 }
 0x4c0   : > { %14565 = vst [vmem:[#allocation77_spill] sm:$0xff] %v13548_v44  ;;  %v7229_v44 = vrot.slane %v13369_v60, 2  ;;  %v6909_v60 = vsel %vm1488_vm5, %v6899_v25, %v6908_v57 }
 0x4c1   : > { %14569 = vst [vmem:[#allocation80_spill] sm:$0xff] %v13573_v2 }
 0x4c2   : > { %v13550_v9 = vpop.f32.mrf.mxu2  ;;  %8115 = vmatmul.bf16.gmra.mxu1 %v7891_v56  ;;  %v7230_v42 = vsel %vm14570_vm14, %v7227_v4, %v7229_v44  ;;  %v7895_v56 = vrot.slane %v7893_v61, 2  ;;  %v7612_v61 = vrot.slane %v13253_v55, 2  ;;  %vm14618_vm14 = vmmov %vm14585_vm0 }
 0x4c3   : > { %v6130_v26 = vpop.f32.mrf.mxu3  ;;  %v13561_v13 = vpop.f32.mrf.mxu1 }
 0x4c4   : > { %14566 = vst [vmem:[#allocation78_spill] sm:$0xff] %v13561_v13  ;;  %v7898_v13 = vrot.slane %v7896_v48, 3  ;;  %v13592_v48 = vld [vmem:[#allocation2 + $0x68] sm:$0xff] }
 0x4c5   : > { %v6348_v23 = vpop.f32.mrf.mxu0  ;;  %7723 = vmatmul.bf16.gmra.mxu0 %v7611_v18  ;;  %v6128_v18 = vadd.f32 %v6127_v32, %v13279_v20 }
 0x4c6   : > { %v13566_v54 = vadd.f32 %v6348_v23, %v6126_v47  ;;  %v7899_v32 = vor.u32 %v7898_v13, %v7895_v56  ;;  %v8279_v13 = vrot.slane %v13592_v48, 3 }
 0x4c7   : > { %7348 = vmatmul.bf16.gmra.mxu3 %v7230_v42  ;;  %v13587_v42 = vld [vmem:[#allocation2 + $0x50] sm:$0xff] }
 0x4c8   : > { %14568 = vst [vmem:[#allocation79_spill] sm:$0xff] %v13566_v54  ;;  %v6911_v25 = vshrl.u32 %v13587_v42, 16  ;;  %v6914_v20 = vshll.u32 %v13587_v42, 16  ;;  %v7231_v54 = vrot.slane %v13403_v59, 2 }
 0x4ca   : > { %v13568_v49 = vpop.f32.mrf.mxu2  ;;  %v6916_v2 = vrot.slane %v6914_v20, 2 }
 0x4cb   : > { %v6132_v47 = vpop.f32.mrf.mxu3  ;;  %v13578_v23 = vpop.f32.mrf.mxu1 }
 0x4cc   : > { %14571 = vst [vmem:[#allocation81_spill] sm:$0xff] %v13578_v23  ;;  %v7900_v23 = vsel %vm2454_vm6, %v7890_v33, %v7899_v32  ;;  %v7902_v33 = vshrl.u32 %v13297_v53, 16 }
 0x4cd   : > { %v6350_v14 = vpop.f32.mrf.mxu0 }
 0x4ce   : > { %v13583_v40 = vadd.f32 %v6350_v14, %v6128_v18  ;;  %v6131_v18 = vadd.f32 %v6130_v26, %v13303_v43  ;;  %v7905_v43 = vshll.u32 %v13297_v53, 16  ;;  %v13608_v26 = vsel %vm2823_vm7, %v8277_v17, %v8279_v13 }
 0x4cf   : > { %7109 = vmatmul.bf16.gmra.mxu2 %v6909_v60  ;;  %v6913_v60 = vrot.slane %v6911_v25, 1  ;;  %14576 = vst [vmem:[#allocation85_spill] sm:$0xff] %v13608_v26  ;;  %v13619_v26 = vld [vmem:[#allocation2 + $0x58] sm:$0xff] }
 0x4d0   : > { %14572 = vst [vmem:[#allocation82_spill] sm:$0xff] %v13583_v40  ;;  %v7613_v40 = vsel %vm14574_vm1, %v7610_v3, %v7612_v61  ;;  %v7232_v3 = vsel %vm14577_vm11, %v7229_v44, %v7231_v54  ;;  %v6920_v44 = vshrl.u32 %v13619_v26, 16  ;;  %vm14626_vm1 = vmmov %vm14585_vm0 }
 0x4d1   : > { %v6917_v20 = vor.u32 %v6916_v2, %v6913_v60  ;;  %v6773_v60 = vadd.f32 %v13099_v58, %v13118_v27  ;;  %vm14630_vm11 = vmmov %vm14585_vm0 }
 0x4d2   : > { %v13585_v4 = vpop.f32.mrf.mxu2  ;;  %8120 = vmatmul.bf16.gmra.mxu1 %v7900_v23  ;;  %v7904_v23 = vrot.slane %v7902_v33, 2 }
 0x4d3   : > { %v6135_v5 = vpop.f32.mrf.mxu3  ;;  %v13596_v14 = vpop.f32.mrf.mxu1  ;;  %v6918_v59 = vsel %vm1488_vm5, %v6908_v57, %v6917_v20  ;;  %v6923_v57 = vshll.u32 %v13619_v26, 16 }
 0x4d4   : > { %14573 = vst [vmem:[#allocation83_spill] sm:$0xff] %v13596_v14  ;;  %v7907_v14 = vrot.slane %v7905_v43, 3  ;;  %v6136_v27 = vadd.f32 %v6135_v5, %v13335_v45  ;;  %v7911_v45 = vshrl.u32 %v13329_v7, 16  ;;  %v7914_v5 = vshll.u32 %v13329_v7, 16 }
 0x4d5   : > { %v6353_v56 = vpop.f32.mrf.mxu0  ;;  %7728 = vmatmul.bf16.gmra.mxu0 %v7613_v40  ;;  %v6133_v40 = vadd.f32 %v6132_v47, %v13317_v10  ;;  %v7614_v10 = vrot.slane %v13297_v53, 2  ;;  %v13626_v47 = vld [vmem:[#allocation2 + $0x70] sm:$0xff]  ;;  %v6774_v53 = vadd.f32 %v13129_v46, %v13144_v52 }
 0x4d6   : > { %v13601_v55 = vadd.f32 %v6353_v56, %v6131_v18  ;;  %v7908_v33 = vor.u32 %v7907_v14, %v7904_v23  ;;  %v7233_v14 = vrot.slane %v13447_v22, 2  ;;  %v8281_v23 = vrot.slane %v13626_v47, 3 }
 0x4d7   : > { %7353 = vmatmul.bf16.gmra.mxu3 %v7232_v3  ;;  %v6922_v3 = vrot.slane %v6920_v44, 1  ;;  %v7916_v46 = vrot.slane %v7914_v5, 3 }
 0x4d8   : > { %14575 = vst [vmem:[#allocation84_spill] sm:$0xff] %v13601_v55  ;;  %v7909_v58 = vsel %vm2454_vm6, %v7899_v32, %v7908_v33  ;;  %v7234_v22 = vsel %vm14581_vm15, %v7231_v54, %v7233_v14  ;;  %vm14637_vm15 = vmmov %vm14585_vm0 }
 0x4da   : > { %v13603_v25 = vpop.f32.mrf.mxu2 }
 0x4db   : > { %v6137_v18 = vpop.f32.mrf.mxu3  ;;  %v13613_v56 = vpop.f32.mrf.mxu1 }
 0x4dc   : > { %14578 = vst [vmem:[#allocation86_spill] sm:$0xff] %v13613_v56  ;;  %v7615_v56 = vsel %vm14579_vm12, %v7612_v61, %v7614_v10  ;;  %v6138_v52 = vadd.f32 %v6137_v18, %v13351_v24  ;;  %v10054_v24 = vld [vmem:[%s14322_s2 + $0x210] sm:$0xff]  ;;  %v7616_v18 = vrot.slane %v13329_v7, 2  ;;  %vm14634_vm12 = vmmov %vm14585_vm0 }
 0x4dd   : > { %v6355_v2 = vpop.f32.mrf.mxu0  ;;  %8366 = vmatpush.bf16.msra.mxu2 %v10054_v24 }
 0x4de   : > { %v13617_v55 = vadd.f32 %v6355_v2, %v6133_v40 }
 0x4df   : > { %7114 = vmatmul.bf16.gmra.mxu2 %v6918_v59  ;;  %v6925_v59 = vrot.slane %v6923_v57, 2  ;;  %v13642_v57 = vsel %vm2823_vm7, %v8279_v13, %v8281_v23  ;;  %v6775_v13 = vadd.f32 %v13164_v41, %v13171_v0 }
 0x4e0   : > { %14580 = vst [vmem:[#allocation87_spill] sm:$0xff] %v13642_v57 }
 0x4e1   : > { %v6926_v44 = vor.u32 %v6925_v59, %v6922_v3 }
 0x4e2   : > { %v7075_v17 = vpop.f32.mrf.mxu2  ;;  %8125 = vmatmul.bf16.gmra.mxu1 %v7909_v58  ;;  %v7913_v58 = vrot.slane %v7911_v45, 2 }
 0x4e3   : > { %v13623_v43 = vadd.f32 %v7075_v17, %v6773_v60  ;;  %v6140_v40 = vpop.f32.mrf.mxu3  ;;  %v13630_v2 = vpop.f32.mrf.mxu1 }
 0x4e4   : > { %v7917_v45 = vor.u32 %v7916_v46, %v7913_v58  ;;  %v7617_v58 = vsel %vm14582_vm8, %v7614_v10, %v7616_v18  ;;  %v7235_v46 = vrot.slane %v13513_v11, 2  ;;  %vm14639_vm8 = vmmov %vm14585_vm0 }
 0x4e5   : > { %v6358_v60 = vpop.f32.mrf.mxu0  ;;  %7733 = vmatmul.bf16.gmra.mxu0 %v7615_v56  ;;  %v6927_v56 = vsel %vm1488_vm5, %v6917_v20, %v6926_v44 }
 0x4e6   : > { %v13637_v17 = vadd.f32 %v6358_v60, %v6136_v27  ;;  %v7236_v11 = vsel %vm14584_vm10, %v7233_v14, %v7235_v46  ;;  %v6938_v14 = vshrl.u32 %v13187_v30, 16  ;;  %vm14643_vm10 = vmmov %vm14585_vm0 }
 0x4e7   : > { %7358 = vmatmul.bf16.gmra.mxu3 %v7234_v22  ;;  %v13665_v22 = vld [vmem:[#allocation2 + $0x78] sm:$0xff] }
 0x4ea   : > { %v7077_v32 = vpop.f32.mrf.mxu2 }
 0x4eb   : > { %v13644_v61 = vadd.f32 %v7077_v32, %v6774_v53  ;;  %v6142_v3 = vpop.f32.mrf.mxu3  ;;  %v13649_v59 = vpop.f32.mrf.mxu1  ;;  %v13655_v32 = vld [vmem:[#allocation2 + $0x60] sm:$0xff] }
 0x4ec   : > { %v6929_v54 = vshrl.u32 %v13655_v32, 16  ;;  %v6932_v20 = vshll.u32 %v13655_v32, 16 }
 0x4ed   : > { %v6360_v27 = vpop.f32.mrf.mxu0 }
 0x4ee   : > { %v13653_v60 = vadd.f32 %v6360_v27, %v6138_v52  ;;  %v6931_v41 = vrot.slane %v6929_v54, 1  ;;  %v6934_v0 = vrot.slane %v6932_v20, 2  ;;  %v6141_v52 = vadd.f32 %v6140_v40, %v13386_v21 }
 0x4ef   : > { %7119 = vmatmul.bf16.gmra.mxu2 %v6927_v56  ;;  %v7918_v56 = vsel %vm2454_vm6, %v7908_v33, %v7917_v45  ;;  %v7920_v21 = vshrl.u32 %v13375_v15, 16  ;;  %v7923_v40 = vshll.u32 %v13375_v15, 16 }
 0x4f0   : > { %v6935_v20 = vor.u32 %v6934_v0, %v6931_v41 }
 0x4f2   : > { %v7080_v53 = vpop.f32.mrf.mxu2  ;;  %8130 = vmatmul.bf16.gmra.mxu1 %v7918_v56  ;;  %v6936_v56 = vsel %vm1488_vm5, %v6926_v44, %v6935_v20 }
 0x4f3   : > { %v13659_v5 = vadd.f32 %v7080_v53, %v6775_v13  ;;  %v6145_v27 = vpop.f32.mrf.mxu3  ;;  %v13669_v57 = vpop.f32.mrf.mxu1  ;;  %v8283_v13 = vrot.slane %v13665_v22, 3  ;;  %v6776_v53 = vadd.f32 %v13182_v31, %v13199_v36  ;;  %v7925_v31 = vrot.slane %v7923_v40, 3 }
 0x4f4   : > { %v6143_v36 = vadd.f32 %v6142_v3, %v13412_v16  ;;  %v7618_v16 = vrot.slane %v13375_v15, 2  ;;  %v13699_v3 = vld [vmem:[#allocation2 + $0x80] sm:$0xff]  ;;  %v6940_v40 = vrot.slane %v6938_v14, 1 }
 0x4f5   : > { %v6363_v7 = vpop.f32.mrf.mxu0  ;;  %7738 = vmatmul.bf16.gmra.mxu0 %v7617_v58  ;;  %v13681_v24 = vsel %vm2823_vm7, %v8281_v23, %v8283_v13  ;;  %v7922_v58 = vrot.slane %v7920_v21, 2  ;;  %v6777_v23 = vadd.f32 %v13221_v38, %v13226_v8  ;;  %v6146_v38 = vadd.f32 %v6145_v27, %v13440_v28  ;;  %v14586_v15 = vld [vmem:[#allocation41_spill] sm:$0xff] }
 0x4f6   : > { %v13676_v54 = vadd.f32 %v6363_v7, %v6141_v52  ;;  %14583 = vst [vmem:[#allocation88_spill] sm:$0xff] %v13681_v24  ;;  %v7929_v28 = vshrl.u32 %v13415_v29, 16  ;;  %v7932_v27 = vshll.u32 %v13415_v29, 16 }
 0x4f7   : > { %7363 = vmatmul.bf16.gmra.mxu3 %v7236_v11  ;;  %v7926_v44 = vor.u32 %v7925_v31, %v7922_v58  ;;  %v6778_v31 = vadd.f32 %v14586_v15, %v13242_v34  ;;  %v14591_v15 = vld [vmem:[#allocation43_spill] sm:$0xff] }
 0x4fa   : > { %v7082_v33 = vpop.f32.mrf.mxu2 }
 0x4fb   : > { %v13683_v10 = vadd.f32 %v7082_v33, %v6776_v53  ;;  %v6147_v41 = vpop.f32.mrf.mxu3  ;;  %v13688_v0 = vpop.f32.mrf.mxu1  ;;  %v6941_v33 = vshll.u32 %v13187_v30, 16  ;;  %v8285_v30 = vrot.slane %v13699_v3, 3 }
 0x4fd   : > { %v6365_v52 = vpop.f32.mrf.mxu0  ;;  %v6943_v11 = vrot.slane %v6941_v33, 2 }
 0x4fe   : > { %v13692_v7 = vadd.f32 %v6365_v52, %v6143_v36  ;;  %v7619_v36 = vsel %vm14585_vm0, %v7616_v18, %v7618_v16  ;;  %v7237_v52 = vrot.slane %v13552_v37, 2  ;;  %v13715_v18 = vsel %vm2823_vm7, %v8283_v13, %v8285_v30 }
 0x4ff   : > { %7124 = vmatmul.bf16.gmra.mxu2 %v6936_v56  ;;  %v7927_v56 = vsel %vm2454_vm6, %v7917_v45, %v7926_v44  ;;  %v6944_v14 = vor.u32 %v6943_v11, %v6940_v40  ;;  %14588 = vst [vmem:[#allocation89_spill] sm:$0xff] %v13715_v18 }
 0x500   : > { %v7238_v33 = vsel %vm14589_vm3, %v7235_v46, %v7237_v52  ;;  %vm14654_vm3 = vmmov %vm14585_vm0 }
 0x501   : > { %v6945_v34 = vsel %vm1488_vm5, %v6935_v20, %v6944_v14 }
 0x502   : > { %v7085_v53 = vpop.f32.mrf.mxu2  ;;  %8135 = vmatmul.bf16.gmra.mxu1 %v7927_v56  ;;  %v7931_v56 = vrot.slane %v7929_v28, 2  ;;  %v13736_v28 = vld [vmem:[#allocation2 + $0x88] sm:$0xff] }
 0x503   : > { %v13696_v21 = vadd.f32 %v7085_v53, %v6777_v23  ;;  %v6150_v8 = vpop.f32.mrf.mxu3  ;;  %v13708_v23 = vpop.f32.mrf.mxu1 }
 0x504   : > { %14587 = vst [vmem:[#allocation41_spill] sm:$0xff] %v13708_v23 }
 0x505   : > { %v6368_v58 = vpop.f32.mrf.mxu0  ;;  %7743 = vmatmul.bf16.gmra.mxu0 %v7619_v36  ;;  %v7934_v36 = vrot.slane %v7932_v27, 3 }
 0x506   : > { %v13710_v53 = vadd.f32 %v6368_v58, %v6146_v38  ;;  %v6148_v38 = vadd.f32 %v6147_v41, %v13473_v1  ;;  %v14590_v58 = vld [vmem:[#allocation44_spill] sm:$0xff]  ;;  %v10053_v1 = vld [vmem:[%s14322_s2 + $0x208] sm:$0xff]  ;;  %v7620_v41 = vrot.slane %v13415_v29, 2 }
 0x507   : > { %7368 = vmatmul.bf16.gmra.mxu3 %v7238_v33  ;;  %v6779_v24 = vadd.f32 %v14591_v15, %v14590_v58  ;;  %v7935_v33 = vor.u32 %v7934_v36, %v7931_v56  ;;  %8367 = vmatpush.bf16.msra.mxu2 %v10053_v1  ;;  %v7239_v36 = vrot.slane %v13587_v42, 2  ;;  %v14361_v58 = vrot.slane %v13736_v28, 3  ;;  %v14594_v29 = vld [vmem:[#allocation48_spill] sm:$0xff] }
 0x50a   : > { %v7087_v45 = vpop.f32.mrf.mxu2 }
 0x50b   : > { %v13717_v37 = vadd.f32 %v7087_v45, %v6778_v31  ;;  %v6152_v40 = vpop.f32.mrf.mxu3  ;;  %v14592_v31 = vld [vmem:[#allocation42_spill] sm:$0xff]  ;;  %v13730_v20 = vpop.f32.mrf.mxu1 }
 0x50c   : > { %v6947_v45 = vshrl.u32 %v14592_v31, 16  ;;  %v6950_v46 = vshll.u32 %v14592_v31, 16 }
 0x50d   : > { %v6370_v11 = vpop.f32.mrf.mxu0 }
 0x50e   : > { %v13724_v23 = vadd.f32 %v6370_v11, %v6148_v38  ;;  %v6949_v27 = vrot.slane %v6947_v45, 1  ;;  %v7936_v38 = vsel %vm2454_vm6, %v7926_v44, %v7935_v33  ;;  %v6151_v11 = vadd.f32 %v6150_v8, %v13511_v12 }
 0x50f   : > { %7129 = vmatmul.bf16.gmra.mxu2 %v6945_v34  ;;  %v6952_v34 = vrot.slane %v6950_v46, 2  ;;  %v7938_v44 = vshrl.u32 %v13465_v51, 16  ;;  %v7941_v12 = vshll.u32 %v13465_v51, 16  ;;  %v7240_v8 = vsel %vm14598_vm13, %v7237_v52, %v7239_v36  ;;  %vm14661_vm13 = vmmov %vm14585_vm0 }
 0x511   : > { %v6953_v46 = vor.u32 %v6952_v34, %v6949_v27  ;;  %v7943_v27 = vrot.slane %v7941_v12, 3  ;;  %v6153_v34 = vadd.f32 %v6152_v40, %v13532_v62 }
 0x512   : > { %v7090_v13 = vpop.f32.mrf.mxu2  ;;  %8140 = vmatmul.bf16.gmra.mxu1 %v7936_v38 }
 0x513   : > { %v13728_v18 = vadd.f32 %v7090_v13, %v6779_v24  ;;  %v6155_v56 = vpop.f32.mrf.mxu3  ;;  %v7621_v24 = vsel %vm14593_vm2, %v7618_v16, %v7620_v41  ;;  %v14595_v13 = vld [vmem:[#allocation46_spill] sm:$0xff]  ;;  %v13752_v16 = vsel %vm2823_vm7, %v8285_v30, %v14361_v58  ;;  %v13757_v38 = vpop.f32.mrf.mxu1  ;;  %vm14657_vm2 = vmmov %vm14585_vm0 }
 0x514   : > { %v6780_v31 = vadd.f32 %v14595_v13, %v14594_v29  ;;  %14597 = vst [vmem:[#allocation43_spill] sm:$0xff] %v13752_v16  ;;  %v14600_v13 = vld [vmem:[#allocation50_spill] sm:$0xff]  ;;  %v6156_v12 = vadd.f32 %v6155_v56, %v13550_v9  ;;  %v7950_v9 = vshll.u32 %v13521_v39, 16 }
 0x515   : > { %v6373_v15 = vpop.f32.mrf.mxu0  ;;  %7748 = vmatmul.bf16.gmra.mxu0 %v7621_v24  ;;  %14599 = vst [vmem:[#allocation42_spill] sm:$0xff] %v13757_v38  ;;  %v7940_v24 = vrot.slane %v7938_v44, 2 }
 0x516   : > { %v13745_v1 = vadd.f32 %v6373_v15, %v6151_v11  ;;  %v6954_v11 = vsel %vm1488_vm5, %v6944_v14, %v6953_v46  ;;  %v7622_v14 = vrot.slane %v13465_v51, 2 }
 0x517   : > { %7373 = vmatmul.bf16.gmra.mxu3 %v7240_v8  ;;  %v7944_v16 = vor.u32 %v7943_v27, %v7940_v24  ;;  %v14605_v27 = vld [vmem:[#allocation54_spill] sm:$0xff] }
 0x518   : > { %14596 = vst [vmem:[#allocation44_spill] sm:$0xff] %v13745_v1  ;;  %v14601_v1 = vld [vmem:[#allocation49_spill] sm:$0xff] }
 0x519   : > { %v6781_v30 = vadd.f32 %v14601_v1, %v14600_v13  ;;  %v7945_v40 = vsel %vm2454_vm6, %v7935_v33, %v7944_v16  ;;  %v7845_v13 = vld [vmem:[#allocation2 + $0xa0] sm:$0x7]  ;;  %v7947_v33 = vshrl.u32 %v13521_v39, 16 }
 0x51a   : > { %v7092_v45 = vpop.f32.mrf.mxu2 }
 0x51b   : > { %v13754_v42 = vadd.f32 %v7092_v45, %v6780_v31  ;;  %v6157_v15 = vpop.f32.mrf.mxu3  ;;  %v14602_v45 = vld [vmem:[#allocation47_spill] sm:$0xff] }
 0x51c   : > { %v6956_v52 = vshrl.u32 %v14602_v45, 16  ;;  %v6959_v8 = vshll.u32 %v14602_v45, 16 }
 0x51d   : > { %v6375_v29 = vpop.f32.mrf.mxu0 }
 0x51e   : > { %v13763_v58 = vadd.f32 %v6375_v29, %v6153_v34  ;;  %v6958_v44 = vrot.slane %v6956_v52, 1  ;;  %v6961_v62 = vrot.slane %v6959_v8, 2  ;;  %v7623_v34 = vsel %vm14604_vm9, %v7620_v41, %v7622_v14  ;;  %vm14663_vm9 = vmmov %vm14585_vm0 }
 0x51f   : > { %7134 = vmatmul.bf16.gmra.mxu2 %v6954_v11  ;;  %v13772_v11 = vpop.f32.mrf.mxu1  ;;  %v7241_v29 = vrot.slane %v13619_v26, 2  ;;  %v7864_v52 = vunpack.c.l.b16 %v7845_v13  ;;  %v7949_v26 = vrot.slane %v7947_v33, 2 }
 0x520   : > { %14603 = vst [vmem:[#allocation48_spill] sm:$0xff] %v13772_v11  ;;  %v6962_v45 = vor.u32 %v6961_v62, %v6958_v44 }
 0x521   : > { %v7242_v41 = vsel %vm14608_vm4, %v7239_v36, %v7241_v29  ;;  %v14611_v36 = vld [vmem:[#allocation55_spill] sm:$0xff]  ;;  %vm14665_vm4 = vmmov %vm14585_vm0 }
 0x522   : > { %v7095_v31 = vpop.f32.mrf.mxu2  ;;  %8145 = vmatmul.bf16.gmra.mxu1 %v7945_v40  ;;  %v7952_v40 = vrot.slane %v7950_v9, 3 }
 0x523   : > { %v13767_v38 = vadd.f32 %v7095_v31, %v6781_v30  ;;  %v6160_v1 = vpop.f32.mrf.mxu3  ;;  %v14606_v30 = vld [vmem:[#allocation52_spill] sm:$0xff] }
 0x524   : > { %v6782_v51 = vadd.f32 %v14606_v30, %v14605_v27  ;;  %v6963_v27 = vsel %vm1488_vm5, %v6953_v46, %v6962_v45  ;;  %v6158_v30 = vadd.f32 %v6157_v15, %v13568_v49  ;;  %v7953_v9 = vor.u32 %v7952_v40, %v7949_v26 }
 0x525   : > { %v6378_v24 = vpop.f32.mrf.mxu0  ;;  %7753 = vmatmul.bf16.gmra.mxu0 %v7623_v34  ;;  %v13785_v34 = vld [vmem:[#allocation2 + $0x90] sm:$0xff] }
 0x526   : > { %v13778_v31 = vadd.f32 %v6378_v24, %v6156_v12  ;;  %v13788_v12 = vld [vmem:[#allocation2 + $0x98] sm:$0xff]  ;;  %v13790_v24 = vpack.c.b16 %v7864_v52, %v7864_v52 }
 0x527   : > { %7378 = vmatmul.bf16.gmra.mxu3 %v7242_v41  ;;  %v13793_v13 = vpop.f32.mrf.mxu1  ;;  %v8289_v41 = vrot.slane %v13785_v34, 3  ;;  %v8291_v49 = vrot.slane %v13788_v12, 3 }
 0x528   : > { %14607 = vst [vmem:[#allocation46_spill] sm:$0xff] %v13778_v31  ;;  %v14613_v31 = vld [vmem:[#allocation53_spill] sm:$0xff]  ;;  %v8293_v15 = vrot.slane %v13790_v24, 3 }
 0x529   : > { %14609 = vst [vmem:[#allocation50_spill] sm:$0xff] %v13793_v13  ;;  %v6965_v11 = vshrl.u32 %v14613_v31, 16  ;;  %v6968_v52 = vshll.u32 %v14613_v31, 16  ;;  %v7624_v13 = vrot.slane %v13521_v39, 2  ;;  %v13813_v26 = vsel %vm2823_vm7, %v8289_v41, %v8291_v49 }
 0x52a   : > { %v7097_v56 = vpop.f32.mrf.mxu2  ;;  %14616 = vst [vmem:[#allocation54_spill] sm:$0xff] %v13813_v26  ;;  %v13816_v40 = vsel %vm2823_vm7, %v8291_v49, %v8293_v15  ;;  %v14620_v26 = vld [vmem:[#allocation58_spill] sm:$0xff] }
 0x52b   : > { %v13782_v8 = vadd.f32 %v7097_v56, %v6782_v51  ;;  %v6162_v44 = vpop.f32.mrf.mxu3  ;;  %v14610_v51 = vld [vmem:[#allocation56_spill] sm:$0xff]  ;;  %14617 = vst [vmem:[#allocation52_spill] sm:$0xff] %v13816_v40  ;;  %v6967_v31 = vrot.slane %v6965_v11, 1  ;;  %v7625_v39 = vsel %vm14618_vm14, %v7622_v14, %v7624_v13  ;;  %v14624_v40 = vld [vmem:[#allocation59_spill] sm:$0xff]  ;;  %vm14666_vm14 = vmmov %vm14585_vm0 }
 0x52c   : > { %v6783_v56 = vadd.f32 %v14611_v36, %v14610_v51  ;;  %v14614_v51 = vrot.slane %v13736_v28, 3  ;;  %v7954_v36 = vsel %vm2454_vm6, %v7944_v16, %v7953_v9  ;;  %v7956_v16 = vshrl.u32 %v13557_v63, 16 }
 0x52d   : > { %v6380_v62 = vpop.f32.mrf.mxu0 }
 0x52e   : > { %v13797_v33 = vadd.f32 %v6380_v62, %v6158_v30  ;;  %v13810_v30 = vsel %vm2823_vm7, %v14614_v51, %v8289_v41  ;;  %v6970_v62 = vrot.slane %v6968_v52, 2  ;;  %v14619_v41 = vld [vmem:[#allocation60_spill] sm:$0xff]  ;;  %vm14621_vm7 = vmmov %vm14585_vm0 }
 0x52f   : > { %7139 = vmatmul.bf16.gmra.mxu2 %v6963_v27  ;;  %14615 = vst [vmem:[#allocation47_spill] sm:$0xff] %v13810_v30  ;;  %v6784_v49 = vadd.f32 %v14620_v26, %v14619_v41  ;;  %v7958_v26 = vrot.slane %v7956_v16, 2  ;;  %v14623_v41 = vld [vmem:[#allocation61_spill] sm:$0xff] }
 0x530   : > { %14612 = vst [vmem:[#allocation49_spill] sm:$0xff] %v13797_v33  ;;  %v7243_v33 = vrot.slane %v13655_v32, 2  ;;  %v6971_v52 = vor.u32 %v6970_v62, %v6967_v31  ;;  %v6163_v62 = vadd.f32 %v6162_v44, %v13603_v25  ;;  %v7626_v25 = vrot.slane %v13557_v63, 2 }
 0x532   : > { %v7100_v46 = vpop.f32.mrf.mxu2  ;;  %8150 = vmatmul.bf16.gmra.mxu1 %v7954_v36  ;;  %v7244_v32 = vsel %vm14621_vm7, %v7241_v29, %v7243_v33  ;;  %vm14668_vm7 = vmmov %vm14585_vm0 }
 0x533   : > { %v13804_v27 = vadd.f32 %v7100_v46, %v6783_v56  ;;  %v6161_v56 = vadd.f32 %v6160_v1, %v13585_v4  ;;  %v7334_v46 = vpop.f32.mrf.mxu3  ;;  %v7959_v4 = vshll.u32 %v13557_v63, 16  ;;  %v13829_v1 = vpop.f32.mrf.mxu1 }
 0x534   : > { %v7424_v51 = vadd.f32 %v7334_v46, %v13623_v43  ;;  %v10052_v43 = vld [vmem:[%s14322_s2 + $0x200] sm:$0xff] }
 0x535   : > { %v6383_v30 = vpop.f32.mrf.mxu0  ;;  %7758 = vmatmul.bf16.gmra.mxu0 %v7625_v39  ;;  %8368 = vmatpush.bf16.msra.mxu2 %v10052_v43  ;;  %v7961_v31 = vrot.slane %v7959_v4, 3  ;;  %v14622_v39 = vld [vmem:[#allocation62_spill] sm:$0xff]  ;;  %v6977_v43 = vshll.u32 %v14624_v40, 16 }
 0x536   : > { %v13825_v15 = vadd.f32 %v6383_v30, %v6161_v56  ;;  %v6972_v30 = vsel %vm1488_vm5, %v6962_v45, %v6971_v52  ;;  %v6785_v29 = vadd.f32 %v14623_v41, %v14622_v39 }
 0x537   : > { %7383 = vmatmul.bf16.gmra.mxu3 %v7244_v32  ;;  %v6974_v32 = vshrl.u32 %v14624_v40, 16  ;;  %v7962_v45 = vor.u32 %v7961_v31, %v7958_v26  ;;  %v14627_v26 = vld [vmem:[#allocation66_spill] sm:$0xff]  ;;  %v14628_v31 = vld [vmem:[#allocation64_spill] sm:$0xff] }
 0x539   : > { %v6976_v4 = vrot.slane %v6974_v32, 1 }
 0x53a   : > { %v7102_v11 = vpop.f32.mrf.mxu2 }
 0x53b   : > { %v13831_v14 = vadd.f32 %v7102_v11, %v6784_v49  ;;  %v7336_v36 = vpop.f32.mrf.mxu3  ;;  %v13849_v44 = vpop.f32.mrf.mxu1 }
 0x53c   : > { %v7425_v56 = vadd.f32 %v7336_v36, %v13644_v61  ;;  %v6979_v61 = vrot.slane %v6977_v43, 2  ;;  %v7965_v43 = vshrl.u32 %v13592_v48, 16 }
 0x53d   : > { %v6385_v46 = vpop.f32.mrf.mxu0 }
 0x53e   : > { %v13842_v49 = vadd.f32 %v6385_v46, %v6163_v62  ;;  %v7627_v62 = vsel %vm14626_vm1, %v7624_v13, %v7626_v25  ;;  %v10247_v46 = vld [vmem:[#allocation2 + $0x68] sm:$0xff]  ;;  %v6980_v32 = vor.u32 %v6979_v61, %v6976_v4  ;;  %vm14671_vm1 = vmmov %vm14585_vm0 }
 0x53f   : > { %7144 = vmatmul.bf16.gmra.mxu2 %v6972_v30  ;;  %v7963_v30 = vsel %vm2454_vm6, %v7953_v9, %v7962_v45  ;;  %v7245_v39 = vrot.slane %v10247_v46, 2  ;;  %v7968_v9 = vshll.u32 %v13592_v48, 16  ;;  %v14631_v61 = vld [vmem:[#allocation67_spill] sm:$0xff] }
 0x541   : > { %v7246_v13 = vsel %vm14630_vm11, %v7243_v33, %v7245_v39 }
 0x542   : > { %v7105_v11 = vpop.f32.mrf.mxu2  ;;  %8155 = vmatmul.bf16.gmra.mxu1 %v7963_v30 }
 0x543   : > { %v13846_v16 = vadd.f32 %v7105_v11, %v6785_v29  ;;  %v7339_v36 = vpop.f32.mrf.mxu3  ;;  %v6786_v29 = vadd.f32 %v14628_v31, %v14627_v26  ;;  %v13864_v46 = vpop.f32.mrf.mxu1  ;;  %v6787_v26 = vadd.f32 %v14631_v61, %v13427_v19 }
 0x544   : > { %v7426_v41 = vadd.f32 %v7339_v36, %v13659_v5  ;;  %v6981_v5 = vsel %vm1488_vm5, %v6971_v52, %v6980_v32  ;;  %v7967_v36 = vrot.slane %v7965_v43, 2 }
 0x545   : > { %14625 = vst [vmem:[#allocation56_spill] sm:$0xff] %v13846_v16  ;;  %v7719_v40 = vpop.f32.mrf.mxu0  ;;  %7763 = vmatmul.bf16.gmra.mxu0 %v7627_v62  ;;  %v7970_v62 = vrot.slane %v7968_v9, 3  ;;  %v7628_v9 = vrot.slane %v13592_v48, 2  ;;  %v6809_v16 = vld [vmem:[#allocation2 + $0x98] sm:$0x3] }
 0x546   : > { %v13856_v63 = vadd.f32 %v7719_v40, %v7424_v51 }
 0x547   : > { %7388 = vmatmul.bf16.gmra.mxu3 %v7246_v13  ;;  %v7971_v52 = vor.u32 %v7970_v62, %v7967_v36  ;;  %v7629_v19 = vsel %vm14634_vm12, %v7626_v25, %v7628_v9  ;;  %v14635_v62 = vld [vmem:[#allocation70_spill] sm:$0xff]  ;;  %v7977_v25 = vshll.u32 %v13626_v47, 16 }
 0x54a   : > { %v7107_v11 = vpop.f32.mrf.mxu2 }
 0x54b   : > { %v13860_v30 = vadd.f32 %v7107_v11, %v6786_v29  ;;  %v7341_v51 = vpop.f32.mrf.mxu3  ;;  %v14633_v11 = vld [vmem:[#allocation65_spill] sm:$0xff]  ;;  %v13879_v36 = vpop.f32.mrf.mxu1 }
 0x54c   : > { %v7427_v40 = vadd.f32 %v7341_v51, %v13683_v10  ;;  %v6983_v33 = vshrl.u32 %v14633_v11, 16  ;;  %v6986_v13 = vshll.u32 %v14633_v11, 16  ;;  %v7972_v10 = vsel %vm2454_vm6, %v7962_v45, %v7971_v52 }
 0x54d   : > { %14629 = vst [vmem:[#allocation55_spill] sm:$0xff] %v13860_v30  ;;  %v7721_v4 = vpop.f32.mrf.mxu0 }
 0x54e   : > { %v13869_v31 = vadd.f32 %v7721_v4, %v7425_v56  ;;  %v6988_v30 = vrot.slane %v6986_v13, 2  ;;  %v10248_v56 = vld [vmem:[#allocation2 + $0x70] sm:$0xff]  ;;  %v7974_v13 = vshrl.u32 %v13626_v47, 16 }
 0x54f   : > { %7149 = vmatmul.bf16.gmra.mxu2 %v6981_v5  ;;  %v6985_v5 = vrot.slane %v6983_v33, 1  ;;  %v7247_v4 = vrot.slane %v10248_v56, 2  ;;  %v6828_v33 = vunpack.c.l.b16 %v6809_v16 }
 0x550   : > { %14632 = vst [vmem:[#allocation53_spill] sm:$0xff] %v13869_v31  ;;  %v7976_v56 = vrot.slane %v7974_v13, 2  ;;  %v7630_v13 = vrot.slane %v13626_v47, 2 }
 0x551   : > { %v6989_v45 = vor.u32 %v6988_v30, %v6985_v5 }
 0x552   : > { %v7110_v29 = vpop.f32.mrf.mxu2  ;;  %8160 = vmatmul.bf16.gmra.mxu1 %v7972_v10 }
 0x553   : > { %v13873_v43 = vadd.f32 %v7110_v29, %v6787_v26  ;;  %v7344_v51 = vpop.f32.mrf.mxu3  ;;  %v14636_v26 = vld [vmem:[#allocation69_spill] sm:$0xff] }
 0x554   : > { %v7428_v61 = vadd.f32 %v7344_v51, %v13696_v21  ;;  %v6788_v48 = vadd.f32 %v14636_v26, %v14635_v62  ;;  %v7248_v21 = vsel %vm14637_vm15, %v7245_v39, %v7247_v4  ;;  %v6990_v51 = vsel %vm1488_vm5, %v6980_v32, %v6989_v45 }
 0x555   : > { %v7724_v31 = vpop.f32.mrf.mxu0  ;;  %7768 = vmatmul.bf16.gmra.mxu0 %v7629_v19  ;;  %v13891_v19 = vpack.c.b16 %v6828_v33, %v6828_v33  ;;  %v7979_v62 = vrot.slane %v7977_v25, 3 }
 0x556   : > { %v13883_v29 = vadd.f32 %v7724_v31, %v7426_v41  ;;  %v6789_v31 = vadd.f32 %v13469_v50, %v13477_v35  ;;  %v7631_v50 = vsel %vm14639_vm8, %v7628_v9, %v7630_v13  ;;  %v10249_v35 = vld [vmem:[#allocation2 + $0x78] sm:$0xff] }
 0x557   : > { %7393 = vmatmul.bf16.gmra.mxu3 %v7248_v21  ;;  %v6992_v39 = vshrl.u32 %v13891_v19, 16  ;;  %v7980_v32 = vor.u32 %v7979_v62, %v7976_v56  ;;  %v14640_v56 = vld [vmem:[#allocation73_spill] sm:$0xff]  ;;  %v14641_v62 = vld [vmem:[#allocation72_spill] sm:$0xff] }
 0x559   : > { %v6994_v25 = vrot.slane %v6992_v39, 1  ;;  %v7981_v21 = vsel %vm2454_vm6, %v7971_v52, %v7980_v32  ;;  %v7986_v52 = vshll.u32 %v13665_v22, 16 }
 0x55a   : > { %v7112_v11 = vpop.f32.mrf.mxu2 }
 0x55b   : > { %v13887_v10 = vadd.f32 %v7112_v11, %v6788_v48  ;;  %v7346_v41 = vpop.f32.mrf.mxu3  ;;  %v6995_v48 = vshll.u32 %v13891_v19, 16  ;;  %v13900_v11 = vpop.f32.mrf.mxu1 }
 0x55c   : > { %v7429_v30 = vadd.f32 %v7346_v41, %v13717_v37 }
 0x55d   : > { %v7726_v16 = vpop.f32.mrf.mxu0  ;;  %v6997_v37 = vrot.slane %v6995_v48, 2  ;;  %v7983_v48 = vshrl.u32 %v13665_v22, 16 }
 0x55e   : > { %v13896_v5 = vadd.f32 %v7726_v16, %v7427_v40  ;;  %v7249_v40 = vrot.slane %v10249_v35, 2 }
 0x55f   : > { %7154 = vmatmul.bf16.gmra.mxu2 %v6990_v51  ;;  %v6998_v39 = vor.u32 %v6997_v37, %v6994_v25  ;;  %v14644_v37 = vld [vmem:[#allocation74_spill] sm:$0xff] }
 0x560   : > { %v7250_v9 = vsel %vm14643_vm10, %v7247_v4, %v7249_v40 }
 0x562   : > { %v7115_v26 = vpop.f32.mrf.mxu2  ;;  %8165 = vmatmul.bf16.gmra.mxu1 %v7981_v21 }
 0x563   : > { %v13902_v33 = vadd.f32 %v7115_v26, %v6789_v31  ;;  %v7349_v51 = vpop.f32.mrf.mxu3  ;;  %v6790_v31 = vadd.f32 %v14641_v62, %v14640_v56  ;;  %v13917_v35 = vpop.f32.mrf.mxu1  ;;  %v6791_v56 = vadd.f32 %v14644_v37, %v13530_v6  ;;  %v7995_v37 = vshll.u32 %v13699_v3, 16 }
 0x564   : > { %v7430_v41 = vadd.f32 %v7349_v51, %v13728_v18  ;;  %v6999_v18 = vsel %vm1488_vm5, %v6989_v45, %v6998_v39  ;;  %v7985_v51 = vrot.slane %v7983_v48, 2  ;;  %vm14646_vm5 = vmmov %vm14585_vm0 }
 0x565   : > { %14638 = vst [vmem:[#allocation60_spill] sm:$0xff] %v13902_v33  ;;  %v7729_v16 = vpop.f32.mrf.mxu0  ;;  %7773 = vmatmul.bf16.gmra.mxu0 %v7631_v50  ;;  %v7988_v50 = vrot.slane %v7986_v52, 3  ;;  %v10250_v52 = vld [vmem:[#allocation2 + $0x80] sm:$0xff] }
 0x566   : > { %v13910_v26 = vadd.f32 %v7729_v16, %v7428_v61 }
 0x567   : > { %7398 = vmatmul.bf16.gmra.mxu3 %v7250_v9  ;;  %v7632_v9 = vrot.slane %v13665_v22, 2 }
 0x56a   : > { %v7117_v47 = vpop.f32.mrf.mxu2 }
 0x56b   : > { %v13914_v21 = vadd.f32 %v7117_v47, %v6790_v31  ;;  %v7351_v61 = vpop.f32.mrf.mxu3  ;;  %v7989_v47 = vor.u32 %v7988_v50, %v7985_v51  ;;  %v13929_v39 = vpop.f32.mrf.mxu1  ;;  %v14648_v51 = vld [vmem:[#allocation76_spill] sm:$0xff] }
 0x56c   : > { %v7431_v16 = vadd.f32 %v7351_v61, %v13754_v42  ;;  %v7633_v42 = vsel %vm14646_vm5, %v7630_v13, %v7632_v9  ;;  %v14647_v61 = vld [vmem:[#allocation77_spill] sm:$0xff] }
 0x56d   : > { %14642 = vst [vmem:[#allocation58_spill] sm:$0xff] %v13914_v21  ;;  %v7731_v25 = vpop.f32.mrf.mxu0  ;;  %v7990_v45 = vsel %vm2454_vm6, %v7980_v32, %v7989_v47  ;;  %v6792_v50 = vadd.f32 %v14648_v51, %v14647_v61  ;;  %v7992_v32 = vshrl.u32 %v13699_v3, 16  ;;  %v14652_v61 = vld [vmem:[#allocation78_spill] sm:$0xff] }
 0x56e   : > { %v13923_v62 = vadd.f32 %v7731_v25, %v7429_v30 }
 0x56f   : > { %7159 = vmatmul.bf16.gmra.mxu2 %v6999_v18  ;;  %v7251_v18 = vrot.slane %v10250_v52, 2 }
 0x571   : > { %v7252_v13 = vsel %vm14585_vm0, %v7249_v40, %v7251_v18  ;;  %v7634_v40 = vrot.slane %v13699_v3, 2  ;;  %v8001_v3 = vshrl.u32 %v13736_v28, 16 }
 0x572   : > { %v7120_v31 = vpop.f32.mrf.mxu2  ;;  %8170 = vmatmul.bf16.gmra.mxu1 %v7990_v45  ;;  %v7997_v45 = vrot.slane %v7995_v37, 3 }
 0x573   : > { %v13925_v4 = vadd.f32 %v7120_v31, %v6791_v56  ;;  %v7354_v48 = vpop.f32.mrf.mxu3  ;;  %v7994_v31 = vrot.slane %v7992_v32, 2 }
 0x574   : > { %v7432_v6 = vadd.f32 %v7354_v48, %v13767_v38  ;;  %v14650_v38 = vld [vmem:[#allocation24_spill] sm:$0xff] }
 0x575   : > { %14645 = vst [vmem:[#allocation62_spill] sm:$0xff] %v13925_v4  ;;  %v7734_v30 = vpop.f32.mrf.mxu0  ;;  %7778 = vmatmul.bf16.gmra.mxu0 %v7633_v42 }
 0x576   : > { %v13935_v25 = vadd.f32 %v7734_v30, %v7430_v41  ;;  %v13944_v41 = vpop.f32.mrf.mxu1  ;;  %v14651_v30 = vld [vmem:[#allocation79_spill] sm:$0xff] }
 0x577   : > { %7403 = vmatmul.bf16.gmra.mxu3 %v7252_v13  ;;  %v6793_v51 = vadd.f32 %v14652_v61, %v14651_v30  ;;  %v10251_v13 = vld [vmem:[#allocation2 + $0x88] sm:$0xff] }
 0x57a   : > { %v7122_v22 = vpop.f32.mrf.mxu2 }
 0x57b   : > { %v13939_v56 = vadd.f32 %v7122_v22, %v6792_v50  ;;  %v7356_v48 = vpop.f32.mrf.mxu3  ;;  %v7998_v22 = vor.u32 %v7997_v45, %v7994_v31 }
 0x57c   : > { %v7433_v42 = vadd.f32 %v7356_v48, %v13782_v8  ;;  %v7635_v8 = vsel %vm14654_vm3, %v7632_v9, %v7634_v40 }
 0x57d   : > { %14649 = vst [vmem:[#allocation61_spill] sm:$0xff] %v13939_v56  ;;  %v7736_v52 = vpop.f32.mrf.mxu0  ;;  %v7999_v32 = vsel %vm2454_vm6, %v7989_v47, %v7998_v22  ;;  %v8004_v47 = vshll.u32 %v13736_v28, 16 }
 0x57e   : > { %v13948_v4 = vadd.f32 %v7736_v52, %v7431_v16  ;;  %v14655_v16 = vld [vmem:[#allocation82_spill] sm:$0xff]  ;;  %v14656_v52 = vld [vmem:[#allocation81_spill] sm:$0xff]  ;;  %v13962_v61 = vpop.f32.mrf.mxu1 }
 0x57f   : > { %8369 = vmatmul.bf16.vlgmr.msra.gmra.mxu2 %v14650_v38  ;;  %v7253_v38 = vrot.slane %v10251_v13, 2  ;;  %v6794_v30 = vadd.f32 %v14656_v52, %v14655_v16  ;;  %v14660_v13 = vld [vmem:[#allocation83_spill] sm:$0xff] }
 0x581   : > { %v7254_v9 = vsel %vm14657_vm2, %v7251_v18, %v7253_v38  ;;  %v7636_v18 = vrot.slane %v13736_v28, 2  ;;  %v8013_v28 = vshll.u32 %v13785_v34, 16 }
 0x582   : > { %v7125_v50 = vpop.f32.mrf.mxu2  ;;  %8175 = vmatmul.bf16.gmra.mxu1 %v7999_v32  ;;  %v14658_v32 = vld [vmem:[#allocation21_spill] sm:$0xff] }
 0x583   : > { %v13950_v56 = vadd.f32 %v7125_v50, %v6793_v51  ;;  %v7359_v37 = vpop.f32.mrf.mxu3  ;;  %v8006_v50 = vrot.slane %v8004_v47, 3  ;;  %v7637_v47 = vsel %vm14661_vm13, %v7634_v40, %v7636_v18 }
 0x584   : > { %v7434_v48 = vadd.f32 %v7359_v37, %v13804_v27  ;;  %v8003_v27 = vrot.slane %v8001_v3, 2 }
 0x585   : > { %14653 = vst [vmem:[#allocation59_spill] sm:$0xff] %v13950_v56  ;;  %v7739_v21 = vpop.f32.mrf.mxu0  ;;  %7783 = vmatmul.bf16.gmra.mxu0 %v7635_v8  ;;  %v14659_v8 = vld [vmem:[#allocation84_spill] sm:$0xff] }
 0x586   : > { %v13958_v31 = vadd.f32 %v7739_v21, %v7432_v6  ;;  %v6795_v16 = vadd.f32 %v14660_v13, %v14659_v8  ;;  %v8007_v33 = vor.u32 %v8006_v50, %v8003_v27  ;;  %v8010_v27 = vshrl.u32 %v13785_v34, 16 }
 0x587   : > { %7408 = vmatmul.bf16.gmra.mxu3 %v7254_v9  ;;  %v8015_v8 = vrot.slane %v8013_v28, 3  ;;  %v8022_v28 = vshll.u32 %v13788_v12, 16 }
 0x588   : > { %v8008_v3 = vsel %vm2454_vm6, %v7998_v22, %v8007_v33  ;;  %v8012_v40 = vrot.slane %v8010_v27, 2 }
 0x58a   : > { %v7127_v45 = vpop.f32.mrf.mxu2 }
 0x58b   : > { %v13964_v51 = vadd.f32 %v7127_v45, %v6794_v30  ;;  %v7361_v37 = vpop.f32.mrf.mxu3  ;;  %v13976_v45 = vpop.f32.mrf.mxu1 }
 0x58c   : > { %v7435_v21 = vadd.f32 %v7361_v37, %v13831_v14  ;;  %v10252_v14 = vld [vmem:[#allocation2 + $0x90] sm:$0xff] }
 0x58d   : > { %v7741_v6 = vpop.f32.mrf.mxu0  ;;  %v7255_v9 = vrot.slane %v10252_v14, 2  ;;  %v8016_v14 = vor.u32 %v8015_v8, %v8012_v40  ;;  %v14667_v40 = vld [vmem:[#allocation51_spill] sm:$0xff] }
 0x58e   : > { %v13971_v52 = vadd.f32 %v7741_v6, %v7433_v42  ;;  %v14662_v42 = vld [vmem:[#allocation86_spill] sm:$0xff] }
 0x58f   : > { %8374 = vmatmul.bf16.gmra.mxu2 %v14658_v32  ;;  %v6796_v37 = vadd.f32 %v14662_v42, %v13617_v55  ;;  %v7256_v22 = vsel %vm14663_vm9, %v7253_v38, %v7255_v9  ;;  %v6797_v55 = vadd.f32 %v13630_v2, %v13637_v17  ;;  %v7638_v42 = vrot.slane %v13785_v34, 2 }
 0x590   : > { %v8017_v38 = vsel %vm2454_vm6, %v8007_v33, %v8016_v14  ;;  %v6798_v2 = vadd.f32 %v13649_v59, %v13653_v60 }
 0x592   : > { %v7130_v56 = vpop.f32.mrf.mxu2  ;;  %8180 = vmatmul.bf16.gmra.mxu1 %v8008_v3 }
 0x593   : > { %v13973_v30 = vadd.f32 %v7130_v56, %v6795_v16  ;;  %v13989_v13 = vpop.f32.mrf.mxu1  ;;  %v14664_v16 = vld [vmem:[#allocation45_spill] sm:$0xff] }
 0x595   : > { %v7744_v32 = vpop.f32.mrf.mxu0  ;;  %7788 = vmatmul.bf16.gmra.mxu0 %v7637_v47 }
 0x596   : > { %v13982_v6 = vadd.f32 %v7744_v32, %v7434_v48 }
 0x597   : > { %7413 = vmatmul.bf16.gmra.mxu3 %v7256_v22 }
 0x59a   : > { %v7132_v56 = vpop.f32.mrf.mxu2 }
 0x59b   : > { %v13986_v50 = vadd.f32 %v7132_v56, %v6796_v37  ;;  %v7639_v37 = vsel %vm14665_vm4, %v7636_v18, %v7638_v42  ;;  %v7257_v56 = vrot.slane %v13891_v19, 2  ;;  %v14002_v27 = vpop.f32.mrf.mxu1  ;;  %v8024_v18 = vrot.slane %v8022_v28, 3  ;;  %v14670_v28 = vld [vmem:[#allocation41_spill] sm:$0xff] }
 0x59c   : > { %v6799_v19 = vadd.f32 %v13669_v57, %v13676_v54  ;;  %v8028_v57 = vshrl.u32 %v13790_v24, 16  ;;  %v8031_v54 = vshll.u32 %v13790_v24, 16 }
 0x59d   : > { %v7746_v3 = vpop.f32.mrf.mxu0  ;;  %v7258_v34 = vsel %vm14666_vm14, %v7255_v9, %v7257_v56 }
 0x59e   : > { %v13994_v48 = vadd.f32 %v7746_v3, %v7435_v21  ;;  %v8019_v21 = vshrl.u32 %v13788_v12, 16  ;;  %v7640_v3 = vrot.slane %v13788_v12, 2  ;;  %v8030_v12 = vrot.slane %v8028_v57, 2 }
 0x59f   : > { %8379 = vmatmul.bf16.gmra.mxu2 %v14664_v16 }
 0x5a0   : > { %v8021_v33 = vrot.slane %v8019_v21, 2  ;;  %v7641_v9 = vsel %vm14668_vm7, %v7638_v42, %v7640_v3  ;;  %v14669_v21 = vld [vmem:[#allocation57_spill] sm:$0xff] }
 0x5a2   : > { %v7135_v47 = vpop.f32.mrf.mxu2  ;;  %8185 = vmatmul.bf16.gmra.mxu1 %v8017_v38  ;;  %v8025_v16 = vor.u32 %v8024_v18, %v8021_v33  ;;  %v6800_v38 = vadd.f32 %v13688_v0, %v13692_v7 }
 0x5a3   : > { %v13996_v32 = vadd.f32 %v7135_v47, %v6797_v55  ;;  %v14014_v59 = vpop.f32.mrf.mxu1  ;;  %v7496_v47 = vld [vmem:[#allocation2 + $0xa0] sm:$0x3] }
 0x5a4   : > { %v8026_v55 = vsel %vm2454_vm6, %v8016_v14, %v8025_v16  ;;  %v8033_v14 = vrot.slane %v8031_v54, 3 }
 0x5a5   : > { %7793 = vmatmul.bf16.gmra.mxu0 %v7639_v37 }
 0x5a6   : > { %v8034_v0 = vor.u32 %v8033_v14, %v8030_v12  ;;  %v14676_v14 = vld [vmem:[#allocation68_spill] sm:$0xff] }
 0x5a7   : > { %7418 = vmatmul.bf16.gmra.mxu3 %v7258_v34  ;;  %v6801_v34 = vadd.f32 %v14670_v28, %v13710_v53  ;;  %v14672_v53 = vld [vmem:[#allocation63_spill] sm:$0xff] }
 0x5a8   : > { %v8035_v24 = vsel %vm2454_vm6, %v8025_v16, %v8034_v0  ;;  %v14675_v16 = vld [vmem:[#allocation48_spill] sm:$0xff] }
 0x5aa   : > { %v7137_v17 = vpop.f32.mrf.mxu2 }
 0x5ab   : > { %v14008_v22 = vadd.f32 %v7137_v17, %v6798_v2  ;;  %v7587_v2 = vunpack.c.l.b16 %v7496_v47  ;;  %v14027_v17 = vpop.f32.mrf.mxu1  ;;  %v14673_v47 = vld [vmem:[#allocation44_spill] sm:$0xff] }
 0x5ad   : > { %v7606_v42 = vpack.c.b16 %v7587_v2, %v7587_v2  ;;  %v6804_v2 = vadd.f32 %v14675_v16, %v13763_v58  ;;  %v6807_v58 = vadd.f32 %v13849_v44, %v13825_v15  ;;  %v14075_v15 = vld [vmem:[%s14326_s6] ss:$0 sm:$0xff] }
 0x5af   : > { %8384 = vmatmul.bf16.gmra.mxu2 %v14667_v40  ;;  %v7642_v18 = vrot.slane %v7606_v42, 2 }
 0x5b2   : > { %v7140_v8 = vpop.f32.mrf.mxu2  ;;  %8190 = vmatmul.bf16.gmra.mxu1 %v8026_v55 }
 0x5b3   : > { %v14016_v60 = vadd.f32 %v7140_v8, %v6799_v19  ;;  %v14035_v40 = vpop.f32.mrf.mxu1  ;;  %v7643_v19 = vsel %vm14671_vm1, %v7640_v3, %v7642_v18  ;;  %v6802_v8 = vadd.f32 %v13730_v20, %v13724_v23  ;;  %v14677_v23 = vld [vmem:[#allocation46_spill] sm:$0xff] }
 0x5b4   : > { %v14678_v20 = vld [vmem:[#allocation50_spill] sm:$0xff] }
 0x5b5   : > { %7798 = vmatmul.bf16.gmra.mxu0 %v7641_v9 }
 0x5ba   : > { %v7142_v37 = vpop.f32.mrf.mxu2 }
 0x5bb   : > { %v14025_v56 = vadd.f32 %v7142_v37, %v6800_v38  ;;  %v14674_v38 = vld [vmem:[#allocation42_spill] sm:$0xff] }
 0x5bc   : > { %v6803_v37 = vadd.f32 %v14674_v38, %v14673_v47  ;;  %v14681_v38 = vld [vmem:[#allocation75_spill] sm:$0xff] }
 0x5bf   : > { %8389 = vmatmul.bf16.gmra.mxu2 %v14669_v21  ;;  %v6805_v21 = vadd.f32 %v14678_v20, %v14677_v23 }
 0x5c2   : > { %v7145_v33 = vpop.f32.mrf.mxu2  ;;  %8195 = vmatmul.bf16.gmra.mxu1 %v8035_v24  ;;  %v14680_v24 = vld [vmem:[#allocation71_spill] sm:$0xff] }
 0x5c3   : > { %v14032_v7 = vadd.f32 %v7145_v33, %v6801_v34  ;;  %v14679_v34 = vld [vmem:[#allocation49_spill] sm:$0xff] }
 0x5c4   : > { %v6806_v33 = vadd.f32 %v13829_v1, %v14679_v34  ;;  %v8201_v1 = vadd.f32 %v13879_v36, %v13856_v63 }
 0x5c5   : > { %7803 = vmatmul.bf16.gmra.mxu0 %v7643_v19 }
 0x5ca   : > { %v7147_v55 = vpop.f32.mrf.mxu2 }
 0x5cb   : > { %v14040_v9 = vadd.f32 %v7147_v55, %v6802_v8  ;;  %v6808_v55 = vadd.f32 %v13864_v46, %v13842_v49  ;;  %v14081_v49 = vld [vmem:[%s14327_s7] ss:$0 sm:$0xff] }
 0x5cc   : > { %v14682_v46 = vld [vmem:[#allocation53_spill] sm:$0xff] }
 0x5cd   : > { %v8202_v16 = vadd.f32 %v13900_v11, %v14682_v46  ;;  %v14687_v46 = vld [vmem:[#allocation85_spill] sm:$0xff] }
 0x5cf   : > { %8394 = vmatmul.bf16.gmra.mxu2 %v14672_v53 }
 0x5d2   : > { %v7150_v57 = vpop.f32.mrf.mxu2 }
 0x5d3   : > { %v14045_v54 = vadd.f32 %v7150_v57, %v6803_v37 }
 0x5da   : > { %v7152_v12 = vpop.f32.mrf.mxu2 }
 0x5db   : > { %v14049_v3 = vadd.f32 %v7152_v12, %v6804_v2 }
 0x5df   : > { %8399 = vmatmul.bf16.gmra.mxu2 %v14676_v14  ;;  %v14683_v14 = vld [vmem:[#allocation25_spill] sm:$0xff] }
 0x5e2   : > { %v7155_v42 = vpop.f32.mrf.mxu2 }
 0x5e3   : > { %v14054_v28 = vadd.f32 %v7155_v42, %v6805_v21  ;;  %v14684_v21 = vld [vmem:[#allocation80_spill] sm:$0xff]  ;;  %v14685_v42 = vld [vmem:[#allocation26_spill] sm:$0xff] }
 0x5ea   : > { %v7157_v0 = vpop.f32.mrf.mxu2 }
 0x5eb   : > { %v14058_v18 = vadd.f32 %v7157_v0, %v6806_v33  ;;  %v8203_v33 = vadd.f32 %v13917_v35, %v13883_v29 }
 0x5ef   : > { %8404 = vmatmul.bf16.gmra.mxu2 %v14680_v24 }
 0x5f2   : > { %v7160_v19 = vpop.f32.mrf.mxu2 }
 0x5f3   : > { %v14063_v8 = vadd.f32 %v7160_v19, %v6807_v58 }
 0x5fa   : > { %v7162_v53 = vpop.f32.mrf.mxu2 }
 0x5fb   : > { %v14067_v47 = vadd.f32 %v7162_v53, %v6808_v55  ;;  %v8204_v53 = vadd.f32 %v13929_v39, %v13896_v5 }
 0x5ff   : > { %8409 = vmatmul.bf16.gmra.mxu2 %v14681_v38 }
 0x602   : > { %v8370_v37 = vpop.f32.mrf.mxu2 }
 0x603   : > { %v8460_v57 = vadd.f32 %v8370_v37, %v8201_v1  ;;  %v14686_v37 = vld [vmem:[#allocation27_spill] sm:$0xff] }
 0x605   : > { %v8500_v44 = vmul.f32 %v14075_v15, %v8460_v57 }
 0x607   : > { %v8540_v63 = vadd.f32 %v14081_v49, %v8500_v44 }
 0x609   : > { %v8576_v23 = vadd.f32 %v8540_v63, %v14683_v14  ;;  %v8205_v63 = vadd.f32 %v13944_v41, %v13910_v26  ;;  %v14689_v41 = vld [vmem:[#allocation3_spill] sm:$0xff] }
 0x60a   : > { %v8372_v2 = vpop.f32.mrf.mxu2 }
 0x60b   : > { %v8461_v36 = vadd.f32 %v8372_v2, %v8202_v16  ;;  %v8612_v11 = vmax.f32 %v8576_v23, 0.0  ;;  %v14688_v16 = vld [vmem:[#allocation28_spill] sm:$0xff] }
 0x60d   : > { %v8501_v12 = vmul.f32 %v14075_v15, %v8461_v36 }
 0x60f   : > { %v8541_v20 = vadd.f32 %v14081_v49, %v8501_v12  ;;  %8414 = vmatmul.bf16.gmra.mxu2 %v14684_v21  ;;  %v14115_v21 = vpop.f32.mrf.mxu3 }
 0x611   : > { %v8577_v34 = vadd.f32 %v8541_v20, %v14685_v42  ;;  %v8206_v20 = vadd.f32 %v13962_v61, %v13923_v62  ;;  %v8207_v62 = vadd.f32 %v13976_v45, %v13935_v25  ;;  %v14127_v61 = vpop.f32.mrf.mxu1 }
 0x612   : > { %v8375_v0 = vpop.f32.mrf.mxu2 }
 0x613   : > { %v8613_v24 = vmax.f32 %v8577_v34, 0.0  ;;  %v8462_v58 = vadd.f32 %v8375_v0, %v8203_v33  ;;  %v14118_v0 = vpop.f32.mrf.mxu0 }
 0x615   : > { %v10071_v19 = vpack.c.bf16 %v8613_v24, %v8612_v11  ;;  %v8502_v55 = vmul.f32 %v14075_v15, %v8462_v58  ;;  %v14690_v58 = vld [vmem:[#allocation87_spill] sm:$0xff] }
 0x617   : > { %10072 = vst [vmem:[%s14097_s22] sm:$0xff] %v10071_v19   ;;  %v8542_v29 = vadd.f32 %v14081_v49, %v8502_v55  ;;  %v14691_v19 = vld [vmem:[#allocation4_spill] sm:$0xff] }
 0x619   : > { %v8578_v57 = vadd.f32 %v8542_v29, %v14686_v37 }
 0x61a   : > { %v8377_v38 = vpop.f32.mrf.mxu2 }
 0x61b   : > { %v8463_v35 = vadd.f32 %v8377_v38, %v8204_v53  ;;  %v8614_v12 = vmax.f32 %v8578_v57, 0.0  ;;  %v14131_v57 = vpop.f32.mrf.mxu0 }
 0x61d   : > { %v8503_v1 = vmul.f32 %v14075_v15, %v8463_v35 }
 0x61f   : > { %v8543_v44 = vadd.f32 %v14081_v49, %v8503_v1  ;;  %8419 = vmatmul.bf16.gmra.mxu2 %v14687_v46  ;;  %v14129_v1 = vpop.f32.mrf.mxu3  ;;  %v8208_v46 = vadd.f32 %v13989_v13, %v13948_v4  ;;  %v14694_v4 = vld [vmem:[#allocation29_spill] sm:$0xff] }
 0x621   : > { %v8579_v2 = vadd.f32 %v8543_v44, %v14688_v16 }
 0x622   : > { %v8380_v36 = vpop.f32.mrf.mxu2 }
 0x623   : > { %v8615_v5 = vmax.f32 %v8579_v2, 0.0  ;;  %v8464_v39 = vadd.f32 %v8380_v36, %v8205_v63  ;;  %v14138_v2 = vpop.f32.mrf.mxu1 }
 0x625   : > { %v10076_v14 = vpack.c.bf16 %v8615_v5, %v8614_v12  ;;  %v8504_v23 = vmul.f32 %v14075_v15, %v8464_v39  ;;  %v14692_v12 = vld [vmem:[#allocation5_spill] sm:$0xff] }
 0x627   : > { %10164 = vst [vmem:[%s14097_s22 + $0x8] sm:$0xff] %v10076_v14   ;;  %v8544_v34 = vadd.f32 %v14081_v49, %v8504_v23  ;;  %v14141_v36 = vpop.f32.mrf.mxu3  ;;  %v14693_v14 = vld [vmem:[#allocation88_spill] sm:$0xff]  ;;  %v14146_v23 = vpop.f32.mrf.mxu0 }
 0x629   : > { %v8580_v11 = vadd.f32 %v8544_v34, %v14689_v41 }
 0x62a   : > { %v8382_v42 = vpop.f32.mrf.mxu2 }
 0x62b   : > { %v8465_v33 = vadd.f32 %v8382_v42, %v8206_v20  ;;  %v8616_v38 = vmax.f32 %v8580_v11, 0.0  ;;  %v8209_v20 = vadd.f32 %v14002_v27, %v13958_v31  ;;  %v14151_v11 = vpop.f32.mrf.mxu1 }
 0x62d   : > { %v8505_v26 = vmul.f32 %v14075_v15, %v8465_v33 }
 0x62f   : > { %v8545_v24 = vadd.f32 %v14081_v49, %v8505_v26  ;;  %8424 = vmatmul.bf16.gmra.mxu2 %v14690_v58  ;;  %v14155_v58 = vpop.f32.mrf.mxu3 }
 0x631   : > { %v8581_v55 = vadd.f32 %v8545_v24, %v14691_v19  ;;  %v8210_v19 = vadd.f32 %v14014_v59, %v13971_v52  ;;  %v8211_v52 = vadd.f32 %v14027_v17, %v13982_v6 }
 0x632   : > { %v8385_v53 = vpop.f32.mrf.mxu2 }
 0x633   : > { %v8617_v29 = vmax.f32 %v8581_v55, 0.0  ;;  %v8466_v35 = vadd.f32 %v8385_v53, %v8207_v62  ;;  %v14159_v55 = vpop.f32.mrf.mxu0 }
 0x635   : > { %v10081_v37 = vpack.c.bf16 %v8617_v29, %v8616_v38  ;;  %v8506_v44 = vmul.f32 %v14075_v15, %v8466_v35  ;;  %v14695_v38 = vld [vmem:[#allocation6_spill] sm:$0xff] }
 0x637   : > { %10165 = vst [vmem:[%s14097_s22 + $0x10] sm:$0xff] %v10081_v37   ;;  %v8546_v25 = vadd.f32 %v14081_v49, %v8506_v44  ;;  %v14696_v37 = vld [vmem:[#allocation89_spill] sm:$0xff]  ;;  %v14166_v44 = vpop.f32.mrf.mxu1  ;;  %v14171_v59 = vpop.f32.mrf.mxu3 }
 0x639   : > { %v8582_v5 = vadd.f32 %v8546_v25, %v14692_v12 }
 0x63a   : > { %v8387_v16 = vpop.f32.mrf.mxu2 }
 0x63b   : > { %v8467_v45 = vadd.f32 %v8387_v16, %v8208_v46  ;;  %v8618_v34 = vmax.f32 %v8582_v5, 0.0  ;;  %v14697_v46 = vld [vmem:[#allocation30_spill] sm:$0xff]  ;;  %v14173_v5 = vpop.f32.mrf.mxu0 }
 0x63d   : > { %v8507_v63 = vmul.f32 %v14075_v15, %v8467_v45 }
 0x63f   : > { %v8547_v39 = vadd.f32 %v14081_v49, %v8507_v63  ;;  %8429 = vmatmul.bf16.gmra.mxu2 %v14693_v14 }
 0x641   : > { %v8583_v13 = vadd.f32 %v8547_v39, %v14694_v4  ;;  %v8212_v4 = vadd.f32 %v14035_v40, %v13994_v48  ;;  %v14700_v40 = vld [vmem:[#allocation43_spill] sm:$0xff] }
 0x642   : > { %v8390_v42 = vpop.f32.mrf.mxu2 }
 0x643   : > { %v8619_v33 = vmax.f32 %v8583_v13, 0.0  ;;  %v8468_v26 = vadd.f32 %v8390_v42, %v8209_v20  ;;  %v14179_v13 = vpop.f32.mrf.mxu1  ;;  %v14698_v42 = vld [vmem:[#allocation56_spill] sm:$0xff] }
 0x644   : > { %v7436_v6 = vadd.f32 %v14115_v21, %v14698_v42  ;;  %v14703_v42 = vld [vmem:[#allocation32_spill] sm:$0xff] }
 0x645   : > { %v10086_v41 = vpack.c.bf16 %v8619_v33, %v8618_v34  ;;  %v8508_v24 = vmul.f32 %v14075_v15, %v8468_v26  ;;  %v7376_v33 = vpop.f32.mrf.mxu3 }
 0x646   : > { %v7821_v26 = vadd.f32 %v14118_v0, %v7436_v6 }
 0x647   : > { %10166 = vst [vmem:[%s14097_s22 + $0x18] sm:$0xff] %v10086_v41   ;;  %v8548_v31 = vadd.f32 %v14081_v49, %v8508_v24  ;;  %v14186_v24 = vpop.f32.mrf.mxu0 }
 0x648   : > { %v8213_v21 = vadd.f32 %v14127_v61, %v7821_v26  ;;  %v7438_v61 = vadd.f32 %v14141_v36, %v13873_v43  ;;  %v14705_v26 = vld [vmem:[#allocation33_spill] sm:$0xff] }
 0x649   : > { %v8584_v29 = vadd.f32 %v8548_v31, %v14695_v38  ;;  %v14701_v31 = vld [vmem:[#allocation31_spill] sm:$0xff] }
 0x64a   : > { %v8392_v62 = vpop.f32.mrf.mxu2  ;;  %v14702_v38 = vld [vmem:[#allocation55_spill] sm:$0xff] }
 0x64b   : > { %v8469_v27 = vadd.f32 %v8392_v62, %v8210_v19  ;;  %v8620_v45 = vmax.f32 %v8584_v29, 0.0  ;;  %v14699_v19 = vld [vmem:[#allocation7_spill] sm:$0xff]  ;;  %v7437_v29 = vadd.f32 %v14129_v1, %v14702_v38 }
 0x64d   : > { %v8509_v53 = vmul.f32 %v14075_v15, %v8469_v27 }
 0x64f   : > { %v8549_v35 = vadd.f32 %v14081_v49, %v8509_v53  ;;  %8434 = vmatmul.bf16.gmra.mxu2 %v14696_v37 }
 0x651   : > { %v8585_v16 = vadd.f32 %v8549_v35, %v14697_v46  ;;  %v8153_v46 = vpop.f32.mrf.mxu1 }
 0x652   : > { %v8395_v25 = vpop.f32.mrf.mxu2 }
 0x653   : > { %v8621_v63 = vmax.f32 %v8585_v16, 0.0  ;;  %v8470_v12 = vadd.f32 %v8395_v25, %v8211_v52  ;;  %v7822_v16 = vadd.f32 %v14131_v57, %v7437_v29  ;;  %v7379_v25 = vpop.f32.mrf.mxu3 }
 0x655   : > { %v10091_v39 = vpack.c.bf16 %v8621_v63, %v8620_v45  ;;  %v8510_v14 = vmul.f32 %v14075_v15, %v8470_v12  ;;  %v7764_v63 = vpop.f32.mrf.mxu0  ;;  %v8214_v12 = vadd.f32 %v14138_v2, %v7822_v16 }
 0x657   : > { %10167 = vst [vmem:[%s14097_s22 + $0x20] sm:$0xff] %v10091_v39   ;;  %v8550_v17 = vadd.f32 %v14081_v49, %v8510_v14 }
 0x659   : > { %v8586_v62 = vadd.f32 %v8550_v17, %v14699_v19  ;;  %v8156_v57 = vpop.f32.mrf.mxu1 }
 0x65a   : > { %v8397_v20 = vpop.f32.mrf.mxu2 }
 0x65b   : > { %v8471_v34 = vadd.f32 %v8397_v20, %v8212_v4  ;;  %v8622_v0 = vmax.f32 %v8586_v62, 0.0  ;;  %v7823_v4 = vadd.f32 %v14146_v23, %v7438_v61  ;;  %v7381_v2 = vpop.f32.mrf.mxu3  ;;  %v7439_v23 = vadd.f32 %v14155_v58, %v13887_v10 }
 0x65d   : > { %v8511_v41 = vmul.f32 %v14075_v15, %v8471_v34  ;;  %v14704_v34 = vld [vmem:[#allocation47_spill] sm:$0xff]  ;;  %v8215_v43 = vadd.f32 %v14151_v11, %v7823_v4  ;;  %v7766_v36 = vpop.f32.mrf.mxu0  ;;  %v14706_v11 = vld [vmem:[#allocation60_spill] sm:$0xff]  ;;  %v14710_v4 = vld [vmem:[#allocation58_spill] sm:$0xff] }
 0x65f   : > { %v8551_v48 = vadd.f32 %v14081_v49, %v8511_v41  ;;  %8439 = vmatmul.bf16.gmra.mxu2 %v14700_v40 }
 0x661   : > { %v8587_v27 = vadd.f32 %v8551_v48, %v14701_v31  ;;  %v7824_v31 = vadd.f32 %v14159_v55, %v7439_v23 }
 0x662   : > { %v8400_v53 = vpop.f32.mrf.mxu2 }
 0x663   : > { %v8623_v35 = vmax.f32 %v8587_v27, 0.0  ;;  %v8472_v37 = vadd.f32 %v8400_v53, %v8213_v21  ;;  %v8158_v53 = vpop.f32.mrf.mxu1  ;;  %v8216_v38 = vadd.f32 %v14166_v44, %v7824_v31  ;;  %v7384_v29 = vpop.f32.mrf.mxu3  ;;  %v14709_v44 = vld [vmem:[#allocation35_spill] sm:$0xff] }
 0x665   : > { %v10096_v52 = vpack.c.bf16 %v8623_v35, %v8622_v0  ;;  %v8512_v45 = vmul.f32 %v14075_v15, %v8472_v37  ;;  %v7440_v35 = vadd.f32 %v14171_v59, %v14706_v11  ;;  %v7769_v58 = vpop.f32.mrf.mxu0  ;;  %v14713_v11 = vld [vmem:[#allocation52_spill] sm:$0xff] }
 0x667   : > { %10168 = vst [vmem:[%s14097_s22 + $0x28] sm:$0xff] %v10096_v52   ;;  %v8552_v1 = vadd.f32 %v14081_v49, %v8512_v45  ;;  %v7825_v16 = vadd.f32 %v14173_v5, %v7440_v35  ;;  %v14707_v52 = vld [vmem:[#allocation34_spill] sm:$0xff] }
 0x669   : > { %v8588_v6 = vadd.f32 %v8552_v1, %v14703_v42  ;;  %v8217_v1 = vadd.f32 %v14179_v13, %v7825_v16  ;;  %v14715_v16 = vld [vmem:[#allocation61_spill] sm:$0xff] }
 0x66a   : > { %v8402_v39 = vpop.f32.mrf.mxu2 }
 0x66b   : > { %v8473_v14 = vadd.f32 %v8402_v39, %v8214_v12  ;;  %v8624_v62 = vmax.f32 %v8588_v6, 0.0  ;;  %v14708_v39 = vld [vmem:[#allocation54_spill] sm:$0xff]  ;;  %v8161_v59 = vpop.f32.mrf.mxu1 }
 0x66d   : > { %v8513_v20 = vmul.f32 %v14075_v15, %v8473_v14 }
 0x66f   : > { %v8553_v17 = vadd.f32 %v14081_v49, %v8513_v20  ;;  %8444 = vmatmul.bf16.gmra.mxu2 %v14704_v34  ;;  %v7441_v20 = vadd.f32 %v7376_v33, %v14710_v4 }
 0x671   : > { %v8589_v41 = vadd.f32 %v8553_v17, %v14705_v26  ;;  %v7386_v17 = vpop.f32.mrf.mxu3  ;;  %v7826_v34 = vadd.f32 %v14186_v24, %v7441_v20 }
 0x672   : > { %v8405_v19 = vpop.f32.mrf.mxu2 }
 0x673   : > { %v8625_v48 = vmax.f32 %v8589_v41, 0.0  ;;  %v8474_v40 = vadd.f32 %v8405_v19, %v8215_v43  ;;  %v7771_v41 = vpop.f32.mrf.mxu0  ;;  %v8218_v19 = vadd.f32 %v8153_v46, %v7826_v34  ;;  %v8163_v31 = vpop.f32.mrf.mxu1  ;;  %v14714_v46 = vld [vmem:[#allocation37_spill] sm:$0xff] }
 0x675   : > { %v10101_v27 = vpack.c.bf16 %v8625_v48, %v8624_v62  ;;  %v8514_v21 = vmul.f32 %v14075_v15, %v8474_v40  ;;  %v14711_v62 = vld [vmem:[#allocation62_spill] sm:$0xff] }
 0x676   : > { %v7442_v48 = vadd.f32 %v7379_v25, %v14711_v62 }
 0x677   : > { %10169 = vst [vmem:[%s14097_s22 + $0x30] sm:$0xff] %v10101_v27   ;;  %v8554_v37 = vadd.f32 %v14081_v49, %v8514_v21 }
 0x678   : > { %v7827_v33 = vadd.f32 %v7764_v63, %v7442_v48 }
 0x679   : > { %v8590_v45 = vadd.f32 %v8554_v37, %v14707_v52  ;;  %v7389_v21 = vpop.f32.mrf.mxu3 }
 0x67a   : > { %v8407_v0 = vpop.f32.mrf.mxu2 }
 0x67b   : > { %v8475_v10 = vadd.f32 %v8407_v0, %v8216_v38  ;;  %v8626_v42 = vmax.f32 %v8590_v45, 0.0  ;;  %v14712_v38 = vld [vmem:[#allocation36_spill] sm:$0xff]  ;;  %v7774_v35 = vpop.f32.mrf.mxu0 }
 0x67d   : > { %v8515_v55 = vmul.f32 %v14075_v15, %v8475_v10  ;;  %v8219_v10 = vadd.f32 %v8156_v57, %v7827_v33 }
 0x67f   : > { %v8555_v12 = vadd.f32 %v14081_v49, %v8515_v55  ;;  %8449 = vmatmul.bf16.gmra.mxu2 %v14708_v39  ;;  %v7443_v55 = vadd.f32 %v7381_v2, %v14715_v16 }
 0x681   : > { %v8591_v61 = vadd.f32 %v8555_v12, %v14709_v44  ;;  %v7828_v12 = vadd.f32 %v7766_v36, %v7443_v55  ;;  %v8166_v44 = vpop.f32.mrf.mxu1 }
 0x682   : > { %v8410_v14 = vpop.f32.mrf.mxu2 }
 0x683   : > { %v8627_v6 = vmax.f32 %v8591_v61, 0.0  ;;  %v8476_v5 = vadd.f32 %v8410_v14, %v8217_v1  ;;  %v7391_v1 = vpop.f32.mrf.mxu3  ;;  %v8220_v14 = vadd.f32 %v8158_v53, %v7828_v12  ;;  %v7776_v4 = vpop.f32.mrf.mxu0 }
 0x685   : > { %v10106_v26 = vpack.c.bf16 %v8627_v6, %v8626_v42  ;;  %v8516_v43 = vmul.f32 %v14075_v15, %v8476_v5  ;;  %v14716_v42 = vld [vmem:[#allocation59_spill] sm:$0xff] }
 0x686   : > { %v7444_v6 = vadd.f32 %v7384_v29, %v14716_v42 }
 0x687   : > { %10170 = vst [vmem:[%s14097_s22 + $0x38] sm:$0xff] %v10106_v26   ;;  %v8556_v13 = vadd.f32 %v14081_v49, %v8516_v43  ;;  %v14717_v26 = vld [vmem:[#allocation38_spill] sm:$0xff] }
 0x688   : > { %v7829_v34 = vadd.f32 %v7769_v58, %v7444_v6 }
 0x689   : > { %v8592_v24 = vadd.f32 %v8556_v13, %v14712_v38 }
 0x68a   : > { %v8412_v23 = vpop.f32.mrf.mxu2  ;;  %v8221_v48 = vadd.f32 %v8161_v59, %v7829_v34 }
 0x68b   : > { %v8477_v40 = vadd.f32 %v8412_v23, %v8218_v19  ;;  %v8628_v52 = vmax.f32 %v8592_v24, 0.0  ;;  %v8168_v19 = vpop.f32.mrf.mxu1  ;;  %v14718_v23 = vld [vmem:[#allocation39_spill] sm:$0xff]  ;;  %v7394_v53 = vpop.f32.mrf.mxu3 }
 0x68c   : > { %v7779_v38 = vpop.f32.mrf.mxu0 }
 0x68d   : > { %v8517_v27 = vmul.f32 %v14075_v15, %v8477_v40  ;;  %v7445_v40 = vadd.f32 %v7386_v17, %v13964_v51 }
 0x68f   : > { %v8557_v0 = vadd.f32 %v14081_v49, %v8517_v27  ;;  %8454 = vmatmul.bf16.gmra.mxu2 %v14713_v11  ;;  %v7830_v58 = vadd.f32 %v7771_v41, %v7445_v40 }
 0x691   : > { %v8593_v37 = vadd.f32 %v8557_v0, %v14714_v46  ;;  %v8222_v11 = vadd.f32 %v8163_v31, %v7830_v58 }
 0x692   : > { %v8415_v25 = vpop.f32.mrf.mxu2 }
 0x693   : > { %v8629_v45 = vmax.f32 %v8593_v37, 0.0  ;;  %v8478_v63 = vadd.f32 %v8415_v25, %v8219_v10  ;;  %v8171_v46 = vpop.f32.mrf.mxu1  ;;  %v7446_v10 = vadd.f32 %v7389_v21, %v13973_v30  ;;  %v7396_v16 = vpop.f32.mrf.mxu3 }
 0x694   : > { %v7781_v17 = vpop.f32.mrf.mxu0 }
 0x695   : > { %v10111_v39 = vpack.c.bf16 %v8629_v45, %v8628_v52  ;;  %v8518_v61 = vmul.f32 %v14075_v15, %v8478_v63  ;;  %v7831_v55 = vadd.f32 %v7774_v35, %v7446_v10  ;;  %v14719_v52 = vld [vmem:[#allocation10_spill] sm:$0xff]  ;;  %v14720_v63 = vld [vmem:[#allocation11_spill] sm:$0xff] }
 0x697   : > { %10171 = vst [vmem:[%s14097_s22 + $0x40] sm:$0xff] %v10111_v39   ;;  %v8558_v57 = vadd.f32 %v14081_v49, %v8518_v61  ;;  %v8223_v31 = vadd.f32 %v8166_v44, %v7831_v55  ;;  %v7447_v61 = vadd.f32 %v7391_v1, %v13986_v50 }
 0x699   : > { %v8594_v36 = vadd.f32 %v8558_v57, %v14717_v26  ;;  %v7832_v42 = vadd.f32 %v7776_v4, %v7447_v61  ;;  %v7448_v26 = vadd.f32 %v7394_v53, %v13996_v32  ;;  %v7449_v32 = vadd.f32 %v7396_v16, %v14008_v22  ;;  %v14723_v16 = vld [vmem:[#allocation19_spill] sm:$0xff] }
 0x69a   : > { %v8417_v20 = vpop.f32.mrf.mxu2 }
 0x69b   : > { %v8479_v5 = vadd.f32 %v8417_v20, %v8220_v14  ;;  %v8630_v29 = vmax.f32 %v8594_v36, 0.0  ;;  %v8173_v20 = vpop.f32.mrf.mxu1  ;;  %v7399_v6 = vpop.f32.mrf.mxu3  ;;  %v8224_v34 = vadd.f32 %v8168_v19, %v7832_v42 }
 0x69d   : > { %v8519_v2 = vmul.f32 %v14075_v15, %v8479_v5  ;;  %v7784_v5 = vpop.f32.mrf.mxu0 }
 0x69f   : > { %v8559_v43 = vadd.f32 %v14081_v49, %v8519_v2 }
 0x6a1   : > { %v8595_v62 = vadd.f32 %v8559_v43, %v14718_v23  ;;  %v7833_v43 = vadd.f32 %v7779_v38, %v7448_v26  ;;  %v14721_v23 = vld [vmem:[#allocation17_spill] sm:$0xff]  ;;  %v7834_v38 = vadd.f32 %v7781_v17, %v7449_v32 }
 0x6a2   : > { %v8420_v13 = vpop.f32.mrf.mxu2 }
 0x6a3   : > { %v8631_v33 = vmax.f32 %v8595_v62, 0.0  ;;  %v8480_v27 = vadd.f32 %v8420_v13, %v8221_v48  ;;  %v8176_v1 = vpop.f32.mrf.mxu1  ;;  %v7401_v48 = vpop.f32.mrf.mxu3  ;;  %v14722_v13 = vld [vmem:[#allocation8_spill] sm:$0xff] }
 0x6a4   : > { %v7451_v61 = vadd.f32 %v7401_v48, %v14025_v56 }
 0x6a5   : > { %v10116_v24 = vpack.c.bf16 %v8631_v33, %v8630_v29  ;;  %v8520_v0 = vmul.f32 %v14075_v15, %v8480_v27  ;;  %v8225_v29 = vadd.f32 %v8171_v46, %v7833_v43  ;;  %v7786_v19 = vpop.f32.mrf.mxu0 }
 0x6a7   : > { %10172 = vst [vmem:[%s14097_s22 + $0x48] sm:$0xff] %v10116_v24   ;;  %v8560_v59 = vadd.f32 %v14081_v49, %v8520_v0 }
 0x6a9   : > { %v8596_v41 = vadd.f32 %v8560_v59, %v14719_v52 }
 0x6aa   : > { %v8422_v37 = vpop.f32.mrf.mxu2 }
 0x6ab   : > { %v8481_v25 = vadd.f32 %v8422_v37, %v8222_v11  ;;  %v8632_v30 = vmax.f32 %v8596_v41, 0.0  ;;  %v8178_v11 = vpop.f32.mrf.mxu1  ;;  %v8226_v37 = vadd.f32 %v8173_v20, %v7834_v38  ;;  %v7404_v10 = vpop.f32.mrf.mxu3  ;;  %v7836_v20 = vadd.f32 %v7786_v19, %v7451_v61 }
 0x6ad   : > { %v8521_v51 = vmul.f32 %v14075_v15, %v8481_v25  ;;  %v7450_v25 = vadd.f32 %v7399_v6, %v14016_v60 }
 0x6af   : > { %v8561_v45 = vadd.f32 %v14081_v49, %v8521_v51  ;;  %v7789_v51 = vpop.f32.mrf.mxu0  ;;  %v7835_v52 = vadd.f32 %v7784_v5, %v7450_v25 }
 0x6b1   : > { %v8597_v12 = vadd.f32 %v8561_v45, %v14720_v63  ;;  %v14724_v45 = vld [vmem:[#allocation9_spill] sm:$0xff] }
 0x6b2   : > { %v8425_v39 = vpop.f32.mrf.mxu2 }
 0x6b3   : > { %v8633_v21 = vmax.f32 %v8597_v12, 0.0  ;;  %v8482_v14 = vadd.f32 %v8425_v39, %v8223_v31  ;;  %v8227_v12 = vadd.f32 %v8176_v1, %v7835_v52  ;;  %v8181_v31 = vpop.f32.mrf.mxu1 }
 0x6b5   : > { %v10121_v35 = vpack.c.bf16 %v8633_v21, %v8632_v30  ;;  %v8522_v57 = vmul.f32 %v14075_v15, %v8482_v14  ;;  %v7406_v14 = vpop.f32.mrf.mxu3 }
 0x6b7   : > { %10173 = vst [vmem:[%s14097_s22 + $0x50] sm:$0xff] %v10121_v35   ;;  %v8562_v44 = vadd.f32 %v14081_v49, %v8522_v57  ;;  %v7791_v35 = vpop.f32.mrf.mxu0  ;;  %v8228_v57 = vadd.f32 %v8178_v11, %v7836_v20 }
 0x6b9   : > { %v8598_v4 = vadd.f32 %v8562_v44, %v14721_v23 }
 0x6ba   : > { %v8427_v2 = vpop.f32.mrf.mxu2 }
 0x6bb   : > { %v8483_v36 = vadd.f32 %v8427_v2, %v8224_v34  ;;  %v8634_v53 = vmax.f32 %v8598_v4, 0.0  ;;  %v7452_v34 = vadd.f32 %v7404_v10, %v14032_v7  ;;  %v8183_v44 = vpop.f32.mrf.mxu1  ;;  %v7453_v7 = vadd.f32 %v7406_v14, %v14040_v9 }
 0x6bd   : > { %v8523_v50 = vmul.f32 %v14075_v15, %v8483_v36  ;;  %v7837_v36 = vadd.f32 %v7789_v51, %v7452_v34  ;;  %v7409_v43 = vpop.f32.mrf.mxu3  ;;  %v7838_v32 = vadd.f32 %v7791_v35, %v7453_v7 }
 0x6bf   : > { %v8563_v62 = vadd.f32 %v14081_v49, %v8523_v50  ;;  %v14725_v50 = vld [vmem:[#allocation13_spill] sm:$0xff]  ;;  %v7794_v4 = vpop.f32.mrf.mxu0 }
 0x6c1   : > { %v8599_v40 = vadd.f32 %v8563_v62, %v14722_v13  ;;  %v14726_v62 = vld [vmem:[#allocation14_spill] sm:$0xff]  ;;  %v8229_v13 = vadd.f32 %v8181_v31, %v7837_v36 }
 0x6c2   : > { %v8430_v33 = vpop.f32.mrf.mxu2  ;;  %v14730_v36 = vld [vmem:[#allocation18_spill] sm:$0xff] }
 0x6c3   : > { %v8635_v27 = vmax.f32 %v8599_v40, 0.0  ;;  %v8484_v58 = vadd.f32 %v8430_v33, %v8225_v29 }
 0x6c5   : > { %v10126_v24 = vpack.c.bf16 %v8635_v27, %v8634_v53  ;;  %v8524_v0 = vmul.f32 %v14075_v15, %v8484_v58  ;;  %v8186_v27 = vpop.f32.mrf.mxu1  ;;  %v7411_v38 = vpop.f32.mrf.mxu3 }
 0x6c7   : > { %10174 = vst [vmem:[%s14097_s22 + $0x58] sm:$0xff] %v10126_v24   ;;  %v8564_v46 = vadd.f32 %v14081_v49, %v8524_v0  ;;  %v8230_v24 = vadd.f32 %v8183_v44, %v7838_v32  ;;  %v7796_v0 = vpop.f32.mrf.mxu0 }
 0x6c9   : > { %v8600_v17 = vadd.f32 %v8564_v46, %v14723_v16  ;;  %v14727_v46 = vld [vmem:[#allocation12_spill] sm:$0xff] }
 0x6ca   : > { %v8432_v59 = vpop.f32.mrf.mxu2 }
 0x6cb   : > { %v8485_v55 = vadd.f32 %v8432_v59, %v8226_v37  ;;  %v8636_v60 = vmax.f32 %v8600_v17, 0.0  ;;  %v7454_v37 = vadd.f32 %v7409_v43, %v14045_v54 }
 0x6cd   : > { %v8525_v22 = vmul.f32 %v14075_v15, %v8485_v55  ;;  %v7839_v25 = vadd.f32 %v7794_v4, %v7454_v37  ;;  %v8188_v52 = vpop.f32.mrf.mxu1 }
 0x6cf   : > { %v8565_v41 = vadd.f32 %v14081_v49, %v8525_v22  ;;  %v14728_v22 = vld [vmem:[#allocation40_spill] sm:$0xff]  ;;  %v8231_v17 = vadd.f32 %v8186_v27, %v7839_v25 }
 0x6d1   : > { %v8601_v63 = vadd.f32 %v8565_v41, %v14724_v45  ;;  %v7414_v41 = vpop.f32.mrf.mxu3 }
 0x6d2   : > { %v8435_v39 = vpop.f32.mrf.mxu2 }
 0x6d3   : > { %v8637_v30 = vmax.f32 %v8601_v63, 0.0  ;;  %v8486_v21 = vadd.f32 %v8435_v39, %v8227_v12  ;;  %v7455_v63 = vadd.f32 %v7411_v38, %v14049_v3  ;;  %v7799_v39 = vpop.f32.mrf.mxu0 }
 0x6d5   : > { %v10131_v42 = vpack.c.bf16 %v8637_v30, %v8636_v60  ;;  %v8526_v6 = vmul.f32 %v14075_v15, %v8486_v21  ;;  %v7840_v61 = vadd.f32 %v7796_v0, %v7455_v63  ;;  %v8191_v14 = vpop.f32.mrf.mxu1 }
 0x6d7   : > { %10175 = vst [vmem:[%s14097_s22 + $0x60] sm:$0xff] %v10131_v42   ;;  %v8566_v2 = vadd.f32 %v14081_v49, %v8526_v6  ;;  %v8232_v21 = vadd.f32 %v8188_v52, %v7840_v61  ;;  %v7456_v42 = vadd.f32 %v7414_v41, %v14054_v28 }
 0x6d9   : > { %v8602_v1 = vadd.f32 %v8566_v2, %v14725_v50  ;;  %v14729_v2 = vld [vmem:[#allocation16_spill] sm:$0xff] }
 0x6da   : > { %v8437_v5 = vpop.f32.mrf.mxu2 }
 0x6db   : > { %v8487_v26 = vadd.f32 %v8437_v5, %v8228_v57  ;;  %v8638_v29 = vmax.f32 %v8602_v1, 0.0  ;;  %v7416_v57 = vpop.f32.mrf.mxu3  ;;  %v7841_v5 = vadd.f32 %v7799_v39, %v7456_v42  ;;  %v7801_v34 = vpop.f32.mrf.mxu0  ;;  %v14733_v39 = vld [vmem:[#allocation23_spill] sm:$0xff] }
 0x6dc   : > { %v7457_v1 = vadd.f32 %v7416_v57, %v14058_v18 }
 0x6dd   : > { %v8527_v56 = vmul.f32 %v14075_v15, %v8487_v26  ;;  %v8233_v43 = vadd.f32 %v8191_v14, %v7841_v5 }
 0x6df   : > { %v8567_v23 = vadd.f32 %v14081_v49, %v8527_v56 }
 0x6e1   : > { %v8603_v48 = vadd.f32 %v8567_v23, %v14726_v62  ;;  %v8193_v62 = vpop.f32.mrf.mxu1 }
 0x6e2   : > { %v8440_v40 = vpop.f32.mrf.mxu2 }
 0x6e3   : > { %v8639_v19 = vmax.f32 %v8603_v48, 0.0  ;;  %v8488_v33 = vadd.f32 %v8440_v40, %v8229_v13  ;;  %v7842_v48 = vadd.f32 %v7801_v34, %v7457_v1  ;;  %v7419_v40 = vpop.f32.mrf.mxu3 }
 0x6e4   : > { %v7458_v32 = vadd.f32 %v7419_v40, %v14063_v8 }
 0x6e5   : > { %v10136_v53 = vpack.c.bf16 %v8639_v19, %v8638_v29  ;;  %v8528_v58 = vmul.f32 %v14075_v15, %v8488_v33  ;;  %v7804_v29 = vpop.f32.mrf.mxu0  ;;  %v8234_v19 = vadd.f32 %v8193_v62, %v7842_v48 }
 0x6e7   : > { %10176 = vst [vmem:[%s14097_s22 + $0x68] sm:$0xff] %v10136_v53   ;;  %v8568_v10 = vadd.f32 %v14081_v49, %v8528_v58  ;;  %v7843_v58 = vadd.f32 %v7804_v29, %v7458_v32 }
 0x6e9   : > { %v8604_v55 = vadd.f32 %v8568_v10, %v14727_v46  ;;  %v8196_v38 = vpop.f32.mrf.mxu1  ;;  %v14732_v10 = vld [vmem:[#allocation22_spill] sm:$0xff] }
 0x6ea   : > { %v8442_v11 = vpop.f32.mrf.mxu2  ;;  %v8235_v25 = vadd.f32 %v8196_v38, %v7843_v58 }
 0x6eb   : > { %v8489_v59 = vadd.f32 %v8442_v11, %v8230_v24  ;;  %v8640_v54 = vmax.f32 %v8604_v55, 0.0  ;;  %v14731_v24 = vld [vmem:[#allocation15_spill] sm:$0xff]  ;;  %v7421_v37 = vpop.f32.mrf.mxu3 }
 0x6ec   : > { %v7459_v8 = vadd.f32 %v7421_v37, %v14067_v47 }
 0x6ed   : > { %v8529_v9 = vmul.f32 %v14075_v15, %v8489_v59 }
 0x6ef   : > { %v8569_v51 = vadd.f32 %v14081_v49, %v8529_v9  ;;  %v7806_v9 = vpop.f32.mrf.mxu0 }
 0x6f1   : > { %v8605_v16 = vadd.f32 %v8569_v51, %v14728_v22  ;;  %v7844_v22 = vadd.f32 %v7806_v9, %v7459_v8  ;;  %v8198_v41 = vpop.f32.mrf.mxu1 }
 0x6f2   : > { %v8445_v45 = vpop.f32.mrf.mxu2 }
 0x6f3   : > { %v8641_v12 = vmax.f32 %v8605_v16, 0.0  ;;  %v8490_v31 = vadd.f32 %v8445_v45, %v8231_v17  ;;  %v8236_v45 = vadd.f32 %v8198_v41, %v7844_v22 }
 0x6f5   : > { %v10141_v60 = vpack.c.bf16 %v8641_v12, %v8640_v54  ;;  %v8530_v30 = vmul.f32 %v14075_v15, %v8490_v31 }
 0x6f7   : > { %10177 = vst [vmem:[%s14097_s22 + $0x70] sm:$0xff] %v10141_v60   ;;  %v8570_v35 = vadd.f32 %v14081_v49, %v8530_v30  ;;  %v14734_v60 = vld [vmem:[#allocation20_spill] sm:$0xff] }
 0x6f9   : > { %v8606_v26 = vadd.f32 %v8570_v35, %v14729_v2 }
 0x6fa   : > { %v8447_v20 = vpop.f32.mrf.mxu2 }
 0x6fb   : > { %v8491_v6 = vadd.f32 %v8447_v20, %v8232_v21  ;;  %v8642_v28 = vmax.f32 %v8606_v26, 0.0 }
 0x6fd   : > { %v8531_v3 = vmul.f32 %v14075_v15, %v8491_v6 }
 0x6ff   : > { %v8571_v44 = vadd.f32 %v14081_v49, %v8531_v3 }
 0x701   : > { %v8607_v56 = vadd.f32 %v8571_v44, %v14730_v36 }
 0x702   : > { %v8450_v50 = vpop.f32.mrf.mxu2 }
 0x703   : > { %v8643_v23 = vmax.f32 %v8607_v56, 0.0  ;;  %v8492_v4 = vadd.f32 %v8450_v50, %v8233_v43 }
 0x705   : > { %v10146_v13 = vpack.c.bf16 %v8643_v23, %v8642_v28  ;;  %v8532_v7 = vmul.f32 %v14075_v15, %v8492_v4 }
 0x707   : > { %10178 = vst [vmem:[%s14097_s22 + $0x78] sm:$0xff] %v10146_v13   ;;  %v8572_v53 = vadd.f32 %v14081_v49, %v8532_v7 }
 0x709   : > { %v8608_v0 = vadd.f32 %v8572_v53, %v14731_v24 }
 0x70a   : > { %v8452_v33 = vpop.f32.mrf.mxu2 }
 0x70b   : > { %v8493_v27 = vadd.f32 %v8452_v33, %v8234_v19  ;;  %v8644_v55 = vmax.f32 %v8608_v0, 0.0 }
 0x70d   : > { %v8533_v18 = vmul.f32 %v14075_v15, %v8493_v27 }
 0x70f   : > { %v8573_v11 = vadd.f32 %v14081_v49, %v8533_v18 }
 0x711   : > { %v8609_v59 = vadd.f32 %v8573_v11, %v14732_v10 }
 0x712   : > { %v8455_v46 = vpop.f32.mrf.mxu2 }
 0x713   : > { %v8645_v51 = vmax.f32 %v8609_v59, 0.0  ;;  %v8494_v52 = vadd.f32 %v8455_v46, %v8235_v25 }
 0x715   : > { %v10151_v16 = vpack.c.bf16 %v8645_v51, %v8644_v55  ;;  %v8534_v17 = vmul.f32 %v14075_v15, %v8494_v52 }
 0x717   : > { %10179 = vst [vmem:[%s14097_s22 + $0x80] sm:$0xff] %v10151_v16   ;;  %v8574_v54 = vadd.f32 %v14081_v49, %v8534_v17 }
 0x719   : > { %v8610_v61 = vadd.f32 %v8574_v54, %v14733_v39 }
 0x71a   : > { %v8457_v63 = vpop.f32.mrf.mxu2 }
 0x71b   : > { %v8495_v12 = vadd.f32 %v8457_v63, %v8236_v45  ;;  %v8646_v21 = vmax.f32 %v8610_v61, 0.0 }
 0x71d   : > { %v8535_v31 = vmul.f32 %v14075_v15, %v8495_v12 }
 0x71f   : > { %v8575_v47 = vadd.f32 %v14081_v49, %v8535_v31 }
 0x721   : > { %v8611_v30 = vadd.f32 %v8575_v47, %v14734_v60 }
 0x723   : > { %v8647_v14 = vmax.f32 %v8611_v30, 0.0 }
 0x725   : > { %v10156_v20 = vpack.c.bf16 %v8647_v14, %v8646_v21 }
 0x727   : > { %10180 = vst [vmem:[%s14097_s22 + $0x88] sm:$0xff] %v10156_v20  }
 0x728 PF: > { %s18_s27 = sadd.s32 1, %s10259_s27  }
 0x729   : > { %p15_p4 = scmp.ge.s32.totalorder %s18_s27, 4  }
 0x72b   :  { %17 = sbr.rel (!%p15_p4) target bundleno = 1 (0x1), region = 98 }

</bundles_post_ra>
